<compile_context>
chip_gen: v7x
topology: tpu7x:2x2x1
jax: 0.10.0
libtpu: 0.0.40
codegen_flags: <defaults>
</compile_context>

<pallas_src>
import jax
import jax.numpy as jnp
from jax import lax
from jax.experimental import pallas as pl
from jax.experimental.pallas import tpu as pltpu


# ----------------------------- Pallas kernels -----------------------------

def _make_conv3x3_in_kernel(H, W, apply_relu, has_residual):
    """Fused: 3x3 conv (9 MXU taps) + bias + InstanceNorm + (ReLU | +residual)."""

    def kernel(*refs):
        if has_residual:
            xp_ref, w_ref, b_ref, res_ref, o_ref = refs
        else:
            xp_ref, w_ref, b_ref, o_ref = refs

        cin = w_ref.shape[1]
        cout = w_ref.shape[2]

        # 3x3 conv as 9 shifted-window matmuls, f32 accumulation on the MXU.
        acc = jnp.zeros((H * W, cout), jnp.float32)
        k = 0
        for dy in range(3):
            for dx in range(3):
                patch = xp_ref[dy:dy + H, dx:dx + W, :].reshape(H * W, cin)
                acc = acc + jnp.dot(patch, w_ref[k],
                                    preferred_element_type=jnp.float32)
                k += 1
        acc = acc + b_ref[...]                      # (1, cout) broadcast, f32

        # Single-pass InstanceNorm over the spatial axis (biased var, eps=1e-5).
        mean = jnp.mean(acc, axis=0, keepdims=True)
        ex2 = jnp.mean(acc * acc, axis=0, keepdims=True)
        var = ex2 - mean * mean
        y = (acc - mean) * lax.rsqrt(var + 1e-5)

        if apply_relu:
            y = jnp.maximum(y, 0.0)

        y = y.reshape(H, W, cout)
        if has_residual:
            y = y + res_ref[...].astype(jnp.float32)

        o_ref[...] = y.astype(o_ref.dtype)

    return kernel


def fused_conv3x3_in(xp, w9, b, *, apply_relu, residual=None,
                     out_dtype=jnp.float32):
    """xp: (B, H+2, W+2, Cin) padded NHWC (bf16); w9: (9, Cin, Cout) bf16;
    b: (Cout,) f32; residual: optional (B, H, W, Cout) f32."""
    B, Hp, Wp, cin = xp.shape
    H, W = Hp - 2, Wp - 2
    cout = w9.shape[2]
    b2d = b.reshape(1, cout).astype(jnp.float32)

    in_specs = [
        # one padded image per grid step (batch dim squeezed away)
        pl.BlockSpec((None, Hp, Wp, cin), lambda i: (i, 0, 0, 0)),
        # weights / bias: constant block index -> stay VMEM-resident
        pl.BlockSpec((9, cin, cout), lambda i: (0, 0, 0)),
        pl.BlockSpec((1, cout), lambda i: (0, 0)),
    ]
    args = [xp, w9, b2d]
    if residual is not None:
        in_specs.append(pl.BlockSpec((None, H, W, cout),
                                     lambda i: (i, 0, 0, 0)))
        args.append(residual)

    kernel = _make_conv3x3_in_kernel(H, W, apply_relu, residual is not None)

    return pl.pallas_call(
        kernel,
        out_shape=jax.ShapeDtypeStruct((B, H, W, cout), out_dtype),
        grid=(B,),
        in_specs=in_specs,
        out_specs=pl.BlockSpec((None, H, W, cout), lambda i: (i, 0, 0, 0)),
        compiler_params=pltpu.CompilerParams(
            dimension_semantics=("parallel",)),
    )(*args)


# ------------------------------ JAX glue ---------------------------------

def res_block_forward(params, x_nchw):
    """PyTorch ResBlock forward.  x: (B, Cin, H, W) f32 -> (B, Cout, H, W)."""
    x = jnp.transpose(x_nchw, (0, 2, 3, 1)).astype(jnp.float32)   # NHWC, f32
    B, H, W, cin = x.shape
    w1, b1 = params["w1"], params["b1"]            # (3,3,Cin,Chid), (Chid,)
    w2, b2 = params["w2"], params["b2"]            # (3,3,Chid,Cout), (Cout,)
    chid = w1.shape[-1]
    cout = w2.shape[-1]

    # conv1 + InstanceNorm + ReLU (one fused kernel); bf16 intermediate.
    xp = jnp.pad(x, ((0, 0), (1, 1), (1, 1), (0, 0))).astype(jnp.bfloat16)
    y1 = fused_conv3x3_in(
        xp, w1.reshape(9, cin, chid).astype(jnp.bfloat16), b1,
        apply_relu=True, out_dtype=jnp.bfloat16)

    # conv2 + InstanceNorm + residual add (one fused kernel), f32 output.
    y1p = jnp.pad(y1, ((0, 0), (1, 1), (1, 1), (0, 0)))
    out = fused_conv3x3_in(
        y1p, w2.reshape(9, chid, cout).astype(jnp.bfloat16), b2,
        apply_relu=False, residual=x, out_dtype=jnp.float32)

    return jnp.transpose(out, (0, 3, 1, 2))                       # NCHW


# --------------------------- pure-JAX reference ---------------------------

def reference(params, x_nchw):
    dn = ("NHWC", "HWIO", "NHWC")
    x = jnp.transpose(x_nchw, (0, 2, 3, 1))

    def conv(h, w, b):
        return lax.conv_general_dilated(h, w, (1, 1), [(1, 1), (1, 1)],
                                        dimension_numbers=dn) + b

    def inorm(h):
        m = jnp.mean(h, axis=(1, 2), keepdims=True)
        v = jnp.mean((h - m) ** 2, axis=(1, 2), keepdims=True)
        return (h - m) * lax.rsqrt(v + 1e-5)

    y = jnp.maximum(inorm(conv(x, params["w1"], params["b1"])), 0.0)
    y = inorm(conv(y, params["w2"], params["b2"]))
    out = x + y
    return jnp.transpose(out, (0, 3, 1, 2))


# --------------------------------- main -----------------------------------

if __name__ == "__main__":
    B, Cin, Chid, Cout, H, W = 2, 64, 128, 64, 16, 16   # residual: Cin == Cout
    key = jax.random.PRNGKey(0)
    kx, k1, k2, k3, k4 = jax.random.split(key, 5)

    x = jax.random.normal(kx, (B, Cin, H, W), jnp.float32)
    params = {
        "w1": jax.random.normal(k1, (3, 3, Cin, Chid), jnp.float32)
              / jnp.sqrt(9.0 * Cin),
        "b1": jax.random.normal(k2, (Chid,), jnp.float32) * 0.1,
        "w2": jax.random.normal(k3, (3, 3, Chid, Cout), jnp.float32)
              / jnp.sqrt(9.0 * Chid),
        "b2": jax.random.normal(k4, (Cout,), jnp.float32) * 0.1,
    }

    fwd = jax.jit(res_block_forward)
    out = jax.block_until_ready(fwd(params, x))

    ref = reference(params, x)
    assert out.shape == (B, Cout, H, W), out.shape
    assert bool(jnp.all(jnp.isfinite(out)))
    max_err = float(jnp.max(jnp.abs(out - ref)))
    assert bool(jnp.allclose(out, ref, atol=5e-2, rtol=5e-2)), max_err
    print("KERNEL_OK")
</pallas_src>

<mosaic_0001>
module attributes {stable_mosaic.version = 11 : i64} {
  func.func @kernel(%arg0: i32, %arg1: memref<1x18x18x64xbf16, #tpu.memory_space<vmem>>, %arg2: memref<9x64x128xbf16, #tpu.memory_space<vmem>>, %arg3: memref<1x128xf32, #tpu.memory_space<vmem>>, %arg4: memref<1x16x16x128xbf16, #tpu.memory_space<vmem>>) attributes {dimension_semantics = [#tpu.dimension_semantics<parallel>], iteration_bounds = array<i64: 2>, scalar_prefetch = 0 : i64, scratch_operands = 0 : i64, tpu.core_type = #tpu.core_type<tc>, window_params = [{transform_indices = @transform_0, window_bounds = array<i64: 1, 18, 18, 64>}, {pipeline_mode = #tpu.pipeline_mode<synchronous>, transform_indices = @transform_1, window_bounds = array<i64: 9, 64, 128>}, {pipeline_mode = #tpu.pipeline_mode<synchronous>, transform_indices = @transform_2, window_bounds = array<i64: 1, 128>}, {transform_indices = @transform_3, window_bounds = array<i64: 1, 16, 16, 128>}]} {
    %cst = arith.constant 0.000000e+00 : f32
    %0 = vector.broadcast %cst : f32 to vector<256x128xf32>
    %c0 = arith.constant 0 : index
    %c0_0 = arith.constant 0 : index
    %c0_1 = arith.constant 0 : index
    %c0_2 = arith.constant 0 : index
    %1 = vector.load %arg1[%c0, %c0_0, %c0_1, %c0_2] : memref<1x18x18x64xbf16, #tpu.memory_space<vmem>>, vector<1x16x16x64xbf16>
    %2 = vector.shape_cast %1 : vector<1x16x16x64xbf16> to vector<16x16x64xbf16>
    %3 = vector.shape_cast %2 : vector<16x16x64xbf16> to vector<256x64xbf16>
    %c0_3 = arith.constant 0 : index
    %c0_4 = arith.constant 0 : index
    %c0_5 = arith.constant 0 : index
    %4 = vector.load %arg2[%c0_3, %c0_4, %c0_5] : memref<9x64x128xbf16, #tpu.memory_space<vmem>>, vector<1x64x128xbf16>
    %5 = vector.shape_cast %4 : vector<1x64x128xbf16> to vector<64x128xbf16>
    %cst_6 = arith.constant dense<0.000000e+00> : vector<256x128xf32>
    %6 = tpu.matmul %3, %5, %cst_6 {dimension_numbers = #tpu.dot_dimension_numbers<[1], [0], [0], [1], [0, 0, 1, 1], [], []>} : vector<256x64xbf16>, vector<64x128xbf16>, vector<256x128xf32> -> vector<256x128xf32>
    %7 = arith.addf %0, %6 : vector<256x128xf32>
    %c0_7 = arith.constant 0 : index
    %c0_8 = arith.constant 0 : index
    %c1 = arith.constant 1 : index
    %c0_9 = arith.constant 0 : index
    %8 = vector.load %arg1[%c0_7, %c0_8, %c1, %c0_9] : memref<1x18x18x64xbf16, #tpu.memory_space<vmem>>, vector<1x16x16x64xbf16>
    %9 = vector.shape_cast %8 : vector<1x16x16x64xbf16> to vector<16x16x64xbf16>
    %10 = vector.shape_cast %9 : vector<16x16x64xbf16> to vector<256x64xbf16>
    %c1_10 = arith.constant 1 : index
    %c0_11 = arith.constant 0 : index
    %c0_12 = arith.constant 0 : index
    %11 = vector.load %arg2[%c1_10, %c0_11, %c0_12] : memref<9x64x128xbf16, #tpu.memory_space<vmem>>, vector<1x64x128xbf16>
    %12 = vector.shape_cast %11 : vector<1x64x128xbf16> to vector<64x128xbf16>
    %cst_13 = arith.constant dense<0.000000e+00> : vector<256x128xf32>
    %13 = tpu.matmul %10, %12, %cst_13 {dimension_numbers = #tpu.dot_dimension_numbers<[1], [0], [0], [1], [0, 0, 1, 1], [], []>} : vector<256x64xbf16>, vector<64x128xbf16>, vector<256x128xf32> -> vector<256x128xf32>
    %14 = arith.addf %7, %13 : vector<256x128xf32>
    %c0_14 = arith.constant 0 : index
    %c0_15 = arith.constant 0 : index
    %c2 = arith.constant 2 : index
    %c0_16 = arith.constant 0 : index
    %15 = vector.load %arg1[%c0_14, %c0_15, %c2, %c0_16] : memref<1x18x18x64xbf16, #tpu.memory_space<vmem>>, vector<1x16x16x64xbf16>
    %16 = vector.shape_cast %15 : vector<1x16x16x64xbf16> to vector<16x16x64xbf16>
    %17 = vector.shape_cast %16 : vector<16x16x64xbf16> to vector<256x64xbf16>
    %c2_17 = arith.constant 2 : index
    %c0_18 = arith.constant 0 : index
    %c0_19 = arith.constant 0 : index
    %18 = vector.load %arg2[%c2_17, %c0_18, %c0_19] : memref<9x64x128xbf16, #tpu.memory_space<vmem>>, vector<1x64x128xbf16>
    %19 = vector.shape_cast %18 : vector<1x64x128xbf16> to vector<64x128xbf16>
    %cst_20 = arith.constant dense<0.000000e+00> : vector<256x128xf32>
    %20 = tpu.matmul %17, %19, %cst_20 {dimension_numbers = #tpu.dot_dimension_numbers<[1], [0], [0], [1], [0, 0, 1, 1], [], []>} : vector<256x64xbf16>, vector<64x128xbf16>, vector<256x128xf32> -> vector<256x128xf32>
    %21 = arith.addf %14, %20 : vector<256x128xf32>
    %c0_21 = arith.constant 0 : index
    %c1_22 = arith.constant 1 : index
    %c0_23 = arith.constant 0 : index
    %c0_24 = arith.constant 0 : index
    %22 = vector.load %arg1[%c0_21, %c1_22, %c0_23, %c0_24] : memref<1x18x18x64xbf16, #tpu.memory_space<vmem>>, vector<1x16x16x64xbf16>
    %23 = vector.shape_cast %22 : vector<1x16x16x64xbf16> to vector<16x16x64xbf16>
    %24 = vector.shape_cast %23 : vector<16x16x64xbf16> to vector<256x64xbf16>
    %c3 = arith.constant 3 : index
    %c0_25 = arith.constant 0 : index
    %c0_26 = arith.constant 0 : index
    %25 = vector.load %arg2[%c3, %c0_25, %c0_26] : memref<9x64x128xbf16, #tpu.memory_space<vmem>>, vector<1x64x128xbf16>
    %26 = vector.shape_cast %25 : vector<1x64x128xbf16> to vector<64x128xbf16>
    %cst_27 = arith.constant dense<0.000000e+00> : vector<256x128xf32>
    %27 = tpu.matmul %24, %26, %cst_27 {dimension_numbers = #tpu.dot_dimension_numbers<[1], [0], [0], [1], [0, 0, 1, 1], [], []>} : vector<256x64xbf16>, vector<64x128xbf16>, vector<256x128xf32> -> vector<256x128xf32>
    %28 = arith.addf %21, %27 : vector<256x128xf32>
    %c0_28 = arith.constant 0 : index
    %c1_29 = arith.constant 1 : index
    %c1_30 = arith.constant 1 : index
    %c0_31 = arith.constant 0 : index
    %29 = vector.load %arg1[%c0_28, %c1_29, %c1_30, %c0_31] : memref<1x18x18x64xbf16, #tpu.memory_space<vmem>>, vector<1x16x16x64xbf16>
    %30 = vector.shape_cast %29 : vector<1x16x16x64xbf16> to vector<16x16x64xbf16>
    %31 = vector.shape_cast %30 : vector<16x16x64xbf16> to vector<256x64xbf16>
    %c4 = arith.constant 4 : index
    %c0_32 = arith.constant 0 : index
    %c0_33 = arith.constant 0 : index
    %32 = vector.load %arg2[%c4, %c0_32, %c0_33] : memref<9x64x128xbf16, #tpu.memory_space<vmem>>, vector<1x64x128xbf16>
    %33 = vector.shape_cast %32 : vector<1x64x128xbf16> to vector<64x128xbf16>
    %cst_34 = arith.constant dense<0.000000e+00> : vector<256x128xf32>
    %34 = tpu.matmul %31, %33, %cst_34 {dimension_numbers = #tpu.dot_dimension_numbers<[1], [0], [0], [1], [0, 0, 1, 1], [], []>} : vector<256x64xbf16>, vector<64x128xbf16>, vector<256x128xf32> -> vector<256x128xf32>
    %35 = arith.addf %28, %34 : vector<256x128xf32>
    %c0_35 = arith.constant 0 : index
    %c1_36 = arith.constant 1 : index
    %c2_37 = arith.constant 2 : index
    %c0_38 = arith.constant 0 : index
    %36 = vector.load %arg1[%c0_35, %c1_36, %c2_37, %c0_38] : memref<1x18x18x64xbf16, #tpu.memory_space<vmem>>, vector<1x16x16x64xbf16>
    %37 = vector.shape_cast %36 : vector<1x16x16x64xbf16> to vector<16x16x64xbf16>
    %38 = vector.shape_cast %37 : vector<16x16x64xbf16> to vector<256x64xbf16>
    %c5 = arith.constant 5 : index
    %c0_39 = arith.constant 0 : index
    %c0_40 = arith.constant 0 : index
    %39 = vector.load %arg2[%c5, %c0_39, %c0_40] : memref<9x64x128xbf16, #tpu.memory_space<vmem>>, vector<1x64x128xbf16>
    %40 = vector.shape_cast %39 : vector<1x64x128xbf16> to vector<64x128xbf16>
    %cst_41 = arith.constant dense<0.000000e+00> : vector<256x128xf32>
    %41 = tpu.matmul %38, %40, %cst_41 {dimension_numbers = #tpu.dot_dimension_numbers<[1], [0], [0], [1], [0, 0, 1, 1], [], []>} : vector<256x64xbf16>, vector<64x128xbf16>, vector<256x128xf32> -> vector<256x128xf32>
    %42 = arith.addf %35, %41 : vector<256x128xf32>
    %c0_42 = arith.constant 0 : index
    %c2_43 = arith.constant 2 : index
    %c0_44 = arith.constant 0 : index
    %c0_45 = arith.constant 0 : index
    %43 = vector.load %arg1[%c0_42, %c2_43, %c0_44, %c0_45] : memref<1x18x18x64xbf16, #tpu.memory_space<vmem>>, vector<1x16x16x64xbf16>
    %44 = vector.shape_cast %43 : vector<1x16x16x64xbf16> to vector<16x16x64xbf16>
    %45 = vector.shape_cast %44 : vector<16x16x64xbf16> to vector<256x64xbf16>
    %c6 = arith.constant 6 : index
    %c0_46 = arith.constant 0 : index
    %c0_47 = arith.constant 0 : index
    %46 = vector.load %arg2[%c6, %c0_46, %c0_47] : memref<9x64x128xbf16, #tpu.memory_space<vmem>>, vector<1x64x128xbf16>
    %47 = vector.shape_cast %46 : vector<1x64x128xbf16> to vector<64x128xbf16>
    %cst_48 = arith.constant dense<0.000000e+00> : vector<256x128xf32>
    %48 = tpu.matmul %45, %47, %cst_48 {dimension_numbers = #tpu.dot_dimension_numbers<[1], [0], [0], [1], [0, 0, 1, 1], [], []>} : vector<256x64xbf16>, vector<64x128xbf16>, vector<256x128xf32> -> vector<256x128xf32>
    %49 = arith.addf %42, %48 : vector<256x128xf32>
    %c0_49 = arith.constant 0 : index
    %c2_50 = arith.constant 2 : index
    %c1_51 = arith.constant 1 : index
    %c0_52 = arith.constant 0 : index
    %50 = vector.load %arg1[%c0_49, %c2_50, %c1_51, %c0_52] : memref<1x18x18x64xbf16, #tpu.memory_space<vmem>>, vector<1x16x16x64xbf16>
    %51 = vector.shape_cast %50 : vector<1x16x16x64xbf16> to vector<16x16x64xbf16>
    %52 = vector.shape_cast %51 : vector<16x16x64xbf16> to vector<256x64xbf16>
    %c7 = arith.constant 7 : index
    %c0_53 = arith.constant 0 : index
    %c0_54 = arith.constant 0 : index
    %53 = vector.load %arg2[%c7, %c0_53, %c0_54] : memref<9x64x128xbf16, #tpu.memory_space<vmem>>, vector<1x64x128xbf16>
    %54 = vector.shape_cast %53 : vector<1x64x128xbf16> to vector<64x128xbf16>
    %cst_55 = arith.constant dense<0.000000e+00> : vector<256x128xf32>
    %55 = tpu.matmul %52, %54, %cst_55 {dimension_numbers = #tpu.dot_dimension_numbers<[1], [0], [0], [1], [0, 0, 1, 1], [], []>} : vector<256x64xbf16>, vector<64x128xbf16>, vector<256x128xf32> -> vector<256x128xf32>
    %56 = arith.addf %49, %55 : vector<256x128xf32>
    %c0_56 = arith.constant 0 : index
    %c2_57 = arith.constant 2 : index
    %c2_58 = arith.constant 2 : index
    %c0_59 = arith.constant 0 : index
    %57 = vector.load %arg1[%c0_56, %c2_57, %c2_58, %c0_59] : memref<1x18x18x64xbf16, #tpu.memory_space<vmem>>, vector<1x16x16x64xbf16>
    %58 = vector.shape_cast %57 : vector<1x16x16x64xbf16> to vector<16x16x64xbf16>
    %59 = vector.shape_cast %58 : vector<16x16x64xbf16> to vector<256x64xbf16>
    %c8 = arith.constant 8 : index
    %c0_60 = arith.constant 0 : index
    %c0_61 = arith.constant 0 : index
    %60 = vector.load %arg2[%c8, %c0_60, %c0_61] : memref<9x64x128xbf16, #tpu.memory_space<vmem>>, vector<1x64x128xbf16>
    %61 = vector.shape_cast %60 : vector<1x64x128xbf16> to vector<64x128xbf16>
    %cst_62 = arith.constant dense<0.000000e+00> : vector<256x128xf32>
    %62 = tpu.matmul %59, %61, %cst_62 {dimension_numbers = #tpu.dot_dimension_numbers<[1], [0], [0], [1], [0, 0, 1, 1], [], []>} : vector<256x64xbf16>, vector<64x128xbf16>, vector<256x128xf32> -> vector<256x128xf32>
    %63 = arith.addf %56, %62 : vector<256x128xf32>
    %c0_63 = arith.constant 0 : index
    %c0_64 = arith.constant 0 : index
    %64 = vector.load %arg3[%c0_63, %c0_64] : memref<1x128xf32, #tpu.memory_space<vmem>>, vector<1x128xf32>
    %65 = vector.broadcast %64 : vector<1x128xf32> to vector<256x128xf32>
    %66 = arith.addf %63, %65 : vector<256x128xf32>
    %cst_65 = arith.constant dense<0.000000e+00> : vector<128xf32>
    %67 = vector.multi_reduction <add>, %66, %cst_65 [0] : vector<256x128xf32> to vector<128xf32>
    %68 = vector.shape_cast %67 : vector<128xf32> to vector<1x128xf32>
    %cst_66 = arith.constant 2.560000e+02 : f32
    %69 = vector.broadcast %cst_66 : f32 to vector<1x128xf32>
    %70 = arith.divf %68, %69 : vector<1x128xf32>
    %71 = arith.mulf %66, %66 : vector<256x128xf32>
    %cst_67 = arith.constant dense<0.000000e+00> : vector<128xf32>
    %72 = vector.multi_reduction <add>, %71, %cst_67 [0] : vector<256x128xf32> to vector<128xf32>
    %73 = vector.shape_cast %72 : vector<128xf32> to vector<1x128xf32>
    %cst_68 = arith.constant 2.560000e+02 : f32
    %74 = vector.broadcast %cst_68 : f32 to vector<1x128xf32>
    %75 = arith.divf %73, %74 : vector<1x128xf32>
    %76 = arith.mulf %70, %70 : vector<1x128xf32>
    %77 = arith.subf %75, %76 : vector<1x128xf32>
    %78 = vector.broadcast %70 : vector<1x128xf32> to vector<256x128xf32>
    %79 = arith.subf %66, %78 : vector<256x128xf32>
    %cst_69 = arith.constant 9.99999974E-6 : f32
    %80 = vector.broadcast %cst_69 : f32 to vector<1x128xf32>
    %81 = arith.addf %77, %80 : vector<1x128xf32>
    %82 = math.rsqrt %81 : vector<1x128xf32>
    %83 = vector.broadcast %82 : vector<1x128xf32> to vector<256x128xf32>
    %84 = arith.mulf %79, %83 : vector<256x128xf32>
    %cst_70 = arith.constant 0.000000e+00 : f32
    %85 = vector.broadcast %cst_70 : f32 to vector<256x128xf32>
    %86 = arith.maximumf %84, %85 : vector<256x128xf32>
    %87 = vector.shape_cast %86 : vector<256x128xf32> to vector<16x16x128xf32>
    %88 = arith.truncf %87 : vector<16x16x128xf32> to vector<16x16x128xbf16>
    %c0_71 = arith.constant 0 : index
    %c0_72 = arith.constant 0 : index
    %c0_73 = arith.constant 0 : index
    %c0_74 = arith.constant 0 : index
    %89 = vector.load %arg4[%c0_71, %c0_72, %c0_73, %c0_74] : memref<1x16x16x128xbf16, #tpu.memory_space<vmem>>, vector<1x16x16x128xbf16>
    %90 = vector.shape_cast %89 : vector<1x16x16x128xbf16> to vector<16x16x128xbf16>
    %91 = vector.shape_cast %88 : vector<16x16x128xbf16> to vector<1x16x16x128xbf16>
    tpu.vector_store %arg4[%c0_71, %c0_72, %c0_73, %c0_74], %91 {strides = array<i32>} : memref<1x16x16x128xbf16, #tpu.memory_space<vmem>>, vector<1x16x16x128xbf16>,
    return
  }
  func.func @transform_0(%arg0: i32) -> (i32, i32, i32, i32) {
    %c0_i32 = arith.constant 0 : i32
    %c0_i32_0 = arith.constant 0 : i32
    %c0_i32_1 = arith.constant 0 : i32
    %c0_i32_2 = arith.constant 0 : i32
    return %arg0, %c0_i32, %c0_i32_0, %c0_i32_1 : i32, i32, i32, i32
  }
  func.func @transform_1(%arg0: i32) -> (i32, i32, i32) {
    %c0_i32 = arith.constant 0 : i32
    %c0_i32_0 = arith.constant 0 : i32
    %c0_i32_1 = arith.constant 0 : i32
    %c0_i32_2 = arith.constant 0 : i32
    return %c0_i32, %c0_i32_0, %c0_i32_1 : i32, i32, i32
  }
  func.func @transform_2(%arg0: i32) -> (i32, i32) {
    %c0_i32 = arith.constant 0 : i32
    %c0_i32_0 = arith.constant 0 : i32
    %c0_i32_1 = arith.constant 0 : i32
    return %c0_i32, %c0_i32_0 : i32, i32
  }
  func.func @transform_3(%arg0: i32) -> (i32, i32, i32, i32) {
    %c0_i32 = arith.constant 0 : i32
    %c0_i32_0 = arith.constant 0 : i32
    %c0_i32_1 = arith.constant 0 : i32
    %c0_i32_2 = arith.constant 0 : i32
    return %arg0, %c0_i32, %c0_i32_0, %c0_i32_1 : i32, i32, i32, i32
  }
}

module attributes {stable_mosaic.version = 11 : i64} {
  func.func @kernel(%arg0: i32, %arg1: memref<1x18x18x128xbf16, #tpu.memory_space<vmem>>, %arg2: memref<9x128x64xbf16, #tpu.memory_space<vmem>>, %arg3: memref<1x64xf32, #tpu.memory_space<vmem>>, %arg4: memref<1x16x16x64xf32, #tpu.memory_space<vmem>>, %arg5: memref<1x16x16x64xf32, #tpu.memory_space<vmem>>) attributes {dimension_semantics = [#tpu.dimension_semantics<parallel>], iteration_bounds = array<i64: 2>, scalar_prefetch = 0 : i64, scratch_operands = 0 : i64, tpu.core_type = #tpu.core_type<tc>, window_params = [{transform_indices = @transform_0, window_bounds = array<i64: 1, 18, 18, 128>}, {pipeline_mode = #tpu.pipeline_mode<synchronous>, transform_indices = @transform_1, window_bounds = array<i64: 9, 128, 64>}, {pipeline_mode = #tpu.pipeline_mode<synchronous>, transform_indices = @transform_2, window_bounds = array<i64: 1, 64>}, {transform_indices = @transform_3, window_bounds = array<i64: 1, 16, 16, 64>}, {transform_indices = @transform_4, window_bounds = array<i64: 1, 16, 16, 64>}]} {
    %cst = arith.constant 0.000000e+00 : f32
    %0 = vector.broadcast %cst : f32 to vector<256x64xf32>
    %c0 = arith.constant 0 : index
    %c0_0 = arith.constant 0 : index
    %c0_1 = arith.constant 0 : index
    %c0_2 = arith.constant 0 : index
    %1 = vector.load %arg1[%c0, %c0_0, %c0_1, %c0_2] : memref<1x18x18x128xbf16, #tpu.memory_space<vmem>>, vector<1x16x16x128xbf16>
    %2 = vector.shape_cast %1 : vector<1x16x16x128xbf16> to vector<16x16x128xbf16>
    %3 = vector.shape_cast %2 : vector<16x16x128xbf16> to vector<256x128xbf16>
    %c0_3 = arith.constant 0 : index
    %c0_4 = arith.constant 0 : index
    %c0_5 = arith.constant 0 : index
    %4 = vector.load %arg2[%c0_3, %c0_4, %c0_5] : memref<9x128x64xbf16, #tpu.memory_space<vmem>>, vector<1x128x64xbf16>
    %5 = vector.shape_cast %4 : vector<1x128x64xbf16> to vector<128x64xbf16>
    %cst_6 = arith.constant dense<0.000000e+00> : vector<256x64xf32>
    %6 = tpu.matmul %3, %5, %cst_6 {dimension_numbers = #tpu.dot_dimension_numbers<[1], [0], [0], [1], [0, 0, 1, 1], [], []>} : vector<256x128xbf16>, vector<128x64xbf16>, vector<256x64xf32> -> vector<256x64xf32>
    %7 = arith.addf %0, %6 : vector<256x64xf32>
    %c0_7 = arith.constant 0 : index
    %c0_8 = arith.constant 0 : index
    %c1 = arith.constant 1 : index
    %c0_9 = arith.constant 0 : index
    %8 = vector.load %arg1[%c0_7, %c0_8, %c1, %c0_9] : memref<1x18x18x128xbf16, #tpu.memory_space<vmem>>, vector<1x16x16x128xbf16>
    %9 = vector.shape_cast %8 : vector<1x16x16x128xbf16> to vector<16x16x128xbf16>
    %10 = vector.shape_cast %9 : vector<16x16x128xbf16> to vector<256x128xbf16>
    %c1_10 = arith.constant 1 : index
    %c0_11 = arith.constant 0 : index
    %c0_12 = arith.constant 0 : index
    %11 = vector.load %arg2[%c1_10, %c0_11, %c0_12] : memref<9x128x64xbf16, #tpu.memory_space<vmem>>, vector<1x128x64xbf16>
    %12 = vector.shape_cast %11 : vector<1x128x64xbf16> to vector<128x64xbf16>
    %cst_13 = arith.constant dense<0.000000e+00> : vector<256x64xf32>
    %13 = tpu.matmul %10, %12, %cst_13 {dimension_numbers = #tpu.dot_dimension_numbers<[1], [0], [0], [1], [0, 0, 1, 1], [], []>} : vector<256x128xbf16>, vector<128x64xbf16>, vector<256x64xf32> -> vector<256x64xf32>
    %14 = arith.addf %7, %13 : vector<256x64xf32>
    %c0_14 = arith.constant 0 : index
    %c0_15 = arith.constant 0 : index
    %c2 = arith.constant 2 : index
    %c0_16 = arith.constant 0 : index
    %15 = vector.load %arg1[%c0_14, %c0_15, %c2, %c0_16] : memref<1x18x18x128xbf16, #tpu.memory_space<vmem>>, vector<1x16x16x128xbf16>
    %16 = vector.shape_cast %15 : vector<1x16x16x128xbf16> to vector<16x16x128xbf16>
    %17 = vector.shape_cast %16 : vector<16x16x128xbf16> to vector<256x128xbf16>
    %c2_17 = arith.constant 2 : index
    %c0_18 = arith.constant 0 : index
    %c0_19 = arith.constant 0 : index
    %18 = vector.load %arg2[%c2_17, %c0_18, %c0_19] : memref<9x128x64xbf16, #tpu.memory_space<vmem>>, vector<1x128x64xbf16>
    %19 = vector.shape_cast %18 : vector<1x128x64xbf16> to vector<128x64xbf16>
    %cst_20 = arith.constant dense<0.000000e+00> : vector<256x64xf32>
    %20 = tpu.matmul %17, %19, %cst_20 {dimension_numbers = #tpu.dot_dimension_numbers<[1], [0], [0], [1], [0, 0, 1, 1], [], []>} : vector<256x128xbf16>, vector<128x64xbf16>, vector<256x64xf32> -> vector<256x64xf32>
    %21 = arith.addf %14, %20 : vector<256x64xf32>
    %c0_21 = arith.constant 0 : index
    %c1_22 = arith.constant 1 : index
    %c0_23 = arith.constant 0 : index
    %c0_24 = arith.constant 0 : index
    %22 = vector.load %arg1[%c0_21, %c1_22, %c0_23, %c0_24] : memref<1x18x18x128xbf16, #tpu.memory_space<vmem>>, vector<1x16x16x128xbf16>
    %23 = vector.shape_cast %22 : vector<1x16x16x128xbf16> to vector<16x16x128xbf16>
    %24 = vector.shape_cast %23 : vector<16x16x128xbf16> to vector<256x128xbf16>
    %c3 = arith.constant 3 : index
    %c0_25 = arith.constant 0 : index
    %c0_26 = arith.constant 0 : index
    %25 = vector.load %arg2[%c3, %c0_25, %c0_26] : memref<9x128x64xbf16, #tpu.memory_space<vmem>>, vector<1x128x64xbf16>
    %26 = vector.shape_cast %25 : vector<1x128x64xbf16> to vector<128x64xbf16>
    %cst_27 = arith.constant dense<0.000000e+00> : vector<256x64xf32>
    %27 = tpu.matmul %24, %26, %cst_27 {dimension_numbers = #tpu.dot_dimension_numbers<[1], [0], [0], [1], [0, 0, 1, 1], [], []>} : vector<256x128xbf16>, vector<128x64xbf16>, vector<256x64xf32> -> vector<256x64xf32>
    %28 = arith.addf %21, %27 : vector<256x64xf32>
    %c0_28 = arith.constant 0 : index
    %c1_29 = arith.constant 1 : index
    %c1_30 = arith.constant 1 : index
    %c0_31 = arith.constant 0 : index
    %29 = vector.load %arg1[%c0_28, %c1_29, %c1_30, %c0_31] : memref<1x18x18x128xbf16, #tpu.memory_space<vmem>>, vector<1x16x16x128xbf16>
    %30 = vector.shape_cast %29 : vector<1x16x16x128xbf16> to vector<16x16x128xbf16>
    %31 = vector.shape_cast %30 : vector<16x16x128xbf16> to vector<256x128xbf16>
    %c4 = arith.constant 4 : index
    %c0_32 = arith.constant 0 : index
    %c0_33 = arith.constant 0 : index
    %32 = vector.load %arg2[%c4, %c0_32, %c0_33] : memref<9x128x64xbf16, #tpu.memory_space<vmem>>, vector<1x128x64xbf16>
    %33 = vector.shape_cast %32 : vector<1x128x64xbf16> to vector<128x64xbf16>
    %cst_34 = arith.constant dense<0.000000e+00> : vector<256x64xf32>
    %34 = tpu.matmul %31, %33, %cst_34 {dimension_numbers = #tpu.dot_dimension_numbers<[1], [0], [0], [1], [0, 0, 1, 1], [], []>} : vector<256x128xbf16>, vector<128x64xbf16>, vector<256x64xf32> -> vector<256x64xf32>
    %35 = arith.addf %28, %34 : vector<256x64xf32>
    %c0_35 = arith.constant 0 : index
    %c1_36 = arith.constant 1 : index
    %c2_37 = arith.constant 2 : index
    %c0_38 = arith.constant 0 : index
    %36 = vector.load %arg1[%c0_35, %c1_36, %c2_37, %c0_38] : memref<1x18x18x128xbf16, #tpu.memory_space<vmem>>, vector<1x16x16x128xbf16>
    %37 = vector.shape_cast %36 : vector<1x16x16x128xbf16> to vector<16x16x128xbf16>
    %38 = vector.shape_cast %37 : vector<16x16x128xbf16> to vector<256x128xbf16>
    %c5 = arith.constant 5 : index
    %c0_39 = arith.constant 0 : index
    %c0_40 = arith.constant 0 : index
    %39 = vector.load %arg2[%c5, %c0_39, %c0_40] : memref<9x128x64xbf16, #tpu.memory_space<vmem>>, vector<1x128x64xbf16>
    %40 = vector.shape_cast %39 : vector<1x128x64xbf16> to vector<128x64xbf16>
    %cst_41 = arith.constant dense<0.000000e+00> : vector<256x64xf32>
    %41 = tpu.matmul %38, %40, %cst_41 {dimension_numbers = #tpu.dot_dimension_numbers<[1], [0], [0], [1], [0, 0, 1, 1], [], []>} : vector<256x128xbf16>, vector<128x64xbf16>, vector<256x64xf32> -> vector<256x64xf32>
    %42 = arith.addf %35, %41 : vector<256x64xf32>
    %c0_42 = arith.constant 0 : index
    %c2_43 = arith.constant 2 : index
    %c0_44 = arith.constant 0 : index
    %c0_45 = arith.constant 0 : index
    %43 = vector.load %arg1[%c0_42, %c2_43, %c0_44, %c0_45] : memref<1x18x18x128xbf16, #tpu.memory_space<vmem>>, vector<1x16x16x128xbf16>
    %44 = vector.shape_cast %43 : vector<1x16x16x128xbf16> to vector<16x16x128xbf16>
    %45 = vector.shape_cast %44 : vector<16x16x128xbf16> to vector<256x128xbf16>
    %c6 = arith.constant 6 : index
    %c0_46 = arith.constant 0 : index
    %c0_47 = arith.constant 0 : index
    %46 = vector.load %arg2[%c6, %c0_46, %c0_47] : memref<9x128x64xbf16, #tpu.memory_space<vmem>>, vector<1x128x64xbf16>
    %47 = vector.shape_cast %46 : vector<1x128x64xbf16> to vector<128x64xbf16>
    %cst_48 = arith.constant dense<0.000000e+00> : vector<256x64xf32>
    %48 = tpu.matmul %45, %47, %cst_48 {dimension_numbers = #tpu.dot_dimension_numbers<[1], [0], [0], [1], [0, 0, 1, 1], [], []>} : vector<256x128xbf16>, vector<128x64xbf16>, vector<256x64xf32> -> vector<256x64xf32>
    %49 = arith.addf %42, %48 : vector<256x64xf32>
    %c0_49 = arith.constant 0 : index
    %c2_50 = arith.constant 2 : index
    %c1_51 = arith.constant 1 : index
    %c0_52 = arith.constant 0 : index
    %50 = vector.load %arg1[%c0_49, %c2_50, %c1_51, %c0_52] : memref<1x18x18x128xbf16, #tpu.memory_space<vmem>>, vector<1x16x16x128xbf16>
    %51 = vector.shape_cast %50 : vector<1x16x16x128xbf16> to vector<16x16x128xbf16>
    %52 = vector.shape_cast %51 : vector<16x16x128xbf16> to vector<256x128xbf16>
    %c7 = arith.constant 7 : index
    %c0_53 = arith.constant 0 : index
    %c0_54 = arith.constant 0 : index
    %53 = vector.load %arg2[%c7, %c0_53, %c0_54] : memref<9x128x64xbf16, #tpu.memory_space<vmem>>, vector<1x128x64xbf16>
    %54 = vector.shape_cast %53 : vector<1x128x64xbf16> to vector<128x64xbf16>
    %cst_55 = arith.constant dense<0.000000e+00> : vector<256x64xf32>
    %55 = tpu.matmul %52, %54, %cst_55 {dimension_numbers = #tpu.dot_dimension_numbers<[1], [0], [0], [1], [0, 0, 1, 1], [], []>} : vector<256x128xbf16>, vector<128x64xbf16>, vector<256x64xf32> -> vector<256x64xf32>
    %56 = arith.addf %49, %55 : vector<256x64xf32>
    %c0_56 = arith.constant 0 : index
    %c2_57 = arith.constant 2 : index
    %c2_58 = arith.constant 2 : index
    %c0_59 = arith.constant 0 : index
    %57 = vector.load %arg1[%c0_56, %c2_57, %c2_58, %c0_59] : memref<1x18x18x128xbf16, #tpu.memory_space<vmem>>, vector<1x16x16x128xbf16>
    %58 = vector.shape_cast %57 : vector<1x16x16x128xbf16> to vector<16x16x128xbf16>
    %59 = vector.shape_cast %58 : vector<16x16x128xbf16> to vector<256x128xbf16>
    %c8 = arith.constant 8 : index
    %c0_60 = arith.constant 0 : index
    %c0_61 = arith.constant 0 : index
    %60 = vector.load %arg2[%c8, %c0_60, %c0_61] : memref<9x128x64xbf16, #tpu.memory_space<vmem>>, vector<1x128x64xbf16>
    %61 = vector.shape_cast %60 : vector<1x128x64xbf16> to vector<128x64xbf16>
    %cst_62 = arith.constant dense<0.000000e+00> : vector<256x64xf32>
    %62 = tpu.matmul %59, %61, %cst_62 {dimension_numbers = #tpu.dot_dimension_numbers<[1], [0], [0], [1], [0, 0, 1, 1], [], []>} : vector<256x128xbf16>, vector<128x64xbf16>, vector<256x64xf32> -> vector<256x64xf32>
    %63 = arith.addf %56, %62 : vector<256x64xf32>
    %c0_63 = arith.constant 0 : index
    %c0_64 = arith.constant 0 : index
    %64 = vector.load %arg3[%c0_63, %c0_64] : memref<1x64xf32, #tpu.memory_space<vmem>>, vector<1x64xf32>
    %65 = vector.broadcast %64 : vector<1x64xf32> to vector<256x64xf32>
    %66 = arith.addf %63, %65 : vector<256x64xf32>
    %cst_65 = arith.constant dense<0.000000e+00> : vector<64xf32>
    %67 = vector.multi_reduction <add>, %66, %cst_65 [0] : vector<256x64xf32> to vector<64xf32>
    %68 = vector.shape_cast %67 : vector<64xf32> to vector<1x64xf32>
    %cst_66 = arith.constant 2.560000e+02 : f32
    %69 = vector.broadcast %cst_66 : f32 to vector<1x64xf32>
    %70 = arith.divf %68, %69 : vector<1x64xf32>
    %71 = arith.mulf %66, %66 : vector<256x64xf32>
    %cst_67 = arith.constant dense<0.000000e+00> : vector<64xf32>
    %72 = vector.multi_reduction <add>, %71, %cst_67 [0] : vector<256x64xf32> to vector<64xf32>
    %73 = vector.shape_cast %72 : vector<64xf32> to vector<1x64xf32>
    %cst_68 = arith.constant 2.560000e+02 : f32
    %74 = vector.broadcast %cst_68 : f32 to vector<1x64xf32>
    %75 = arith.divf %73, %74 : vector<1x64xf32>
    %76 = arith.mulf %70, %70 : vector<1x64xf32>
    %77 = arith.subf %75, %76 : vector<1x64xf32>
    %78 = vector.broadcast %70 : vector<1x64xf32> to vector<256x64xf32>
    %79 = arith.subf %66, %78 : vector<256x64xf32>
    %cst_69 = arith.constant 9.99999974E-6 : f32
    %80 = vector.broadcast %cst_69 : f32 to vector<1x64xf32>
    %81 = arith.addf %77, %80 : vector<1x64xf32>
    %82 = math.rsqrt %81 : vector<1x64xf32>
    %83 = vector.broadcast %82 : vector<1x64xf32> to vector<256x64xf32>
    %84 = arith.mulf %79, %83 : vector<256x64xf32>
    %85 = vector.shape_cast %84 : vector<256x64xf32> to vector<16x16x64xf32>
    %c0_70 = arith.constant 0 : index
    %c0_71 = arith.constant 0 : index
    %c0_72 = arith.constant 0 : index
    %c0_73 = arith.constant 0 : index
    %86 = vector.load %arg4[%c0_70, %c0_71, %c0_72, %c0_73] : memref<1x16x16x64xf32, #tpu.memory_space<vmem>>, vector<1x16x16x64xf32>
    %87 = vector.shape_cast %86 : vector<1x16x16x64xf32> to vector<16x16x64xf32>
    %88 = arith.addf %85, %87 : vector<16x16x64xf32>
    %c0_74 = arith.constant 0 : index
    %c0_75 = arith.constant 0 : index
    %c0_76 = arith.constant 0 : index
    %c0_77 = arith.constant 0 : index
    %89 = vector.load %arg5[%c0_74, %c0_75, %c0_76, %c0_77] : memref<1x16x16x64xf32, #tpu.memory_space<vmem>>, vector<1x16x16x64xf32>
    %90 = vector.shape_cast %89 : vector<1x16x16x64xf32> to vector<16x16x64xf32>
    %91 = vector.shape_cast %88 : vector<16x16x64xf32> to vector<1x16x16x64xf32>
    tpu.vector_store %arg5[%c0_74, %c0_75, %c0_76, %c0_77], %91 {strides = array<i32>} : memref<1x16x16x64xf32, #tpu.memory_space<vmem>>, vector<1x16x16x64xf32>,
    return
  }
  func.func @transform_0(%arg0: i32) -> (i32, i32, i32, i32) {
    %c0_i32 = arith.constant 0 : i32
    %c0_i32_0 = arith.constant 0 : i32
    %c0_i32_1 = arith.constant 0 : i32
    %c0_i32_2 = arith.constant 0 : i32
    return %arg0, %c0_i32, %c0_i32_0, %c0_i32_1 : i32, i32, i32, i32
  }
  func.func @transform_1(%arg0: i32) -> (i32, i32, i32) {
    %c0_i32 = arith.constant 0 : i32
    %c0_i32_0 = arith.constant 0 : i32
    %c0_i32_1 = arith.constant 0 : i32
    %c0_i32_2 = arith.constant 0 : i32
    return %c0_i32, %c0_i32_0, %c0_i32_1 : i32, i32, i32
  }
  func.func @transform_2(%arg0: i32) -> (i32, i32) {
    %c0_i32 = arith.constant 0 : i32
    %c0_i32_0 = arith.constant 0 : i32
    %c0_i32_1 = arith.constant 0 : i32
    return %c0_i32, %c0_i32_0 : i32, i32
  }
  func.func @transform_3(%arg0: i32) -> (i32, i32, i32, i32) {
    %c0_i32 = arith.constant 0 : i32
    %c0_i32_0 = arith.constant 0 : i32
    %c0_i32_1 = arith.constant 0 : i32
    %c0_i32_2 = arith.constant 0 : i32
    return %arg0, %c0_i32, %c0_i32_0, %c0_i32_1 : i32, i32, i32, i32
  }
  func.func @transform_4(%arg0: i32) -> (i32, i32, i32, i32) {
    %c0_i32 = arith.constant 0 : i32
    %c0_i32_0 = arith.constant 0 : i32
    %c0_i32_1 = arith.constant 0 : i32
    %c0_i32_2 = arith.constant 0 : i32
    return %arg0, %c0_i32, %c0_i32_0, %c0_i32_1 : i32, i32, i32, i32
  }
}

</mosaic_0001>

<bundles_post_ra>
// kernel: res_block_forward.2
= control target key start
LH: loop header
LB: loop body
LE: loop exit
PB: predicated region body
PF: predicated region fallthrough
CT: control target
= control target key end

     0   :  { %s7237_s12 = smov 0   ;;  %s9353_s0 = inlined_call_operand.vmem [shape: bf16[2,18,18,64], index: 0, kind: input, shape index: {}]   ;;  %s9354_s1 = inlined_call_operand.vmem [shape: bf16[9,64,128], index: 1, kind: input, shape index: {}]   ;;  %s9355_s2 = inlined_call_operand.vmem [shape: f32[1,128], index: 2, kind: input, shape index: {}]   ;;  %s9356_s3 = inlined_call_operand.vmem [shape: bf16[2,16,16,128], index: 3, kind: output, shape index: {}]  }
   0x1 LB: > { %s5445_s13 = sadd.s32 4294967295, %s7215_s12   ;;  %p5449_p0 = scmp.ge.s32.totalorder %s7215_s12, 1  ;;  %s7215_s12 = sphi %s7237_s12, %s13_s12  }
   0x2   : > { %p137_p1 = scmp.lt.s32.totalorder %s7215_s12, 3 }
   0x4   : > { %p138_p2 = pnand %p5449_p0, %p137_p1 }
   0x6   : > { %141 = sbr.rel (%p138_p2) target bundleno = 649 (0x289), region = 32 }
   0xd   : > { %v7057_v0 = vld [vmem:[%s9354_s1 + $0x20] sm:$0xff]   ;;  %p161_p3 = scmp.lt.s32.totalorder %s5445_s13, 1  ;;  %v7059_v2 = vld [vmem:[%s9354_s1 + $0x28] sm:$0xff]   ;;  %v7061_v4 = vld [vmem:[%s9354_s1 + $0x30] sm:$0xff]   ;;  %vm228_vm0 = vsmask.f32 3328 }
   0xe   : > { %v7058_v1 = vld [vmem:[%s9354_s1 + $0x80] sm:$0xff]   ;;  %6424 = vmatprep.subr.bf16.mxu1 %v7057_v0  ;;  %v7060_v3 = vld [vmem:[%s9354_s1 + $0x88] sm:$0xff]   ;;  %v7062_v5 = vld [vmem:[%s9354_s1 + $0x90] sm:$0xff]   ;;  %vm229_vm1 = vsmask.f32 7440  ;;  %vm696_vm3 = vcmask 523264  }
   0xf   : > { %s9420_s13 = smov (!%p161_p3, %s5445_s13), 1  ;;  %6584 = vmatprep.subr.bf16.mxu0 %v7058_v1  ;;  %6425 = vmatpush3.bf16.msra.mxu1 %v7057_v0  ;;  %v7063_v6 = vld [vmem:[%s9354_s1 + $0x38] sm:$0xff]   ;;  %v7283_v18 = vld [vmem:[%s9354_s1] sm:$0xff]   ;;  %vm7299_vm2 = vmor %vm228_vm0, %vm229_vm1  ;;  %vm1267_vm4 = vcmask 1042432   ;;  %vm1268_vm5 = vcmask 1046532  }
  0x10   : > { %6585 = vmatpush3.bf16.msra.mxu0 %v7058_v1  ;;  %6426 = vmatprep.subr.bf16.mxu1 %v7059_v2  ;;  %s7048_s24 = smul.u32 216, %s9420_s13  ;;  %v7064_v7 = vld [vmem:[%s9354_s1 + $0x98] sm:$0xff]   ;;  %v7289_v23 = vld [vmem:[%s9354_s1 + $0xa0] sm:$0xff]   ;;  %vm7532_vm6 = vmor %vm1267_vm4, %vm1268_vm5  ;;  %s6116_s28 = sshll.u32 %s9420_s13, 7 }
  0x11   : > { %6586 = vmatprep.subr.bf16.mxu0 %v7060_v3  ;;  %s9332_s5 = scalar_lea.vmem %s9356_s3, %s6116_s28 }
  0x12   : > { %s7272_s4 = scalar_lea.vmem %s9353_s0, %s7048_s24 }
  0x13   : > { %6427 = vmatpush3.bf16.msra.mxu1 %v7059_v2  ;;  %v172_v8 = vld [vmem:[%s7272_s4] sm:$0xf]  ;;  %v173_v9 = vld [vmem:[%s7272_s4 + $0x4] sm:$0xf]  ;;  %v212_v10 = vld [vmem:[%s7272_s4 + $0x8] sm:$0x1] }
  0x14   : > { %6587 = vmatpush3.bf16.msra.mxu0 %v7060_v3  ;;  %6428 = vmatprep.subr.bf16.mxu1 %v7061_v4  ;;  %v232_v11 = vshrl.u32 %v172_v8, 16  ;;  %v235_v12 = vshll.u32 %v172_v8, 16  ;;  %v241_v13 = vshll.u32 %v173_v9, 16  ;;  %v245_v14 = vshrl.u32 %v173_v9, 16  ;;  %v5669_v22 = vld [vmem:[%s7272_s4 + $0xc] sm:$0xf] }
  0x15   : > { %6588 = vmatprep.subr.bf16.mxu0 %v7062_v5  ;;  %v251_v15 = vshll.u32 %v212_v10, 16  ;;  %v7292_v25 = vld [vmem:[%s7272_s4 + $0x10] sm:$0xf]  ;;  %v7295_v26 = vld [vmem:[%s7272_s4 + $0x14] sm:$0x1]  ;;  %v2140_v27 = vshrl.u32 %v5669_v22, 16 }
  0x16   : > { %v234_v16 = vrot.slane %v232_v11, 4  ;;  %v237_v17 = vrot.slane %v235_v12, 5  ;;  %v243_v19 = vrot.slane %v241_v13, 5  ;;  %v247_v20 = vrot.slane %v245_v14, 4  ;;  %v174_v40 = vld [vmem:[%s7272_s4 + $0xc] sm:$0xf] }
  0x17   : > { %6429 = vmatpush3.bf16.msra.mxu1 %v7061_v4  ;;  %v253_v21 = vrot.slane %v251_v15, 5  ;;  %v2143_v28 = vshll.u32 %v5669_v22, 16  ;;  %v2149_v31 = vshll.u32 %v7292_v25, 16  ;;  %v2153_v32 = vshrl.u32 %v7292_v25, 16  ;;  %v175_v44 = vld [vmem:[%s7272_s4 + $0x10] sm:$0xf] }
  0x18   : > { %6589 = vmatpush3.bf16.msra.mxu0 %v7062_v5  ;;  %6430 = vmatprep.subr.bf16.mxu1 %v7063_v6  ;;  %v238_v24 = vor.u32 %v237_v17, %v234_v16  ;;  %v248_v30 = vor.u32 %v247_v20, %v243_v19  ;;  %v2159_v33 = vshll.u32 %v7295_v26, 16  ;;  %v2142_v35 = vrot.slane %v2140_v27, 4  ;;  %v213_v45 = vld [vmem:[%s7272_s4 + $0x14] sm:$0x1]  ;;  %v5672_v55 = vld [vmem:[%s7272_s4 + $0x18] sm:$0xf] }
  0x19   : > { %6590 = vmatprep.subr.bf16.mxu0 %v7064_v7  ;;  %v2145_v36 = vrot.slane %v2143_v28, 5  ;;  %v2151_v38 = vrot.slane %v2149_v31, 5  ;;  %v2155_v39 = vrot.slane %v2153_v32, 4  ;;  %v256_v46 = vshrl.u32 %v174_v40, 16  ;;  %v7317_v60 = vld [vmem:[%s7272_s4 + $0x1c] sm:$0xf] }
  0x1a   : > { %v239_v34 = vrot.slane %v238_v24, 4  ;;  %v249_v37 = vrot.slane %v248_v30, 4  ;;  %v2161_v43 = vrot.slane %v2159_v33, 5  ;;  %v259_v49 = vshll.u32 %v174_v40, 16  ;;  %v7325_v1 = vld [vmem:[%s7272_s4 + $0x20] sm:$0x1] }
  0x1b   : > { %6431 = vmatpush3.bf16.msra.mxu1 %v7063_v6  ;;  %v2146_v42 = vor.u32 %v2145_v36, %v2142_v35  ;;  %v2156_v48 = vor.u32 %v2155_v39, %v2151_v38  ;;  %v265_v50 = vshll.u32 %v175_v44, 16  ;;  %v258_v53 = vrot.slane %v256_v46, 4  ;;  %v176_v10 = vld [vmem:[%s7272_s4 + $0x18] sm:$0xf]  ;;  %v177_v11 = vld [vmem:[%s7272_s4 + $0x1c] sm:$0xf] }
  0x1c   : > { %6591 = vmatpush3.bf16.msra.mxu0 %v7064_v7  ;;  %6464 = vmatprep.subr.bf16.mxu1 %v7283_v18  ;;  %v244_v41 = vsel %vm7299_vm2, %v239_v34, %v243_v19  ;;  %v254_v47 = vsel %vm7299_vm2, %v249_v37, %v253_v21  ;;  %v269_v54 = vshrl.u32 %v175_v44, 16  ;;  %v261_v57 = vrot.slane %v259_v49, 5  ;;  %v214_v28 = vld [vmem:[%s7272_s4 + $0x20] sm:$0x1]  ;;  %v5675_v34 = vld [vmem:[%s7272_s4 + $0x24] sm:$0xf] }
  0x1d   : > { %6624 = vmatprep.subr.bf16.mxu0 %v7289_v23  ;;  %v5461_v51 = vcombine.low %v244_v41, %v254_v47  ;;  %v2147_v52 = vrot.slane %v2146_v42, 4  ;;  %v2157_v56 = vrot.slane %v2156_v48, 4  ;;  %v267_v58 = vrot.slane %v265_v50, 5  ;;  %v7068_v39 = vld [vmem:[%s9354_s1 + $0x8] sm:$0xff]  }
  0x1e   : > { %v275_v59 = vshll.u32 %v213_v45, 16  ;;  %v2911_v62 = vrot.slane %v7292_v25, 5  ;;  %v2914_v63 = vrot.slane %v7295_v26, 5  ;;  %v271_v0 = vrot.slane %v269_v54, 4  ;;  %v7351_v44 = vld [vmem:[%s7272_s4 + $0x28] sm:$0xf] }
  0x1f   : > { %6432 = vmatprep.mubr.msk.bf16.mxu1 %vm696_vm3, %v5461_v51  ;;  %v2152_v61 = vsel %vm7299_vm2, %v2147_v52, %v2151_v38  ;;  %v2162_v2 = vsel %vm7299_vm2, %v2157_v56, %v2161_v43  ;;  %v262_v3 = vor.u32 %v261_v57, %v258_v53  ;;  %v2164_v5 = vshrl.u32 %v5672_v55, 16  ;;  %v7355_v48 = vld [vmem:[%s7272_s4 + $0x2c] sm:$0x1]  ;;  %v7071_v56 = vld [vmem:[%s9354_s1 + $0x10] sm:$0xff]  }
  0x20   : > { %v277_v4 = vrot.slane %v275_v59, 5  ;;  %v5725_v6 = vcombine.low %v2152_v61, %v2162_v2  ;;  %v272_v7 = vor.u32 %v271_v0, %v267_v58  ;;  %v2167_v8 = vshll.u32 %v5672_v55, 16  ;;  %v7067_v54 = vld [vmem:[%s9354_s1 + $0xa8] sm:$0xff]   ;;  %v178_v55 = vld [vmem:[%s7272_s4 + $0x24] sm:$0xf] }
  0x21   : > { %v2173_v9 = vshll.u32 %v7317_v60, 16  ;;  %v263_v12 = vrot.slane %v262_v3, 4  ;;  %v2166_v13 = vrot.slane %v2164_v5, 4  ;;  %v2177_v14 = vshrl.u32 %v7317_v60, 16  ;;  %v179_v61 = vld [vmem:[%s7272_s4 + $0x28] sm:$0xf] }
  0x22   : > { %v2183_v15 = vshll.u32 %v7325_v1, 16  ;;  %6592 = vmatprep.mubr.msk.bf16.mxu0 %vm696_vm3, %v5725_v6  ;;  %v273_v16 = vrot.slane %v272_v7, 4  ;;  %v2169_v17 = vrot.slane %v2167_v8, 5  ;;  %v2918_v20 = vrot.slane %v7317_v60, 5  ;;  %v215_v5 = vld [vmem:[%s7272_s4 + $0x2c] sm:$0x1] }
  0x23   : > { %v2175_v19 = vrot.slane %v2173_v9, 5  ;;  %v268_v21 = vsel %vm7299_vm2, %v263_v12, %v267_v58  ;;  %v2179_v22 = vrot.slane %v2177_v14, 4  ;;  %v2921_v27 = vrot.slane %v7325_v1, 5 }
  0x24   : > { %v2185_v24 = vrot.slane %v2183_v15, 5  ;;  %v278_v30 = vsel %vm7299_vm2, %v273_v16, %v277_v4  ;;  %v2170_v31 = vor.u32 %v2169_v17, %v2166_v13  ;;  %v7344_v32 = vrot.slane %v2918_v20, 4  ;;  %v7377_v15 = vld [vmem:[%s7272_s4 + $0x34] sm:$0xf] }
  0x25   : > { %v280_v33 = vshrl.u32 %v176_v10, 16  ;;  %v5462_v35 = vcombine.low %v268_v21, %v278_v30  ;;  %v2180_v36 = vor.u32 %v2179_v22, %v2175_v19  ;;  %v283_v37 = vshll.u32 %v176_v10, 16  ;;  %v5678_v10 = vld [vmem:[%s7272_s4 + $0x30] sm:$0xf] }
  0x26   : > { %v289_v38 = vshll.u32 %v177_v11, 16  ;;  %v2171_v40 = vrot.slane %v2170_v31, 4  ;;  %v293_v42 = vshrl.u32 %v177_v11, 16  ;;  %v299_v43 = vshll.u32 %v214_v28, 16  ;;  %v7069_v31 = vld [vmem:[%s9354_s1 + $0xb0] sm:$0xff]  }
  0x27   : > { %v282_v41 = vrot.slane %v280_v33, 4  ;;  %6433 = vmatmul.mubr.msk.bf16.vlgmr.msra.gmra.mrb[0].mxu1 %vm696_vm3, %v5462_v35  ;;  %v2181_v45 = vrot.slane %v2180_v36, 4  ;;  %v285_v46 = vrot.slane %v283_v37, 5  ;;  %v2188_v49 = vshrl.u32 %v5675_v34, 16 }
  0x28   : > { %v291_v47 = vrot.slane %v289_v38, 5  ;;  %6465 = vmatpush3.bf16.msra.mxu1 %v7283_v18  ;;  %v2176_v50 = vsel %vm7299_vm2, %v2171_v40, %v2175_v19  ;;  %v295_v51 = vrot.slane %v293_v42, 4  ;;  %v301_v52 = vrot.slane %v299_v43, 5  ;;  %v7393_v40 = vld [vmem:[%s7272_s4 + $0x38] sm:$0x1] }
  0x29   : > { %v2191_v53 = vshll.u32 %v5675_v34, 16  ;;  %v2186_v18 = vsel %vm7299_vm2, %v2181_v45, %v2185_v24  ;;  %v286_v57 = vor.u32 %v285_v46, %v282_v41  ;;  %v2190_v58 = vrot.slane %v2188_v49, 4  ;;  %6466 = vmatprep.subr.bf16.mxu1 %v7068_v39  ;;  %v7070_v42 = vld [vmem:[%s9354_s1 + $0xb8] sm:$0xff]   ;;  %v180_v49 = vld [vmem:[%s7272_s4 + $0x30] sm:$0xf] }
  0x2a   : > { %v2197_v59 = vshll.u32 %v7351_v44, 16  ;;  %v5726_v0 = vcombine.low %v2176_v50, %v2186_v18  ;;  %v296_v2 = vor.u32 %v295_v51, %v291_v47  ;;  %v2201_v4 = vshrl.u32 %v7351_v44, 16 }
  0x2b   : > { %v2193_v3 = vrot.slane %v2191_v53, 5  ;;  %v287_v6 = vrot.slane %v286_v57, 4  ;;  %v2207_v8 = vshll.u32 %v7355_v48, 16  ;;  %v304_v9 = vshrl.u32 %v178_v55, 16 }
  0x2c   : > { %v2199_v7 = vrot.slane %v2197_v59, 5  ;;  %6593 = vmatmul.mubr.msk.bf16.vlgmr.msra.gmra.mrb[0].mxu0 %vm696_vm3, %v5726_v0  ;;  %v297_v11 = vrot.slane %v296_v2, 4  ;;  %v2203_v13 = vrot.slane %v2201_v4, 4  ;;  %v307_v14 = vshll.u32 %v178_v55, 16  ;;  %6467 = vmatpush3.bf16.msra.mxu1 %v7068_v39  ;;  %v181_v55 = vld [vmem:[%s7272_s4 + $0x34] sm:$0xf] }
  0x2d   : > { %v2194_v12 = vor.u32 %v2193_v3, %v2190_v58  ;;  %6625 = vmatpush3.bf16.msra.mxu0 %v7289_v23  ;;  %v292_v16 = vsel %vm7299_vm2, %v287_v6, %v291_v47  ;;  %v2209_v17 = vrot.slane %v2207_v8, 5  ;;  %v306_v19 = vrot.slane %v304_v9, 4  ;;  %6468 = vmatprep.subr.bf16.mxu1 %v7071_v56  ;;  %v7073_v23 = vld [vmem:[%s9354_s1 + $0x18] sm:$0xff]  }
  0x2e   : > { %v313_v21 = vshll.u32 %v179_v61, 16  ;;  %v302_v22 = vsel %vm7299_vm2, %v297_v11, %v301_v52  ;;  %v2204_v28 = vor.u32 %v2203_v13, %v2199_v7  ;;  %6626 = vmatprep.subr.bf16.mxu0 %v7067_v54  ;;  %v309_v30 = vrot.slane %v307_v14, 5  ;;  %v7417_v13 = vld [vmem:[%s9354_s1 + $0xc0] sm:$0xff]  }
  0x2f   : > { %v2195_v24 = vrot.slane %v2194_v12, 4  ;;  %v5463_v33 = vcombine.low %v292_v16, %v302_v22  ;;  %v317_v35 = vshrl.u32 %v179_v61, 16  ;;  %v323_v36 = vshll.u32 %v215_v5, 16  ;;  %v216_v5 = vld [vmem:[%s7272_s4 + $0x38] sm:$0x1] }
  0x30   : > { %v315_v34 = vrot.slane %v313_v21, 5  ;;  %v2205_v38 = vrot.slane %v2204_v28, 4  ;;  %v310_v39 = vor.u32 %v309_v30, %v306_v19  ;;  %v2212_v41 = vshrl.u32 %v5678_v10, 16  ;;  %6469 = vmatpush3.bf16.msra.mxu1 %v7071_v56  ;;  %v7076_v56 = vld [vmem:[%s9354_s1 + $0x40] sm:$0xff]   ;;  %v5681_v12 = vld [vmem:[%s7272_s4 + $0x3c] sm:$0xf] }
  0x31   : > { %v2200_v37 = vsel %vm7299_vm2, %v2195_v24, %v2199_v7  ;;  %6436 = vmatprep.mubr.msk.bf16.mxu1 %vm696_vm3, %v5463_v33  ;;  %v319_v43 = vrot.slane %v317_v35, 4  ;;  %v325_v45 = vrot.slane %v323_v36, 5  ;;  %v2215_v46 = vshll.u32 %v5678_v10, 16  ;;  %6627 = vmatpush3.bf16.msra.mxu0 %v7067_v54  ;;  %v7422_v21 = vld [vmem:[%s7272_s4 + $0x40] sm:$0xf] }
  0x32   : > { %v2221_v47 = vshll.u32 %v7377_v15, 16  ;;  %v2210_v50 = vsel %vm7299_vm2, %v2205_v38, %v2209_v17  ;;  %v311_v51 = vrot.slane %v310_v39, 4  ;;  %v2214_v52 = vrot.slane %v2212_v41, 4  ;;  %6628 = vmatprep.subr.bf16.mxu0 %v7069_v31  ;;  %6470 = vmatprep.subr.bf16.mxu1 %v7073_v23  ;;  %v7427_v33 = vld [vmem:[%s7272_s4 + $0x44] sm:$0x1] }
  0x33   : > { %v2225_v53 = vshrl.u32 %v7377_v15, 16  ;;  %v5727_v18 = vcombine.low %v2200_v37, %v2210_v50  ;;  %v320_v57 = vor.u32 %v319_v43, %v315_v34  ;;  %v2217_v58 = vrot.slane %v2215_v46, 5  ;;  %v182_v41 = vld [vmem:[%s7272_s4 + $0x3c] sm:$0xf] }
  0x34   : > { %v2223_v54 = vrot.slane %v2221_v47, 5  ;;  %v316_v59 = vsel %vm7299_vm2, %v311_v51, %v315_v34  ;;  %v2231_v0 = vshll.u32 %v7393_v40, 16  ;;  %v328_v2 = vshrl.u32 %v180_v49, 16  ;;  %6471 = vmatpush3.bf16.msra.mxu1 %v7073_v23 }
  0x35   : > { %v2227_v61 = vrot.slane %v2225_v53, 4  ;;  %6596 = vmatprep.mubr.msk.bf16.mxu0 %vm696_vm3, %v5727_v18  ;;  %v321_v3 = vrot.slane %v320_v57, 4  ;;  %v2218_v4 = vor.u32 %v2217_v58, %v2214_v52  ;;  %v331_v6 = vshll.u32 %v180_v49, 16  ;;  %6629 = vmatpush3.bf16.msra.mxu0 %v7069_v31  ;;  %v183_v49 = vld [vmem:[%s7272_s4 + $0x40] sm:$0xf] }
  0x36   : > { %v337_v7 = vshll.u32 %v181_v55, 16  ;;  %v2233_v9 = vrot.slane %v2231_v0, 5  ;;  %v330_v10 = vrot.slane %v328_v2, 4  ;;  %v341_v11 = vshrl.u32 %v181_v55, 16  ;;  %6630 = vmatprep.subr.bf16.mxu0 %v7070_v42  ;;  %6504 = vmatprep.subr.bf16.mxu1 %v7076_v56  ;;  %v217_v56 = vld [vmem:[%s7272_s4 + $0x44] sm:$0x1] }
  0x37   : > { %v2228_v8 = vor.u32 %v2227_v61, %v2223_v54  ;;  %v326_v14 = vsel %vm7299_vm2, %v321_v3, %v325_v45  ;;  %v2219_v16 = vrot.slane %v2218_v4, 4  ;;  %v333_v17 = vrot.slane %v331_v6, 5  ;;  %v5684_v58 = vld [vmem:[%s7272_s4 + $0x48] sm:$0xf]  ;;  %v7446_v2 = vld [vmem:[%s7272_s4 + $0x4c] sm:$0xf] }
  0x38   : > { %v339_v19 = vrot.slane %v337_v7, 5  ;;  %v5464_v22 = vcombine.low %v316_v59, %v326_v14  ;;  %v343_v28 = vrot.slane %v341_v11, 4  ;;  %v347_v30 = vshll.u32 %v216_v5, 16  ;;  %v7449_v7 = vld [vmem:[%s7272_s4 + $0x50] sm:$0x1] }
  0x39   : > { %v2229_v24 = vrot.slane %v2228_v8, 4  ;;  %v2224_v31 = vsel %vm7299_vm2, %v2219_v16, %v2223_v54  ;;  %v334_v23 = vor.u32 %v333_v17, %v330_v10  ;;  %v2236_v34 = vshrl.u32 %v5681_v12, 16  ;;  %6631 = vmatpush3.bf16.msra.mxu0 %v7070_v42 }
  0x3a   : > { %v2239_v35 = vshll.u32 %v5681_v12, 16  ;;  %6437 = vmatmul.mubr.msk.bf16.gmra.mrb[4].mxu1 %vm696_vm3, %v5464_v22  ;;  %v344_v37 = vor.u32 %v343_v28, %v339_v19  ;;  %v349_v38 = vrot.slane %v347_v30, 5  ;;  %v2245_v39 = vshll.u32 %v7422_v21, 16  ;;  %6664 = vmatprep.subr.bf16.mxu0 %v7417_v13 }
  0x3b   : > { %v2234_v36 = vsel %vm7299_vm2, %v2229_v24, %v2233_v9  ;;  %v335_v45 = vrot.slane %v334_v23, 4  ;;  %v2238_v46 = vrot.slane %v2236_v34, 4  ;;  %v2249_v51 = vshrl.u32 %v7422_v21, 16 }
  0x3c   : > { %v5728_v43 = vcombine.low %v2224_v31, %v2234_v36  ;;  %v2241_v47 = vrot.slane %v2239_v35, 5  ;;  %v345_v42 = vrot.slane %v344_v37, 4  ;;  %v2247_v50 = vrot.slane %v2245_v39, 5 }
  0x3d   : > { %v2255_v52 = vshll.u32 %v7427_v33, 16  ;;  %v340_v53 = vsel %vm7299_vm2, %v335_v45, %v339_v19  ;;  %v352_v18 = vshrl.u32 %v182_v41, 16  ;;  %v355_v57 = vshll.u32 %v182_v41, 16  ;;  %v184_v19 = vld [vmem:[%s7272_s4 + $0x48] sm:$0xf] }
  0x3e   : > { %6597 = vmatmul.mubr.msk.bf16.gmra.mrb[4].mxu0 %vm696_vm3, %v5728_v43  ;;  %v2242_v55 = vor.u32 %v2241_v47, %v2238_v46  ;;  %v350_v54 = vsel %vm7299_vm2, %v345_v42, %v349_v38  ;;  %v2251_v59 = vrot.slane %v2249_v51, 4  ;;  %v361_v0 = vshll.u32 %v183_v49, 16  ;;  %v185_v41 = vld [vmem:[%s7272_s4 + $0x4c] sm:$0xf] }
  0x3f   : > { %v2257_v61 = vrot.slane %v2255_v52, 5  ;;  %v5465_v3 = vcombine.low %v340_v53, %v350_v54  ;;  %v354_v5 = vrot.slane %v352_v18, 4  ;;  %v357_v6 = vrot.slane %v355_v57, 5  ;;  %v5687_v57 = vld [vmem:[%s7272_s4 + $0x54] sm:$0xf] }
  0x40   : > { %v2243_v4 = vrot.slane %v2242_v55, 4  ;;  %v2252_v8 = vor.u32 %v2251_v59, %v2247_v50  ;;  %v363_v9 = vrot.slane %v361_v0, 5  ;;  %v365_v10 = vshrl.u32 %v183_v49, 16  ;;  %v218_v49 = vld [vmem:[%s7272_s4 + $0x50] sm:$0x1] }
  0x41   : > { %v371_v11 = vshll.u32 %v217_v56, 16  ;;  %6440 = vmatprep.mubr.msk.bf16.mxu1 %vm696_vm3, %v5465_v3  ;;  %v358_v14 = vor.u32 %v357_v6, %v354_v5  ;;  %v2260_v16 = vshrl.u32 %v5684_v58, 16  ;;  %v2263_v17 = vshll.u32 %v5684_v58, 16  ;;  %v7469_v0 = vld [vmem:[%s7272_s4 + $0x58] sm:$0xf] }
  0x42   : > { %v2248_v12 = vsel %vm7299_vm2, %v2243_v4, %v2247_v50  ;;  %v2253_v22 = vrot.slane %v2252_v8, 4  ;;  %v367_v24 = vrot.slane %v365_v10, 4  ;;  %v2269_v30 = vshll.u32 %v7446_v2, 16 }
  0x43   : > { %v373_v28 = vrot.slane %v371_v11, 5  ;;  %v359_v31 = vrot.slane %v358_v14, 4  ;;  %v2262_v23 = vrot.slane %v2260_v16, 4  ;;  %v2265_v34 = vrot.slane %v2263_v17, 5  ;;  %v7474_v11 = vld [vmem:[%s7272_s4 + $0x5c] sm:$0x1] }
  0x44   : > { %v2273_v35 = vshrl.u32 %v7446_v2, 16  ;;  %v2258_v36 = vsel %vm7299_vm2, %v2253_v22, %v2257_v61  ;;  %v368_v37 = vor.u32 %v367_v24, %v363_v9  ;;  %v2271_v38 = vrot.slane %v2269_v30, 5  ;;  %v7482_v22 = vld [vmem:[%s7272_s4 + $0x54] sm:$0xf] }
  0x45   : > { %v2279_v39 = vshll.u32 %v7449_v7, 16  ;;  %v5729_v43 = vcombine.low %v2248_v12, %v2258_v36  ;;  %v364_v45 = vsel %vm7299_vm2, %v359_v31, %v363_v9  ;;  %v2266_v46 = vor.u32 %v2265_v34, %v2262_v23  ;;  %v7485_v23 = vld [vmem:[%s7272_s4 + $0x58] sm:$0xf] }
  0x46   : > { %v2275_v47 = vrot.slane %v2273_v35, 4  ;;  %v369_v42 = vrot.slane %v368_v37, 4  ;;  %v376_v51 = vshrl.u32 %v184_v19, 16  ;;  %v379_v52 = vshll.u32 %v184_v19, 16 }
  0x47   : > { %v2281_v50 = vrot.slane %v2279_v39, 5  ;;  %6600 = vmatprep.mubr.msk.bf16.mxu0 %vm696_vm3, %v5729_v43  ;;  %v2267_v53 = vrot.slane %v2266_v46, 4  ;;  %v385_v56 = vshll.u32 %v185_v41, 16  ;;  %v389_v18 = vshrl.u32 %v185_v41, 16  ;;  %v5690_v46 = vld [vmem:[%s7272_s4 + $0x60] sm:$0xf] }
  0x48   : > { %v2276_v55 = vor.u32 %v2275_v47, %v2271_v38  ;;  %v374_v58 = vsel %vm7299_vm2, %v369_v42, %v373_v28  ;;  %v378_v54 = vrot.slane %v376_v51, 4  ;;  %v381_v59 = vrot.slane %v379_v52, 5 }
  0x49   : > { %v395_v61 = vshll.u32 %v218_v49, 16  ;;  %v5466_v3 = vcombine.low %v364_v45, %v374_v58  ;;  %v2272_v4 = vsel %vm7299_vm2, %v2267_v53, %v2271_v38  ;;  %v387_v6 = vrot.slane %v385_v56, 5  ;;  %v219_v38 = vld [vmem:[%s7272_s4 + $0x5c] sm:$0x1]  ;;  %v7500_v56 = vld [vmem:[%s7272_s4 + $0x64] sm:$0xf] }
  0x4a   : > { %v2277_v5 = vrot.slane %v2276_v55, 4  ;;  %v382_v8 = vor.u32 %v381_v59, %v378_v54  ;;  %v391_v9 = vrot.slane %v389_v18, 4  ;;  %v2284_v12 = vshrl.u32 %v5687_v57, 16 }
  0x4b   : > { %v397_v10 = vrot.slane %v395_v61, 5  ;;  %6441 = vmatmul.mubr.msk.bf16.gmra.mrb[8].mxu1 %vm696_vm3, %v5466_v3  ;;  %v2287_v16 = vshll.u32 %v5687_v57, 16  ;;  %v2293_v17 = vshll.u32 %v7469_v0, 16  ;;  %v2297_v19 = vshrl.u32 %v7469_v0, 16 }
  0x4c   : > { %v2282_v14 = vsel %vm7299_vm2, %v2277_v5, %v2281_v50  ;;  %v383_v28 = vrot.slane %v382_v8, 4  ;;  %v392_v30 = vor.u32 %v391_v9, %v387_v6  ;;  %v2286_v31 = vrot.slane %v2284_v12, 4  ;;  %v7508_v8 = vld [vmem:[%s7272_s4 + $0x68] sm:$0x1]  ;;  %v7512_v12 = vld [vmem:[%s7272_s4 + $0x60] sm:$0xf] }
  0x4d   : > { %v5730_v24 = vcombine.low %v2272_v4, %v2282_v14  ;;  %v2289_v34 = vrot.slane %v2287_v16, 5  ;;  %v2295_v35 = vrot.slane %v2293_v17, 5  ;;  %v2299_v36 = vrot.slane %v2297_v19, 4 }
  0x4e   : > { %v2303_v37 = vshll.u32 %v7474_v11, 16  ;;  %v388_v39 = vsel %vm7299_vm2, %v383_v28, %v387_v6  ;;  %v393_v41 = vrot.slane %v392_v30, 4  ;;  %v400_v43 = vshrl.u32 %v7482_v22, 16 }
  0x4f   : > { %6601 = vmatmul.mubr.msk.bf16.gmra.mrb[8].mxu0 %vm696_vm3, %v5730_v24  ;;  %v403_v45 = vshll.u32 %v7482_v22, 16  ;;  %v2290_v47 = vor.u32 %v2289_v34, %v2286_v31  ;;  %v2300_v49 = vor.u32 %v2299_v36, %v2295_v35  ;;  %v409_v50 = vshll.u32 %v7485_v23, 16  ;;  %v7515_v24 = vld [vmem:[%s7272_s4 + $0x64] sm:$0xf] }
  0x50   : > { %v2305_v42 = vrot.slane %v2303_v37, 5  ;;  %v398_v51 = vsel %vm7299_vm2, %v393_v41, %v397_v10  ;;  %v402_v52 = vrot.slane %v400_v43, 4  ;;  %v413_v55 = vshrl.u32 %v7485_v23, 16 }
  0x51   : > { %v405_v53 = vrot.slane %v403_v45, 5  ;;  %v5467_v18 = vcombine.low %v388_v39, %v398_v51  ;;  %v2291_v57 = vrot.slane %v2290_v47, 4  ;;  %v2301_v58 = vrot.slane %v2300_v49, 4  ;;  %v5761_v47 = vld [vmem:[%s7272_s4 + $0xc] sm:$0xe] }
  0x52   : > { %v411_v54 = vrot.slane %v409_v50, 5  ;;  %v415_v61 = vrot.slane %v413_v55, 4  ;;  %v419_v3 = vshll.u32 %v219_v38, 16  ;;  %v2308_v4 = vshrl.u32 %v5690_v46, 16  ;;  %v220_v38 = vld [vmem:[%s7272_s4 + $0x68] sm:$0x1] }
  0x53   : > { %v406_v59 = vor.u32 %v405_v53, %v402_v52  ;;  %6444 = vmatprep.mubr.msk.bf16.mxu1 %vm696_vm3, %v5467_v18  ;;  %v2296_v5 = vsel %vm7299_vm2, %v2291_v57, %v2295_v35  ;;  %v2306_v6 = vsel %vm7299_vm2, %v2301_v58, %v2305_v42  ;;  %v2311_v9 = vshll.u32 %v5690_v46, 16  ;;  %v7537_v58 = vld [vmem:[%s7272_s4 + $0x6c] sm:$0xf] }
  0x54   : > { %v2317_v10 = vshll.u32 %v7500_v56, 16  ;;  %v5731_v14 = vcombine.low %v2296_v5, %v2306_v6  ;;  %v416_v17 = vor.u32 %v415_v61, %v411_v54  ;;  %v421_v19 = vrot.slane %v419_v3, 5 }
  0x55   : > { %v407_v16 = vrot.slane %v406_v59, 4  ;;  %v2310_v28 = vrot.slane %v2308_v4, 4  ;;  %v2313_v30 = vrot.slane %v2311_v9, 5  ;;  %v2321_v34 = vshrl.u32 %v7500_v56, 16 }
  0x56   : > { %v2319_v31 = vrot.slane %v2317_v10, 5  ;;  %6604 = vmatprep.mubr.msk.bf16.mxu0 %vm696_vm3, %v5731_v14  ;;  %v417_v36 = vrot.slane %v416_v17, 4  ;;  %v2327_v37 = vshll.u32 %v7508_v8, 16  ;;  %v424_v39 = vshrl.u32 %v7512_v12, 16  ;;  %v7549_v17 = vld [vmem:[%s7272_s4 + $0x70] sm:$0xf] }
  0x57   : > { %v412_v35 = vsel %vm7299_vm2, %v407_v16, %v411_v54  ;;  %v2314_v41 = vor.u32 %v2313_v30, %v2310_v28  ;;  %v2323_v43 = vrot.slane %v2321_v34, 4  ;;  %v427_v45 = vshll.u32 %v7512_v12, 16  ;;  %v221_v34 = vld [vmem:[%s7272_s4 + $0x74] sm:$0x1] }
  0x58   : > { %v433_v46 = vshll.u32 %v7515_v24, 16  ;;  %v422_v49 = vsel %vm7299_vm2, %v417_v36, %v421_v19  ;;  %v2329_v42 = vrot.slane %v2327_v37, 5  ;;  %v426_v50 = vrot.slane %v424_v39, 4 }
  0x59   : > { %v437_v51 = vshrl.u32 %v7515_v24, 16  ;;  %v5468_v52 = vcombine.low %v412_v35, %v422_v49  ;;  %v2315_v53 = vrot.slane %v2314_v41, 4  ;;  %v2324_v55 = vor.u32 %v2323_v43, %v2319_v31  ;;  %v5762_v35 = vld [vmem:[%s7272_s4 + $0x18] sm:$0xe] }
  0x5a   : > { %v429_v18 = vrot.slane %v427_v45, 5  ;;  %v435_v54 = vrot.slane %v433_v46, 5  ;;  %v443_v61 = vshll.u32 %v220_v38, 16  ;;  %v5777_v3 = vrot.slane %v5761_v47, 9  ;;  %v7566_v45 = vld [vmem:[%s7272_s4 + $0x78] sm:$0xf] }
  0x5b   : > { %v439_v59 = vrot.slane %v437_v51, 4  ;;  %6445 = vmatmul.mubr.msk.bf16.gmra.mrb[12].mxu1 %vm696_vm3, %v5468_v52  ;;  %v2320_v4 = vsel %vm7299_vm2, %v2315_v53, %v2319_v31  ;;  %v2325_v5 = vrot.slane %v2324_v55, 4  ;;  %v2913_v9 = vrot.slane %v2911_v62, 4  ;;  %v222_v55 = vld [vmem:[%s7272_s4 + $0x80] sm:$0x1] }
  0x5c   : > { %v430_v6 = vor.u32 %v429_v18, %v426_v50  ;;  %v445_v14 = vrot.slane %v443_v61, 5  ;;  %v2912_v16 = vsel %vm7532_vm6, %v5777_v3, %v2911_v62  ;;  %v448_v19 = vshrl.u32 %v7537_v58, 16 }
  0x5d   : > { %v440_v10 = vor.u32 %v439_v59, %v435_v54  ;;  %v2330_v28 = vsel %vm7299_vm2, %v2325_v5, %v2329_v42  ;;  %v2915_v31 = vsel %vm7532_vm6, %v2913_v9, %v2914_v63  ;;  %v451_v25 = vshll.u32 %v7537_v58, 16  ;;  %v7577_v42 = vld [vmem:[%s7272_s4 + $0x7c] sm:$0xf]  ;;  %v7591_v5 = vld [vmem:[%s7272_s4 + $0x84] sm:$0xf] }
  0x5e   : > { %v431_v30 = vrot.slane %v430_v6, 4  ;;  %v5732_v62 = vcombine.low %v2320_v4, %v2330_v28  ;;  %v5801_v37 = vcombine.low %v2912_v16, %v2915_v31  ;;  %v450_v38 = vrot.slane %v448_v19, 4 }
  0x5f   : > { %v441_v36 = vrot.slane %v440_v10, 4  ;;  %v453_v41 = vrot.slane %v451_v25, 5  ;;  %v457_v43 = vshll.u32 %v7549_v17, 16  ;;  %v461_v26 = vshrl.u32 %v7549_v17, 16  ;;  %v7595_v10 = vld [vmem:[%s7272_s4 + $0x88] sm:$0xf] }
  0x60   : > { %v436_v39 = vsel %vm7299_vm2, %v431_v30, %v435_v54  ;;  %6605 = vmatmul.mubr.msk.bf16.gmra.mrb[12].mxu0 %vm696_vm3, %v5732_v62  ;;  %v467_v46 = vshll.u32 %v221_v34, 16  ;;  %v5778_v47 = vrot.slane %v5762_v35, 9  ;;  %v2922_v49 = vsel %vm7532_vm6, %v7344_v32, %v2921_v27  ;;  %v5763_v32 = vld [vmem:[%s7272_s4 + $0x24] sm:$0xe]  ;;  %v7074_v35 = vld [vmem:[%s9354_s1 + $0xc8] sm:$0xff]  }
  0x61   : > { %v446_v63 = vsel %vm7299_vm2, %v441_v36, %v445_v14  ;;  %6632 = vmatprep.mubr.msk.bf16.mxu0 %vm696_vm3, %v5801_v37  ;;  %v454_v51 = vor.u32 %v453_v41, %v450_v38  ;;  %v459_v52 = vrot.slane %v457_v43, 5  ;;  %v463_v53 = vrot.slane %v461_v26, 4  ;;  %v223_v37 = vld [vmem:[%s7272_s4 + $0x8c] sm:$0x1] }
  0x62   : > { %v5469_v50 = vcombine.low %v436_v39, %v446_v63  ;;  %v469_v18 = vrot.slane %v467_v46, 5  ;;  %v2919_v1 = vsel %vm7532_vm6, %v5778_v47, %v2918_v20  ;;  %v472_v54 = vshrl.u32 %v7566_v45, 16  ;;  %v5764_v63 = vld [vmem:[%s7272_s4 + $0x30] sm:$0xe] }
  0x63   : > { %v475_v27 = vshll.u32 %v7566_v45, 16  ;;  %v455_v59 = vrot.slane %v454_v51, 4  ;;  %v464_v61 = vor.u32 %v463_v53, %v459_v52  ;;  %v5802_v3 = vcombine.low %v2919_v1, %v2922_v49 }
  0x64   : > { %6448 = vmatprep.mubr.msk.bf16.mxu1 %vm696_vm3, %v5469_v50  ;;  %v481_v4 = vshll.u32 %v7577_v42, 16  ;;  %v474_v6 = vrot.slane %v472_v54, 4  ;;  %v485_v9 = vshrl.u32 %v7577_v42, 16  ;;  %v491_v20 = vshll.u32 %v222_v55, 16 }
  0x65   : > { %v477_v60 = vrot.slane %v475_v27, 5  ;;  %v460_v14 = vsel %vm7299_vm2, %v455_v59, %v459_v52  ;;  %v465_v16 = vrot.slane %v464_v61, 4  ;;  %v5779_v28 = vrot.slane %v5763_v32, 9  ;;  %v7625_v27 = vld [vmem:[%s7272_s4 + $0x90] sm:$0xf] }
  0x66   : > { %v483_v19 = vrot.slane %v481_v4, 5  ;;  %v487_v31 = vrot.slane %v485_v9, 4  ;;  %v493_v34 = vrot.slane %v491_v20, 5  ;;  %v2925_v25 = vrot.slane %v7351_v44, 5  ;;  %v7628_v32 = vld [vmem:[%s7272_s4 + $0x94] sm:$0xf] }
  0x67   : > { %v478_v30 = vor.u32 %v477_v60, %v474_v6  ;;  %v470_v62 = vsel %vm7299_vm2, %v465_v16, %v469_v18  ;;  %v2928_v36 = vrot.slane %v7355_v48, 5  ;;  %v496_v38 = vshrl.u32 %v7591_v5, 16 }
  0x68   : > { %v499_v39 = vshll.u32 %v7591_v5, 16  ;;  %v5470_v41 = vcombine.low %v460_v14, %v470_v62  ;;  %6633 = vmatmul.mubr.msk.bf16.vlgmr.msra.gmra.mrb[0].mxu0 %vm696_vm3, %v5802_v3  ;;  %v488_v26 = vor.u32 %v487_v31, %v483_v19  ;;  %v2926_v44 = vsel %vm7532_vm6, %v5779_v28, %v2925_v25  ;;  %v224_v14 = vld [vmem:[%s7272_s4 + $0x98] sm:$0x1]  ;;  %v5765_v31 = vld [vmem:[%s7272_s4 + $0x3c] sm:$0xe] }
  0x69   : > { %v479_v43 = vrot.slane %v478_v30, 4  ;;  %6665 = vmatpush3.bf16.msra.mxu0 %v7417_v13  ;;  %v2927_v46 = vrot.slane %v2925_v25, 4  ;;  %v498_v48 = vrot.slane %v496_v38, 4  ;;  %v505_v49 = vshll.u32 %v7595_v10, 16  ;;  %v7077_v13 = vld [vmem:[%s9354_s1 + $0xd0] sm:$0xff]  }
  0x6a   : > { %v501_v47 = vrot.slane %v499_v39, 5  ;;  %6449 = vmatmul.mubr.msk.bf16.gmra.mrb[16].mxu1 %vm696_vm3, %v5470_v41  ;;  %v489_v51 = vrot.slane %v488_v26, 4  ;;  %v509_v52 = vshrl.u32 %v7595_v10, 16  ;;  %v515_v53 = vshll.u32 %v223_v37, 16  ;;  %6666 = vmatprep.subr.bf16.mxu0 %v7074_v35  ;;  %v7650_v62 = vld [vmem:[%s7272_s4 + $0x9c] sm:$0xf] }
  0x6b   : > { %v484_v50 = vsel %vm7299_vm2, %v479_v43, %v483_v19  ;;  %v2929_v55 = vsel %vm7532_vm6, %v2927_v46, %v2928_v36  ;;  %v507_v1 = vrot.slane %v505_v49, 5  ;;  %v5780_v54 = vrot.slane %v5764_v63, 9  ;;  %v7653_v41 = vld [vmem:[%s7272_s4 + $0xa0] sm:$0xf]  ;;  %v225_v46 = vld [vmem:[%s7272_s4 + $0xa4] sm:$0x1] }
  0x6c   : > { %v502_v18 = vor.u32 %v501_v47, %v498_v48  ;;  %v494_v59 = vsel %vm7299_vm2, %v489_v51, %v493_v34  ;;  %v5803_v61 = vcombine.low %v2926_v44, %v2929_v55  ;;  %v511_v3 = vrot.slane %v509_v52, 4  ;;  %v7664_v51 = vld [vmem:[%s9354_s1 + $0xe0] sm:$0xff]  }
  0x6d   : > { %v517_v4 = vrot.slane %v515_v53, 5  ;;  %v5471_v6 = vcombine.low %v484_v50, %v494_v59  ;;  %v2932_v9 = vrot.slane %v7377_v15, 5  ;;  %v2935_v20 = vrot.slane %v7393_v40, 5  ;;  %6667 = vmatpush3.bf16.msra.mxu0 %v7074_v35  ;;  %v7083_v15 = vld [vmem:[%s9354_s1 + $0xd8] sm:$0xff]  }
  0x6e   : > { %v503_v60 = vrot.slane %v502_v18, 4  ;;  %6636 = vmatprep.mubr.msk.bf16.mxu0 %vm696_vm3, %v5803_v61  ;;  %v512_v16 = vor.u32 %v511_v3, %v507_v1  ;;  %v520_v19 = vshrl.u32 %v7625_v27, 16  ;;  %v523_v28 = vshll.u32 %v7625_v27, 16  ;;  %6668 = vmatprep.subr.bf16.mxu0 %v7077_v13  ;;  %v5766_v18 = vld [vmem:[%s7272_s4 + $0x48] sm:$0xe] }
  0x6f   : > { %v529_v30 = vshll.u32 %v7628_v32, 16  ;;  %6452 = vmatprep.mubr.msk.bf16.mxu1 %vm696_vm3, %v5471_v6  ;;  %v2933_v34 = vsel %vm7532_vm6, %v5780_v54, %v2932_v9  ;;  %v2934_v25 = vrot.slane %v2932_v9, 4  ;;  %v533_v35 = vshrl.u32 %v7628_v32, 16  ;;  %v7673_v61 = vld [vmem:[%s7272_s4 + $0xa8] sm:$0xf] }
  0x70   : > { %v508_v40 = vsel %vm7299_vm2, %v503_v60, %v507_v1  ;;  %v513_v36 = vrot.slane %v512_v16, 4  ;;  %v522_v37 = vrot.slane %v520_v19, 4  ;;  %v525_v38 = vrot.slane %v523_v28, 5  ;;  %v7680_v60 = vld [vmem:[%s7272_s4 + $0xac] sm:$0xf] }
  0x71   : > { %v531_v39 = vrot.slane %v529_v30, 5  ;;  %v2936_v43 = vsel %vm7532_vm6, %v2934_v25, %v2935_v20  ;;  %v535_v26 = vrot.slane %v533_v35, 4  ;;  %v539_v44 = vshll.u32 %v224_v14, 16  ;;  %6669 = vmatpush3.bf16.msra.mxu0 %v7077_v13  ;;  %v226_v35 = vld [vmem:[%s7272_s4 + $0xb0] sm:$0x1] }
  0x72   : > { %v5781_v63 = vrot.slane %v5765_v31, 9  ;;  %v518_v48 = vsel %vm7299_vm2, %v513_v36, %v517_v4  ;;  %v5804_v47 = vcombine.low %v2933_v34, %v2936_v43  ;;  %v526_v49 = vor.u32 %v525_v38, %v522_v37  ;;  %6670 = vmatprep.subr.bf16.mxu0 %v7083_v15  ;;  %v5767_v36 = vld [vmem:[%s7272_s4 + $0x54] sm:$0xe] }
  0x73   : > { %v2939_v50 = vrot.slane %v7422_v21, 5  ;;  %v5472_v52 = vcombine.low %v508_v40, %v518_v48  ;;  %v536_v53 = vor.u32 %v535_v26, %v531_v39  ;;  %v541_v55 = vrot.slane %v539_v44, 5 }
  0x74   : > { %v2942_v13 = vrot.slane %v7427_v33, 5  ;;  %6637 = vmatmul.mubr.msk.bf16.gmra.mrb[4].mxu0 %vm696_vm3, %v5804_v47  ;;  %v527_v1 = vrot.slane %v526_v49, 4  ;;  %v544_v59 = vshrl.u32 %v7650_v62, 16  ;;  %v547_v4 = vshll.u32 %v7650_v62, 16 }
  0x75   : > { %v2940_v54 = vsel %vm7532_vm6, %v5781_v63, %v2939_v50  ;;  %v2941_v21 = vrot.slane %v2939_v50, 4  ;;  %6453 = vmatmul.mubr.msk.bf16.gmra.mrb[20].mxu1 %vm696_vm3, %v5472_v52  ;;  %v537_v3 = vrot.slane %v536_v53, 4  ;;  %v553_v6 = vshll.u32 %v7653_v41, 16  ;;  %6671 = vmatpush3.bf16.msra.mxu0 %v7083_v15  ;;  %v7702_v50 = vld [vmem:[%s7272_s4 + $0xb4] sm:$0xf] }
  0x76   : > { %v557_v33 = vshrl.u32 %v7653_v41, 16  ;;  %v532_v9 = vsel %vm7299_vm2, %v527_v1, %v531_v39  ;;  %v546_v14 = vrot.slane %v544_v59, 4  ;;  %v563_v16 = vshll.u32 %v225_v46, 16  ;;  %6704 = vmatprep.subr.bf16.mxu0 %v7664_v51 }
  0x77   : > { %v2943_v20 = vsel %vm7532_vm6, %v2941_v21, %v2942_v13  ;;  %v542_v19 = vsel %vm7299_vm2, %v537_v3, %v541_v55  ;;  %v549_v30 = vrot.slane %v547_v4, 5  ;;  %v555_v31 = vrot.slane %v553_v6, 5  ;;  %v7705_v13 = vld [vmem:[%s7272_s4 + $0xb8] sm:$0xf] }
  0x78   : > { %v5805_v28 = vcombine.low %v2940_v54, %v2943_v20  ;;  %v5473_v40 = vcombine.low %v532_v9, %v542_v19  ;;  %v559_v34 = vrot.slane %v557_v33, 4  ;;  %v565_v25 = vrot.slane %v563_v16, 5  ;;  %v227_v16 = vld [vmem:[%s7272_s4 + $0xbc] sm:$0x1]  ;;  %v5768_v19 = vld [vmem:[%s7272_s4 + $0x60] sm:$0xe] }
  0x79   : > { %v5782_v15 = vrot.slane %v5766_v18, 9  ;;  %v550_v37 = vor.u32 %v549_v30, %v546_v14  ;;  %v2946_v38 = vrot.slane %v7446_v2, 5  ;;  %v2949_v39 = vrot.slane %v7449_v7, 5 }
  0x7a   : > { %6640 = vmatprep.mubr.msk.bf16.mxu0 %vm696_vm3, %v5805_v28  ;;  %v568_v43 = vshrl.u32 %v7673_v61, 16  ;;  %6456 = vmatprep.mubr.msk.bf16.mxu1 %vm696_vm3, %v5473_v40  ;;  %v560_v26 = vor.u32 %v559_v34, %v555_v31  ;;  %v571_v44 = vshll.u32 %v7673_v61, 16  ;;  %v577_v63 = vshll.u32 %v7680_v60, 16 }
  0x7b   : > { %v581_v46 = vshrl.u32 %v7680_v60, 16  ;;  %v551_v48 = vrot.slane %v550_v37, 4  ;;  %v2947_v47 = vsel %vm7532_vm6, %v5782_v15, %v2946_v38  ;;  %v2948_v49 = vrot.slane %v2946_v38, 4  ;;  %v5694_v15 = vld [vmem:[%s7272_s4 + $0x70] sm:$0xf] }
  0x7c   : > { %v570_v2 = vrot.slane %v568_v43, 4  ;;  %v561_v7 = vrot.slane %v560_v26, 4  ;;  %v573_v52 = vrot.slane %v571_v44, 5  ;;  %v579_v53 = vrot.slane %v577_v63, 5  ;;  %v5769_v43 = vld [vmem:[%s7272_s4 + $0x6c] sm:$0xe] }
  0x7d   : > { %v583_v55 = vrot.slane %v581_v46, 4  ;;  %v556_v18 = vsel %vm7299_vm2, %v551_v48, %v555_v31  ;;  %v2950_v1 = vsel %vm7532_vm6, %v2948_v49, %v2949_v39  ;;  %v587_v54 = vshll.u32 %v226_v35, 16  ;;  %v5695_v35 = vld [vmem:[%s7272_s4 + $0x74] sm:$0x1] }
  0x7e   : > { %v5783_v21 = vrot.slane %v5767_v36, 9  ;;  %v566_v59 = vsel %vm7299_vm2, %v561_v7, %v565_v25  ;;  %v5806_v3 = vcombine.low %v2947_v47, %v2950_v1  ;;  %v574_v4 = vor.u32 %v573_v52, %v570_v2 }
  0x7f   : > { %v584_v6 = vor.u32 %v583_v55, %v579_v53  ;;  %v5474_v33 = vcombine.low %v556_v18, %v566_v59  ;;  %v589_v9 = vrot.slane %v587_v54, 5  ;;  %v2953_v20 = vrot.slane %v7469_v0, 5  ;;  %v5770_v59 = vld [vmem:[%s7272_s4 + $0x78] sm:$0xe] }
  0x80   : > { %v2956_v14 = vrot.slane %v7474_v11, 5  ;;  %6641 = vmatmul.mubr.msk.bf16.gmra.mrb[8].mxu0 %vm696_vm3, %v5806_v3  ;;  %v575_v28 = vrot.slane %v574_v4, 4  ;;  %v592_v31 = vshrl.u32 %v7702_v50, 16  ;;  %v595_v40 = vshll.u32 %v7702_v50, 16 }
  0x81   : > { %v585_v30 = vrot.slane %v584_v6, 4  ;;  %6457 = vmatmul.mubr.msk.bf16.gmra.mrb[24].mxu1 %vm696_vm3, %v5474_v33  ;;  %v2954_v34 = vsel %vm7532_vm6, %v5783_v21, %v2953_v20  ;;  %v2955_v25 = vrot.slane %v2953_v20, 4  ;;  %v601_v0 = vshll.u32 %v7705_v13, 16  ;;  %v7742_v6 = vld [vmem:[%s7272_s4 + $0x7c] sm:$0xf] }
  0x82   : > { %v605_v11 = vshrl.u32 %v7705_v13, 16  ;;  %v580_v36 = vsel %vm7299_vm2, %v575_v28, %v579_v53  ;;  %v594_v38 = vrot.slane %v592_v31, 4  ;;  %v597_v39 = vrot.slane %v595_v40, 5  ;;  %v7143_v28 = vld [vmem:[%s7272_s4] sm:$0xf] }
  0x83   : > { %v590_v37 = vsel %vm7299_vm2, %v585_v30, %v589_v9  ;;  %v2957_v44 = vsel %vm7532_vm6, %v2955_v25, %v2956_v14  ;;  %v603_v63 = vrot.slane %v601_v0, 5  ;;  %v611_v49 = vshll.u32 %v227_v16, 16  ;;  %v5700_v14 = vld [vmem:[%s7272_s4 + $0x88] sm:$0xf]  ;;  %v7758_v30 = vld [vmem:[%s7272_s4 + $0x4] sm:$0xf] }
  0x84   : > { %v5475_v26 = vcombine.low %v580_v36, %v590_v37  ;;  %v607_v46 = vrot.slane %v605_v11, 4  ;;  %v5807_v48 = vcombine.low %v2954_v34, %v2957_v44  ;;  %v598_v47 = vor.u32 %v597_v39, %v594_v38  ;;  %v5701_v40 = vld [vmem:[%s7272_s4 + $0x8c] sm:$0x1]  ;;  %v5771_v34 = vld [vmem:[%s7272_s4 + $0x84] sm:$0xe] }
  0x85   : > { %v5784_v2 = vrot.slane %v5768_v19, 9  ;;  %v2960_v52 = vrot.slane %v7500_v56, 5  ;;  %v2963_v53 = vrot.slane %v7508_v8, 5  ;;  %v5785_v55 = vrot.slane %v5769_v43, 9  ;;  %v7745_v8 = vld [vmem:[%s7272_s4 + $0x80] sm:$0x1] }
  0x86   : > { %6460 = vmatprep.mubr.msk.bf16.mxu1 %vm696_vm3, %v5475_v26  ;;  %v608_v7 = vor.u32 %v607_v46, %v603_v63  ;;  %6644 = vmatprep.mubr.msk.bf16.mxu0 %vm696_vm3, %v5807_v48  ;;  %v599_v18 = vrot.slane %v598_v47, 4  ;;  %v613_v1 = vrot.slane %v611_v49, 5  ;;  %v2967_v54 = vrot.slane %v5694_v15, 5  ;;  %v5703_v15 = vld [vmem:[%s7272_s4 + $0x94] sm:$0xf] }
  0x87   : > { %v2970_v21 = vrot.slane %v5695_v35, 5  ;;  %v2961_v4 = vsel %vm7532_vm6, %v5784_v2, %v2960_v52  ;;  %v2962_v56 = vrot.slane %v2960_v52, 4  ;;  %v5497_v31 = vcombine.low %v7143_v28, %v7758_v30  ;;  %v5704_v37 = vld [vmem:[%s7272_s4 + $0x98] sm:$0x1]  ;;  %v5772_v38 = vld [vmem:[%s7272_s4 + $0x90] sm:$0xe] }
  0x88   : > { %v609_v3 = vrot.slane %v608_v7, 4  ;;  %v604_v33 = vsel %vm7299_vm2, %v599_v18, %v603_v63  ;;  %v2968_v9 = vsel %vm7532_vm6, %v5785_v55, %v2967_v54  ;;  %v2969_v20 = vrot.slane %v2967_v54, 4  ;;  %v5706_v44 = vld [vmem:[%s7272_s4 + $0xa0] sm:$0xf]  ;;  %v5707_v2 = vld [vmem:[%s7272_s4 + $0xa4] sm:$0x1] }
  0x89   : > { %v2964_v19 = vsel %vm7532_vm6, %v2962_v56, %v2963_v53  ;;  %v5786_v36 = vrot.slane %v5770_v59, 9  ;;  %v2974_v39 = vrot.slane %v7742_v6, 5  ;;  %v2977_v43 = vrot.slane %v7745_v8, 5  ;;  %v7145_v7 = vld [vmem:[%s7272_s4 + $0xc] sm:$0xf] }
  0x8a   : > { %v614_v16 = vsel %vm7299_vm2, %v609_v3, %v613_v1  ;;  %v5808_v0 = vcombine.low %v2961_v4, %v2964_v19  ;;  %v2971_v11 = vsel %vm7532_vm6, %v2969_v20, %v2970_v21  ;;  %v5787_v26 = vrot.slane %v5771_v34, 9  ;;  %v7780_v52 = vld [vmem:[%s7272_s4 + $0x10] sm:$0xf]  ;;  %v5773_v1 = vld [vmem:[%s7272_s4 + $0x9c] sm:$0xe] }
  0x8b   : > { %v5476_v25 = vcombine.low %v604_v33, %v614_v16  ;;  %v5809_v35 = vcombine.low %v2968_v9, %v2971_v11  ;;  %v2981_v63 = vrot.slane %v5700_v14, 5  ;;  %v2984_v46 = vrot.slane %v5701_v40, 5  ;;  %v7147_v21 = vld [vmem:[%s7272_s4 + $0x18] sm:$0xf]  ;;  %v7790_v59 = vld [vmem:[%s7272_s4 + $0x1c] sm:$0xf] }
  0x8c   : > { %6645 = vmatmul.mubr.msk.bf16.gmra.mrb[12].mxu0 %vm696_vm3, %v5808_v0  ;;  %v2975_v48 = vsel %vm7532_vm6, %v5786_v36, %v2974_v39  ;;  %v2976_v47 = vrot.slane %v2974_v39, 4  ;;  %v2988_v49 = vrot.slane %v5703_v15, 5  ;;  %v5498_v53 = vcombine.low %v7145_v7, %v7780_v52  ;;  %v7082_v33 = vld [vmem:[%s9354_s1 + $0x48] sm:$0xff]   ;;  %v5710_v0 = vld [vmem:[%s7272_s4 + $0xb0] sm:$0x1]  ;;  %v7149_v11 = vld [vmem:[%s9354_s1 + $0x40] sm:$0xff]  }
  0x8d   : > { %6461 = vmatmul.mubr.msk.bf16.gmra.mrb[28].mxu1 %vm696_vm3, %v5476_v25  ;;  %6648 = vmatprep.mubr.msk.bf16.mxu0 %vm696_vm3, %v5809_v35  ;;  %v2982_v55 = vsel %vm7532_vm6, %v5787_v26, %v2981_v63  ;;  %v2983_v18 = vrot.slane %v2981_v63, 4  ;;  %v5499_v3 = vcombine.low %v7147_v21, %v7790_v59  ;;  %v5788_v4 = vrot.slane %v5772_v38, 9  ;;  %v5709_v40 = vld [vmem:[%s7272_s4 + $0xac] sm:$0xf]  ;;  %v5712_v25 = vld [vmem:[%s7272_s4 + $0xb8] sm:$0xf] }
  0x8e   : > { %6472 = vmatprep.mubr.msk.bf16.mxu1 %vm696_vm3, %v5497_v31  ;;  %v2978_v54 = vsel %vm7532_vm6, %v2976_v47, %v2977_v43  ;;  %v2991_v56 = vrot.slane %v5704_v37, 5  ;;  %v2990_v14 = vrot.slane %v2988_v49, 4  ;;  %v2995_v16 = vrot.slane %v5706_v44, 5  ;;  %v5774_v36 = vld [vmem:[%s7272_s4 + $0xa8] sm:$0xe]  ;;  %v7088_v26 = vld [vmem:[%s9354_s1 + $0x50] sm:$0xff]  }
  0x8f   : > { %v5810_v9 = vcombine.low %v2975_v48, %v2978_v54  ;;  %v2985_v20 = vsel %vm7532_vm6, %v2983_v18, %v2984_v46  ;;  %v5789_v28 = vrot.slane %v5773_v1, 9  ;;  %v2998_v31 = vrot.slane %v5707_v2, 5  ;;  %v5713_v44 = vld [vmem:[%s7272_s4 + $0xbc] sm:$0x1]  ;;  %v5775_v63 = vld [vmem:[%s7272_s4 + $0xb4] sm:$0xe] }
  0x90   : > { %v5811_v19 = vcombine.low %v2982_v55, %v2985_v20  ;;  %v2997_v34 = vrot.slane %v2995_v16, 4  ;;  %v2989_v15 = vsel %vm7532_vm6, %v5788_v4, %v2988_v49  ;;  %v2992_v35 = vsel %vm7532_vm6, %v2990_v14, %v2991_v56  ;;  %v7150_v46 = vld [vmem:[%s7272_s4 + $0x24] sm:$0xf]  ;;  %v7824_v48 = vld [vmem:[%s7272_s4 + $0x28] sm:$0xf] }
  0x91   : > { %v3002_v37 = vrot.slane %v5709_v40, 5  ;;  %v2996_v38 = vsel %vm7532_vm6, %v5789_v28, %v2995_v16  ;;  %v3009_v43 = vrot.slane %v5712_v25, 5  ;;  %v5500_v47 = vcombine.low %v7150_v46, %v7824_v48  ;;  %v7152_v2 = vld [vmem:[%s7272_s4 + $0x30] sm:$0xf]  ;;  %v7829_v7 = vld [vmem:[%s7272_s4 + $0x34] sm:$0xf] }
  0x92   : > { %v2999_v39 = vsel %vm7532_vm6, %v2997_v34, %v2998_v31  ;;  %v5812_v49 = vcombine.low %v2989_v15, %v2992_v35  ;;  %v5790_v18 = vrot.slane %v5774_v36, 9  ;;  %v3005_v54 = vrot.slane %v5710_v0, 5  ;;  %v5715_v56 = vld [vmem:[%s7272_s4 + $0xc4] sm:$0xf]  ;;  %v5776_v14 = vld [vmem:[%s7272_s4 + $0xc0] sm:$0xe] }
  0x93   : > { %v5813_v55 = vcombine.low %v2996_v38, %v2999_v39  ;;  %v3004_v1 = vrot.slane %v3002_v37, 4  ;;  %v5791_v21 = vrot.slane %v5775_v63, 9  ;;  %v3012_v4 = vrot.slane %v5713_v44, 5  ;;  %v5716_v31 = vld [vmem:[%s7272_s4 + $0xc8] sm:$0x1]  ;;  %v7853_v40 = vld [vmem:[%s9354_s1 + $0x60] sm:$0xff]  }
  0x94   : > { %6649 = vmatmul.mubr.msk.bf16.gmra.mrb[16].mxu0 %vm696_vm3, %v5810_v9  ;;  %v7098_v9 = vld [vmem:[%s9354_s1 + $0x58] sm:$0xff]   ;;  %v3016_v16 = vrot.slane %v5715_v56, 5  ;;  %v7857_v25 = vld [vmem:[%s7272_s4 + $0x40] sm:$0xf]  ;;  %v5792_v15 = vrot.slane %v5776_v14, 9  ;;  %v2365_v63 = vshll.u32 %v7742_v6, 16 }
  0x95   : > { %6473 = vmatmul.mubr.msk.bf16.vlgmr.msra.gmra.mrb[0].mxu1 %vm696_vm3, %v5498_v53  ;;  %6652 = vmatprep.mubr.msk.bf16.mxu0 %vm696_vm3, %v5811_v19  ;;  %v5501_v53 = vcombine.low %v7152_v2, %v7829_v7  ;;  %v3006_v20 = vsel %vm7532_vm6, %v3004_v1, %v3005_v54  ;;  %v3010_v19 = vsel %vm7532_vm6, %v5791_v21, %v3009_v43  ;;  %v7154_v34 = vld [vmem:[%s7272_s4 + $0x3c] sm:$0xf]  ;;  %v7156_v35 = vld [vmem:[%s7272_s4 + $0x48] sm:$0xf]  ;;  %v7862_v36 = vld [vmem:[%s7272_s4 + $0x4c] sm:$0xf] }
  0x96   : > { %6505 = vmatpush3.bf16.msra.mxu1 %v7149_v11  ;;  %6476 = vmatprep.mubr.msk.bf16.mxu1 %vm696_vm3, %v5499_v3  ;;  %v3011_v3 = vrot.slane %v3009_v43, 4  ;;  %v5502_v0 = vcombine.low %v7154_v34, %v7857_v25  ;;  %v3018_v39 = vrot.slane %v3016_v16, 4  ;;  %v3019_v43 = vrot.slane %v5716_v31, 5  ;;  %v1222_v56 = vld [vmem:[%s7272_s4 + $0x24] sm:$0xe] }
  0x97   : > { %6506 = vmatprep.subr.bf16.mxu1 %v7082_v33  ;;  %v2369_v46 = vshrl.u32 %v7742_v6, 16  ;;  %v5505_v2 = vcombine.low %v7512_v12, %v7515_v24  ;;  %v7882_v1 = vrot.slane %v2365_v63, 5  ;;  %v1279_v21 = vrot.slane %v7780_v52, 5  ;;  %v1220_v12 = vld [vmem:[%s7272_s4 + $0xc] sm:$0xe] }
  0x98   : > { %v3013_v28 = vsel %vm7532_vm6, %v3011_v3, %v3012_v4  ;;  %v3020_v44 = vsel %vm7532_vm6, %v3018_v39, %v3019_v43  ;;  %v7159_v24 = vld [vmem:[%s7272_s4 + $0x14] sm:$0x1]  ;;  %v1221_v3 = vld [vmem:[%s7272_s4 + $0x18] sm:$0xe]  ;;  %v1286_v52 = vrot.slane %v7790_v59, 5  ;;  %v2375_v4 = vshll.u32 %v7745_v8, 16 }
  0x99   : > { %v5815_v38 = vcombine.low %v3010_v19, %v3013_v28  ;;  %9372 = vst [vmem:[#allocation2_spill] sm:$0xff] %v7882_v1  ;;  %v7884_v54 = vrot.slane %v2369_v46, 4  ;;  %v1282_v6 = vrot.slane %v7159_v24, 5  ;;  %v5507_v19 = vcombine.low %v7566_v45, %v7577_v42  ;;  %v7094_v59 = vld [vmem:[%s7272_s4 + $0x30] sm:$0xff]   ;;  %v7100_v8 = vld [vmem:[%s9354_s1 + $0xe8] sm:$0xff]  }
  0x9a   : > { %6507 = vmatpush3.bf16.msra.mxu1 %v7082_v33  ;;  %v3003_v33 = vsel %vm7532_vm6, %v5790_v18, %v3002_v37  ;;  %v5503_v37 = vcombine.low %v7156_v35, %v7862_v36  ;;  %v5535_v31 = vrot.slane %v1221_v3, 9  ;;  %v1223_v34 = vld [vmem:[%s7272_s4 + $0x30] sm:$0xe]  ;;  %v5508_v35 = vcombine.low %v7591_v5, %v7595_v10  ;;  %v5913_v24 = vld [vmem:[%s7272_s4 + $0x18] sm:$0xf] }
  0x9b   : > { %6508 = vmatprep.subr.bf16.mxu1 %v7088_v26  ;;  %v5814_v11 = vcombine.low %v3003_v33, %v3006_v20  ;;  %v5506_v33 = vcombine.low %v7537_v58, %v7549_v17  ;;  %v7092_v20 = vld [vmem:[%s7272_s4 + $0x24] sm:$0xff]   ;;  %v5536_v58 = vrot.slane %v1222_v56, 9  ;;  %v1300_v17 = vrot.slane %v7829_v7, 5 }
  0x9c   : > { %6653 = vmatmul.mubr.msk.bf16.gmra.mrb[20].mxu0 %vm696_vm3, %v5812_v49  ;;  %v5509_v45 = vcombine.low %v7625_v27, %v7628_v32  ;;  %v5510_v39 = vcombine.low %v7650_v62, %v7653_v41  ;;  %v7167_v10 = vld [vmem:[%s7272_s4 + $0x64] sm:$0xf] }
  0x9d   : > { %6477 = vmatmul.mubr.msk.bf16.gmra.mrb[4].mxu1 %vm696_vm3, %v5500_v47  ;;  %6656 = vmatprep.mubr.msk.bf16.mxu0 %vm696_vm3, %v5813_v55  ;;  %v5504_v47 = vcombine.low %v7482_v22, %v7485_v23  ;;  %v7158_v55 = vld [vmem:[%s7272_s4 + $0x8] sm:$0x1]  ;;  %v1219_v22 = vld [vmem:[%s7272_s4] sm:$0xe]  ;;  %v1272_v23 = vrot.slane %v7758_v30, 5 }
  0x9e   : > { %6480 = vmatprep.mubr.msk.bf16.mxu1 %vm696_vm3, %v5501_v53  ;;  %6509 = vmatpush3.bf16.msra.mxu1 %v7088_v26  ;;  %v3017_v26 = vsel %vm7532_vm6, %v5792_v15, %v3016_v16  ;;  %v7089_v53 = vld [vmem:[%s7272_s4 + $0x18] sm:$0xff]   ;;  %v1275_v18 = vrot.slane %v7158_v55, 5  ;;  %v5533_v14 = vrot.slane %v1219_v22, 9  ;;  %v5534_v16 = vrot.slane %v1220_v12, 9  ;;  %v1225_v22 = vld [vmem:[%s7272_s4 + $0x48] sm:$0xe] }
  0x9f   : > { %6510 = vmatprep.subr.bf16.mxu1 %v7098_v9  ;;  %v5816_v49 = vcombine.low %v3017_v26, %v3020_v44  ;;  %v1274_v28 = vrot.slane %v1272_v23, 4  ;;  %v1307_v26 = vrot.slane %v7857_v25, 5  ;;  %v7930_v44 = vrot.slane %v2375_v4, 5  ;;  %v1224_v25 = vld [vmem:[%s7272_s4 + $0x3c] sm:$0xe] }
  0xa0   : > { %v7923_v43 = vsel %vm7532_vm6, %v5533_v14, %v1272_v23  ;;  %v7927_v7 = vsel %vm7532_vm6, %v5534_v16, %v1279_v21  ;;  %v1302_v55 = vrot.slane %v1300_v17, 4  ;;  %v5538_v3 = vrot.slane %v1224_v25, 9  ;;  %v7163_v4 = vld [vmem:[%s7272_s4 + $0x44] sm:$0x1]  ;;  %v7099_v14 = vld [vmem:[%s7272_s4 + $0x48] sm:$0xff]  }
  0xa1   : > { %9373 = vst [vmem:[#allocation3_spill] sm:$0xff] %v7930_v44  ;;  %v7936_v63 = vsel %vm7532_vm6, %v1274_v28, %v1275_v18  ;;  %v7162_v18 = vld [vmem:[%s7272_s4 + $0x38] sm:$0x1]  ;;  %v1310_v56 = vrot.slane %v7163_v4, 5  ;;  %v7984_v28 = vld [vmem:[%s7272_s4 + $0x54] sm:$0xe] }
  0xa2   : > { %6511 = vmatpush3.bf16.msra.mxu1 %v7098_v9  ;;  %v1293_v9 = vrot.slane %v7824_v48, 5  ;;  %v1281_v48 = vrot.slane %v1279_v21, 4  ;;  %v1303_v21 = vrot.slane %v7162_v18, 5  ;;  %v7164_v25 = vld [vmem:[%s7272_s4 + $0x50] sm:$0x1] }
  0xa3   : > { %6544 = vmatprep.subr.bf16.mxu1 %v7853_v40  ;;  %v5916_v18 = vld [vmem:[%s7272_s4 + $0x24] sm:$0xf] }
  0xa4   : > { %6657 = vmatmul.mubr.msk.bf16.gmra.mrb[24].mxu0 %vm696_vm3, %v5814_v11  ;;  %v7160_v11 = vld [vmem:[%s7272_s4 + $0x20] sm:$0x1]  ;;  %v1295_v42 = vrot.slane %v1293_v9, 4  ;;  %v7940_v46 = vsel %vm7532_vm6, %v1281_v48, %v1282_v6  ;;  %v7963_v23 = vsel %vm7532_vm6, %v5536_v58, %v1293_v9  ;;  %v5914_v6 = vld [vmem:[%s7272_s4 + $0x1c] sm:$0xf]  ;;  %v7992_v48 = vsel %vm7532_vm6, %v1302_v55, %v1303_v21 }
  0xa5   : > { %6481 = vmatmul.mubr.msk.bf16.gmra.mrb[8].mxu1 %vm696_vm3, %v5502_v0  ;;  %6660 = vmatprep.mubr.msk.bf16.mxu0 %vm696_vm3, %v5815_v38  ;;  %v1288_v0 = vrot.slane %v1286_v52, 4  ;;  %v1289_v15 = vrot.slane %v7160_v11, 5  ;;  %v3788_v58 = vshll.u32 %v5914_v6, 16  ;;  %v5915_v55 = vld [vmem:[%s7272_s4 + $0x20] sm:$0x1]  ;;  %v5540_v21 = vrot.slane %v7984_v28, 9 }
  0xa6   : > { %6484 = vmatprep.mubr.msk.bf16.mxu1 %vm696_vm3, %v5503_v37  ;;  %v7161_v37 = vld [vmem:[%s7272_s4 + $0x2c] sm:$0x1]  ;;  %v7102_v28 = vld [vmem:[%s7272_s4 + $0x54] sm:$0xff]  }
  0xa7   : > { %v1296_v38 = vrot.slane %v7161_v37, 5  ;;  %v8039_v32 = vrot.slane %v3788_v58, 5  ;;  %v5920_v58 = vld [vmem:[%s7272_s4 + $0x34] sm:$0xf] }
  0xa8   : > { %v3836_v9 = vshll.u32 %v5920_v58, 16 }
  0xa9   : > { %v7967_v12 = vsel %vm7532_vm6, %v1295_v42, %v1296_v38  ;;  %v8004_v42 = vsel %vm7532_vm6, %v5538_v3, %v1307_v26 }
  0xac   : > { %6661 = vmatmul.mubr.msk.bf16.gmra.mrb[28].mxu0 %vm696_vm3, %v5816_v49  ;;  %v7109_v49 = vld [vmem:[%s9354_s1 + $0xf0] sm:$0xff]  }
  0xad   : > { %6485 = vmatmul.mubr.msk.bf16.gmra.mrb[12].mxu1 %vm696_vm3, %v5504_v47  ;;  %6672 = vmatprep.mubr.msk.bf16.mxu0 %vm696_vm3, %v7089_v53  ;;  %v7944_v47 = vsel %vm7532_vm6, %v5535_v31, %v1286_v52  ;;  %v5537_v53 = vrot.slane %v1223_v34, 9  ;;  %v1309_v52 = vrot.slane %v1307_v26, 4  ;;  %v7995_v31 = vld [vmem:[%s7272_s4 + $0x60] sm:$0xe]  ;;  %v3779_v34 = vshrl.u32 %v5913_v24, 16 }
  0xae   : > { %6488 = vmatprep.mubr.msk.bf16.mxu1 %vm696_vm3, %v5505_v2  ;;  %v7954_v2 = vsel %vm7532_vm6, %v1288_v0, %v1289_v15  ;;  %v3782_v0 = vshll.u32 %v5913_v24, 16  ;;  %v5539_v15 = vrot.slane %v1225_v22, 9  ;;  %v7165_v22 = vld [vmem:[%s7272_s4 + $0x58] sm:$0xf]  ;;  %v5541_v5 = vrot.slane %v7995_v31, 9  ;;  %v7104_v31 = vld [vmem:[%s7272_s4 + $0x60] sm:$0xff]  }
  0xaf   : > { %v8008_v37 = vsel %vm7532_vm6, %v1309_v52, %v1310_v56  ;;  %v1321_v24 = vrot.slane %v7165_v22, 5  ;;  %v5917_v52 = vld [vmem:[%s7272_s4 + $0x28] sm:$0xf]  ;;  %v3781_v4 = vrot.slane %v3779_v34, 4  ;;  %v7168_v22 = vld [vmem:[%s7272_s4 + $0x70] sm:$0xf] }
  0xb0   : > { %v3784_v56 = vrot.slane %v3782_v0, 5  ;;  %v8052_v0 = vld [vmem:[%s9354_s1 + $0x100] sm:$0xff]   ;;  %v7169_v26 = vld [vmem:[%s7272_s4 + $0x68] sm:$0x1] }
  0xb1   : > { %v1331_v11 = vrot.slane %v7169_v26, 5  ;;  %v7170_v26 = vld [vmem:[%s7272_s4 + $0x74] sm:$0x1]  ;;  %v8079_v62 = vsel %vm7532_vm6, %v5540_v21, %v1321_v24 }
  0xb4   : > { %6673 = vmatmul.mubr.msk.bf16.vlgmr.msra.gmra.mrb[0].mxu0 %vm696_vm3, %v7092_v20  ;;  %v7096_v20 = vld [vmem:[%s7272_s4 + $0x3c] sm:$0xff]  }
  0xb5   : > { %6489 = vmatmul.mubr.msk.bf16.gmra.mrb[16].mxu1 %vm696_vm3, %v5506_v33  ;;  %6705 = vmatpush3.bf16.msra.mxu0 %v7664_v51  ;;  %v1314_v33 = vrot.slane %v7862_v36, 5  ;;  %v7988_v36 = vsel %vm7532_vm6, %v5537_v53, %v1300_v17  ;;  %v3792_v17 = vshrl.u32 %v5914_v6, 16  ;;  %v1317_v53 = vrot.slane %v7164_v25, 5  ;;  %v7166_v6 = vld [vmem:[%s7272_s4 + $0x5c] sm:$0x1] }
  0xb6   : > { %6492 = vmatprep.mubr.msk.bf16.mxu1 %vm696_vm3, %v5507_v19  ;;  %6676 = vmatprep.mubr.msk.bf16.mxu0 %vm696_vm3, %v7094_v59  ;;  %v1324_v3 = vrot.slane %v7166_v6, 5  ;;  %v1335_v6 = vrot.slane %v7168_v22, 5  ;;  %v3816_v25 = vshrl.u32 %v5917_v52, 16  ;;  %v5918_v19 = vld [vmem:[%s7272_s4 + $0x2c] sm:$0x1] }
  0xb7   : > { %6706 = vmatprep.subr.bf16.mxu0 %v7100_v8  ;;  %v1316_v38 = vrot.slane %v1314_v33, 4  ;;  %v8037_v27 = vsel %vm7532_vm6, %v5539_v15, %v1314_v33  ;;  %v3803_v33 = vshrl.u32 %v5916_v18, 16  ;;  %v3806_v15 = vshll.u32 %v5916_v18, 16 }
  0xb8   : > { %v3840_v18 = vshrl.u32 %v5920_v58, 16  ;;  %v1229_v58 = vld [vmem:[%s7272_s4 + $0x78] sm:$0xe] }
  0xb9   : > { %6707 = vmatpush3.bf16.msra.mxu0 %v7100_v8  ;;  %v7115_v8 = vld [vmem:[%s9354_s1 + $0xf8] sm:$0xff]   ;;  %v8047_v34 = vsel %vm7532_vm6, %v1316_v38, %v1317_v53  ;;  %v3805_v22 = vrot.slane %v3803_v33, 4  ;;  %v3808_v51 = vrot.slane %v3806_v15, 5  ;;  %v3822_v33 = vshll.u32 %v5918_v19, 16 }
  0xba   : > { %6708 = vmatprep.subr.bf16.mxu0 %v7109_v49  ;;  %v7108_v15 = vld [vmem:[%s7272_s4 + $0x78] sm:$0xff]  }
  0xbc   : > { %6677 = vmatmul.mubr.msk.bf16.gmra.mrb[4].mxu0 %vm696_vm3, %v7096_v20  ;;  %v5919_v20 = vld [vmem:[%s7272_s4 + $0x30] sm:$0xf] }
  0xbd   : > { %6493 = vmatmul.mubr.msk.bf16.gmra.mrb[20].mxu1 %vm696_vm3, %v5508_v35  ;;  %6680 = vmatprep.mubr.msk.bf16.mxu0 %vm696_vm3, %v7099_v14  ;;  %v1328_v35 = vrot.slane %v7167_v10, 5  ;;  %v8042_v14 = vld [vmem:[%s7272_s4 + $0x6c] sm:$0xe]  ;;  %v3812_v10 = vshll.u32 %v5917_v52, 16  ;;  %v3827_v38 = vshrl.u32 %v5919_v20, 16  ;;  %v3830_v53 = vshll.u32 %v5919_v20, 16 }
  0xbe   : > { %6496 = vmatprep.mubr.msk.bf16.mxu1 %vm696_vm3, %v5509_v45  ;;  %6709 = vmatpush3.bf16.msra.mxu0 %v7109_v49  ;;  %v3794_v45 = vrot.slane %v3792_v17, 4  ;;  %v3798_v49 = vshll.u32 %v5915_v55, 16  ;;  %v1323_v17 = vrot.slane %v1321_v24, 4  ;;  %v3785_v55 = vor.u32 %v3784_v56, %v3781_v4 }
  0xbf   : > { %6710 = vmatprep.subr.bf16.mxu0 %v7115_v8  ;;  %v1330_v30 = vrot.slane %v1328_v35, 4  ;;  %v5542_v52 = vrot.slane %v8042_v14, 9  ;;  %v1338_v4 = vrot.slane %v7170_v26, 5  ;;  %v8069_v56 = vrot.slane %v3812_v10, 5 }
  0xc0   : > { %v3795_v59 = vor.u32 %v3794_v45, %v8039_v32  ;;  %v8059_v16 = vrot.slane %v3798_v49, 5  ;;  %v3818_v20 = vrot.slane %v3816_v25, 4  ;;  %v5921_v45 = vld [vmem:[%s7272_s4 + $0x38] sm:$0x1]  ;;  %v9374_v14 = vcombine.low %v7673_v61, %v7680_v60 }
  0xc1   : > { %v8083_v41 = vsel %vm7532_vm6, %v1323_v17, %v1324_v3  ;;  %v3786_v25 = vrot.slane %v3785_v55, 4  ;;  %v8085_v61 = vrot.slane %v3836_v9, 5  ;;  %v3842_v60 = vrot.slane %v3840_v18, 4  ;;  %v7106_v3 = vld [vmem:[%s7272_s4 + $0x6c] sm:$0xff]   ;;  %v7171_v17 = vld [vmem:[%s7272_s4 + $0x7c] sm:$0xf] }
  0xc2   : > { %6711 = vmatpush3.bf16.msra.mxu0 %v7115_v8  ;;  %v1337_v8 = vrot.slane %v1335_v6, 4  ;;  %v3796_v49 = vrot.slane %v3795_v59, 4  ;;  %v8091_v21 = vsel %vm7532_vm6, %v5541_v5, %v1328_v35  ;;  %v3809_v24 = vor.u32 %v3808_v51, %v3805_v22  ;;  %v7172_v22 = vld [vmem:[%s7272_s4 + $0x88] sm:$0xf] }
  0xc3   : > { %6744 = vmatprep.subr.bf16.mxu0 %v8052_v0  ;;  %v3819_v9 = vor.u32 %v3818_v20, %v8069_v56  ;;  %v1342_v10 = vrot.slane %v7171_v17, 5  ;;  %v8102_v5 = vsel %vm7532_vm6, %v1330_v30, %v1331_v11  ;;  %v8106_v51 = vsel %vm7532_vm6, %v5542_v52, %v1335_v6  ;;  %v1230_v11 = vld [vmem:[%s7272_s4 + $0x84] sm:$0xe]  ;;  %v5923_v52 = vld [vmem:[%s7272_s4 + $0x40] sm:$0xf] }
  0xc4   : > { %6681 = vmatmul.mubr.msk.bf16.gmra.mrb[8].mxu0 %vm696_vm3, %v7102_v28  ;;  %v3832_v28 = vrot.slane %v3830_v53, 5  ;;  %v8110_v19 = vsel %vm7532_vm6, %v1337_v8, %v1338_v4  ;;  %v5922_v53 = vld [vmem:[%s7272_s4 + $0x3c] sm:$0xf]  ;;  %v3791_v55 = vsel %vm7299_vm2, %v3786_v25, %v8039_v32  ;;  %v3801_v18 = vsel %vm7299_vm2, %v3796_v49, %v8059_v16  ;;  %v7173_v20 = vld [vmem:[%s7272_s4 + $0x80] sm:$0x1] }
  0xc5   : > { %6497 = vmatmul.mubr.msk.bf16.gmra.mrb[24].mxu1 %vm696_vm3, %v5510_v39  ;;  %6684 = vmatprep.mubr.msk.bf16.mxu0 %vm696_vm3, %v7104_v31  ;;  %v3829_v39 = vrot.slane %v3827_v38, 4  ;;  %v3846_v38 = vshll.u32 %v5921_v45, 16  ;;  %v3843_v30 = vor.u32 %v3842_v60, %v8085_v61  ;;  %v1349_v6 = vrot.slane %v7172_v22, 5  ;;  %v7111_v22 = vld [vmem:[%s7272_s4 + $0x90] sm:$0xff]  }
  0xc6   : > { %6500 = vmatprep.mubr.msk.bf16.mxu1 %vm696_vm3, %v9374_v14  ;;  %v3810_v26 = vrot.slane %v3809_v24, 4  ;;  %v3824_v8 = vrot.slane %v3822_v33, 5  ;;  %v5543_v4 = vrot.slane %v1229_v58, 9  ;;  %v1345_v45 = vrot.slane %v7173_v20, 5  ;;  %v7110_v33 = vld [vmem:[%s7272_s4 + $0x84] sm:$0xff]  }
  0xc7   : > { %v3833_v35 = vor.u32 %v3832_v28, %v3829_v39  ;;  %v9375_v32 = vcombine.low %v7702_v50, %v7705_v13  ;;  %v3820_v16 = vrot.slane %v3819_v9, 4  ;;  %v1344_v14 = vrot.slane %v1342_v10, 4  ;;  %v5924_v13 = vld [vmem:[%s7272_s4 + $0x44] sm:$0x1]  ;;  %v7174_v58 = vld [vmem:[%s7272_s4 + $0x8c] sm:$0x1] }
  0xc8   : > { %v3848_v39 = vrot.slane %v3846_v38, 5  ;;  %v3851_v28 = vshrl.u32 %v5922_v53, 16  ;;  %v9376_v25 = vcombine.low %v7923_v43, %v7936_v63  ;;  %v5544_v50 = vrot.slane %v1230_v11, 9  ;;  %v5925_v43 = vld [vmem:[%s7272_s4 + $0x48] sm:$0xf] }
  0xc9   : > { %v3834_v49 = vrot.slane %v3833_v35, 4  ;;  %v3854_v60 = vshll.u32 %v5922_v53, 16  ;;  %v3860_v24 = vshll.u32 %v5923_v52, 16  ;;  %v1351_v9 = vrot.slane %v1349_v6, 4  ;;  %v8149_v11 = vld [vmem:[%s7272_s4 + $0x4c] sm:$0xf] }
  0xca   : > { %v1352_v17 = vrot.slane %v7174_v58, 5  ;;  %v3864_v38 = vshrl.u32 %v5923_v52, 16  ;;  %v8146_v53 = vsel %vm7532_vm6, %v5543_v4, %v1342_v10  ;;  %v7113_v52 = vld [vmem:[%s9354_s1 + $0x68] sm:$0xff]   ;;  %v8163_v10 = vsel %vm7532_vm6, %v1344_v14, %v1345_v45  ;;  %v8166_v20 = vld [vmem:[%s7272_s4 + $0x58] sm:$0xf] }
  0xcb   : > { %v3853_v4 = vrot.slane %v3851_v28, 4  ;;  %v3870_v14 = vshll.u32 %v5924_v13, 16  ;;  %v1231_v28 = vld [vmem:[%s7272_s4 + $0x90] sm:$0xe]  ;;  %v3875_v58 = vshrl.u32 %v5925_v43, 16  ;;  %v3878_v35 = vshll.u32 %v5925_v43, 16 }
  0xcc   : > { %6685 = vmatmul.mubr.msk.bf16.gmra.mrb[12].mxu0 %vm696_vm3, %v7106_v3  ;;  %v3844_v3 = vrot.slane %v3843_v30, 4  ;;  %v5928_v30 = vld [vmem:[%s7272_s4 + $0x54] sm:$0xf]  ;;  %v8181_v45 = vsel %vm7532_vm6, %v1351_v9, %v1352_v17  ;;  %v5545_v9 = vrot.slane %v1231_v28, 9  ;;  %v5931_v17 = vld [vmem:[%s7272_s4 + $0x60] sm:$0xf] }
  0xcd   : > { %6501 = vmatmul.mubr.msk.bf16.gmra.mrb[28].mxu1 %vm696_vm3, %v9375_v32  ;;  %6688 = vmatprep.mubr.msk.bf16.mxu0 %vm696_vm3, %v7108_v15  ;;  %v8140_v15 = vcombine.low %v3791_v55, %v3801_v18  ;;  %v3815_v55 = vsel %vm7299_vm2, %v3810_v26, %v8069_v56  ;;  %v3825_v18 = vsel %vm7299_vm2, %v3820_v16, %v3824_v8  ;;  %v3856_v56 = vrot.slane %v3854_v60, 5  ;;  %v7176_v63 = vld [vmem:[%s7272_s4 + $0x98] sm:$0x1] }
  0xce   : > { %6512 = vmatprep.mubr.msk.bf16.mxu1 %vm696_vm3, %v9376_v25  ;;  %v3839_v32 = vsel %vm7299_vm2, %v3834_v49, %v8085_v61  ;;  %v8173_v25 = vsel %vm7532_vm6, %v5544_v50, %v1349_v6  ;;  %v8175_v26 = vrot.slane %v3860_v24, 5  ;;  %v3849_v8 = vsel %vm7299_vm2, %v3844_v3, %v3848_v39  ;;  %v8192_v39 = vld [vmem:[%s7272_s4 + $0x50] sm:$0x1] }
  0xcf   : > { %v3866_v16 = vrot.slane %v3864_v38, 4  ;;  %v3884_v61 = vshll.u32 %v8149_v11, 16  ;;  %v3888_v6 = vshrl.u32 %v8149_v11, 16  ;;  %v9377_v49 = vcombine.low %v7927_v7, %v7940_v46  ;;  %v8207_v38 = vld [vmem:[%s7272_s4 + $0x64] sm:$0xf] }
  0xd0   : > { %v3899_v50 = vshrl.u32 %v5928_v30, 16  ;;  %v3902_v13 = vshll.u32 %v5928_v30, 16  ;;  %v3908_v60 = vshll.u32 %v8166_v20, 16  ;;  %v3912_v24 = vshrl.u32 %v8166_v20, 16  ;;  %9379 = vst [vmem:[#allocation4_spill] sm:$0xff] %v8207_v38 }
  0xd1   : > { %v9378_v3 = vcombine.low %v7944_v47, %v7954_v2  ;;  %v8201_v7 = vcombine.low %v3815_v55, %v3825_v18  ;;  %v7119_v47 = vld [vmem:[%s9354_s1 + $0x70] sm:$0xff]   ;;  %v8214_v2 = vcombine.low %v3839_v32, %v3849_v8  ;;  %v3867_v30 = vor.u32 %v3866_v16, %v8175_v26  ;;  %v7114_v18 = vld [vmem:[%s7272_s4 + $0xa8] sm:$0xff]  }
  0xd2   : > { %v8219_v55 = vrot.slane %v3870_v14, 5  ;;  %v3890_v28 = vrot.slane %v3888_v6, 4  ;;  %v3901_v32 = vrot.slane %v3899_v50, 4  ;;  %v3904_v8 = vrot.slane %v3902_v13, 5  ;;  %v7175_v16 = vld [vmem:[%s7272_s4 + $0x94] sm:$0xf] }
  0xd3   : > { %v3914_v46 = vrot.slane %v3912_v24, 4  ;;  %v1356_v14 = vrot.slane %v7175_v16, 5  ;;  %v3923_v6 = vshrl.u32 %v5931_v17, 16  ;;  %v3926_v59 = vshll.u32 %v5931_v17, 16 }
  0xd4   : > { %6689 = vmatmul.mubr.msk.bf16.gmra.mrb[16].mxu0 %vm696_vm3, %v7110_v33  ;;  %v3857_v33 = vor.u32 %v3856_v56, %v3853_v4  ;;  %v3877_v4 = vrot.slane %v3875_v58, 4  ;;  %v8222_v56 = vrot.slane %v3884_v61, 5  ;;  %v1359_v58 = vrot.slane %v7176_v63, 5  ;;  %v8235_v61 = vld [vmem:[%s7272_s4 + $0x5c] sm:$0x1] }
  0xd5   : > { %6513 = vmatmul.mubr.msk.bf16.vlgmr.msra.gmra.mrb[0].mxu1 %vm696_vm3, %v9377_v49  ;;  %6692 = vmatprep.mubr.msk.bf16.mxu0 %vm696_vm3, %v7111_v22  ;;  %v3880_v22 = vrot.slane %v3878_v35, 5  ;;  %v8225_v49 = vld [vmem:[%s7272_s4 + $0x9c] sm:$0xe]  ;;  %v3894_v35 = vshll.u32 %v8192_v39, 16  ;;  %9380 = vst [vmem:[#allocation5_spill] sm:$0xff] %v8235_v61  ;;  %v3932_v50 = vshll.u32 %v8207_v38, 16  ;;  %v9381_v17 = vcombine.low %v7963_v23, %v7967_v12 }
  0xd6   : > { %6545 = vmatpush3.bf16.msra.mxu1 %v7853_v40  ;;  %6516 = vmatprep.mubr.msk.bf16.mxu1 %vm696_vm3, %v9378_v3  ;;  %v7112_v40 = vld [vmem:[%s7272_s4 + $0x9c] sm:$0xff]   ;;  %v8227_v3 = vrot.slane %v3908_v60, 5  ;;  %v8229_v43 = vrot.slane %v3857_v33, 4  ;;  %v3936_v13 = vshrl.u32 %v8207_v38, 16  ;;  %v8239_v60 = vrot.slane %v3867_v30, 4 }
  0xd7   : > { %6546 = vmatprep.subr.bf16.mxu1 %v7113_v52  ;;  %v3881_v24 = vor.u32 %v3880_v22, %v3877_v4  ;;  %v3891_v63 = vor.u32 %v3890_v28, %v8222_v56  ;;  %v7177_v33 = vld [vmem:[%s7272_s4 + $0xa0] sm:$0xf]  ;;  %v8253_v30 = vsel %vm7532_vm6, %v5545_v9, %v1356_v14  ;;  %v3905_v31 = vor.u32 %v3904_v8, %v3901_v32  ;;  %v1233_v9 = vld [vmem:[%s7272_s4 + $0xa8] sm:$0xe]  ;;  %v7178_v28 = vld [vmem:[%s7272_s4 + $0xac] sm:$0xf] }
  0xd8   : > { %v1363_v16 = vrot.slane %v7177_v33, 5  ;;  %v3915_v44 = vor.u32 %v3914_v46, %v8227_v3  ;;  %v3918_v4 = vshll.u32 %v8235_v61, 16  ;;  %v9382_v22 = vcombine.low %v7988_v36, %v7992_v48  ;;  %v1234_v61 = vld [vmem:[%s7272_s4 + $0xb4] sm:$0xe] }
  0xd9   : > { %v1358_v23 = vrot.slane %v1356_v14, 4  ;;  %v3896_v12 = vrot.slane %v3894_v35, 5  ;;  %v1370_v32 = vrot.slane %v7178_v28, 5  ;;  %v3925_v46 = vrot.slane %v3923_v6, 4  ;;  %v7179_v35 = vld [vmem:[%s7272_s4 + $0xa4] sm:$0x1] }
  0xda   : > { %6547 = vmatpush3.bf16.msra.mxu1 %v7113_v52  ;;  %v7121_v52 = vld [vmem:[%s9354_s1 + $0x78] sm:$0xff]   ;;  %v3928_v8 = vrot.slane %v3926_v59, 5  ;;  %v8265_v33 = vrot.slane %v3932_v50, 5  ;;  %v3938_v36 = vrot.slane %v3936_v13, 4  ;;  %v3882_v48 = vrot.slane %v3881_v24, 4  ;;  %v7117_v59 = vld [vmem:[%s7272_s4 + $0xc0] sm:$0xff]  }
  0xdb   : > { %6548 = vmatprep.subr.bf16.mxu1 %v7119_v47  ;;  %v1365_v14 = vrot.slane %v1363_v16, 4  ;;  %v3906_v38 = vrot.slane %v3905_v31, 4  ;;  %v3920_v6 = vrot.slane %v3918_v4, 5  ;;  %v5547_v28 = vrot.slane %v1233_v9, 9 }
  0xdc   : > { %6693 = vmatmul.mubr.msk.bf16.gmra.mrb[20].mxu0 %vm696_vm3, %v7112_v40  ;;  %v5546_v40 = vrot.slane %v8225_v49, 9  ;;  %v7116_v49 = vld [vmem:[%s7272_s4 + $0xb4] sm:$0xff]   ;;  %v3863_v50 = vsel %vm7299_vm2, %v8229_v43, %v8175_v26  ;;  %v3873_v13 = vsel %vm7299_vm2, %v8239_v60, %v8219_v55  ;;  %v1372_v24 = vrot.slane %v1370_v32, 4  ;;  %v5934_v26 = vld [vmem:[%s7272_s4 + $0x6c] sm:$0xf] }
  0xdd   : > { %6517 = vmatmul.mubr.msk.bf16.gmra.mrb[4].mxu1 %vm696_vm3, %v9381_v17  ;;  %6696 = vmatprep.mubr.msk.bf16.mxu0 %vm696_vm3, %v7114_v18  ;;  %v3892_v18 = vrot.slane %v3891_v63, 4  ;;  %v1366_v17 = vrot.slane %v7179_v35, 5  ;;  %v7180_v63 = vld [vmem:[%s7272_s4 + $0xb0] sm:$0x1]  ;;  %v8284_v31 = vsel %vm7532_vm6, %v1358_v23, %v1359_v58  ;;  %v3939_v4 = vor.u32 %v3938_v36, %v8265_v33 }
  0xde   : > { %6520 = vmatprep.mubr.msk.bf16.mxu1 %vm696_vm3, %v9382_v22  ;;  %6549 = vmatpush3.bf16.msra.mxu1 %v7119_v47  ;;  %v8269_v22 = vld [vmem:[%s7272_s4 + $0x68] sm:$0x1]  ;;  %v3916_v47 = vrot.slane %v3915_v44, 4  ;;  %v1373_v35 = vrot.slane %v7180_v63, 5  ;;  %v3929_v44 = vor.u32 %v3928_v8, %v3925_v46  ;;  %v3887_v43 = vsel %vm7299_vm2, %v3882_v48, %v8222_v56 }
  0xdf   : > { %6550 = vmatprep.subr.bf16.mxu1 %v7121_v52  ;;  %v3942_v9 = vshll.u32 %v8269_v22, 16  ;;  %v3897_v55 = vsel %vm7299_vm2, %v3892_v18, %v3896_v12  ;;  %v8297_v58 = vsel %vm7532_vm6, %v5546_v40, %v1363_v16  ;;  %v8301_v60 = vsel %vm7532_vm6, %v1365_v14, %v1366_v17 }
  0xe0   : > { %v9384_v56 = vor.u32 %v7884_v54, %v7882_v1  ;;  %v9386_v16 = vcombine.low %v8004_v42, %v8008_v37  ;;  %v3911_v12 = vsel %vm7299_vm2, %v3906_v38, %v8227_v3  ;;  %v3921_v40 = vsel %vm7299_vm2, %v3916_v47, %v3920_v6  ;;  %v7182_v38 = vld [vmem:[%s7272_s4 + $0xb8] sm:$0xf]  ;;  %v8359_v47 = vld [vmem:[%s7272_s4 + $0x7c] sm:$0xf]  ;;  %v5940_v6 = vld [vmem:[%s7272_s4 + $0x84] sm:$0xf] }
  0xe1   : > { %v8326_v46 = vsel %vm7532_vm6, %v5547_v28, %v1370_v32  ;;  %v9387_v54 = vcombine.low %v8037_v27, %v8047_v34  ;;  %v8335_v42 = vsel %vm7532_vm6, %v1372_v24, %v1373_v35  ;;  %v5548_v37 = vrot.slane %v1234_v61, 9  ;;  %v8339_v32 = vld [vmem:[%s7272_s4 + $0x70] sm:$0xf]  ;;  %9389 = vst [vmem:[#allocation9_spill] sm:$0xff] %v8359_v47  ;;  %v8371_v35 = vld [vmem:[%s7272_s4 + $0x88] sm:$0xf] }
  0xe2   : > { %6551 = vmatpush3.bf16.msra.mxu1 %v7121_v52  ;;  %v8306_v52 = vld [vmem:[%s9354_s1 + $0x80] sm:$0xff]   ;;  %v8312_v23 = vrot.slane %v9384_v56, 4  ;;  %v1377_v3 = vrot.slane %v7182_v38, 5  ;;  %9388 = vst [vmem:[#allocation8_spill] sm:$0xff] %v8339_v32  ;;  %v3947_v8 = vshrl.u32 %v5934_v26, 16  ;;  %v8341_v27 = vcombine.low %v3863_v50, %v3873_v13  ;;  %v7118_v28 = vld [vmem:[%s7272_s4 + $0xcc] sm:$0xff]  }
  0xe3   : > { %9383 = vst [vmem:[#allocation6_spill] sm:$0xff] %v8306_v52  ;;  %6784 = vmatprep.subr.bf16.mxu1 %v8306_v52  ;;  %v8343_v34 = vrot.slane %v3929_v44, 4  ;;  %v8345_v36 = vrot.slane %v3939_v4, 4  ;;  %v8347_v48 = vrot.slane %v3942_v9, 5  ;;  %v8351_v61 = vcombine.low %v3887_v43, %v3897_v55  ;;  %v8366_v50 = vld [vmem:[%s7272_s4 + $0xbc] sm:$0x1] }
  0xe4   : > { %9385 = vst [vmem:[#allocation7_spill] sm:$0xff] %v8312_v23  ;;  %6697 = vmatmul.mubr.msk.bf16.gmra.mrb[24].mxu0 %vm696_vm3, %v7116_v49  ;;  %v8355_v17 = vcombine.low %v3911_v12, %v3921_v40  ;;  %v5937_v49 = vld [vmem:[%s7272_s4 + $0x78] sm:$0xf]  ;;  %v3950_v24 = vshll.u32 %v5934_v26, 16  ;;  %v3956_v63 = vshll.u32 %v8339_v32, 16  ;;  %9390 = vst [vmem:[#allocation10_spill] sm:$0xff] %v8371_v35  ;;  %v8375_v44 = vsel %vm7532_vm6, %v5548_v37, %v1377_v3 }
  0xe5   : > { %6521 = vmatmul.mubr.msk.bf16.gmra.mrb[8].mxu1 %vm696_vm3, %v9386_v16  ;;  %6700 = vmatprep.mubr.msk.bf16.mxu0 %vm696_vm3, %v7117_v59  ;;  %v8377_v4 = vrot.slane %v1377_v3, 4  ;;  %v8379_v9 = vrot.slane %v3947_v8, 4  ;;  %v3960_v43 = vshrl.u32 %v8339_v32, 16  ;;  %v5943_v55 = vld [vmem:[%s7272_s4 + $0x90] sm:$0xf]  ;;  %v3971_v16 = vshrl.u32 %v5937_v49, 16 }
  0xe6   : > { %6524 = vmatprep.mubr.msk.bf16.mxu1 %vm696_vm3, %v9387_v54  ;;  %v3974_v12 = vshll.u32 %v5937_v49, 16  ;;  %v8392_v40 = vld [vmem:[%s7272_s4 + $0x94] sm:$0xf]  ;;  %v3980_v37 = vshll.u32 %v8359_v47, 16  ;;  %v3984_v38 = vshrl.u32 %v8359_v47, 16  ;;  %v3995_v3 = vshrl.u32 %v5940_v6, 16 }
  0xe7   : > { %9391 = vst [vmem:[#allocation11_spill] sm:$0xff] %v8392_v40  ;;  %v8395_v54 = vld [vmem:[%s7272_s4 + $0x74] sm:$0x1]  ;;  %v3998_v8 = vshll.u32 %v5940_v6, 16  ;;  %v9393_v59 = vcombine.low %v8079_v62, %v8083_v41  ;;  %v4004_v49 = vshll.u32 %v8371_v35, 16  ;;  %v4008_v14 = vshrl.u32 %v8371_v35, 16 }
  0xe8   : > { %9392 = vst [vmem:[#allocation12_spill] sm:$0xff] %v8395_v54  ;;  %v4019_v26 = vshrl.u32 %v5943_v55, 16  ;;  %v4022_v56 = vshll.u32 %v5943_v55, 16  ;;  %v9394_v18 = vcombine.low %v8091_v21, %v8102_v5  ;;  %v3952_v62 = vrot.slane %v3950_v24, 5  ;;  %v8415_v6 = vld [vmem:[%s7272_s4 + $0x80] sm:$0x1] }
  0xe9   : > { %v8412_v41 = vrot.slane %v3956_v63, 5  ;;  %v3962_v55 = vrot.slane %v3960_v43, 4  ;;  %v3966_v13 = vshll.u32 %v8395_v54, 16  ;;  %v3973_v21 = vrot.slane %v3971_v16, 4  ;;  %v8424_v24 = vld [vmem:[%s7272_s4 + $0x8c] sm:$0x1] }
  0xea   : > { %v3976_v5 = vrot.slane %v3974_v12, 5  ;;  %v8421_v1 = vrot.slane %v3980_v37, 5  ;;  %v3997_v63 = vrot.slane %v3995_v3, 4  ;;  %v4000_v52 = vrot.slane %v3998_v8, 5  ;;  %v8432_v43 = vld [vmem:[%s7272_s4 + $0x98] sm:$0x1] }
  0xeb   : > { %v8426_v35 = vrot.slane %v4004_v49, 5  ;;  %v4010_v23 = vrot.slane %v4008_v14, 4  ;;  %v4021_v47 = vrot.slane %v4019_v26, 4  ;;  %v4024_v32 = vrot.slane %v4022_v56, 5  ;;  %9396 = vst [vmem:[#allocation14_spill] sm:$0xff] %v8432_v43 }
  0xec   : > { %6701 = vmatmul.mubr.msk.bf16.gmra.mrb[28].mxu0 %vm696_vm3, %v7118_v28  ;;  %v4028_v28 = vshll.u32 %v8392_v40, 16  ;;  %v3953_v3 = vor.u32 %v3952_v62, %v8379_v9  ;;  %v3963_v8 = vor.u32 %v3962_v55, %v8412_v41  ;;  %v3977_v14 = vor.u32 %v3976_v5, %v3973_v21 }
  0xed   : > { %6525 = vmatmul.mubr.msk.bf16.gmra.mrb[12].mxu1 %vm696_vm3, %v9393_v59  ;;  %6712 = vmatprep.mubr.msk.bf16.mxu0 %vm696_vm3, %v8140_v15  ;;  %v4032_v59 = vshrl.u32 %v8392_v40, 16  ;;  %v3986_v15 = vrot.slane %v3984_v38, 4  ;;  %v8429_v40 = vld [vmem:[%s7272_s4 + $0xa0] sm:$0xf]  ;;  %v7122_v38 = vld [vmem:[%s9354_s1 + $0x108] sm:$0xff]   ;;  %v3990_v26 = vshll.u32 %v8415_v6, 16  ;;  %v4001_v49 = vor.u32 %v4000_v52, %v3997_v63 }
  0xee   : > { %6528 = vmatprep.mubr.msk.bf16.mxu1 %vm696_vm3, %v9394_v18  ;;  %v5946_v18 = vld [vmem:[%s7272_s4 + $0x9c] sm:$0xf]  ;;  %9395 = vst [vmem:[#allocation13_spill] sm:$0xff] %v8429_v40  ;;  %v8434_v54 = vrot.slane %v4028_v28, 5  ;;  %v4052_v28 = vshll.u32 %v8429_v40, 16  ;;  %v4011_v9 = vor.u32 %v4010_v23, %v8426_v35  ;;  %v4014_v62 = vshll.u32 %v8424_v24, 16 }
  0xef   : > { %v4034_v16 = vrot.slane %v4032_v59, 4  ;;  %v4043_v12 = vshrl.u32 %v5946_v18, 16  ;;  %v4046_v37 = vshll.u32 %v5946_v18, 16  ;;  %v3987_v56 = vor.u32 %v3986_v15, %v8421_v1 }
  0xf0   : > { %v4056_v59 = vshrl.u32 %v8429_v40, 16  ;;  %v9397_v18 = vcombine.low %v8106_v51, %v8110_v19  ;;  %v4025_v55 = vor.u32 %v4024_v32, %v4021_v47  ;;  %v4038_v52 = vshll.u32 %v8432_v43, 16  ;;  %v7124_v19 = vld [vmem:[%s9354_s1 + $0x110] sm:$0xff]   ;;  %v5949_v47 = vld [vmem:[%s7272_s4 + $0xa8] sm:$0xf] }
  0xf1   : > { %v9398_v21 = vcombine.low %v8146_v53, %v8163_v10  ;;  %v3968_v51 = vrot.slane %v3966_v13, 5  ;;  %v4045_v23 = vrot.slane %v4043_v12, 4  ;;  %v4048_v5 = vrot.slane %v4046_v37, 5  ;;  %v8469_v40 = vld [vmem:[%s7272_s4 + $0xa4] sm:$0x1] }
  0xf2   : > { %v3964_v32 = vrot.slane %v3963_v8, 4  ;;  %v3978_v53 = vrot.slane %v3977_v14, 4  ;;  %v3992_v10 = vrot.slane %v3990_v26, 5  ;;  %v3988_v13 = vrot.slane %v3987_v56, 4 }
  0xf3   : > { %v4002_v15 = vrot.slane %v4001_v49, 4  ;;  %v8466_v63 = vrot.slane %v4052_v28, 5  ;;  %v4026_v12 = vrot.slane %v4025_v55, 4  ;;  %v4040_v37 = vrot.slane %v4038_v52, 5 }
  0xf4   : > { %6713 = vmatmul.mubr.msk.bf16.vlgmr.msra.gmra.mrb[0].mxu0 %vm696_vm3, %v8201_v7  ;;  %v4035_v7 = vor.u32 %v4034_v16, %v8434_v54  ;;  %v4016_v16 = vrot.slane %v4014_v62, 5  ;;  %v4049_v43 = vor.u32 %v4048_v5, %v4045_v23  ;;  %v4067_v8 = vshrl.u32 %v5949_v47, 16 }
  0xf5   : > { %6529 = vmatmul.mubr.msk.bf16.gmra.mrb[16].mxu1 %vm696_vm3, %v9397_v18  ;;  %6745 = vmatpush3.bf16.msra.mxu0 %v8052_v0  ;;  %v3954_v0 = vrot.slane %v3953_v3, 4  ;;  %v4058_v18 = vrot.slane %v4056_v59, 4  ;;  %v8472_v3 = vld [vmem:[%s7272_s4 + $0xac] sm:$0xf]  ;;  %v4070_v14 = vshll.u32 %v5949_v47, 16  ;;  %v9399_v26 = vrot.slane %v8366_v50, 5 }
  0xf6   : > { %6532 = vmatprep.mubr.msk.bf16.mxu1 %vm696_vm3, %v9398_v21  ;;  %6716 = vmatprep.mubr.msk.bf16.mxu0 %vm696_vm3, %v8214_v2  ;;  %v4012_v21 = vrot.slane %v4011_v9, 4  ;;  %v4036_v2 = vrot.slane %v4035_v7, 4  ;;  %v3983_v28 = vsel %vm7299_vm2, %v3978_v53, %v8421_v1  ;;  %v3993_v50 = vsel %vm7299_vm2, %v3988_v13, %v3992_v10  ;;  %v7129_v9 = vld [vmem:[%s9354_s1 + $0x118] sm:$0xff]   ;;  %v6010_v47 = vld [vmem:[%s7272_s4 + $0x54] sm:$0xe] }
  0xf7   : > { %6746 = vmatprep.subr.bf16.mxu0 %v7122_v38  ;;  %v8479_v56 = vsel %vm7532_vm6, %v8377_v4, %v9399_v26  ;;  %v3959_v49 = vsel %vm7299_vm2, %v3954_v0, %v8412_v41  ;;  %v4007_v4 = vsel %vm7299_vm2, %v4002_v15, %v8426_v35  ;;  %v4059_v59 = vor.u32 %v4058_v18, %v8466_v63 }
  0xf8   : > { %v4062_v41 = vshll.u32 %v8469_v40, 16  ;;  %v9400_v1 = vcombine.low %v8173_v25, %v8181_v45  ;;  %v4017_v62 = vsel %vm7299_vm2, %v4012_v21, %v4016_v16  ;;  %v4031_v35 = vsel %vm7299_vm2, %v4026_v12, %v8434_v54  ;;  %v8524_v54 = vld [vmem:[%s7272_s4 + $0xb0] sm:$0x1]  ;;  %v6011_v12 = vld [vmem:[%s7272_s4 + $0x60] sm:$0xe] }
  0xf9   : > { %6747 = vmatpush3.bf16.msra.mxu0 %v7122_v38  ;;  %v3969_v38 = vsel %vm7299_vm2, %v3964_v32, %v3968_v51  ;;  %v4076_v55 = vshll.u32 %v8472_v3, 16  ;;  %v4080_v52 = vshrl.u32 %v8472_v3, 16  ;;  %v6009_v51 = vld [vmem:[%s7272_s4 + $0x48] sm:$0xe]  ;;  %v9401_v25 = vcombine.low %v8253_v30, %v8284_v31  ;;  %v5952_v32 = vld [vmem:[%s7272_s4 + $0xb4] sm:$0xf] }
  0xfa   : > { %6748 = vmatprep.subr.bf16.mxu0 %v7124_v19  ;;  %v4041_v45 = vsel %vm7299_vm2, %v4036_v2, %v4040_v37  ;;  %v4069_v7 = vrot.slane %v4067_v8, 4  ;;  %v4072_v23 = vrot.slane %v4070_v14, 5  ;;  %v9402_v30 = vsel %vm7299_vm2, %v8345_v36, %v8347_v48  ;;  %v9404_v14 = vld [vmem:[#allocation5_spill] sm:$0xff] }
  0xfb   : > { %v9403_v31 = vsel %vm7299_vm2, %v8343_v34, %v8265_v33  ;;  %v5572_v5 = vcombine.low %v8375_v44, %v8479_v56  ;;  %v8540_v0 = vcombine.low %v3983_v28, %v3993_v50  ;;  %v8543_v53 = vcombine.low %v4007_v4, %v4017_v62  ;;  %v8575_v50 = vld [vmem:[%s7272_s4 + $0xb8] sm:$0xf] }
  0xfc   : > { %6717 = vmatmul.mubr.msk.bf16.gmra.mrb[4].mxu0 %vm696_vm3, %v8341_v27  ;;  %v8521_v27 = vrot.slane %v4049_v43, 4  ;;  %v8538_v43 = vcombine.low %v3959_v49, %v3969_v38  ;;  %v4060_v10 = vrot.slane %v4059_v59, 4  ;;  %v4064_v36 = vrot.slane %v4062_v41, 5  ;;  %v6012_v49 = vld [vmem:[%s7272_s4 + $0x6c] sm:$0xe] }
  0xfd   : > { %6533 = vmatmul.mubr.msk.bf16.gmra.mrb[20].mxu1 %vm696_vm3, %v9400_v1  ;;  %6720 = vmatprep.mubr.msk.bf16.mxu0 %vm696_vm3, %v8351_v61  ;;  %v5975_v61 = vcombine.low %v9403_v31, %v9402_v30  ;;  %v6025_v48 = vrot.slane %v6009_v51, 9  ;;  %v8546_v33 = vcombine.low %v4031_v35, %v4041_v45  ;;  %v8548_v34 = vrot.slane %v4076_v55, 5  ;;  %v5955_v45 = vld [vmem:[%s7272_s4 + $0xc0] sm:$0xf] }
  0xfe   : > { %6536 = vmatprep.mubr.msk.bf16.mxu1 %vm696_vm3, %v9401_v25  ;;  %6749 = vmatpush3.bf16.msra.mxu0 %v7124_v19  ;;  %v4082_v13 = vrot.slane %v4080_v52, 4  ;;  %v4086_v15 = vshll.u32 %v8524_v54, 16  ;;  %v4055_v19 = vsel %vm7299_vm2, %v8521_v27, %v8466_v63  ;;  %v4073_v18 = vor.u32 %v4072_v23, %v4069_v7  ;;  %v9409_v52 = vld [vmem:[#allocation12_spill] sm:$0xff] }
  0xff   : > { %6750 = vmatprep.subr.bf16.mxu0 %v7129_v9  ;;  %v4578_v21 = vrot.slane %v8149_v11, 5  ;;  %v4581_v16 = vrot.slane %v8192_v39, 5  ;;  %v4091_v37 = vshrl.u32 %v5952_v32, 16  ;;  %v6026_v2 = vrot.slane %v6010_v47, 9 }
 0x100   : > { %v4585_v8 = vrot.slane %v8166_v20, 5  ;;  %v4588_v26 = vrot.slane %v9404_v14, 5  ;;  %v4065_v38 = vsel %vm7299_vm2, %v4060_v10, %v4064_v36  ;;  %v4094_v28 = vshll.u32 %v5952_v32, 16  ;;  %v6013_v32 = vld [vmem:[%s7272_s4 + $0x78] sm:$0xe]  ;;  %v7123_v10 = vld [vmem:[%s7272_s4 + $0xc] sm:$0xff]  }
 0x101   : > { %v8565_v63 = vsel %vm7532_vm6, %v6025_v48, %v4578_v21  ;;  %v4580_v11 = vrot.slane %v4578_v21, 4  ;;  %v9405_v39 = vcombine.low %v8297_v58, %v8301_v60  ;;  %v4083_v20 = vor.u32 %v4082_v13, %v8548_v34  ;;  %v9407_v60 = vld [vmem:[#allocation4_spill] sm:$0xff] }
 0x102   : > { %6751 = vmatpush3.bf16.msra.mxu0 %v7129_v9  ;;  %v8579_v4 = vsel %vm7532_vm6, %v6026_v2, %v4585_v8  ;;  %v4587_v59 = vrot.slane %v4585_v8, 4  ;;  %v6027_v41 = vrot.slane %v6011_v12, 9  ;;  %v9406_v9 = vcombine.low %v8326_v46, %v8335_v42  ;;  %v9408_v42 = vld [vmem:[#allocation8_spill] sm:$0xff]  ;;  %v8633_v12 = vld [vmem:[%s7272_s4 + $0xc4] sm:$0xf] }
 0x103   : > { %v8588_v58 = vsel %vm7532_vm6, %v4580_v11, %v4581_v16  ;;  %v4595_v1 = vrot.slane %v8269_v22, 5  ;;  %v6028_v62 = vrot.slane %v6012_v49, 9  ;;  %v4599_v55 = vrot.slane %v9408_v42, 5  ;;  %v8653_v49 = vld [vmem:[%s7272_s4 + $0xbc] sm:$0x1]  ;;  %v9413_v42 = vld [vmem:[#allocation10_spill] sm:$0xff] }
 0x104   : > { %6721 = vmatmul.mubr.msk.bf16.gmra.mrb[8].mxu0 %vm696_vm3, %v8355_v17  ;;  %v4592_v17 = vrot.slane %v9407_v60, 5  ;;  %v6049_v35 = vcombine.low %v8565_v63, %v8588_v58  ;;  %v8596_v46 = vsel %vm7532_vm6, %v4587_v59, %v4588_v26  ;;  %v4602_v51 = vrot.slane %v9409_v52, 5  ;;  %v6014_v26 = vld [vmem:[%s7272_s4 + $0x84] sm:$0xe]  ;;  %v9412_v59 = vld [vmem:[#allocation7_spill] sm:$0xff]  ;;  %v7125_v52 = vld [vmem:[%s7272_s4 + $0x18] sm:$0xff]  }
 0x105   : > { %6537 = vmatmul.mubr.msk.bf16.gmra.mrb[24].mxu1 %vm696_vm3, %v9405_v39  ;;  %6724 = vmatprep.mubr.msk.bf16.mxu0 %vm696_vm3, %v5975_v61  ;;  %v4100_v25 = vshll.u32 %v8575_v50, 16  ;;  %v6050_v22 = vcombine.low %v8579_v4, %v8596_v46  ;;  %v8608_v23 = vrot.slane %v4086_v15, 5  ;;  %v4104_v30 = vshrl.u32 %v8575_v50, 16  ;;  %v5696_v15 = vld [vmem:[%s7272_s4 + $0x78] sm:$0xf] }
 0x106   : > { %6540 = vmatprep.mubr.msk.bf16.mxu1 %vm696_vm3, %v9406_v9  ;;  %v8606_v27 = vsel %vm7532_vm6, %v6027_v41, %v4592_v17  ;;  %v4594_v7 = vrot.slane %v4592_v17, 4  ;;  %v8613_v31 = vsel %vm7532_vm6, %v6028_v62, %v4599_v55  ;;  %v4601_v61 = vrot.slane %v4599_v55, 4  ;;  %v7200_v46 = vld [vmem:[%s7272_s4 + $0x8c] sm:$0x1] }
 0x107   : > { %v8617_v36 = vcombine.low %v4055_v19, %v4065_v38  ;;  %v8619_v48 = vrot.slane %v4073_v18, 4  ;;  %v8621_v47 = vrot.slane %v4091_v37, 4  ;;  %v8628_v21 = vrot.slane %v4083_v20, 4 }
 0x108   : > { %v8625_v13 = vsel %vm7532_vm6, %v4594_v7, %v4595_v1  ;;  %v8630_v16 = vrot.slane %v4094_v28, 5  ;;  %v8639_v18 = vsel %vm7532_vm6, %v4601_v61, %v4602_v51  ;;  %v8641_v37 = vrot.slane %v4100_v25, 5  ;;  %v9410_v28 = vld [vmem:[#allocation9_spill] sm:$0xff]  ;;  %v7126_v61 = vld [vmem:[%s7272_s4 + $0x24] sm:$0xff]  }
 0x109   : > { %v6051_v19 = vcombine.low %v8606_v27, %v8625_v13  ;;  %v4115_v2 = vshrl.u32 %v5955_v45, 16  ;;  %v6052_v8 = vcombine.low %v8613_v31, %v8639_v18  ;;  %v6029_v14 = vrot.slane %v6013_v32, 9 }
 0x10a   : > { %v4118_v38 = vshll.u32 %v5955_v45, 16  ;;  %v4606_v11 = vrot.slane %v9410_v28, 5  ;;  %v4609_v39 = vrot.slane %v8415_v6, 5  ;;  %v2356_v20 = vshrl.u32 %v5696_v15, 16  ;;  %v5958_v45 = vld [vmem:[%s7272_s4 + $0xcc] sm:$0xf] }
 0x10b   : > { %v4124_v44 = vshll.u32 %v8633_v12, 16  ;;  %v4128_v56 = vshrl.u32 %v8633_v12, 16  ;;  %v6030_v17 = vrot.slane %v6014_v26, 9  ;;  %v4110_v1 = vshll.u32 %v8653_v49, 16  ;;  %v6015_v26 = vld [vmem:[%s7272_s4 + $0x90] sm:$0xe] }
 0x10c   : > { %6725 = vmatmul.mubr.msk.bf16.gmra.mrb[12].mxu0 %vm696_vm3, %v8538_v43  ;;  %v9411_v43 = vld [vmem:[#allocation3_spill] sm:$0xff]  ;;  %v8668_v6 = vsel %vm7532_vm6, %v6029_v14, %v4606_v11  ;;  %v4608_v9 = vrot.slane %v4606_v11, 4  ;;  %v2358_v60 = vrot.slane %v2356_v20, 4  ;;  %v4613_v55 = vrot.slane %v9413_v42, 5 }
 0x10d   : > { %6541 = vmatmul.mubr.msk.bf16.gmra.mrb[28].mxu1 %vm696_vm3, %v5572_v5  ;;  %6728 = vmatprep.mubr.msk.bf16.mxu0 %vm696_vm3, %v8540_v0  ;;  %v2359_v5 = vshll.u32 %v5696_v15, 16  ;;  %v2378_v41 = vsel %vm7299_vm2, %v9412_v59, %v9411_v43  ;;  %v4106_v0 = vrot.slane %v4104_v30, 4  ;;  %v4079_v51 = vsel %vm7299_vm2, %v8619_v48, %v8548_v34 }
 0x10e   : > { %6552 = vmatprep.mubr.msk.bf16.mxu1 %vm696_vm3, %v7123_v10  ;;  %v4097_v25 = vor.u32 %v8630_v16, %v8621_v47  ;;  %v8682_v7 = vsel %vm7532_vm6, %v4608_v9, %v4609_v39  ;;  %v4616_v30 = vrot.slane %v8424_v24, 5  ;;  %v4117_v32 = vrot.slane %v4115_v2, 4  ;;  %v8692_v47 = vld [vmem:[%s7272_s4 + $0xd0] sm:$0xf]  ;;  %v9416_v9 = vld [vmem:[#allocation2_spill] sm:$0xff] }
 0x10f   : > { %v2361_v62 = vrot.slane %v2359_v5, 5  ;;  %v4120_v10 = vrot.slane %v4118_v38, 5  ;;  %v6053_v15 = vcombine.low %v8668_v6, %v8682_v7  ;;  %v8689_v34 = vrot.slane %v4124_v44, 5  ;;  %v8704_v38 = vld [vmem:[%s7272_s4 + $0xc8] sm:$0x1] }
 0x110   : > { %v4130_v48 = vrot.slane %v4128_v56, 4  ;;  %v8696_v16 = vsel %vm7532_vm6, %v6030_v17, %v4613_v55  ;;  %v4615_v28 = vrot.slane %v4613_v55, 4  ;;  %v4089_v24 = vsel %vm7299_vm2, %v8628_v21, %v8608_v23  ;;  %v9414_v5 = vld [vmem:[#allocation11_spill] sm:$0xff]  ;;  %v9415_v23 = vld [vmem:[#allocation6_spill] sm:$0xff] }
 0x111   : > { %v2362_v14 = vor.u32 %v2361_v62, %v2358_v60  ;;  %v4107_v2 = vor.u32 %v4106_v0, %v8641_v37  ;;  %v4139_v11 = vshrl.u32 %v5958_v45, 16  ;;  %v4142_v20 = vshll.u32 %v5958_v45, 16  ;;  %v7184_v17 = vld [vmem:[%s9354_s1 + $0x88] sm:$0xff]  }
 0x112   : > { %v8711_v44 = vsel %vm7532_vm6, %v4615_v28, %v4616_v30  ;;  %v6031_v56 = vrot.slane %v6015_v26, 9  ;;  %v4620_v43 = vrot.slane %v9414_v5, 5  ;;  %v4148_v21 = vshll.u32 %v8692_v47, 16  ;;  %v9417_v30 = vld [vmem:[#allocation14_spill] sm:$0xff] }
 0x113   : > { %v2363_v39 = vrot.slane %v2362_v14, 4  ;;  %v4152_v59 = vshrl.u32 %v8692_v47, 16  ;;  %v6054_v60 = vcombine.low %v8696_v16, %v8711_v44  ;;  %v4121_v0 = vor.u32 %v4120_v10, %v4117_v32  ;;  %v7127_v14 = vld [vmem:[%s7272_s4 + $0x30] sm:$0xff]   ;;  %v6016_v10 = vld [vmem:[%s7272_s4 + $0x9c] sm:$0xe] }
 0x114   : > { %6729 = vmatmul.mubr.msk.bf16.gmra.mrb[16].mxu0 %vm696_vm3, %v8543_v53  ;;  %v4131_v62 = vor.u32 %v4130_v48, %v8689_v34  ;;  %v4134_v42 = vshll.u32 %v8704_v38, 16  ;;  %v8734_v45 = vsel %vm7532_vm6, %v6031_v56, %v4620_v43  ;;  %v5981_v26 = vcombine.low %v4079_v51, %v4089_v24  ;;  %v7128_v5 = vld [vmem:[%s7272_s4 + $0x3c] sm:$0xff]   ;;  %v8741_v48 = vld [vmem:[%s7272_s4 + $0xd4] sm:$0x1]  ;;  %v7206_v16 = vld [vmem:[%s7272_s4 + $0xc4] sm:$0xf] }
 0x115   : > { %6553 = vmatmul.mubr.msk.bf16.vlgmr.msra.gmra.mrb[0].mxu1 %vm696_vm3, %v7125_v52  ;;  %v2368_v53 = vsel %vm7299_vm2, %v2363_v39, %v9416_v9  ;;  %6732 = vmatprep.mubr.msk.bf16.mxu0 %vm696_vm3, %v8546_v33  ;;  %v4112_v52 = vrot.slane %v4110_v1, 5  ;;  %v4622_v33 = vrot.slane %v4620_v43, 4  ;;  %v4098_v28 = vrot.slane %v4097_v25, 4  ;;  %v7185_v51 = vld [vmem:[%s9354_s1 + $0x90] sm:$0xff]  }
 0x116   : > { %6788 = vmatpush3.bf16.msra.mxu1 %v9415_v23  ;;  %6556 = vmatprep.mubr.msk.bf16.mxu1 %vm696_vm3, %v7126_v61  ;;  %v8730_v55 = vcombine.low %v2368_v53, %v2378_v41  ;;  %v4623_v61 = vrot.slane %v9417_v30, 5  ;;  %v4108_v39 = vrot.slane %v4107_v2, 4  ;;  %v4141_v32 = vrot.slane %v4139_v11, 4  ;;  %v9418_v2 = vld [vmem:[#allocation13_spill] sm:$0xff] }
 0x117   : > { %6785 = vmatprep.subr.bf16.mxu1 %v7184_v17  ;;  %v4144_v41 = vrot.slane %v4142_v20, 5  ;;  %v8743_v23 = vrot.slane %v4148_v21, 5  ;;  %v4154_v1 = vrot.slane %v4152_v59, 4  ;;  %v4122_v43 = vrot.slane %v4121_v0, 4 }
 0x118   : > { %v8747_v56 = vsel %vm7532_vm6, %v4622_v33, %v4623_v61  ;;  %v4132_v9 = vrot.slane %v4131_v62, 4  ;;  %v4136_v53 = vrot.slane %v4134_v42, 5  ;;  %v6032_v24 = vrot.slane %v6016_v10, 9  ;;  %v6005_v62 = vld [vmem:[%s7272_s4 + $0x18] sm:$0xe] }
 0x119   : > { %v6055_v25 = vcombine.low %v8734_v45, %v8747_v56  ;;  %v4627_v11 = vrot.slane %v9418_v2, 5  ;;  %v4103_v20 = vsel %vm7299_vm2, %v4098_v28, %v8641_v37  ;;  %v4113_v21 = vsel %vm7299_vm2, %v4108_v39, %v4112_v52  ;;  %v7186_v33 = vld [vmem:[%s7272_s4 + $0x1c] sm:$0xf]  ;;  %v7130_v28 = vld [vmem:[%s7272_s4 + $0x48] sm:$0xff]  }
 0x11a   : > { %6789 = vmatpush3.bf16.msra.mxu1 %v7184_v17  ;;  %v4158_v59 = vshll.u32 %v8741_v48, 16  ;;  %v4630_v17 = vrot.slane %v8469_v40, 5  ;;  %v4145_v0 = vor.u32 %v4144_v41, %v4141_v32  ;;  %v4127_v40 = vsel %vm7299_vm2, %v4122_v43, %v8689_v34  ;;  %v7187_v61 = vld [vmem:[%s9354_s1 + $0x98] sm:$0xff]  }
 0x11b   : > { %6786 = vmatprep.subr.bf16.mxu1 %v7185_v51  ;;  %v8771_v37 = vsel %vm7532_vm6, %v6032_v24, %v4627_v11  ;;  %v4629_v42 = vrot.slane %v4627_v11, 4  ;;  %v4137_v52 = vsel %vm7299_vm2, %v4132_v9, %v4136_v53  ;;  %v4550_v30 = vrot.slane %v7186_v33, 5  ;;  %v7188_v9 = vld [vmem:[%s7272_s4 + $0x20] sm:$0x1] }
 0x11c   : > { %6733 = vmatmul.mubr.msk.bf16.gmra.mrb[20].mxu0 %vm696_vm3, %v8617_v36  ;;  %v4155_v36 = vor.u32 %v4154_v1, %v8743_v23  ;;  %v5982_v34 = vcombine.low %v4103_v20, %v4113_v21  ;;  %v4160_v39 = vrot.slane %v4158_v59, 5  ;;  %v6021_v32 = vrot.slane %v6005_v62, 9  ;;  %v6018_v20 = vld [vmem:[%s7272_s4 + $0xb4] sm:$0xe] }
 0x11d   : > { %6557 = vmatmul.mubr.msk.bf16.gmra.mrb[4].mxu1 %vm696_vm3, %v7127_v14  ;;  %6736 = vmatprep.mubr.msk.bf16.mxu0 %vm696_vm3, %v5981_v26  ;;  %v8784_v14 = vsel %vm7532_vm6, %v4629_v42, %v4630_v17  ;;  %v6017_v26 = vld [vmem:[%s7272_s4 + $0xa8] sm:$0xe]  ;;  %v5983_v41 = vcombine.low %v4127_v40, %v4137_v52  ;;  %v4146_v1 = vrot.slane %v4145_v0, 4  ;;  %v4553_v53 = vrot.slane %v7188_v9, 5  ;;  %v6006_v0 = vld [vmem:[%s7272_s4 + $0x24] sm:$0xe] }
 0x11e   : > { %6560 = vmatprep.mubr.msk.bf16.mxu1 %vm696_vm3, %v7128_v5  ;;  %6790 = vmatpush3.bf16.msra.mxu1 %v7185_v51  ;;  %v6056_v10 = vcombine.low %v8771_v37, %v8784_v14  ;;  %v7131_v5 = vld [vmem:[%s7272_s4 + $0x54] sm:$0xff]   ;;  %v4156_v43 = vrot.slane %v4155_v36, 4  ;;  %v4552_v51 = vrot.slane %v4550_v30, 4  ;;  %v6033_v24 = vrot.slane %v6017_v26, 9  ;;  %v7189_v36 = vld [vmem:[%s7272_s4 + $0x28] sm:$0xf] }
 0x11f   : > { %6787 = vmatprep.subr.bf16.mxu1 %v7187_v61  ;;  %v4634_v2 = vrot.slane %v8472_v3, 5  ;;  %v4637_v11 = vrot.slane %v8524_v54, 5  ;;  %v4151_v3 = vsel %vm7299_vm2, %v4146_v1, %v8743_v23  ;;  %v4551_v17 = vsel %vm7532_vm6, %v6021_v32, %v4550_v30  ;;  %v7190_v40 = vld [vmem:[%s7272_s4 + $0x34] sm:$0xf]  ;;  %v7191_v32 = vld [vmem:[%s7272_s4 + $0x2c] sm:$0x1] }
 0x120   : > { %v4161_v54 = vsel %vm7299_vm2, %v4156_v43, %v4160_v39  ;;  %v4557_v62 = vrot.slane %v7189_v36, 5  ;;  %v4554_v42 = vsel %vm7532_vm6, %v4552_v51, %v4553_v53  ;;  %v4564_v52 = vrot.slane %v7190_v40, 5  ;;  %v7133_v1 = vld [vmem:[%s7272_s4 + $0x6c] sm:$0xff]  }
 0x121   : > { %v8799_v21 = vsel %vm7532_vm6, %v6033_v24, %v4634_v2  ;;  %v4636_v59 = vrot.slane %v4634_v2, 4  ;;  %v6034_v23 = vrot.slane %v6018_v20, 9  ;;  %v4641_v30 = vrot.slane %v8575_v50, 5  ;;  %v7192_v50 = vld [vmem:[%s7272_s4 + $0x38] sm:$0x1] }
 0x122   : > { %6791 = vmatpush3.bf16.msra.mxu1 %v7187_v61  ;;  %v6007_v61 = vld [vmem:[%s7272_s4 + $0x30] sm:$0xe]  ;;  %v6022_v39 = vrot.slane %v6006_v0, 9  ;;  %v6045_v43 = vcombine.low %v4551_v17, %v4554_v42  ;;  %v4559_v9 = vrot.slane %v4557_v62, 4  ;;  %v4566_v2 = vrot.slane %v4564_v52, 4 }
 0x123   : > { %v8817_v33 = vsel %vm7532_vm6, %v4636_v59, %v4637_v11  ;;  %v8829_v53 = vsel %vm7532_vm6, %v6034_v23, %v4641_v30  ;;  %v4643_v51 = vrot.slane %v4641_v30, 4  ;;  %v6023_v24 = vrot.slane %v6007_v61, 9  ;;  %v6019_v20 = vld [vmem:[%s7272_s4 + $0xc0] sm:$0xe]  ;;  %v6008_v23 = vld [vmem:[%s7272_s4 + $0x3c] sm:$0xe] }
 0x124   : > { %6737 = vmatmul.mubr.msk.bf16.gmra.mrb[24].mxu0 %vm696_vm3, %v5982_v34  ;;  %v6057_v26 = vcombine.low %v8799_v21, %v8817_v33  ;;  %v5984_v34 = vcombine.low %v4151_v3, %v4161_v54  ;;  %v4567_v11 = vrot.slane %v7192_v50, 5  ;;  %v4558_v3 = vsel %vm7532_vm6, %v6022_v39, %v4557_v62  ;;  %v7193_v17 = vld [vmem:[%s7272_s4 + $0x40] sm:$0xf]  ;;  %v5693_v62 = vld [vmem:[%s7272_s4 + $0x6c] sm:$0xf] }
 0x125   : > { %6561 = vmatmul.mubr.msk.bf16.gmra.mrb[8].mxu1 %vm696_vm3, %v7130_v28  ;;  %6740 = vmatprep.mubr.msk.bf16.mxu0 %vm696_vm3, %v5983_v41  ;;  %v7132_v28 = vld [vmem:[%s7272_s4 + $0x60] sm:$0xff]   ;;  %v4644_v41 = vrot.slane %v8653_v49, 5  ;;  %v4571_v0 = vrot.slane %v7193_v17, 5  ;;  %v6035_v36 = vrot.slane %v6019_v20, 9  ;;  %v4565_v42 = vsel %vm7532_vm6, %v6023_v24, %v4564_v52 }
 0x126   : > { %6564 = vmatprep.mubr.msk.bf16.mxu1 %vm696_vm3, %v7131_v5  ;;  %v4560_v5 = vrot.slane %v7191_v32, 5  ;;  %v4568_v40 = vsel %vm7532_vm6, %v4566_v2, %v4567_v11  ;;  %v4648_v61 = vrot.slane %v8633_v12, 5  ;;  %v4651_v30 = vrot.slane %v8704_v38, 5  ;;  %v7195_v11 = vld [vmem:[%s7272_s4 + $0x70] sm:$0xf] }
 0x127   : > { %v8835_v59 = vsel %vm7532_vm6, %v4643_v51, %v4644_v41  ;;  %v7135_v41 = vld [vmem:[%s7272_s4 + $0x84] sm:$0xff]   ;;  %v6047_v52 = vcombine.low %v4565_v42, %v4568_v40  ;;  %v2332_v24 = vshrl.u32 %v5693_v62, 16  ;;  %v2335_v12 = vshll.u32 %v5693_v62, 16 }
 0x128   : > { %v6058_v49 = vcombine.low %v8829_v53, %v8835_v59  ;;  %v4561_v54 = vsel %vm7532_vm6, %v4559_v9, %v4560_v5  ;;  %v8860_v32 = vsel %vm7532_vm6, %v6035_v36, %v4648_v61  ;;  %v4650_v5 = vrot.slane %v4648_v61, 4  ;;  %v7194_v9 = vld [vmem:[%s7272_s4 + $0x44] sm:$0x1] }
 0x129   : > { %v6046_v39 = vcombine.low %v4558_v3, %v4561_v54  ;;  %v4574_v51 = vrot.slane %v7194_v9, 5  ;;  %v2341_v20 = vshll.u32 %v7195_v11, 16  ;;  %v2345_v3 = vshrl.u32 %v7195_v11, 16  ;;  %v5702_v11 = vld [vmem:[%s7272_s4 + $0x90] sm:$0xf] }
 0x12a   : > { %v8866_v38 = vsel %vm7532_vm6, %v4650_v5, %v4651_v30  ;;  %v4655_v54 = vrot.slane %v8692_v47, 5  ;;  %v4658_v17 = vrot.slane %v8741_v48, 5  ;;  %v2334_v40 = vrot.slane %v2332_v24, 4  ;;  %v7136_v30 = vld [vmem:[%s7272_s4 + $0x90] sm:$0xff]  }
 0x12b   : > { %v6059_v50 = vcombine.low %v8860_v32, %v8866_v38  ;;  %v2343_v62 = vrot.slane %v2341_v20, 5  ;;  %v7138_v20 = vld [vmem:[%s7272_s4 + $0xa8] sm:$0xff]   ;;  %v2404_v63 = vshrl.u32 %v5702_v11, 16  ;;  %v2407_v58 = vshll.u32 %v5702_v11, 16  ;;  %v7140_v11 = vld [vmem:[%s7272_s4 + $0xc0] sm:$0xff]  }
 0x12c   : > { %6741 = vmatmul.mubr.msk.bf16.gmra.mrb[28].mxu0 %vm696_vm3, %v5984_v34  ;;  %v7134_v34 = vld [vmem:[%s7272_s4 + $0x78] sm:$0xff]   ;;  %v4657_v47 = vrot.slane %v4655_v54, 4  ;;  %v2509_v44 = vshll.u32 %v7206_v16, 16 }
 0x12d   : > { %6565 = vmatmul.mubr.msk.bf16.gmra.mrb[12].mxu1 %vm696_vm3, %v7132_v28  ;;  %6752 = vmatprep.mubr.msk.bf16.mxu0 %vm696_vm3, %v6045_v43  ;;  %v6020_v28 = vld [vmem:[%s7272_s4 + $0xcc] sm:$0xe]  ;;  %v4573_v43 = vrot.slane %v4571_v0, 4 }
 0x12e   : > { %6568 = vmatprep.mubr.msk.bf16.mxu1 %vm696_vm3, %v7133_v1  ;;  %v6024_v1 = vrot.slane %v6008_v23, 9  ;;  %v6036_v2 = vrot.slane %v6020_v28, 9  ;;  %v2337_v23 = vrot.slane %v2335_v12, 5  ;;  %v2347_v28 = vrot.slane %v2345_v3, 4 }
 0x12f   : > { %v4575_v42 = vsel %vm7532_vm6, %v4573_v43, %v4574_v51  ;;  %v7197_v51 = vld [vmem:[%s7272_s4 + $0x88] sm:$0xf]  ;;  %v2511_v45 = vrot.slane %v2509_v44, 5 }
 0x130   : > { %v4572_v36 = vsel %vm7532_vm6, %v6024_v1, %v4571_v0  ;;  %v8883_v61 = vsel %vm7532_vm6, %v6036_v2, %v4655_v54  ;;  %v7137_v0 = vld [vmem:[%s7272_s4 + $0x9c] sm:$0xff]   ;;  %v7196_v1 = vld [vmem:[%s7272_s4 + $0x74] sm:$0x1]  ;;  %v2389_v24 = vshll.u32 %v7197_v51, 16  ;;  %v2393_v12 = vshrl.u32 %v7197_v51, 16 }
 0x131   : > { %v6048_v48 = vcombine.low %v4572_v36, %v4575_v42  ;;  %v2351_v43 = vshll.u32 %v7196_v1, 16  ;;  %v5705_v42 = vld [vmem:[%s7272_s4 + $0x9c] sm:$0xf]  ;;  %v7199_v1 = vld [vmem:[%s7272_s4 + $0xa0] sm:$0xf] }
 0x133   : > { %v2353_v54 = vrot.slane %v2351_v43, 5  ;;  %v2441_v43 = vshrl.u32 %v7199_v1, 16 }
 0x134   : > { %6753 = vmatmul.mubr.msk.bf16.vlgmr.msra.gmra.mrb[0].mxu0 %vm696_vm3, %v6046_v39  ;;  %v5699_v39 = vld [vmem:[%s7272_s4 + $0x84] sm:$0xf] }
 0x135   : > { %6569 = vmatmul.mubr.msk.bf16.gmra.mrb[16].mxu1 %vm696_vm3, %v7134_v34  ;;  %6756 = vmatprep.mubr.msk.bf16.mxu0 %vm696_vm3, %v6047_v52  ;;  %v8888_v34 = vsel %vm7532_vm6, %v4657_v47, %v4658_v17  ;;  %v2348_v52 = vor.u32 %v2347_v28, %v2343_v62  ;;  %v2380_v57 = vshrl.u32 %v5699_v39, 16  ;;  %v2383_v9 = vshll.u32 %v5699_v39, 16 }
 0x136   : > { %6572 = vmatprep.mubr.msk.bf16.mxu1 %vm696_vm3, %v7135_v41  ;;  %v6060_v5 = vcombine.low %v8883_v61, %v8888_v34  ;;  %v2338_v41 = vor.u32 %v2337_v23, %v2334_v40  ;;  %v7139_v40 = vld [vmem:[%s7272_s4 + $0xb4] sm:$0xff]   ;;  %v8907_v23 = vrot.slane %v2389_v24, 5  ;;  %v2395_v47 = vrot.slane %v2393_v12, 4 }
 0x137   : > { %v2349_v3 = vrot.slane %v2348_v52, 4  ;;  %v2382_v17 = vrot.slane %v2380_v57, 4  ;;  %v2385_v36 = vrot.slane %v2383_v9, 5  ;;  %v2431_v39 = vshll.u32 %v5705_v42, 16 }
 0x138   : > { %v2339_v2 = vrot.slane %v2338_v41, 4  ;;  %v2396_v4 = vor.u32 %v2395_v47, %v8907_v23  ;;  %v2406_v57 = vrot.slane %v2404_v63, 4  ;;  %v2409_v9 = vrot.slane %v2407_v58, 5  ;;  %v7202_v58 = vld [vmem:[%s7272_s4 + $0xa4] sm:$0x1] }
 0x139   : > { %v2354_v41 = vsel %vm7299_vm2, %v2349_v3, %v2353_v54  ;;  %v2386_v52 = vor.u32 %v2385_v36, %v2382_v17  ;;  %v5708_v3 = vld [vmem:[%s7272_s4 + $0xa8] sm:$0xf] }
 0x13a   : > { %v2397_v54 = vrot.slane %v2396_v4, 4  ;;  %v2410_v36 = vor.u32 %v2409_v9, %v2406_v57  ;;  %v7204_v4 = vld [vmem:[%s7272_s4 + $0xb8] sm:$0xf] }
 0x13b   : > { %v2387_v27 = vrot.slane %v2386_v52, 4 }
 0x13c   : > { %6757 = vmatmul.mubr.msk.bf16.gmra.mrb[4].mxu0 %vm696_vm3, %v6048_v48  ;;  %v2411_v18 = vrot.slane %v2410_v36, 4 }
 0x13d   : > { %6573 = vmatmul.mubr.msk.bf16.gmra.mrb[20].mxu1 %vm696_vm3, %v7136_v30  ;;  %6760 = vmatprep.mubr.msk.bf16.mxu0 %vm696_vm3, %v6049_v35  ;;  %v2344_v35 = vsel %vm7299_vm2, %v2339_v2, %v2343_v62  ;;  %v7198_v30 = vld [vmem:[%s7272_s4 + $0x94] sm:$0xf]  ;;  %v2437_v62 = vshll.u32 %v7199_v1, 16  ;;  %v2433_v2 = vrot.slane %v2431_v39, 5  ;;  %v7203_v39 = vld [vmem:[%s7272_s4 + $0xac] sm:$0xf]  ;;  %v2392_v1 = vsel %vm7299_vm2, %v2387_v27, %v8907_v23 }
 0x13e   : > { %6576 = vmatprep.mubr.msk.bf16.mxu1 %vm696_vm3, %v7137_v0  ;;  %v2413_v48 = vshll.u32 %v7198_v30, 16  ;;  %v2417_v28 = vshrl.u32 %v7198_v30, 16  ;;  %v2428_v0 = vshrl.u32 %v5705_v42, 16  ;;  %v7201_v42 = vld [vmem:[%s7272_s4 + $0x98] sm:$0x1]  ;;  %v2447_v30 = vshll.u32 %v7202_v58, 16 }
 0x13f   : > { %v8930_v13 = vrot.slane %v2437_v62, 5  ;;  %v2465_v52 = vshrl.u32 %v7203_v39, 16  ;;  %v2513_v58 = vshrl.u32 %v7206_v16, 16 }
 0x140   : > { %v8927_v51 = vrot.slane %v2413_v48, 5  ;;  %v2419_v24 = vrot.slane %v2417_v28, 4  ;;  %v2430_v12 = vrot.slane %v2428_v0, 4  ;;  %v2452_v48 = vshrl.u32 %v5708_v3, 16  ;;  %v5711_v28 = vld [vmem:[%s7272_s4 + $0xb4] sm:$0xf] }
 0x141   : > { %v2455_v0 = vshll.u32 %v5708_v3, 16  ;;  %v2476_v62 = vshrl.u32 %v5711_v28, 16  ;;  %v2449_v6 = vrot.slane %v2447_v30, 5  ;;  %v2467_v23 = vrot.slane %v2465_v52, 4  ;;  %v5714_v3 = vld [vmem:[%s7272_s4 + $0xc0] sm:$0xf] }
 0x142   : > { %v2420_v47 = vor.u32 %v2419_v24, %v8927_v51  ;;  %v2434_v63 = vor.u32 %v2433_v2, %v2430_v12  ;;  %v2454_v7 = vrot.slane %v2452_v48, 4  ;;  %v7207_v48 = vld [vmem:[%s7272_s4 + $0xbc] sm:$0x1]  ;;  %v2515_v56 = vrot.slane %v2513_v58, 4 }
 0x143   : > { %v2457_v24 = vrot.slane %v2455_v0, 5 }
 0x144   : > { %6761 = vmatmul.mubr.msk.bf16.gmra.mrb[8].mxu0 %vm696_vm3, %v6050_v22  ;;  %v2399_v22 = vshll.u32 %v7200_v46, 16  ;;  %v2485_v46 = vshll.u32 %v7204_v4, 16  ;;  %v2421_v57 = vrot.slane %v2420_v47, 4  ;;  %v2435_v9 = vrot.slane %v2434_v63, 4  ;;  %v7205_v47 = vld [vmem:[%s7272_s4 + $0xb0] sm:$0x1] }
 0x145   : > { %6577 = vmatmul.mubr.msk.bf16.gmra.mrb[24].mxu1 %vm696_vm3, %v7138_v20  ;;  %6764 = vmatprep.mubr.msk.bf16.mxu0 %vm696_vm3, %v6051_v19  ;;  %v5733_v20 = vcombine.low %v2344_v35, %v2354_v41  ;;  %v2443_v19 = vrot.slane %v2441_v43, 4  ;;  %v2461_v41 = vshll.u32 %v7203_v39, 16  ;;  %v2479_v43 = vshll.u32 %v5711_v28, 16 }
 0x146   : > { %6580 = vmatprep.mubr.msk.bf16.mxu1 %vm696_vm3, %v7139_v40  ;;  %v2401_v17 = vrot.slane %v2399_v22, 5  ;;  %v2423_v40 = vshll.u32 %v7201_v42, 16  ;;  %v2489_v22 = vshrl.u32 %v7204_v4, 16  ;;  %v2487_v27 = vrot.slane %v2485_v46, 5 }
 0x147   : > { %v2444_v35 = vor.u32 %v2443_v19, %v8930_v13  ;;  %v2463_v12 = vrot.slane %v2461_v41, 5  ;;  %v2440_v36 = vsel %vm7299_vm2, %v2435_v9, %v8930_v13  ;;  %v2471_v63 = vshll.u32 %v7205_v47, 16 }
 0x148   : > { %v2402_v31 = vsel %vm7299_vm2, %v2397_v54, %v2401_v17  ;;  %v2491_v19 = vrot.slane %v2489_v22, 4  ;;  %v2416_v54 = vsel %vm7299_vm2, %v2411_v18, %v8927_v51  ;;  %v2458_v51 = vor.u32 %v2457_v24, %v2454_v7  ;;  %v7208_v22 = vld [vmem:[%s7272_s4 + $0xc8] sm:$0x1] }
 0x149   : > { %v5735_v2 = vcombine.low %v2392_v1, %v2402_v31  ;;  %v2503_v13 = vshll.u32 %v5714_v3, 16  ;;  %v2495_v28 = vshll.u32 %v7207_v48, 16  ;;  %v2473_v52 = vrot.slane %v2471_v63, 5 }
 0x14a   : > { %v2492_v30 = vor.u32 %v2491_v19, %v2487_v27  ;;  %v2459_v39 = vrot.slane %v2458_v51, 4  ;;  %v2516_v46 = vor.u32 %v2515_v56, %v2511_v45 }
 0x14b   : > { %v2505_v31 = vrot.slane %v2503_v13, 5 }
 0x14c   : > { %6765 = vmatmul.mubr.msk.bf16.gmra.mrb[12].mxu0 %vm696_vm3, %v6052_v8  ;;  %v2425_v8 = vrot.slane %v2423_v40, 5  ;;  %v2468_v40 = vor.u32 %v2467_v23, %v2463_v12  ;;  %v2493_v18 = vrot.slane %v2492_v30, 4  ;;  %v2517_v7 = vrot.slane %v2516_v46, 4 }
 0x14d   : > { %6581 = vmatmul.mubr.msk.bf16.gmra.mrb[28].mxu1 %vm696_vm3, %v7140_v11  ;;  %6768 = vmatprep.mubr.msk.bf16.mxu0 %vm696_vm3, %v6053_v15  ;;  %v2445_v15 = vrot.slane %v2444_v35, 4  ;;  %v2478_v11 = vrot.slane %v2476_v62, 4  ;;  %v2464_v62 = vsel %vm7299_vm2, %v2459_v39, %v2463_v12 }
 0x14e   : > { %6608 = vmatprep.mubr.msk.bf16.mxu1 %vm696_vm3, %v5733_v20  ;;  %v2481_v20 = vrot.slane %v2479_v43, 5  ;;  %v2426_v17 = vsel %vm7299_vm2, %v2421_v57, %v2425_v8  ;;  %v2469_v41 = vrot.slane %v2468_v40, 4  ;;  %v2497_v8 = vrot.slane %v2495_v28, 5 }
 0x14f   : > { %v2450_v42 = vsel %vm7299_vm2, %v2445_v15, %v2449_v6  ;;  %v5736_v35 = vcombine.low %v2416_v54, %v2426_v17  ;;  %v2519_v57 = vshll.u32 %v7208_v22, 16 }
 0x150   : > { %v5737_v0 = vcombine.low %v2440_v36, %v2450_v42  ;;  %v2474_v43 = vsel %vm7299_vm2, %v2469_v41, %v2473_v52  ;;  %v2498_v14 = vsel %vm7299_vm2, %v2493_v18, %v2497_v8 }
 0x151   : > { %v2521_v21 = vrot.slane %v2519_v57, 5 }
 0x154   : > { %6769 = vmatmul.mubr.msk.bf16.gmra.mrb[16].mxu0 %vm696_vm3, %v6054_v60  ;;  %v2482_v60 = vor.u32 %v2481_v20, %v2478_v11 }
 0x155   : > { %6609 = vmatmul.mubr.msk.bf16.vlgmr.msra.gmra.mrb[16].mxu1 %vm696_vm3, %v8730_v55  ;;  %6772 = vmatprep.mubr.msk.bf16.mxu0 %vm696_vm3, %v6055_v25  ;;  %v2500_v55 = vshrl.u32 %v5714_v3, 16  ;;  %v9029_v3 = vld [vmem:[%s9355_s2] ss:$0 sm:$0xff] }
 0x156   : > { %6612 = vmatprep.mubr.msk.bf16.mxu1 %vm696_vm3, %v5735_v2  ;;  %v2483_v25 = vrot.slane %v2482_v60, 4 }
 0x157   : > { %v2502_v1 = vrot.slane %v2500_v55, 4 }
 0x158   : > { %v2488_v37 = vsel %vm7299_vm2, %v2483_v25, %v2487_v27 }
 0x159   : > { %v2506_v4 = vor.u32 %v2505_v31, %v2502_v1  ;;  %v5739_v9 = vcombine.low %v2488_v37, %v2498_v14 }
 0x15b   : > { %v2507_v6 = vrot.slane %v2506_v4, 4 }
 0x15c   : > { %6773 = vmatmul.mubr.msk.bf16.gmra.mrb[20].mxu0 %vm696_vm3, %v6056_v10  ;;  %v5738_v10 = vcombine.low %v2464_v62, %v2474_v43 }
 0x15d   : > { %6613 = vmatmul.mubr.msk.bf16.gmra.mrb[20].mxu1 %vm696_vm3, %v5736_v35  ;;  %6776 = vmatprep.mubr.msk.bf16.mxu0 %vm696_vm3, %v6057_v26  ;;  %v2512_v33 = vsel %vm7299_vm2, %v2507_v6, %v2511_v45  ;;  %v2522_v26 = vsel %vm7299_vm2, %v2517_v7, %v2521_v21 }
 0x15e   : > { %6616 = vmatprep.mubr.msk.bf16.mxu1 %vm696_vm3, %v5737_v0  ;;  %v5740_v15 = vcombine.low %v2512_v33, %v2522_v26 }
 0x164   : > { %6777 = vmatmul.mubr.msk.bf16.gmra.mrb[24].mxu0 %vm696_vm3, %v6058_v49 }
 0x165   : > { %6617 = vmatmul.mubr.msk.bf16.gmra.mrb[24].mxu1 %vm696_vm3, %v5738_v10  ;;  %6780 = vmatprep.mubr.msk.bf16.mxu0 %vm696_vm3, %v6059_v50 }
 0x166   : > { %6620 = vmatprep.mubr.msk.bf16.mxu1 %vm696_vm3, %v5739_v9 }
 0x16c   : > { %6781 = vmatmul.mubr.msk.bf16.gmra.mrb[28].mxu0 %vm696_vm3, %v6060_v5 }
 0x16d   : > { %6621 = vmatmul.mubr.msk.bf16.gmra.mrb[28].mxu1 %vm696_vm3, %v5740_v15 }
 0x1e8   : > { %v6554_v53 = vpop.f32.mrb[0].mxu1 }
 0x1e9   : > { %v1932_v59 = vpop.f32.mrb[1].mxu1 }
 0x1ea   : > { %v6555_v49 = vpop.f32.mrb[2].mxu1 }
 0x1eb   : > { %v1935_v32 = vpop.f32.mrb[3].mxu1 }
 0x1f0   : > { %v6558_v38 = vpop.f32.mrb[4].mxu1 }
 0x1f1   : > { %v1948_v50 = vpop.f32.mrb[5].mxu1 }
 0x1f2   : > { %v6559_v24 = vpop.f32.mrb[6].mxu1 }
 0x1f3   : > { %v1951_v12 = vpop.f32.mrb[7].mxu1 }
 0x1f8   : > { %v6562_v23 = vpop.f32.mrb[8].mxu1 }
 0x1f9   : > { %v1964_v2 = vpop.f32.mrb[9].mxu1 }
 0x1fa   : > { %v6563_v29 = vpop.f32.mrb[10].mxu1 }
 0x1fb   : > { %v1967_v11 = vpop.f32.mrb[11].mxu1 }
 0x200   : > { %v9018_v20 = vpop.f32.mrb[12].mxu1 }
 0x201   : > { %v9020_v27 = vpop.f32.mrb[13].mxu1 }
 0x202   : > { %v9022_v19 = vpop.f32.mrb[14].mxu1 }
 0x203   : > { %v9024_v61 = vpop.f32.mrb[15].mxu1 }
 0x207   : > { %v6754_v34 = vpop.f32.mrb[0].mxu0 }
 0x208   : > { %v6792_v5 = vadd.f32 %v6754_v34, %v6554_v53  ;;  %v4823_v54 = vpop.f32.mrb[1].mxu0 }
 0x209   : > { %v6793_v17 = vadd.f32 %v4823_v54, %v1932_v59  ;;  %v6755_v36 = vpop.f32.mrb[2].mxu0 }
 0x20a   : > { %v6794_v42 = vadd.f32 %v6755_v36, %v6555_v49  ;;  %v4826_v51 = vpop.f32.mrb[3].mxu0  ;;  %v9035_v63 = vadd.f32 %v6792_v5, %v9029_v3 }
 0x20b   : > { %v9032_v40 = vadd.f32 %v6793_v17, %v9029_v3  ;;  %v6795_v47 = vadd.f32 %v4826_v51, %v1935_v32 }
 0x20c   : > { %v9041_v13 = vadd.f32 %v6794_v42, %v9029_v3  ;;  %v5062_v28 = vmul.f32 %v9035_v63, %v9035_v63 }
 0x20d   : > { %v9038_v55 = vadd.f32 %v6795_v47, %v9029_v3  ;;  %v5060_v16 = vmul.f32 %v9032_v40, %v9032_v40 }
 0x20e   : > { %v5063_v52 = vmul.f32 %v9041_v13, %v9041_v13 }
 0x20f   : > { %v5021_v44 = vadd.f32 %v9038_v55, %v9032_v40  ;;  %v5061_v58 = vmul.f32 %v9038_v55, %v9038_v55  ;;  %v6758_v60 = vpop.f32.mrb[4].mxu0 }
 0x210   : > { %v6796_v30 = vadd.f32 %v6758_v60, %v6558_v38  ;;  %v4839_v48 = vpop.f32.mrb[5].mxu0 }
 0x211   : > { %v5022_v35 = vadd.f32 %v5021_v44, %v9035_v63  ;;  %v5092_v0 = vadd.f32 %v5061_v58, %v5060_v16  ;;  %v6797_v39 = vadd.f32 %v4839_v48, %v1948_v50  ;;  %v6759_v41 = vpop.f32.mrb[6].mxu0 }
 0x212   : > { %v6798_v1 = vadd.f32 %v6759_v41, %v6559_v24  ;;  %v4842_v31 = vpop.f32.mrb[7].mxu0  ;;  %v9059_v8 = vadd.f32 %v6796_v30, %v9029_v3 }
 0x213   : > { %v5093_v45 = vadd.f32 %v5092_v0, %v5062_v28  ;;  %v9055_v56 = vadd.f32 %v6797_v39, %v9029_v3  ;;  %v5023_v25 = vadd.f32 %v5022_v35, %v9041_v13  ;;  %v6799_v18 = vadd.f32 %v4842_v31, %v1951_v12 }
 0x214   : > { %v9068_v22 = vadd.f32 %v6798_v1, %v9029_v3  ;;  %v5066_v7 = vmul.f32 %v9059_v8, %v9059_v8 }
 0x215   : > { %v5024_v62 = vadd.f32 %v5023_v25, %v9055_v56  ;;  %v5064_v43 = vmul.f32 %v9055_v56, %v9055_v56  ;;  %v5094_v4 = vadd.f32 %v5093_v45, %v5063_v52  ;;  %v9065_v46 = vadd.f32 %v6799_v18, %v9029_v3 }
 0x216   : > { %v5067_v53 = vmul.f32 %v9068_v22, %v9068_v22 }
 0x217   : > { %v5095_v57 = vadd.f32 %v5094_v4, %v5064_v43  ;;  %v5025_v37 = vadd.f32 %v5024_v62, %v9065_v46  ;;  %v5065_v14 = vmul.f32 %v9065_v46, %v9065_v46  ;;  %v6762_v10 = vpop.f32.mrb[8].mxu0 }
 0x218   : > { %v6800_v9 = vadd.f32 %v6762_v10, %v6562_v23  ;;  %v4855_v6 = vpop.f32.mrb[9].mxu0 }
 0x219   : > { %v5026_v21 = vadd.f32 %v5025_v37, %v9059_v8  ;;  %v5096_v33 = vadd.f32 %v5095_v57, %v5065_v14  ;;  %v6801_v26 = vadd.f32 %v4855_v6, %v1964_v2  ;;  %v6763_v15 = vpop.f32.mrb[10].mxu0 }
 0x21a   : > { %v6802_v59 = vadd.f32 %v6763_v15, %v6563_v29  ;;  %v4858_v49 = vpop.f32.mrb[11].mxu0  ;;  %v9083_v12 = vadd.f32 %v6800_v9, %v9029_v3 }
 0x21b   : > { %v5097_v32 = vadd.f32 %v5096_v33, %v5066_v7  ;;  %v9079_v38 = vadd.f32 %v6801_v26, %v9029_v3  ;;  %v5027_v50 = vadd.f32 %v5026_v21, %v9068_v22  ;;  %v6803_v24 = vadd.f32 %v4858_v49, %v1967_v11 }
 0x21c   : > { %v9092_v29 = vadd.f32 %v6802_v59, %v9029_v3  ;;  %v5070_v47 = vmul.f32 %v9083_v12, %v9083_v12 }
 0x21d   : > { %v5028_v23 = vadd.f32 %v5027_v50, %v9079_v38  ;;  %v5068_v2 = vmul.f32 %v9079_v38, %v9079_v38  ;;  %v5098_v34 = vadd.f32 %v5097_v32, %v5067_v53  ;;  %v9089_v5 = vadd.f32 %v6803_v24, %v9029_v3 }
 0x21e   : > { %v5071_v30 = vmul.f32 %v9092_v29, %v9092_v29 }
 0x21f   : > { %v5099_v54 = vadd.f32 %v5098_v34, %v5068_v2  ;;  %v5029_v17 = vadd.f32 %v5028_v23, %v9089_v5  ;;  %v5069_v11 = vmul.f32 %v9089_v5, %v9089_v5  ;;  %v6766_v36 = vpop.f32.mrb[12].mxu0 }
 0x220   : > { %v6804_v42 = vadd.f32 %v6766_v36, %v9018_v20  ;;  %v4871_v51 = vpop.f32.mrb[13].mxu0 }
 0x221   : > { %v5030_v16 = vadd.f32 %v5029_v17, %v9083_v12  ;;  %v5100_v44 = vadd.f32 %v5099_v54, %v5069_v11  ;;  %v6805_v58 = vadd.f32 %v4871_v51, %v9020_v27  ;;  %v6767_v60 = vpop.f32.mrb[14].mxu0 }
 0x222   : > { %v6806_v48 = vadd.f32 %v6767_v60, %v9022_v19  ;;  %v4874_v28 = vpop.f32.mrb[15].mxu0  ;;  %v9111_v41 = vadd.f32 %v6804_v42, %v9029_v3 }
 0x223   : > { %v5101_v35 = vadd.f32 %v5100_v44, %v5070_v47  ;;  %v9106_v0 = vadd.f32 %v6805_v58, %v9029_v3  ;;  %v5031_v20 = vadd.f32 %v5030_v16, %v9092_v29  ;;  %v6807_v39 = vadd.f32 %v4874_v28, %v9024_v61 }
 0x224   : > { %v9120_v31 = vadd.f32 %v6806_v48, %v9029_v3  ;;  %v5074_v37 = vmul.f32 %v9111_v41, %v9111_v41 }
 0x225   : > { %v5032_v27 = vadd.f32 %v5031_v20, %v9106_v0  ;;  %v5072_v52 = vmul.f32 %v9106_v0, %v9106_v0  ;;  %v5102_v1 = vadd.f32 %v5101_v35, %v5071_v30  ;;  %v9117_v19 = vadd.f32 %v6807_v39, %v9029_v3 }
 0x226   : > { %v5075_v21 = vmul.f32 %v9120_v31, %v9120_v31 }
 0x227   : > { %v5103_v45 = vadd.f32 %v5102_v1, %v5072_v52  ;;  %v5033_v25 = vadd.f32 %v5032_v27, %v9117_v19  ;;  %v5073_v61 = vmul.f32 %v9117_v19, %v9117_v19  ;;  %v6770_v62 = vpop.f32.mrb[16].mxu0 }
 0x228   : > { %v6610_v18 = vpop.f32.mrb[16].mxu1  ;;  %v4887_v57 = vpop.f32.mrb[17].mxu0 }
 0x229   : > { %v6808_v43 = vadd.f32 %v6770_v62, %v6610_v18  ;;  %v2750_v4 = vpop.f32.mrb[17].mxu1  ;;  %v5034_v14 = vadd.f32 %v5033_v25, %v9111_v41  ;;  %v5104_v10 = vadd.f32 %v5103_v45, %v5073_v61  ;;  %v6771_v7 = vpop.f32.mrb[18].mxu0 }
 0x22a   : > { %v6809_v9 = vadd.f32 %v4887_v57, %v2750_v4  ;;  %v6611_v6 = vpop.f32.mrb[18].mxu1  ;;  %v4890_v15 = vpop.f32.mrb[19].mxu0 }
 0x22b   : > { %v6810_v33 = vadd.f32 %v6771_v7, %v6611_v6  ;;  %v2753_v26 = vpop.f32.mrb[19].mxu1  ;;  %v5105_v53 = vadd.f32 %v5104_v10, %v5074_v37  ;;  %v5035_v49 = vadd.f32 %v5034_v14, %v9120_v31  ;;  %v9135_v50 = vadd.f32 %v6808_v43, %v9029_v3 }
 0x22c   : > { %v9131_v59 = vadd.f32 %v6809_v9, %v9029_v3  ;;  %v6811_v32 = vadd.f32 %v4890_v15, %v2753_v26 }
 0x22d   : > { %v5106_v2 = vadd.f32 %v5105_v53, %v5075_v21  ;;  %v9144_v54 = vadd.f32 %v6810_v33, %v9029_v3  ;;  %v5078_v58 = vmul.f32 %v9135_v50, %v9135_v50 }
 0x22e   : > { %v5036_v24 = vadd.f32 %v5035_v49, %v9131_v59  ;;  %v5076_v23 = vmul.f32 %v9131_v59, %v9131_v59  ;;  %v9141_v34 = vadd.f32 %v6811_v32, %v9029_v3 }
 0x22f   : > { %v6774_v51 = vpop.f32.mrb[20].mxu0  ;;  %v5079_v20 = vmul.f32 %v9144_v54, %v9144_v54 }
 0x230   : > { %v5107_v17 = vadd.f32 %v5106_v2, %v5076_v23  ;;  %v5037_v11 = vadd.f32 %v5036_v24, %v9141_v34  ;;  %v5077_v36 = vmul.f32 %v9141_v34, %v9141_v34  ;;  %v6614_v42 = vpop.f32.mrb[20].mxu1  ;;  %v4903_v44 = vpop.f32.mrb[21].mxu0 }
 0x231   : > { %v6812_v47 = vadd.f32 %v6774_v51, %v6614_v42  ;;  %v2766_v16 = vpop.f32.mrb[21].mxu1  ;;  %v6775_v35 = vpop.f32.mrb[22].mxu0 }
 0x232   : > { %v5038_v60 = vadd.f32 %v5037_v11, %v9135_v50  ;;  %v5108_v30 = vadd.f32 %v5107_v17, %v5077_v36  ;;  %v6813_v48 = vadd.f32 %v4903_v44, %v2766_v16  ;;  %v6615_v28 = vpop.f32.mrb[22].mxu1  ;;  %v4906_v52 = vpop.f32.mrb[23].mxu0 }
 0x233   : > { %v6814_v39 = vadd.f32 %v6775_v35, %v6615_v28  ;;  %v2769_v27 = vpop.f32.mrb[23].mxu1  ;;  %v9159_v18 = vadd.f32 %v6812_v47, %v9029_v3 }
 0x234   : > { %v5109_v1 = vadd.f32 %v5108_v30, %v5078_v58  ;;  %v9155_v45 = vadd.f32 %v6813_v48, %v9029_v3  ;;  %v5039_v25 = vadd.f32 %v5038_v60, %v9144_v54  ;;  %v6815_v61 = vadd.f32 %v4906_v52, %v2769_v27 }
 0x235   : > { %v9168_v37 = vadd.f32 %v6814_v39, %v9029_v3  ;;  %v5082_v15 = vmul.f32 %v9159_v18, %v9159_v18 }
 0x236   : > { %v5040_v62 = vadd.f32 %v5039_v25, %v9155_v45  ;;  %v5080_v43 = vmul.f32 %v9155_v45, %v9155_v45  ;;  %v5110_v4 = vadd.f32 %v5109_v1, %v5079_v20  ;;  %v9165_v57 = vadd.f32 %v6815_v61, %v9029_v3 }
 0x237   : > { %v6778_v7 = vpop.f32.mrb[24].mxu0  ;;  %v5083_v2 = vmul.f32 %v9168_v37, %v9168_v37 }
 0x238   : > { %v5111_v14 = vadd.f32 %v5110_v4, %v5080_v43  ;;  %v5041_v10 = vadd.f32 %v5040_v62, %v9165_v57  ;;  %v5081_v9 = vmul.f32 %v9165_v57, %v9165_v57  ;;  %v6618_v6 = vpop.f32.mrb[24].mxu1  ;;  %v4919_v26 = vpop.f32.mrb[25].mxu0 }
 0x239   : > { %v6816_v21 = vadd.f32 %v6778_v7, %v6618_v6  ;;  %v2782_v33 = vpop.f32.mrb[25].mxu1  ;;  %v6779_v23 = vpop.f32.mrb[26].mxu0 }
 0x23a   : > { %v5042_v53 = vadd.f32 %v5041_v10, %v9159_v18  ;;  %v5112_v49 = vadd.f32 %v5111_v14, %v5081_v9  ;;  %v6817_v32 = vadd.f32 %v4919_v26, %v2782_v33  ;;  %v6619_v24 = vpop.f32.mrb[26].mxu1  ;;  %v4922_v36 = vpop.f32.mrb[27].mxu0 }
 0x23b   : > { %v6818_v17 = vadd.f32 %v6779_v23, %v6619_v24  ;;  %v2785_v11 = vpop.f32.mrb[27].mxu1  ;;  %v9183_v44 = vadd.f32 %v6816_v21, %v9029_v3 }
 0x23c   : > { %v5113_v42 = vadd.f32 %v5112_v49, %v5082_v15  ;;  %v9179_v51 = vadd.f32 %v6817_v32, %v9029_v3  ;;  %v5043_v47 = vadd.f32 %v5042_v53, %v9168_v37  ;;  %v6819_v16 = vadd.f32 %v4922_v36, %v2785_v11 }
 0x23d   : > { %v9192_v28 = vadd.f32 %v6818_v17, %v9029_v3  ;;  %v5086_v62 = vmul.f32 %v9183_v44, %v9183_v44 }
 0x23e   : > { %v5044_v58 = vadd.f32 %v5043_v47, %v9179_v51  ;;  %v5084_v60 = vmul.f32 %v9179_v51, %v9179_v51  ;;  %v5114_v30 = vadd.f32 %v5113_v42, %v5083_v2  ;;  %v9189_v48 = vadd.f32 %v6819_v16, %v9029_v3 }
 0x23f   : > { %v6782_v52 = vpop.f32.mrb[28].mxu0  ;;  %v5087_v6 = vmul.f32 %v9192_v28, %v9192_v28 }
 0x240   : > { %v5115_v35 = vadd.f32 %v5114_v30, %v5084_v60  ;;  %v5045_v20 = vadd.f32 %v5044_v58, %v9189_v48  ;;  %v5085_v39 = vmul.f32 %v9189_v48, %v9189_v48  ;;  %v6622_v27 = vpop.f32.mrb[28].mxu1  ;;  %v4935_v61 = vpop.f32.mrb[29].mxu0 }
 0x241   : > { %v6820_v1 = vadd.f32 %v6782_v52, %v6622_v27  ;;  %v2798_v25 = vpop.f32.mrb[29].mxu1  ;;  %v6783_v9 = vpop.f32.mrb[30].mxu0 }
 0x242   : > { %v5046_v43 = vadd.f32 %v5045_v20, %v9183_v44  ;;  %v5116_v4 = vadd.f32 %v5115_v35, %v5085_v39  ;;  %v6821_v14 = vadd.f32 %v4935_v61, %v2798_v25  ;;  %v6623_v10 = vpop.f32.mrb[30].mxu1  ;;  %v4938_v33 = vpop.f32.mrb[31].mxu0 }
 0x243   : > { %v6822_v7 = vadd.f32 %v6783_v9, %v6623_v10  ;;  %v2801_v21 = vpop.f32.mrb[31].mxu1  ;;  %v9207_v32 = vadd.f32 %v6820_v1, %v9029_v3 }
 0x244   : > { %v5117_v26 = vadd.f32 %v5116_v4, %v5086_v62  ;;  %v9203_v15 = vadd.f32 %v6821_v14, %v9029_v3  ;;  %v5047_v53 = vadd.f32 %v5046_v43, %v9192_v28  ;;  %v6823_v49 = vadd.f32 %v4938_v33, %v2801_v21 }
 0x245   : > { %v9216_v36 = vadd.f32 %v6822_v7, %v9029_v3  ;;  %v5090_v16 = vmul.f32 %v9207_v32, %v9207_v32 }
 0x246   : > { %v5048_v24 = vadd.f32 %v5047_v53, %v9203_v15  ;;  %v5088_v23 = vmul.f32 %v9203_v15, %v9203_v15  ;;  %v5118_v2 = vadd.f32 %v5117_v26, %v5087_v6  ;;  %v9213_v17 = vadd.f32 %v6823_v49, %v9029_v3 }
 0x247   : > { %v5091_v30 = vmul.f32 %v9216_v36, %v9216_v36 }
 0x248   : > { %v5119_v11 = vadd.f32 %v5118_v2, %v5088_v23  ;;  %v5049_v42 = vadd.f32 %v5048_v24, %v9213_v17  ;;  %v5089_v47 = vmul.f32 %v9213_v17, %v9213_v17 }
 0x24a   : > { %v5050_v58 = vadd.f32 %v5049_v42, %v9207_v32  ;;  %v5120_v60 = vadd.f32 %v5119_v11, %v5089_v47 }
 0x24c   : > { %v5051_v35 = vadd.f32 %v5050_v58, %v9216_v36  ;;  %v5121_v20 = vadd.f32 %v5120_v60, %v5090_v16 }
 0x24e   : > { %v5052_v39 = vrot.slane %v5051_v35, 4  ;;  %v5122_v3 = vadd.f32 %v5121_v20, %v5091_v30 }
 0x250   : > { %v5053_v27 = vadd.f32 %v5052_v39, %v5051_v35  ;;  %v5123_v52 = vrot.slane %v5122_v3, 4 }
 0x252   : > { %v5054_v1 = vrot.slane %v5053_v27, 2  ;;  %v5124_v25 = vadd.f32 %v5123_v52, %v5122_v3 }
 0x254   : > { %v5055_v61 = vadd.f32 %v5054_v1, %v5053_v27  ;;  %v5125_v62 = vrot.slane %v5124_v25, 2 }
 0x256   : > { %v5056_v43 = vrot.slane %v5055_v61, 1  ;;  %v5126_v4 = vadd.f32 %v5125_v62, %v5124_v25 }
 0x258   : > { %v5057_v14 = vadd.f32 %v5056_v43, %v5055_v61  ;;  %v5127_v10 = vrot.slane %v5126_v4, 1 }
 0x25a   : > { %v9227_v9 = vmul.f32 0.00390625, %v5057_v14  ;;  %v5128_v6 = vadd.f32 %v5127_v10, %v5126_v4 }
 0x25c   : > { %v5129_v7 = vmul.f32 0.00390625, %v5128_v6  ;;  %v5130_v21 = vmul.f32 %v9227_v9, %v9227_v9  ;;  %v5140_v26 = vsub.f32 %v9079_v38, %v9227_v9  ;;  %v5141_v53 = vsub.f32 %v9089_v5, %v9227_v9 }
 0x25d   : > { %v5143_v49 = vsub.f32 %v9092_v29, %v9227_v9  ;;  %v5144_v24 = vsub.f32 %v9106_v0, %v9227_v9  ;;  %v5145_v23 = vsub.f32 %v9117_v19, %v9227_v9  ;;  %v5146_v2 = vsub.f32 %v9111_v41, %v9227_v9 }
 0x25e   : > { %v5131_v33 = vsub.f32 %v5129_v7, %v5130_v21  ;;  %v5147_v11 = vsub.f32 %v9120_v31, %v9227_v9  ;;  %v5148_v38 = vsub.f32 %v9131_v59, %v9227_v9  ;;  %v5149_v5 = vsub.f32 %v9141_v34, %v9227_v9 }
 0x25f   : > { %v5150_v29 = vsub.f32 %v9135_v50, %v9227_v9  ;;  %v5151_v0 = vsub.f32 %v9144_v54, %v9227_v9  ;;  %v5152_v19 = vsub.f32 %v9155_v45, %v9227_v9  ;;  %v5153_v41 = vsub.f32 %v9165_v57, %v9227_v9 }
 0x260   : > { %v5154_v31 = vsub.f32 %v9159_v18, %v9227_v9  ;;  %v5155_v59 = vsub.f32 %v9168_v37, %v9227_v9  ;;  %v5156_v34 = vsub.f32 %v9179_v51, %v9227_v9  ;;  %v5157_v50 = vsub.f32 %v9189_v48, %v9227_v9 }
 0x261   : > { %v5158_v54 = vsub.f32 %v9183_v44, %v9227_v9  ;;  %v5159_v45 = vsub.f32 %v9192_v28, %v9227_v9  ;;  %v5160_v57 = vsub.f32 %v9203_v15, %v9227_v9  ;;  %v5161_v18 = vsub.f32 %v9213_v17, %v9227_v9 }
 0x262   : > { %v5162_v37 = vsub.f32 %v9207_v32, %v9227_v9  ;;  %v5163_v51 = vsub.f32 %v9216_v36, %v9227_v9  ;;  %v5164_v42 = vadd.f32 1e-05, %v5131_v33  ;;  %v5132_v44 = vsub.f32 %v9032_v40, %v9227_v9 }
 0x263   : > { %v5133_v48 = vsub.f32 %v9038_v55, %v9227_v9  ;;  %v5134_v28 = vsub.f32 %v9035_v63, %v9227_v9  ;;  %v5135_v15 = vsub.f32 %v9041_v13, %v9227_v9  ;;  %v5136_v32 = vsub.f32 %v9055_v56, %v9227_v9 }
 0x264   : > { %7141 = vrsqrt.f32 %v5164_v42  ;;  %v5137_v36 = vsub.f32 %v9065_v46, %v9227_v9  ;;  %v5138_v47 = vsub.f32 %v9059_v8, %v9227_v9  ;;  %v5139_v40 = vsub.f32 %v9068_v22, %v9227_v9 }
 0x265   : > { %v5142_v55 = vsub.f32 %v9083_v12, %v9227_v9 }
 0x26e   : > { %v7142_v17 = vpop.eup %7141 }
 0x26f   : > { %v9295_v63 = vmul.f32 %v7142_v17, %v5132_v44  ;;  %v9297_v16 = vmul.f32 %v7142_v17, %v5133_v48  ;;  %v9299_v13 = vmul.f32 %v7142_v17, %v5134_v28  ;;  %v9301_v56 = vmul.f32 %v7142_v17, %v5135_v15 }
 0x270   : > { %v9303_v58 = vmul.f32 %v7142_v17, %v5136_v32  ;;  %v9305_v46 = vmul.f32 %v7142_v17, %v5137_v36  ;;  %v9307_v60 = vmul.f32 %v7142_v17, %v5138_v47  ;;  %v9309_v8 = vmul.f32 %v7142_v17, %v5139_v40 }
 0x271   : > { %v9311_v22 = vmul.f32 %v7142_v17, %v5140_v26  ;;  %v5175_v30 = vmul.f32 %v7142_v17, %v5141_v53  ;;  %v5176_v12 = vmul.f32 %v7142_v17, %v5142_v55  ;;  %v5177_v35 = vmul.f32 %v7142_v17, %v5143_v49 }
 0x272   : > { %v5178_v20 = vmul.f32 %v7142_v17, %v5144_v24  ;;  %v5179_v39 = vmul.f32 %v7142_v17, %v5145_v23  ;;  %v5180_v3 = vmul.f32 %v7142_v17, %v5146_v2  ;;  %v5181_v27 = vmul.f32 %v7142_v17, %v5147_v11 }
 0x273   : > { %v9313_v52 = vmul.f32 %v7142_v17, %v5148_v38  ;;  %v5183_v1 = vmul.f32 %v7142_v17, %v5149_v5  ;;  %v5184_v25 = vmul.f32 %v7142_v17, %v5150_v29  ;;  %v5185_v61 = vmul.f32 %v7142_v17, %v5151_v0 }
 0x274   : > { %v5186_v62 = vmul.f32 %v7142_v17, %v5152_v19  ;;  %v5187_v43 = vmul.f32 %v7142_v17, %v5153_v41  ;;  %v5188_v4 = vmul.f32 %v7142_v17, %v5154_v31  ;;  %v5189_v14 = vmul.f32 %v7142_v17, %v5155_v59 }
 0x275   : > { %v9315_v10 = vmul.f32 %v7142_v17, %v5156_v34  ;;  %v5191_v9 = vmul.f32 %v7142_v17, %v5157_v50  ;;  %v5192_v6 = vmul.f32 %v7142_v17, %v5158_v54  ;;  %v5193_v7 = vmul.f32 %v7142_v17, %v5159_v45 }
 0x276   : > { %v5194_v21 = vmul.f32 %v7142_v17, %v5160_v57  ;;  %v5195_v33 = vmul.f32 %v7142_v17, %v5161_v18  ;;  %v5196_v26 = vmul.f32 %v7142_v17, %v5162_v37  ;;  %v5197_v53 = vmul.f32 %v7142_v17, %v5163_v51 }
 0x277   : > { %v5198_v49 = vmax.f32 %v9295_v63, 0.0  ;;  %v5199_v24 = vmax.f32 %v9297_v16, 0.0  ;;  %v5200_v23 = vmax.f32 %v9299_v13, 0.0  ;;  %v5201_v2 = vmax.f32 %v9301_v56, 0.0 }
 0x278   : > { %v5202_v11 = vmax.f32 %v9303_v58, 0.0  ;;  %v5203_v38 = vmax.f32 %v9305_v46, 0.0  ;;  %v5204_v5 = vmax.f32 %v9307_v60, 0.0  ;;  %v5205_v29 = vmax.f32 %v9309_v8, 0.0 }
 0x279   : > { %v5206_v0 = vmax.f32 %v9311_v22, 0.0  ;;  %v5207_v19 = vmax.f32 %v5175_v30, 0.0  ;;  %v5208_v41 = vmax.f32 %v5176_v12, 0.0  ;;  %v5209_v31 = vmax.f32 %v5177_v35, 0.0 }
 0x27a   : > { %v5210_v59 = vmax.f32 %v5178_v20, 0.0  ;;  %v5211_v34 = vmax.f32 %v5179_v39, 0.0  ;;  %v5212_v50 = vmax.f32 %v5180_v3, 0.0  ;;  %v5213_v54 = vmax.f32 %v5181_v27, 0.0 }
 0x27b   : > { %v5214_v45 = vmax.f32 %v9313_v52, 0.0  ;;  %v5215_v57 = vmax.f32 %v5183_v1, 0.0  ;;  %v5216_v18 = vmax.f32 %v5184_v25, 0.0  ;;  %v5217_v37 = vmax.f32 %v5185_v61, 0.0 }
 0x27c   : > { %v5218_v51 = vmax.f32 %v5186_v62, 0.0  ;;  %v5219_v42 = vmax.f32 %v5187_v43, 0.0  ;;  %v5220_v44 = vmax.f32 %v5188_v4, 0.0  ;;  %v5221_v48 = vmax.f32 %v5189_v14, 0.0 }
 0x27d   : > { %v5222_v28 = vmax.f32 %v9315_v10, 0.0  ;;  %v5223_v15 = vmax.f32 %v5191_v9, 0.0  ;;  %v5224_v32 = vmax.f32 %v5192_v6, 0.0  ;;  %v5225_v17 = vmax.f32 %v5193_v7, 0.0 }
 0x27e   : > { %v5226_v36 = vmax.f32 %v5194_v21, 0.0  ;;  %v5227_v47 = vmax.f32 %v5195_v33, 0.0  ;;  %v5228_v40 = vmax.f32 %v5196_v26, 0.0  ;;  %v5229_v55 = vmax.f32 %v5197_v53, 0.0 }
 0x27f   : > { %v6152_v63 = vpack.c.bf16 %v5199_v24, %v5198_v49  ;;  %v6157_v16 = vpack.c.bf16 %v5201_v2, %v5200_v23  ;;  %v6162_v13 = vpack.c.bf16 %v5203_v38, %v5202_v11  ;;  %v6167_v56 = vpack.c.bf16 %v5205_v29, %v5204_v5 }
 0x280   : > { %v6172_v58 = vpack.c.bf16 %v5207_v19, %v5206_v0  ;;  %v6177_v46 = vpack.c.bf16 %v5209_v31, %v5208_v41  ;;  %v6182_v60 = vpack.c.bf16 %v5211_v34, %v5210_v59  ;;  %v6187_v8 = vpack.c.bf16 %v5213_v54, %v5212_v50 }
 0x281   : > { %6153 = vst [vmem:[%s9332_s5] sm:$0xff] %v6152_v63   ;;  %6229 = vst [vmem:[%s9332_s5 + $0x8] sm:$0xff] %v6157_v16   ;;  %v6192_v22 = vpack.c.bf16 %v5215_v57, %v5214_v45  ;;  %v6197_v30 = vpack.c.bf16 %v5217_v37, %v5216_v18  ;;  %v6202_v12 = vpack.c.bf16 %v5219_v42, %v5218_v51 }
 0x282   : > { %6230 = vst [vmem:[%s9332_s5 + $0x10] sm:$0xff] %v6162_v13   ;;  %6231 = vst [vmem:[%s9332_s5 + $0x18] sm:$0xff] %v6167_v56   ;;  %v6207_v35 = vpack.c.bf16 %v5221_v48, %v5220_v44  ;;  %v6212_v20 = vpack.c.bf16 %v5223_v15, %v5222_v28  ;;  %v6217_v39 = vpack.c.bf16 %v5225_v17, %v5224_v32 }
 0x283   : > { %6232 = vst [vmem:[%s9332_s5 + $0x20] sm:$0xff] %v6172_v58   ;;  %6233 = vst [vmem:[%s9332_s5 + $0x28] sm:$0xff] %v6177_v46   ;;  %v6222_v3 = vpack.c.bf16 %v5227_v47, %v5226_v36  ;;  %v6227_v27 = vpack.c.bf16 %v5229_v55, %v5228_v40 }
 0x284   : > { %6234 = vst [vmem:[%s9332_s5 + $0x30] sm:$0xff] %v6182_v60   ;;  %6235 = vst [vmem:[%s9332_s5 + $0x38] sm:$0xff] %v6187_v8  }
 0x285   : > { %6236 = vst [vmem:[%s9332_s5 + $0x40] sm:$0xff] %v6192_v22   ;;  %6237 = vst [vmem:[%s9332_s5 + $0x48] sm:$0xff] %v6197_v30  }
 0x286   : > { %6238 = vst [vmem:[%s9332_s5 + $0x50] sm:$0xff] %v6202_v12   ;;  %6239 = vst [vmem:[%s9332_s5 + $0x58] sm:$0xff] %v6207_v35  }
 0x287   : > { %6240 = vst [vmem:[%s9332_s5 + $0x60] sm:$0xff] %v6212_v20   ;;  %6241 = vst [vmem:[%s9332_s5 + $0x68] sm:$0xff] %v6217_v39  }
 0x288   : > { %6242 = vst [vmem:[%s9332_s5 + $0x70] sm:$0xff] %v6222_v3   ;;  %6243 = vst [vmem:[%s9332_s5 + $0x78] sm:$0xff] %v6227_v27  }
 0x289 PF: > { %s13_s12 = sadd.s32 1, %s7215_s12  }
 0x28a   : > { %p10_p4 = scmp.ge.s32.totalorder %s13_s12, 4  }
 0x28c   :  { %12 = sbr.rel (!%p10_p4) target bundleno = 1 (0x1), region = 72 }

// kernel: res_block_forward.3
= control target key start
LH: loop header
LB: loop body
LE: loop exit
PB: predicated region body
PF: predicated region fallthrough
CT: control target
= control target key end

     0   :  { %9 = vsyncpa [#allocation3], 0  ;;  %s9748_s0 = inlined_call_operand.vmem [shape: bf16[2,18,18,128], index: 0, kind: input, shape index: {}]   ;;  %s9749_s1 = inlined_call_operand.vmem [shape: bf16[9,128,64], index: 1, kind: input, shape index: {}]   ;;  %s9750_s2 = inlined_call_operand.vmem [shape: f32[1,64], index: 2, kind: input, shape index: {}]   ;;  %s9751_s3 = inlined_call_operand.vmem [shape: f32[2,16,16,64], index: 3, kind: input, shape index: {}]   ;;  %s9752_s4 = inlined_call_operand.hbm [shape: f32[2,16,16,64], index: 4, kind: output, shape index: {}]  }
   0x1   :  { %11 = vsyncpa [#allocation3 + $0x1], 0  ;;  %s7337_s15 = smov 0   ;;  %s7339_s16 = smov 0  }
   0x2   :  { %s7341_s17 = smov 0   ;;  %s7343_s18 = smov 0  }
   0x3 LB: > { %s7358_s19 = sadd.s32 4294967295, %s7307_s18   ;;  %s5491_s20 = sadd.s32 4294967294, %s7307_s18   ;;  %s7307_s18 = sphi %s7343_s18, %s9826_s18   ;;  %s7303_s17 = sphi %s7341_s17, %s9825_s17   ;;  %s7299_s16 = sphi %s7339_s16, %s9824_s16   ;;  %s7295_s15 = sphi %s7337_s15, %s9823_s15  }
   0x4   : > { %s7362_s21 = sadd.s32 1, %s7307_s18   ;;  %s118_s22 = sadd.s32 1, %s7303_s17 }
   0x5   : > { %s115_s23 = ssub.s32 %s7307_s18, %s7362_s21  ;;  %p128_p0 = scmp.ne.s32.totalorder %s7303_s17, %s7299_s16 }
   0x6   : > { %p116_p1 = scmp.eq.s32.totalorder %s115_s23, 0  ;;  %p129_p2 = scmp.eq.s32.totalorder %s7358_s19, 1 }
   0x7   : > { %p134_p3 = scmp.ne.s32.totalorder %s7299_s16, %s7295_s15  ;;  %p135_p4 = scmp.eq.s32.totalorder %s5491_s20, 1 }
   0x8   : > { %s7373_s24 = scalar_select %p116_p1, %s7303_s17, %s118_s22  }
   0x9   : > { %p7375_p5 = por %p129_p2, %p128_p0  ;;  %p7379_p6 = por %p135_p4, %p134_p3 }
   0xa   : > { %p5494_p7 = scmp.ge.s32.totalorder %s7307_s18, 1  ;;  %p175_p8 = scmp.lt.s32.totalorder %s7307_s18, 3 }
   0xc   : > { %p176_p9 = pnand %p5494_p7, %p175_p8 }
   0xe   : > { %179 = sbr.rel (%p176_p9) target bundleno = 671 (0x29f), region = 36 }
  0x15   : > { %v7053_v0 = vld [vmem:[%s9749_s1 + $0x40] sm:$0xff]   ;;  %p206_p10 = scmp.lt.s32.totalorder %s7358_s19, 1  ;;  %v7055_v2 = vld [vmem:[%s9749_s1 + $0x48] sm:$0xff]   ;;  %v7057_v4 = vld [vmem:[%s9749_s1 + $0x50] sm:$0xff]   ;;  %vm281_vm0 = vsmask.f32 3328 }
  0x16   : > { %v7054_v1 = vld [vmem:[%s9749_s1 + $0x100] sm:$0xff]   ;;  %6307 = vmatprep.subr.bf16.mxu1 %v7053_v0  ;;  %v7056_v3 = vld [vmem:[%s9749_s1 + $0x108] sm:$0xff]   ;;  %v7058_v5 = vld [vmem:[%s9749_s1 + $0x110] sm:$0xff]   ;;  %vm282_vm1 = vsmask.f32 7440  ;;  %vm1311_vm3 = vcmask 1042432  }
  0x17   : > { %6499 = vmatprep.subr.bf16.mxu0 %v7054_v1  ;;  %6308 = vmatpush3.bf16.msra.mxu1 %v7053_v0  ;;  %s7405_s13 = scalar_select %p206_p10, %s7358_s19, 1  ;;  %v7059_v6 = vld [vmem:[%s9749_s1 + $0x58] sm:$0xff]   ;;  %v7061_v8 = vld [vmem:[%s9749_s1 + $0x60] sm:$0xff]   ;;  %v7063_v10 = vld [vmem:[%s9749_s1 + $0x68] sm:$0xff]   ;;  %vm1312_vm4 = vcmask 1046532   ;;  %vm5065_vm6 = vcmask 523264  }
  0x18   : > { %6500 = vmatpush3.bf16.msra.mxu0 %v7054_v1  ;;  %6309 = vmatprep.subr.bf16.mxu1 %v7055_v2  ;;  %v7060_v7 = vld [vmem:[%s9749_s1 + $0x118] sm:$0xff]   ;;  %v7062_v9 = vld [vmem:[%s9749_s1 + $0x120] sm:$0xff]   ;;  %v7064_v11 = vld [vmem:[%s9749_s1 + $0x128] sm:$0xff]   ;;  %s203_s23 = sand.u32 1, %s7299_s16   ;;  %s6090_s5 = sshll.u32 %s7358_s19, 12 }
  0x19   : > { %6501 = vmatprep.subr.bf16.mxu0 %v7056_v3  ;;  %s7011_s27 = smul.u32 216, %s7405_s13  ;;  %v7065_v25 = vld [vmem:[%s9749_s1 + $0x70] sm:$0xff]   ;;  %v7067_v36 = vld [vmem:[%s9749_s1 + $0x78] sm:$0xff]   ;;  %vm7455_vm2 = vmor %vm281_vm0, %vm282_vm1  ;;  %s6089_s22 = sshll.u32 %s7405_s13, 8 }
  0x1a   : > { %v7066_v30 = vld [vmem:[%s9749_s1 + $0x130] sm:$0xff]   ;;  %v7068_v51 = vld [vmem:[%s9749_s1 + $0x138] sm:$0xff]   ;;  %vm7701_vm5 = vmor %vm1311_vm3, %vm1312_vm4  ;;  %s9482_s29 = scalar_lea.vmem %s9751_s3, %s6089_s22  ;;  %s9494_s13 = sshll.u32 %s203_s23, 8 }
  0x1b   : > { %6310 = vmatpush3.bf16.msra.mxu1 %v7055_v2  ;;  %s7423_s8 = scalar_lea.vmem %s9748_s0, %s7011_s27  ;;  %s9520_s30 = scalar_lea.vmem [#allocation2], %s9494_s13 }
  0x1c   : > { %6502 = vmatpush3.bf16.msra.mxu0 %v7056_v3  ;;  %6311 = vmatprep.subr.bf16.mxu1 %v7057_v4  ;;  %v217_v12 = vld [vmem:[%s7423_s8] sm:$0xf]  ;;  %v218_v13 = vld [vmem:[%s7423_s8 + $0x4] sm:$0xf]  ;;  %v265_v14 = vld [vmem:[%s7423_s8 + $0x8] sm:$0x1]  ;;  %s9671_s10 = scalar_lea.hbm %s9752_s4, %s6090_s5 }
  0x1d   : > { %6503 = vmatprep.subr.bf16.mxu0 %v7058_v5  ;;  %v285_v15 = vshrl.u32 %v217_v12, 16  ;;  %v288_v16 = vshll.u32 %v217_v12, 16  ;;  %v294_v17 = vshll.u32 %v218_v13, 16  ;;  %v298_v18 = vshrl.u32 %v218_v13, 16  ;;  %v5691_v20 = vld [vmem:[%s7423_s8 + $0xc] sm:$0xf] }
  0x1e   : > { %v304_v19 = vshll.u32 %v265_v14, 16  ;;  %v7436_v23 = vld [vmem:[%s7423_s8 + $0x10] sm:$0xf]  ;;  %v7439_v24 = vld [vmem:[%s7423_s8 + $0x14] sm:$0x1]  ;;  %v2184_v29 = vshrl.u32 %v5691_v20, 16 }
  0x1f   : > { %6312 = vmatpush3.bf16.msra.mxu1 %v7057_v4  ;;  %v287_v21 = vrot.slane %v285_v15, 4  ;;  %v290_v22 = vrot.slane %v288_v16, 5  ;;  %v296_v26 = vrot.slane %v294_v17, 5  ;;  %v300_v27 = vrot.slane %v298_v18, 4  ;;  %v219_v35 = vld [vmem:[%s7423_s8 + $0xc] sm:$0xf] }
  0x20   : > { %6504 = vmatpush3.bf16.msra.mxu0 %v7058_v5  ;;  %6313 = vmatprep.subr.bf16.mxu1 %v7059_v6  ;;  %v306_v28 = vrot.slane %v304_v19, 5  ;;  %v2187_v32 = vshll.u32 %v5691_v20, 16  ;;  %v2193_v33 = vshll.u32 %v7436_v23, 16  ;;  %v2197_v34 = vshrl.u32 %v7436_v23, 16  ;;  %v220_v42 = vld [vmem:[%s7423_s8 + $0x10] sm:$0xf] }
  0x21   : > { %6505 = vmatprep.subr.bf16.mxu0 %v7060_v7  ;;  %v291_v31 = vor.u32 %v290_v22, %v287_v21  ;;  %v301_v38 = vor.u32 %v300_v27, %v296_v26  ;;  %v2186_v39 = vrot.slane %v2184_v29, 4  ;;  %v2203_v40 = vshll.u32 %v7439_v24, 16  ;;  %v266_v55 = vld [vmem:[%s7423_s8 + $0x14] sm:$0x1]  ;;  %v5694_v57 = vld [vmem:[%s7423_s8 + $0x18] sm:$0xf] }
  0x22   : > { %v2958_v41 = vrot.slane %v7439_v24, 5  ;;  %v2189_v44 = vrot.slane %v2187_v32, 5  ;;  %v2195_v45 = vrot.slane %v2193_v33, 5  ;;  %v2199_v46 = vrot.slane %v2197_v34, 4  ;;  %v7472_v62 = vld [vmem:[%s7423_s8 + $0x1c] sm:$0xf] }
  0x23   : > { %6314 = vmatpush3.bf16.msra.mxu1 %v7059_v6  ;;  %v292_v43 = vrot.slane %v291_v31, 4  ;;  %v302_v47 = vrot.slane %v301_v38, 4  ;;  %v2205_v48 = vrot.slane %v2203_v40, 5  ;;  %v309_v49 = vshrl.u32 %v219_v35, 16  ;;  %v7069_v3 = vld [vmem:[%s9749_s1] sm:$0xff]   ;;  %s5417_s6 = sshll.u32 %s9520_s30, 4  ;;  %s9675_s6 = int_to_ptr.vmem [resolvable:$true] %s5417_s6 }
  0x24   : > { %6506 = vmatpush3.bf16.msra.mxu0 %v7060_v7  ;;  %6315 = vmatprep.subr.bf16.mxu1 %v7061_v8  ;;  %v312_v50 = vshll.u32 %v219_v35, 16  ;;  %v2190_v53 = vor.u32 %v2189_v44, %v2186_v39  ;;  %v2200_v54 = vor.u32 %v2199_v46, %v2195_v45  ;;  %v318_v56 = vshll.u32 %v220_v42, 16  ;;  %v7480_v4 = vld [vmem:[%s9749_s1 + $0x140] sm:$0xff]   ;;  %v221_v21 = vld [vmem:[%s7423_s8 + $0x18] sm:$0xf]  ;;  %v7072_v46 = vld [vmem:[%s9749_s1 + $0x8] sm:$0xff]  }
  0x25   : > { %6507 = vmatprep.subr.bf16.mxu0 %v7062_v9  ;;  %v297_v52 = vsel %vm7455_vm2, %v292_v43, %v296_v26  ;;  %v307_v58 = vsel %vm7455_vm2, %v302_v47, %v306_v28  ;;  %v311_v59 = vrot.slane %v309_v49, 4  ;;  %v322_v61 = vshrl.u32 %v220_v42, 16  ;;  %v222_v28 = vld [vmem:[%s7423_s8 + $0x1c] sm:$0xf]  ;;  %v267_v33 = vld [vmem:[%s7423_s8 + $0x20] sm:$0x1] }
  0x26   : > { %v314_v60 = vrot.slane %v312_v50, 5  ;;  %v5515_v63 = vcombine.low %v297_v52, %v307_v58  ;;  %v2191_v0 = vrot.slane %v2190_v53, 4  ;;  %v2201_v1 = vrot.slane %v2200_v54, 4  ;;  %v5697_v39 = vld [vmem:[%s7423_s8 + $0x24] sm:$0xf]  ;;  %s9707_s19 = scalar_lea.sflag [#allocation3], %s203_s23 }
  0x27   : > { %6316 = vmatpush3.bf16.msra.mxu1 %v7061_v8  ;;  %v320_v2 = vrot.slane %v318_v56, 5  ;;  %v324_v6 = vrot.slane %v322_v61, 4  ;;  %v328_v7 = vshll.u32 %v266_v55, 16  ;;  %v7483_v8 = vld [vmem:[%s7423_s8 + $0x20] sm:$0x1]  ;;  %v2211_v12 = vshll.u32 %v5694_v57, 16 }
  0x28   : > { %6508 = vmatpush3.bf16.msra.mxu0 %v7062_v9  ;;  %6317 = vmatprep.subr.bf16.mxu1 %v7063_v10  ;;  %v315_v5 = vor.u32 %v314_v60, %v311_v59  ;;  %v2196_v9 = vsel %vm7455_vm2, %v2191_v0, %v2195_v45  ;;  %v2217_v19 = vshll.u32 %v7472_v62, 16  ;;  %v2221_v20 = vshrl.u32 %v7472_v62, 16  ;;  %v7508_v45 = vld [vmem:[%s7423_s8 + $0x28] sm:$0xf]  ;;  %v223_v52 = vld [vmem:[%s7423_s8 + $0x24] sm:$0xf] }
  0x29   : > { %6509 = vmatprep.subr.bf16.mxu0 %v7064_v11  ;;  %6323 = vmatprep.mubr.bf16.mxu1 %v5515_v63  ;;  %v325_v15 = vor.u32 %v324_v6, %v320_v2  ;;  %v330_v16 = vrot.slane %v328_v7, 5  ;;  %v2213_v18 = vrot.slane %v2211_v12, 5  ;;  %v2227_v26 = vshll.u32 %v7483_v8, 16  ;;  %v7071_v63 = vld [vmem:[%s9749_s1 + $0x148] sm:$0xff]   ;;  %s7245_s11 = scalar_lea.vmem %s9675_s6, 4096  ;;  %s7309_s12 = smov [#allocation2]  }
  0x2a   : > { %v316_v14 = vrot.slane %v315_v5, 4  ;;  %v2962_v27 = vrot.slane %v7472_v62, 5  ;;  %v2223_v31 = vrot.slane %v2221_v20, 4  ;;  %v2965_v32 = vrot.slane %v7483_v8, 5  ;;  %v224_v5 = vld [vmem:[%s7423_s8 + $0x28] sm:$0xf]  ;;  %p7246_p11 = scmp.ne.s32.totalorder %s9675_s6, %s7245_s11 }
  0x2b   : > { %6318 = vmatpush3.bf16.msra.mxu1 %v7063_v10  ;;  %v2206_v10 = vsel %vm7455_vm2, %v2201_v1, %v2205_v48  ;;  %v2229_v35 = vrot.slane %v2227_v26, 5  ;;  %v333_v38 = vshrl.u32 %v221_v21, 16  ;;  %v336_v44 = vshll.u32 %v221_v21, 16  ;;  %s7249_s14 = sshll.u32 %s7309_s12, 4  ;;  %s7250_s14 = int_to_ptr.vmem [resolvable:$false] %s7249_s14 }
  0x2c   : > { %6510 = vmatpush3.bf16.msra.mxu0 %v7064_v11  ;;  %6319 = vmatprep.subr.bf16.mxu1 %v7065_v25  ;;  %v2208_v11 = vshrl.u32 %v5694_v57, 16  ;;  %v5755_v13 = vcombine.low %v2196_v9, %v2206_v10  ;;  %v321_v22 = vsel %vm7455_vm2, %v316_v14, %v320_v2  ;;  %v342_v48 = vshll.u32 %v222_v28, 16  ;;  %p7247_p12 = pnand %p7246_p11, %p7375_p5  ;;  %p7252_p0 = scmp.lt.s32.totalorder %s9675_s6, %s7250_s14 }
  0x2d   : > { %6511 = vmatprep.subr.bf16.mxu0 %v7066_v30  ;;  %v335_v47 = vrot.slane %v333_v38, 4  ;;  %v346_v49 = vshrl.u32 %v222_v28, 16  ;;  %v352_v50 = vshll.u32 %v267_v33, 16  ;;  %v338_v55 = vrot.slane %v336_v44, 5  ;;  %v7539_v33 = vld [vmem:[%s7423_s8 + $0x34] sm:$0xf] }
  0x2e   : > { %v2210_v17 = vrot.slane %v2208_v11, 4  ;;  %6515 = vmatprep.mubr.bf16.mxu0 %v5755_v13  ;;  %v2232_v56 = vshrl.u32 %v5697_v39, 16  ;;  %v344_v57 = vrot.slane %v342_v48, 5  ;;  %v2235_v60 = vshll.u32 %v5697_v39, 16  ;;  %v268_v11 = vld [vmem:[%s7423_s8 + $0x2c] sm:$0x1]  ;;  %p7248_p13 = pneg %p7247_p12 }
  0x2f   : > { %6320 = vmatpush3.bf16.msra.mxu1 %v7065_v25  ;;  %v326_v25 = vrot.slane %v325_v15, 4  ;;  %v348_v58 = vrot.slane %v346_v49, 4  ;;  %v354_v59 = vrot.slane %v352_v50, 5  ;;  %v339_v0 = vor.u32 %v338_v55, %v335_v47  ;;  %v7074_v48 = vld [vmem:[%s9749_s1 + $0x158] sm:$0xff]  }
  0x30   : > { %6512 = vmatpush3.bf16.msra.mxu0 %v7066_v30  ;;  %6321 = vmatprep.subr.bf16.mxu1 %v7067_v36  ;;  %v2214_v29 = vor.u32 %v2213_v18, %v2210_v17  ;;  %v2219_v30 = vrot.slane %v2217_v19, 5  ;;  %v2234_v1 = vrot.slane %v2232_v56, 4  ;;  %v2241_v2 = vshll.u32 %v7508_v45, 16 }
  0x31   : > { %6513 = vmatprep.subr.bf16.mxu0 %v7068_v51  ;;  %v331_v34 = vsel %vm7455_vm2, %v326_v25, %v330_v16  ;;  %v349_v7 = vor.u32 %v348_v58, %v344_v57  ;;  %v2237_v9 = vrot.slane %v2235_v60, 5  ;;  %v2245_v10 = vshrl.u32 %v7508_v45, 16  ;;  %v5700_v16 = vld [vmem:[%s7423_s8 + $0x30] sm:$0xf]  ;;  %v7081_v60 = vld [vmem:[%s9749_s1 + $0x20] sm:$0xff]  }
  0x32   : > { %v5516_v40 = vcombine.low %v321_v22, %v331_v34  ;;  %v2215_v42 = vrot.slane %v2214_v29, 4  ;;  %v2224_v43 = vor.u32 %v2223_v31, %v2219_v30  ;;  %v340_v12 = vrot.slane %v339_v0, 4  ;;  %v7078_v34 = vld [vmem:[%s9749_s1 + $0x18] sm:$0xff]  }
  0x33   : > { %6322 = vmatpush3.bf16.msra.mxu1 %v7067_v36  ;;  %v7504_v36 = vrot.slane %v2962_v27, 4  ;;  %v2243_v13 = vrot.slane %v2241_v2, 5  ;;  %v357_v15 = vshrl.u32 %v223_v52, 16  ;;  %v350_v17 = vrot.slane %v349_v7, 4  ;;  %v269_v2 = vld [vmem:[%s7423_s8 + $0x38] sm:$0x1] }
  0x34   : > { %6514 = vmatpush3.bf16.msra.mxu0 %v7068_v51  ;;  %6355 = vmatprep.subr.bf16.mxu1 %v7069_v3  ;;  %v7514_v51 = vld [vmem:[%s7423_s8 + $0x2c] sm:$0x1]  ;;  %v2220_v53 = vsel %vm7455_vm2, %v2215_v42, %v2219_v30  ;;  %v2225_v54 = vrot.slane %v2224_v43, 4  ;;  %v2238_v18 = vor.u32 %v2237_v9, %v2234_v1  ;;  %v2247_v19 = vrot.slane %v2245_v10, 4  ;;  %v5703_v9 = vld [vmem:[%s7423_s8 + $0x3c] sm:$0xf] }
  0x35   : > { %6547 = vmatprep.subr.bf16.mxu0 %v7480_v4  ;;  %v2251_v14 = vshll.u32 %v7514_v51, 16  ;;  %v360_v20 = vshll.u32 %v223_v52, 16  ;;  %v345_v21 = vsel %vm7455_vm2, %v340_v12, %v344_v57  ;;  %v359_v25 = vrot.slane %v357_v15, 4 }
  0x36   : > { %6324 = vmatmul.mubr.bf16.vlgmr.msra.gmra.mrb[0].mxu1 %v5516_v40  ;;  %v2230_v61 = vsel %vm7455_vm2, %v2225_v54, %v2229_v35  ;;  %v366_v26 = vshll.u32 %v224_v5, 16  ;;  %v355_v28 = vsel %vm7455_vm2, %v350_v17, %v354_v59  ;;  %v2239_v29 = vrot.slane %v2238_v18, 4  ;;  %v225_v54 = vld [vmem:[%s7423_s8 + $0x30] sm:$0xf]  ;;  %v226_v59 = vld [vmem:[%s7423_s8 + $0x34] sm:$0xf] }
  0x37   : > { %6356 = vmatpush3.bf16.msra.mxu1 %v7069_v3  ;;  %v7075_v3 = vld [vmem:[%s9749_s1 + $0x10] sm:$0xff]   ;;  %v5756_v6 = vcombine.low %v2220_v53, %v2230_v61  ;;  %v2253_v22 = vrot.slane %v2251_v14, 5  ;;  %v2248_v30 = vor.u32 %v2247_v19, %v2243_v13  ;;  %v362_v31 = vrot.slane %v360_v20, 5  ;;  %v7083_v14 = vld [vmem:[%s9749_s1 + $0x28] sm:$0xff]   ;;  %v7573_v19 = vld [vmem:[%s7423_s8 + $0x40] sm:$0xf] }
  0x38   : > { %6357 = vmatprep.subr.bf16.mxu1 %v7072_v46  ;;  %v5517_v35 = vcombine.low %v345_v21, %v355_v28  ;;  %v368_v38 = vrot.slane %v366_v26, 5  ;;  %v370_v39 = vshrl.u32 %v224_v5, 16  ;;  %v376_v40 = vshll.u32 %v268_v11, 16  ;;  %v7076_v20 = vld [vmem:[%s9749_s1 + $0x160] sm:$0xff]  }
  0x39   : > { %6516 = vmatmul.mubr.bf16.vlgmr.msra.gmra.mrb[0].mxu0 %v5756_v6  ;;  %v2244_v42 = vsel %vm7455_vm2, %v2239_v29, %v2243_v13  ;;  %v2249_v43 = vrot.slane %v2248_v30, 4  ;;  %v363_v44 = vor.u32 %v362_v31, %v359_v25  ;;  %v2256_v47 = vshrl.u32 %v5700_v16, 16  ;;  %v7581_v28 = vld [vmem:[%s7423_s8 + $0x44] sm:$0x1] }
  0x3a   : > { %6548 = vmatpush3.bf16.msra.mxu0 %v7480_v4  ;;  %v7073_v4 = vld [vmem:[%s9749_s1 + $0x150] sm:$0xff]   ;;  %6327 = vmatprep.mubr.bf16.mxu1 %v5517_v35  ;;  %v372_v49 = vrot.slane %v370_v39, 4  ;;  %v378_v50 = vrot.slane %v376_v40, 5  ;;  %v2259_v52 = vshll.u32 %v5700_v16, 16  ;;  %v2265_v53 = vshll.u32 %v7539_v33, 16 }
  0x3b   : > { %6358 = vmatpush3.bf16.msra.mxu1 %v7072_v46  ;;  %6549 = vmatprep.subr.bf16.mxu0 %v7071_v63  ;;  %v7550_v46 = vld [vmem:[%s7423_s8 + $0x38] sm:$0x1]  ;;  %v2254_v55 = vsel %vm7455_vm2, %v2249_v43, %v2253_v22  ;;  %v364_v56 = vrot.slane %v363_v44, 4  ;;  %v2258_v57 = vrot.slane %v2256_v47, 4  ;;  %v2269_v58 = vshrl.u32 %v7539_v33, 16  ;;  %v7085_v35 = vld [vmem:[%s9749_s1 + $0x30] sm:$0xff]  }
  0x3c   : > { %6359 = vmatprep.subr.bf16.mxu1 %v7075_v3  ;;  %v5757_v61 = vcombine.low %v2244_v42, %v2254_v55  ;;  %v2261_v0 = vrot.slane %v2259_v52, 5  ;;  %v2267_v1 = vrot.slane %v2265_v53, 5  ;;  %v2275_v6 = vshll.u32 %v7550_v46, 16  ;;  %v228_v55 = vld [vmem:[%s7423_s8 + $0x40] sm:$0xf] }
  0x3d   : > { %v369_v5 = vsel %vm7455_vm2, %v364_v56, %v368_v38  ;;  %v381_v7 = vshrl.u32 %v225_v54, 16  ;;  %v384_v12 = vshll.u32 %v225_v54, 16  ;;  %v390_v13 = vshll.u32 %v226_v59, 16 }
  0x3e   : > { %6550 = vmatpush3.bf16.msra.mxu0 %v7071_v63  ;;  %v373_v63 = vor.u32 %v372_v49, %v368_v38  ;;  %6519 = vmatprep.mubr.bf16.mxu0 %v5757_v61  ;;  %v2262_v11 = vor.u32 %v2261_v0, %v2258_v57  ;;  %v2277_v16 = vrot.slane %v2275_v6, 5  ;;  %v394_v18 = vshrl.u32 %v226_v59, 16 }
  0x3f   : > { %6360 = vmatpush3.bf16.msra.mxu1 %v7075_v3  ;;  %6551 = vmatprep.subr.bf16.mxu0 %v7073_v4  ;;  %v2271_v3 = vrot.slane %v2269_v58, 4  ;;  %v383_v17 = vrot.slane %v381_v7, 4  ;;  %v386_v25 = vrot.slane %v384_v12, 5  ;;  %v392_v26 = vrot.slane %v390_v13, 5 }
  0x40   : > { %6361 = vmatprep.subr.bf16.mxu1 %v7078_v34  ;;  %v374_v10 = vrot.slane %v373_v63, 4  ;;  %v2263_v22 = vrot.slane %v2262_v11, 4  ;;  %v396_v31 = vrot.slane %v394_v18, 4  ;;  %v2280_v40 = vshrl.u32 %v5703_v9, 16  ;;  %v270_v63 = vld [vmem:[%s7423_s8 + $0x44] sm:$0x1] }
  0x41   : > { %v2272_v15 = vor.u32 %v2271_v3, %v2267_v1  ;;  %v387_v39 = vor.u32 %v386_v25, %v383_v17  ;;  %v2283_v42 = vshll.u32 %v5703_v9, 16  ;;  %v2289_v49 = vshll.u32 %v7573_v19, 16  ;;  %v5706_v9 = vld [vmem:[%s7423_s8 + $0x48] sm:$0xf] }
  0x42   : > { %6552 = vmatpush3.bf16.msra.mxu0 %v7073_v4  ;;  %v379_v21 = vsel %vm7455_vm2, %v374_v10, %v378_v50  ;;  %v400_v4 = vshll.u32 %v269_v2, 16  ;;  %v2268_v38 = vsel %vm7455_vm2, %v2263_v22, %v2267_v1  ;;  %v397_v44 = vor.u32 %v396_v31, %v392_v26  ;;  %v7087_v2 = vld [vmem:[%s9749_s1 + $0x38] sm:$0xff]   ;;  %v7614_v22 = vld [vmem:[%s7423_s8 + $0x50] sm:$0x1] }
  0x43   : > { %6362 = vmatpush3.bf16.msra.mxu1 %v7078_v34  ;;  %6553 = vmatprep.subr.bf16.mxu0 %v7074_v48  ;;  %v5518_v29 = vcombine.low %v369_v5, %v379_v21  ;;  %v2273_v30 = vrot.slane %v2272_v15, 4  ;;  %v227_v34 = vld [vmem:[%s7423_s8 + $0x3c] sm:$0xf]  ;;  %v388_v52 = vrot.slane %v387_v39, 4  ;;  %v2282_v53 = vrot.slane %v2280_v40, 4  ;;  %v7079_v15 = vld [vmem:[%s9749_s1 + $0x170] sm:$0xff]  }
  0x44   : > { %6363 = vmatprep.subr.bf16.mxu1 %v7081_v60  ;;  %v402_v47 = vrot.slane %v400_v4, 5  ;;  %v2285_v54 = vrot.slane %v2283_v42, 5  ;;  %v398_v56 = vrot.slane %v397_v44, 4  ;;  %v2291_v57 = vrot.slane %v2289_v49, 5  ;;  %v7080_v31 = vld [vmem:[%s9749_s1 + $0x178] sm:$0xff]   ;;  %v7625_v4 = vld [vmem:[%s9749_s1 + $0x80] sm:$0xff]  }
  0x45   : > { %6328 = vmatmul.mubr.bf16.gmra.mrb[4].mxu1 %v5518_v29  ;;  %v2278_v43 = vsel %vm7455_vm2, %v2273_v30, %v2277_v16  ;;  %v2293_v58 = vshrl.u32 %v7573_v19, 16  ;;  %v2299_v59 = vshll.u32 %v7581_v28, 16  ;;  %v405_v0 = vshrl.u32 %v227_v34, 16  ;;  %v229_v30 = vld [vmem:[%s7423_s8 + $0x48] sm:$0xf] }
  0x46   : > { %6554 = vmatpush3.bf16.msra.mxu0 %v7074_v48  ;;  %v5758_v50 = vcombine.low %v2268_v38, %v2278_v43  ;;  %v7077_v48 = vld [vmem:[%s9749_s1 + $0x168] sm:$0xff]   ;;  %v2286_v61 = vor.u32 %v2285_v54, %v2282_v53  ;;  %v408_v1 = vshll.u32 %v227_v34, 16  ;;  %v403_v5 = vsel %vm7455_vm2, %v398_v56, %v402_v47  ;;  %v271_v54 = vld [vmem:[%s7423_s8 + $0x50] sm:$0x1] }
  0x47   : > { %6364 = vmatpush3.bf16.msra.mxu1 %v7081_v60  ;;  %6555 = vmatprep.subr.bf16.mxu0 %v7076_v20  ;;  %v393_v60 = vsel %vm7455_vm2, %v388_v52, %v392_v26  ;;  %v2295_v3 = vrot.slane %v2293_v58, 4  ;;  %v2301_v6 = vrot.slane %v2299_v59, 5  ;;  %v414_v7 = vshll.u32 %v228_v55, 16  ;;  %v230_v53 = vld [vmem:[%s7423_s8 + $0x4c] sm:$0xf] }
  0x48   : > { %6365 = vmatprep.subr.bf16.mxu1 %v7083_v14  ;;  %6520 = vmatmul.mubr.bf16.gmra.mrb[4].mxu0 %v5758_v50  ;;  %v5519_v10 = vcombine.low %v393_v60, %v403_v5  ;;  %v2287_v11 = vrot.slane %v2286_v61, 4  ;;  %v407_v12 = vrot.slane %v405_v0, 4  ;;  %v410_v13 = vrot.slane %v408_v1, 5  ;;  %v5709_v58 = vld [vmem:[%s7423_s8 + $0x54] sm:$0xf] }
  0x49   : > { %v2296_v16 = vor.u32 %v2295_v3, %v2291_v57  ;;  %v416_v17 = vrot.slane %v414_v7, 5  ;;  %v418_v18 = vshrl.u32 %v228_v55, 16  ;;  %v424_v21 = vshll.u32 %v270_v63, 16  ;;  %v7639_v0 = vld [vmem:[%s7423_s8 + $0x58] sm:$0xf] }
  0x4a   : > { %6556 = vmatpush3.bf16.msra.mxu0 %v7076_v20  ;;  %6331 = vmatprep.mubr.bf16.mxu1 %v5519_v10  ;;  %v2292_v20 = vsel %vm7455_vm2, %v2287_v11, %v2291_v57  ;;  %v411_v25 = vor.u32 %v410_v13, %v407_v12  ;;  %v2304_v26 = vshrl.u32 %v5706_v9, 16  ;;  %v2307_v29 = vshll.u32 %v5706_v9, 16 }
  0x4b   : > { %6366 = vmatpush3.bf16.msra.mxu1 %v7083_v14  ;;  %v7608_v14 = vld [vmem:[%s7423_s8 + $0x4c] sm:$0xf]  ;;  %6557 = vmatprep.subr.bf16.mxu0 %v7077_v48  ;;  %v2297_v34 = vrot.slane %v2296_v16, 4  ;;  %v426_v38 = vrot.slane %v424_v21, 5  ;;  %v2323_v52 = vshll.u32 %v7614_v22, 16  ;;  %v429_v61 = vshrl.u32 %v229_v30, 16 }
  0x4c   : > { %6367 = vmatprep.subr.bf16.mxu1 %v7085_v35  ;;  %v2313_v39 = vshll.u32 %v7608_v14, 16  ;;  %v412_v40 = vrot.slane %v411_v25, 4  ;;  %v2306_v42 = vrot.slane %v2304_v26, 4  ;;  %v2309_v43 = vrot.slane %v2307_v29, 5 }
  0x4d   : > { %v2317_v44 = vshrl.u32 %v7608_v14, 16  ;;  %v2302_v47 = vsel %vm7455_vm2, %v2297_v34, %v2301_v6  ;;  %v2325_v60 = vrot.slane %v2323_v52, 5  ;;  %v432_v63 = vshll.u32 %v229_v30, 16  ;;  %v7644_v6 = vld [vmem:[%s9749_s1 + $0x180] sm:$0xff]  }
  0x4e   : > { %6558 = vmatpush3.bf16.msra.mxu0 %v7077_v48  ;;  %v2315_v50 = vrot.slane %v2313_v39, 5  ;;  %v5759_v55 = vcombine.low %v2292_v20, %v2302_v47  ;;  %v417_v48 = vsel %vm7455_vm2, %v412_v40, %v416_v17  ;;  %v2310_v56 = vor.u32 %v2309_v43, %v2306_v42  ;;  %v7651_v20 = vld [vmem:[%s7423_s8 + $0x5c] sm:$0x1]  ;;  %v232_v43 = vld [vmem:[%s7423_s8 + $0x58] sm:$0xf] }
  0x4f   : > { %6368 = vmatpush3.bf16.msra.mxu1 %v7085_v35  ;;  %v420_v35 = vrot.slane %v418_v18, 4  ;;  %6559 = vmatprep.subr.bf16.mxu0 %v7079_v15  ;;  %v2319_v57 = vrot.slane %v2317_v44, 4  ;;  %v442_v3 = vshrl.u32 %v230_v53, 16  ;;  %v431_v9 = vrot.slane %v429_v61, 4  ;;  %v5712_v52 = vld [vmem:[%s7423_s8 + $0x60] sm:$0xf] }
  0x50   : > { %6369 = vmatprep.subr.bf16.mxu1 %v7087_v2  ;;  %6523 = vmatprep.mubr.bf16.mxu0 %v5759_v55  ;;  %v2311_v1 = vrot.slane %v2310_v56, 4  ;;  %v434_v10 = vrot.slane %v432_v63, 5  ;;  %v448_v11 = vshll.u32 %v271_v54, 16  ;;  %v2328_v25 = vshrl.u32 %v5709_v58, 16 }
  0x51   : > { %v421_v49 = vor.u32 %v420_v35, %v416_v17  ;;  %v2320_v5 = vor.u32 %v2319_v57, %v2315_v50  ;;  %v444_v18 = vrot.slane %v442_v3, 4  ;;  %v2331_v29 = vshll.u32 %v5709_v58, 16  ;;  %v231_v35 = vld [vmem:[%s7423_s8 + $0x54] sm:$0xf] }
  0x52   : > { %6560 = vmatpush3.bf16.msra.mxu0 %v7079_v15  ;;  %v2316_v13 = vsel %vm7455_vm2, %v2311_v1, %v2315_v50  ;;  %v435_v17 = vor.u32 %v434_v10, %v431_v9  ;;  %v450_v21 = vrot.slane %v448_v11, 5  ;;  %v2337_v30 = vshll.u32 %v7639_v0, 16  ;;  %v272_v50 = vld [vmem:[%s7423_s8 + $0x5c] sm:$0x1] }
  0x53   : > { %6370 = vmatpush3.bf16.msra.mxu1 %v7087_v2  ;;  %v422_v59 = vrot.slane %v421_v49, 4  ;;  %v438_v2 = vshll.u32 %v230_v53, 16  ;;  %6561 = vmatprep.subr.bf16.mxu0 %v7080_v31  ;;  %v2321_v15 = vrot.slane %v2320_v5, 4  ;;  %v2341_v34 = vshrl.u32 %v7639_v0, 16 }
  0x54   : > { %6403 = vmatprep.subr.bf16.mxu1 %v7625_v4  ;;  %v436_v39 = vrot.slane %v435_v17, 4  ;;  %v2330_v42 = vrot.slane %v2328_v25, 4  ;;  %v2339_v44 = vrot.slane %v2337_v30, 5  ;;  %v2347_v49 = vshll.u32 %v7651_v20, 16  ;;  %v7675_v17 = vld [vmem:[%s7423_s8 + $0x68] sm:$0x1] }
  0x55   : > { %v427_v7 = vsel %vm7455_vm2, %v422_v59, %v426_v38  ;;  %v440_v16 = vrot.slane %v438_v2, 5  ;;  %v2326_v26 = vsel %vm7455_vm2, %v2321_v15, %v2325_v60  ;;  %v2343_v47 = vrot.slane %v2341_v34, 4  ;;  %v7666_v60 = vld [vmem:[%s7423_s8 + $0x64] sm:$0xf]  ;;  %v7679_v25 = vld [vmem:[%s7423_s8 + $0x60] sm:$0xf] }
  0x56   : > { %v5520_v12 = vcombine.low %v417_v48, %v427_v7  ;;  %6562 = vmatpush3.bf16.msra.mxu0 %v7080_v31  ;;  %v5760_v38 = vcombine.low %v2316_v13, %v2326_v26  ;;  %v2333_v31 = vrot.slane %v2331_v29, 5  ;;  %v453_v55 = vshrl.u32 %v231_v35, 16 }
  0x57   : > { %6595 = vmatprep.subr.bf16.mxu0 %v7644_v6  ;;  %v445_v40 = vor.u32 %v444_v18, %v440_v16  ;;  %v441_v53 = vsel %vm7455_vm2, %v436_v39, %v440_v16  ;;  %v456_v48 = vshll.u32 %v231_v35, 16  ;;  %v2344_v57 = vor.u32 %v2343_v47, %v2339_v44  ;;  %v7682_v35 = vld [vmem:[%s7423_s8 + $0x64] sm:$0xf] }
  0x58   : > { %6332 = vmatmul.mubr.bf16.gmra.mrb[8].mxu1 %v5520_v12  ;;  %6524 = vmatmul.mubr.bf16.gmra.mrb[8].mxu0 %v5760_v38  ;;  %v2334_v56 = vor.u32 %v2333_v31, %v2330_v42  ;;  %v2349_v58 = vrot.slane %v2347_v49, 5  ;;  %v462_v59 = vshll.u32 %v232_v43, 16  ;;  %v455_v63 = vrot.slane %v453_v55, 4 }
  0x59   : > { %v446_v54 = vrot.slane %v445_v40, 4  ;;  %v458_v1 = vrot.slane %v456_v48, 5  ;;  %v466_v5 = vshrl.u32 %v232_v43, 16  ;;  %v2345_v7 = vrot.slane %v2344_v57, 4  ;;  %v273_v43 = vld [vmem:[%s7423_s8 + $0x68] sm:$0x1] }
  0x5a   : > { %v2335_v3 = vrot.slane %v2334_v56, 4  ;;  %v464_v9 = vrot.slane %v462_v59, 5  ;;  %v472_v12 = vshll.u32 %v272_v50, 16  ;;  %v2352_v13 = vshrl.u32 %v5712_v52, 16  ;;  %v5779_v50 = vld [vmem:[%s7423_s8 + $0xc] sm:$0xe] }
  0x5b   : > { %v451_v61 = vsel %vm7455_vm2, %v446_v54, %v450_v21  ;;  %v459_v10 = vor.u32 %v458_v1, %v455_v63  ;;  %v468_v11 = vrot.slane %v466_v5, 4  ;;  %v2350_v16 = vsel %vm7455_vm2, %v2345_v7, %v2349_v58  ;;  %v7697_v5 = vld [vmem:[%s7423_s8 + $0x6c] sm:$0xf] }
  0x5c   : > { %v5521_v2 = vcombine.low %v441_v53, %v451_v61  ;;  %v2340_v15 = vsel %vm7455_vm2, %v2335_v3, %v2339_v44  ;;  %v2355_v18 = vshll.u32 %v5712_v52, 16  ;;  %v2361_v21 = vshll.u32 %v7666_v60, 16 }
  0x5d   : > { %v5761_v26 = vcombine.low %v2340_v15, %v2350_v16  ;;  %v460_v29 = vrot.slane %v459_v10, 4  ;;  %v469_v30 = vor.u32 %v468_v11, %v464_v9  ;;  %v474_v34 = vrot.slane %v472_v12, 5 }
  0x5e   : > { %6335 = vmatprep.mubr.bf16.mxu1 %v5521_v2  ;;  %v2354_v38 = vrot.slane %v2352_v13, 4  ;;  %v2357_v39 = vrot.slane %v2355_v18, 5  ;;  %v2363_v40 = vrot.slane %v2361_v21, 5  ;;  %v2365_v42 = vshrl.u32 %v7666_v60, 16  ;;  %v7709_v21 = vld [vmem:[%s7423_s8 + $0x70] sm:$0xf] }
  0x5f   : > { %6527 = vmatprep.mubr.bf16.mxu0 %v5761_v26  ;;  %v465_v31 = vsel %vm7455_vm2, %v460_v29, %v464_v9  ;;  %v470_v44 = vrot.slane %v469_v30, 4  ;;  %v2371_v47 = vshll.u32 %v7675_v17, 16  ;;  %v477_v49 = vshrl.u32 %v7679_v25, 16  ;;  %v7171_v9 = vld [vmem:[%s7423_s8 + $0xb4] sm:$0xff]  }
  0x60   : > { %v2358_v52 = vor.u32 %v2357_v39, %v2354_v38  ;;  %v2367_v53 = vrot.slane %v2365_v42, 4  ;;  %v480_v54 = vshll.u32 %v7679_v25, 16  ;;  %v486_v55 = vshll.u32 %v7682_v35, 16 }
  0x61   : > { %v475_v48 = vsel %vm7455_vm2, %v470_v44, %v474_v34  ;;  %v2373_v56 = vrot.slane %v2371_v47, 5  ;;  %v479_v57 = vrot.slane %v477_v49, 4  ;;  %v490_v58 = vshrl.u32 %v7682_v35, 16  ;;  %v7720_v47 = vld [vmem:[%s7423_s8 + $0x78] sm:$0xf] }
  0x62   : > { %v5522_v59 = vcombine.low %v465_v31, %v475_v48  ;;  %v2359_v61 = vrot.slane %v2358_v52, 4  ;;  %v2368_v63 = vor.u32 %v2367_v53, %v2363_v40  ;;  %v482_v1 = vrot.slane %v480_v54, 5  ;;  %v7731_v54 = vld [vmem:[%s7423_s8 + $0x7c] sm:$0xf] }
  0x63   : > { %v488_v2 = vrot.slane %v486_v55, 5  ;;  %v492_v3 = vrot.slane %v490_v58, 4  ;;  %v496_v7 = vshll.u32 %v273_v43, 16  ;;  %v5795_v10 = vrot.slane %v5779_v50, 9  ;;  %v275_v58 = vld [vmem:[%s7423_s8 + $0x80] sm:$0x1] }
  0x64   : > { %6336 = vmatmul.mubr.bf16.gmra.mrb[12].mxu1 %v5522_v59  ;;  %v2364_v11 = vsel %vm7455_vm2, %v2359_v61, %v2363_v40  ;;  %v2369_v12 = vrot.slane %v2368_v63, 4  ;;  %v483_v13 = vor.u32 %v482_v1, %v479_v57  ;;  %v2955_v15 = vrot.slane %v7436_v23, 5  ;;  %v274_v40 = vld [vmem:[%s7423_s8 + $0x74] sm:$0x1]  ;;  %v5780_v23 = vld [vmem:[%s7423_s8 + $0x18] sm:$0xe] }
  0x65   : > { %v493_v16 = vor.u32 %v492_v3, %v488_v2  ;;  %v498_v18 = vrot.slane %v496_v7, 5  ;;  %v501_v26 = vshrl.u32 %v7697_v5, 16  ;;  %v504_v29 = vshll.u32 %v7697_v5, 16 }
  0x66   : > { %v2374_v30 = vsel %vm7455_vm2, %v2369_v12, %v2373_v56  ;;  %v484_v34 = vrot.slane %v483_v13, 4  ;;  %v2956_v38 = vsel %vm7701_vm5, %v5795_v10, %v2955_v15  ;;  %v2957_v39 = vrot.slane %v2955_v15, 4  ;;  %v5781_v13 = vld [vmem:[%s7423_s8 + $0x24] sm:$0xe] }
  0x67   : > { %v5762_v42 = vcombine.low %v2364_v11, %v2374_v30  ;;  %v494_v43 = vrot.slane %v493_v16, 4  ;;  %v503_v31 = vrot.slane %v501_v26, 4  ;;  %v506_v44 = vrot.slane %v504_v29, 5  ;;  %v7753_v16 = vld [vmem:[%s7423_s8 + $0x84] sm:$0xf]  ;;  %v7084_v29 = vld [vmem:[%s9749_s1 + $0x188] sm:$0xff]  }
  0x68   : > { %v489_v49 = vsel %vm7455_vm2, %v484_v34, %v488_v2  ;;  %v2959_v50 = vsel %vm7701_vm5, %v2957_v39, %v2958_v41  ;;  %v510_v52 = vshll.u32 %v7709_v21, 16  ;;  %v514_v53 = vshrl.u32 %v7709_v21, 16 }
  0x69   : > { %6528 = vmatmul.mubr.bf16.gmra.mrb[12].mxu0 %v5762_v42  ;;  %v499_v55 = vsel %vm7455_vm2, %v494_v43, %v498_v18  ;;  %v5827_v48 = vcombine.low %v2956_v38, %v2959_v50  ;;  %v507_v56 = vor.u32 %v506_v44, %v503_v31  ;;  %v520_v57 = vshll.u32 %v274_v40, 16  ;;  %v7761_v40 = vld [vmem:[%s7423_s8 + $0x88] sm:$0xf]  ;;  %v276_v31 = vld [vmem:[%s7423_s8 + $0x8c] sm:$0x1] }
  0x6a   : > { %v5523_v59 = vcombine.low %v489_v49, %v499_v55  ;;  %v512_v24 = vrot.slane %v510_v52, 5  ;;  %v516_v61 = vrot.slane %v514_v53, 4  ;;  %v5796_v63 = vrot.slane %v5780_v23, 9 }
  0x6b   : > { %6563 = vmatprep.mubr.bf16.mxu0 %v5827_v48  ;;  %v508_v41 = vrot.slane %v507_v56, 4  ;;  %v522_v1 = vrot.slane %v520_v57, 5  ;;  %v2966_v2 = vsel %vm7701_vm5, %v7504_v36, %v2965_v32  ;;  %v525_v3 = vshrl.u32 %v7720_v47, 16 }
  0x6c   : > { %6339 = vmatprep.mubr.bf16.mxu1 %v5523_v59  ;;  %v517_v7 = vor.u32 %v516_v61, %v512_v24  ;;  %v2963_v10 = vsel %vm7701_vm5, %v5796_v63, %v2962_v27  ;;  %v528_v11 = vshll.u32 %v7720_v47, 16  ;;  %v534_v12 = vshll.u32 %v7731_v54, 16 }
  0x6d   : > { %v513_v8 = vsel %vm7455_vm2, %v508_v41, %v512_v24  ;;  %v5828_v15 = vcombine.low %v2963_v10, %v2966_v2  ;;  %v527_v32 = vrot.slane %v525_v3, 4  ;;  %v538_v36 = vshrl.u32 %v7731_v54, 16  ;;  %v7782_v2 = vld [vmem:[%s7423_s8 + $0x90] sm:$0xf]  ;;  %v7785_v3 = vld [vmem:[%s7423_s8 + $0x94] sm:$0xf] }
  0x6e   : > { %v518_v62 = vrot.slane %v517_v7, 4  ;;  %v530_v18 = vrot.slane %v528_v11, 5  ;;  %v536_v26 = vrot.slane %v534_v12, 5  ;;  %v544_v27 = vshll.u32 %v275_v58, 16 }
  0x6f   : > { %v540_v30 = vrot.slane %v538_v36, 4  ;;  %v5797_v34 = vrot.slane %v5781_v13, 9  ;;  %v2969_v38 = vrot.slane %v7508_v45, 5  ;;  %v2972_v39 = vrot.slane %v7514_v51, 5  ;;  %v5782_v45 = vld [vmem:[%s7423_s8 + $0x30] sm:$0xe] }
  0x70   : > { %v523_v23 = vsel %vm7455_vm2, %v518_v62, %v522_v1  ;;  %v531_v42 = vor.u32 %v530_v18, %v527_v32  ;;  %v546_v43 = vrot.slane %v544_v27, 5  ;;  %v549_v44 = vshrl.u32 %v7753_v16, 16  ;;  %v277_v62 = vld [vmem:[%s7423_s8 + $0x98] sm:$0x1] }
  0x71   : > { %v5524_v49 = vcombine.low %v513_v8, %v523_v23  ;;  %6564 = vmatmul.mubr.bf16.vlgmr.msra.gmra.mrb[0].mxu0 %v5828_v15  ;;  %v541_v50 = vor.u32 %v540_v30, %v536_v26  ;;  %v2970_v52 = vsel %vm7701_vm5, %v5797_v34, %v2969_v38  ;;  %v2971_v53 = vrot.slane %v2969_v38, 4  ;;  %v7088_v30 = vld [vmem:[%s9749_s1 + $0x198] sm:$0xff]  }
  0x72   : > { %6596 = vmatpush3.bf16.msra.mxu0 %v7644_v6  ;;  %v532_v51 = vrot.slane %v531_v42, 4  ;;  %v551_v55 = vrot.slane %v549_v44, 4  ;;  %v552_v48 = vshll.u32 %v7753_v16, 16  ;;  %v558_v56 = vshll.u32 %v7761_v40, 16  ;;  %v7086_v6 = vld [vmem:[%s9749_s1 + $0x190] sm:$0xff]  }
  0x73   : > { %6340 = vmatmul.mubr.bf16.gmra.mrb[16].mxu1 %v5524_v49  ;;  %v542_v57 = vrot.slane %v541_v50, 4  ;;  %v2973_v58 = vsel %vm7701_vm5, %v2971_v53, %v2972_v39  ;;  %v562_v59 = vshrl.u32 %v7761_v40, 16  ;;  %v568_v24 = vshll.u32 %v276_v31, 16  ;;  %6597 = vmatprep.subr.bf16.mxu0 %v7084_v29  ;;  %v5783_v38 = vld [vmem:[%s7423_s8 + $0x3c] sm:$0xe] }
  0x74   : > { %v537_v61 = vsel %vm7455_vm2, %v532_v51, %v536_v26  ;;  %v5829_v63 = vcombine.low %v2970_v52, %v2973_v58  ;;  %v554_v41 = vrot.slane %v552_v48, 5  ;;  %v560_v1 = vrot.slane %v558_v56, 5  ;;  %v7803_v31 = vld [vmem:[%s7423_s8 + $0x9c] sm:$0xf]  ;;  %v7812_v48 = vld [vmem:[%s7423_s8 + $0xa0] sm:$0xf] }
  0x75   : > { %v547_v7 = vsel %vm7455_vm2, %v542_v57, %v546_v43  ;;  %v564_v10 = vrot.slane %v562_v59, 4  ;;  %v570_v11 = vrot.slane %v568_v24, 5  ;;  %v5798_v12 = vrot.slane %v5782_v45, 9  ;;  %v7092_v56 = vld [vmem:[%s9749_s1 + $0x1a0] sm:$0xff]  }
  0x76   : > { %v5525_v13 = vcombine.low %v537_v61, %v547_v7  ;;  %6567 = vmatprep.mubr.bf16.mxu0 %v5829_v63  ;;  %v555_v8 = vor.u32 %v554_v41, %v551_v55  ;;  %v2976_v15 = vrot.slane %v7539_v33, 5  ;;  %v2979_v32 = vrot.slane %v7550_v46, 5  ;;  %6598 = vmatpush3.bf16.msra.mxu0 %v7084_v29  ;;  %v278_v61 = vld [vmem:[%s7423_s8 + $0xa4] sm:$0x1] }
  0x77   : > { %v565_v36 = vor.u32 %v564_v10, %v560_v1  ;;  %v573_v18 = vshrl.u32 %v7782_v2, 16  ;;  %v576_v26 = vshll.u32 %v7782_v2, 16  ;;  %v582_v27 = vshll.u32 %v7785_v3, 16  ;;  %6599 = vmatprep.subr.bf16.mxu0 %v7086_v6 }
  0x78   : > { %6343 = vmatprep.mubr.bf16.mxu1 %v5525_v13  ;;  %v556_v34 = vrot.slane %v555_v8, 4  ;;  %v2977_v33 = vsel %vm7701_vm5, %v5798_v12, %v2976_v15  ;;  %v2978_v46 = vrot.slane %v2976_v15, 4  ;;  %v586_v29 = vshrl.u32 %v7785_v3, 16  ;;  %v5784_v15 = vld [vmem:[%s7423_s8 + $0x48] sm:$0xe] }
  0x79   : > { %v566_v39 = vrot.slane %v565_v36, 4  ;;  %v575_v23 = vrot.slane %v573_v18, 4  ;;  %v578_v42 = vrot.slane %v576_v26, 5  ;;  %v584_v43 = vrot.slane %v582_v27, 5  ;;  %v7837_v27 = vld [vmem:[%s7423_s8 + $0xa8] sm:$0xf] }
  0x7a   : > { %v561_v44 = vsel %vm7455_vm2, %v556_v34, %v560_v1  ;;  %v2980_v49 = vsel %vm7701_vm5, %v2978_v46, %v2979_v32  ;;  %v588_v50 = vrot.slane %v586_v29, 4  ;;  %v592_v52 = vshll.u32 %v277_v62, 16  ;;  %6600 = vmatpush3.bf16.msra.mxu0 %v7086_v6  ;;  %v7096_v32 = vld [vmem:[%s9749_s1 + $0x1a8] sm:$0xff]  }
  0x7b   : > { %v571_v53 = vsel %vm7455_vm2, %v566_v39, %v570_v11  ;;  %v5830_v45 = vcombine.low %v2977_v33, %v2980_v49  ;;  %v579_v51 = vor.u32 %v578_v42, %v575_v23  ;;  %v5799_v55 = vrot.slane %v5783_v38, 9  ;;  %6601 = vmatprep.subr.bf16.mxu0 %v7088_v30  ;;  %v7840_v29 = vld [vmem:[%s7423_s8 + $0xac] sm:$0xf] }
  0x7c   : > { %v5526_v57 = vcombine.low %v561_v44, %v571_v53  ;;  %v589_v58 = vor.u32 %v588_v50, %v584_v43  ;;  %v594_v59 = vrot.slane %v592_v52, 5  ;;  %v2983_v24 = vrot.slane %v7573_v19, 5  ;;  %v5785_v53 = vld [vmem:[%s7423_s8 + $0x54] sm:$0xe] }
  0x7d   : > { %6568 = vmatmul.mubr.bf16.gmra.mrb[4].mxu0 %v5830_v45  ;;  %v580_v6 = vrot.slane %v579_v51, 4  ;;  %v2986_v63 = vrot.slane %v7581_v28, 5  ;;  %v597_v41 = vshrl.u32 %v7803_v31, 16  ;;  %v600_v1 = vshll.u32 %v7803_v31, 16  ;;  %v7100_v45 = vld [vmem:[%s9749_s1 + $0x1b0] sm:$0xff]  }
  0x7e   : > { %6344 = vmatmul.mubr.bf16.gmra.mrb[20].mxu1 %v5526_v57  ;;  %v590_v7 = vrot.slane %v589_v58, 4  ;;  %v2984_v10 = vsel %vm7701_vm5, %v5799_v55, %v2983_v24  ;;  %v2985_v11 = vrot.slane %v2983_v24, 4  ;;  %v606_v12 = vshll.u32 %v7812_v48, 16  ;;  %6602 = vmatpush3.bf16.msra.mxu0 %v7088_v30 }
  0x7f   : > { %v585_v19 = vsel %vm7455_vm2, %v580_v6, %v584_v43  ;;  %v599_v13 = vrot.slane %v597_v41, 4  ;;  %v602_v28 = vrot.slane %v600_v1, 5  ;;  %v610_v8 = vshrl.u32 %v7812_v48, 16  ;;  %6603 = vmatprep.subr.bf16.mxu0 %v7092_v56  ;;  %v279_v43 = vld [vmem:[%s7423_s8 + $0xb0] sm:$0x1] }
  0x80   : > { %v595_v36 = vsel %vm7455_vm2, %v590_v7, %v594_v59  ;;  %v2987_v62 = vsel %vm7701_vm5, %v2985_v11, %v2986_v63  ;;  %v608_v18 = vrot.slane %v606_v12, 5  ;;  %v616_v26 = vshll.u32 %v278_v61, 16  ;;  %v7860_v41 = vld [vmem:[%s7423_s8 + $0xb4] sm:$0xf]  ;;  %v7865_v12 = vld [vmem:[%s7423_s8 + $0xb8] sm:$0xf] }
  0x81   : > { %v5527_v30 = vcombine.low %v585_v19, %v595_v36  ;;  %v5831_v34 = vcombine.low %v2984_v10, %v2987_v62  ;;  %v603_v33 = vor.u32 %v602_v28, %v599_v13  ;;  %v612_v46 = vrot.slane %v610_v8, 4  ;;  %v280_v19 = vld [vmem:[%s7423_s8 + $0xbc] sm:$0x1] }
  0x82   : > { %v618_v38 = vrot.slane %v616_v26, 5  ;;  %v5800_v39 = vrot.slane %v5784_v15, 9  ;;  %v2990_v23 = vrot.slane %v7608_v14, 5  ;;  %v2993_v42 = vrot.slane %v7614_v22, 5  ;;  %6604 = vmatpush3.bf16.msra.mxu0 %v7092_v56  ;;  %v7104_v13 = vld [vmem:[%s9749_s1 + $0x1b8] sm:$0xff]  }
  0x83   : > { %6347 = vmatprep.mubr.bf16.mxu1 %v5527_v30  ;;  %6571 = vmatprep.mubr.bf16.mxu0 %v5831_v34  ;;  %v604_v44 = vrot.slane %v603_v33, 4  ;;  %v613_v49 = vor.u32 %v612_v46, %v608_v18  ;;  %v621_v50 = vshrl.u32 %v7837_v27, 16  ;;  %v624_v52 = vshll.u32 %v7837_v27, 16  ;;  %v5786_v30 = vld [vmem:[%s7423_s8 + $0x60] sm:$0xe] }
  0x84   : > { %v2991_v14 = vsel %vm7701_vm5, %v5800_v39, %v2990_v23  ;;  %v2992_v22 = vrot.slane %v2990_v23, 4  ;;  %v630_v51 = vshll.u32 %v7840_v29, 16  ;;  %v634_v55 = vshrl.u32 %v7840_v29, 16  ;;  %6605 = vmatprep.subr.bf16.mxu0 %v7096_v32  ;;  %v5716_v39 = vld [vmem:[%s7423_s8 + $0x70] sm:$0xf] }
  0x85   : > { %v609_v56 = vsel %vm7455_vm2, %v604_v44, %v608_v18  ;;  %v614_v57 = vrot.slane %v613_v49, 4  ;;  %v623_v58 = vrot.slane %v621_v50, 4  ;;  %v626_v59 = vrot.slane %v624_v52, 5  ;;  %v7887_v44 = vld [vmem:[%s9749_s1 + $0x1c0] sm:$0xff]  }
  0x86   : > { %v2994_v24 = vsel %vm7701_vm5, %v2992_v22, %v2993_v42  ;;  %v632_v61 = vrot.slane %v630_v51, 5  ;;  %v636_v6 = vrot.slane %v634_v55, 4  ;;  %v640_v63 = vshll.u32 %v279_v43, 16  ;;  %6606 = vmatpush3.bf16.msra.mxu0 %v7096_v32  ;;  %v5787_v43 = vld [vmem:[%s7423_s8 + $0x6c] sm:$0xe] }
  0x87   : > { %v619_v1 = vsel %vm7455_vm2, %v614_v57, %v618_v38  ;;  %v5832_v7 = vcombine.low %v2991_v14, %v2994_v24  ;;  %v627_v10 = vor.u32 %v626_v59, %v623_v58  ;;  %v5801_v11 = vrot.slane %v5785_v53, 9  ;;  %6607 = vmatprep.subr.bf16.mxu0 %v7100_v45  ;;  %v5717_v55 = vld [vmem:[%s7423_s8 + $0x74] sm:$0x1]  ;;  %v5788_v24 = vld [vmem:[%s7423_s8 + $0x78] sm:$0xe] }
  0x88   : > { %v5528_v28 = vcombine.low %v609_v56, %v619_v1  ;;  %v637_v8 = vor.u32 %v636_v6, %v632_v61  ;;  %v642_v15 = vrot.slane %v640_v63, 5  ;;  %v2997_v32 = vrot.slane %v7639_v0, 5 }
  0x89   : > { %6572 = vmatmul.mubr.bf16.gmra.mrb[8].mxu0 %v5832_v7  ;;  %v628_v36 = vrot.slane %v627_v10, 4  ;;  %v3000_v62 = vrot.slane %v7651_v20, 5  ;;  %v645_v18 = vshrl.u32 %v7860_v41, 16  ;;  %v648_v26 = vshll.u32 %v7860_v41, 16 }
  0x8a   : > { %6348 = vmatmul.mubr.bf16.gmra.mrb[24].mxu1 %v5528_v28  ;;  %v638_v34 = vrot.slane %v637_v8, 4  ;;  %v2998_v33 = vsel %vm7701_vm5, %v5801_v11, %v2997_v32  ;;  %v2999_v46 = vrot.slane %v2997_v32, 4  ;;  %v654_v38 = vshll.u32 %v7865_v12, 16  ;;  %6608 = vmatpush3.bf16.msra.mxu0 %v7100_v45  ;;  %v7900_v11 = vld [vmem:[%s7423_s8 + $0x7c] sm:$0xf] }
  0x8b   : > { %v633_v0 = vsel %vm7455_vm2, %v628_v36, %v632_v61  ;;  %v647_v20 = vrot.slane %v645_v18, 4  ;;  %v650_v23 = vrot.slane %v648_v26, 5  ;;  %v658_v42 = vshrl.u32 %v7865_v12, 16  ;;  %6609 = vmatprep.subr.bf16.mxu0 %v7104_v13  ;;  %v7175_v36 = vld [vmem:[%s7423_s8] sm:$0xf] }
  0x8c   : > { %v643_v49 = vsel %vm7455_vm2, %v638_v34, %v642_v15  ;;  %v3001_v50 = vsel %vm7701_vm5, %v2999_v46, %v3000_v62  ;;  %v656_v52 = vrot.slane %v654_v38, 5  ;;  %v664_v53 = vshll.u32 %v280_v19, 16  ;;  %v5722_v15 = vld [vmem:[%s7423_s8 + $0x88] sm:$0xf]  ;;  %v7915_v62 = vld [vmem:[%s7423_s8 + $0x4] sm:$0xf] }
  0x8d   : > { %v5529_v45 = vcombine.low %v633_v0, %v643_v49  ;;  %v5833_v14 = vcombine.low %v2998_v33, %v3001_v50  ;;  %v651_v22 = vor.u32 %v650_v23, %v647_v20  ;;  %v660_v51 = vrot.slane %v658_v42, 4  ;;  %v5723_v26 = vld [vmem:[%s7423_s8 + $0x8c] sm:$0x1]  ;;  %v5726_v23 = vld [vmem:[%s7423_s8 + $0x98] sm:$0x1] }
  0x8e   : > { %v666_v56 = vrot.slane %v664_v53, 5  ;;  %v5802_v57 = vrot.slane %v5786_v30, 9  ;;  %v3004_v58 = vrot.slane %v7666_v60, 5  ;;  %v3007_v59 = vrot.slane %v7675_v17, 5  ;;  %6610 = vmatpush3.bf16.msra.mxu0 %v7104_v13  ;;  %v7903_v17 = vld [vmem:[%s7423_s8 + $0x80] sm:$0x1] }
  0x8f   : > { %6351 = vmatprep.mubr.bf16.mxu1 %v5529_v45  ;;  %6575 = vmatprep.mubr.bf16.mxu0 %v5833_v14  ;;  %v652_v61 = vrot.slane %v651_v22, 4  ;;  %v661_v6 = vor.u32 %v660_v51, %v656_v52  ;;  %v5803_v63 = vrot.slane %v5787_v43, 9  ;;  %v3011_v1 = vrot.slane %v5716_v39, 5  ;;  %v5789_v30 = vld [vmem:[%s7423_s8 + $0x84] sm:$0xe] }
  0x90   : > { %v3005_v7 = vsel %vm7701_vm5, %v5802_v57, %v3004_v58  ;;  %v3006_v10 = vrot.slane %v3004_v58, 4  ;;  %v3014_v60 = vrot.slane %v5717_v55, 5  ;;  %6643 = vmatprep.subr.bf16.mxu0 %v7887_v44  ;;  %v5539_v18 = vcombine.low %v7175_v36, %v7915_v62  ;;  %v5725_v39 = vld [vmem:[%s7423_s8 + $0x94] sm:$0xf]  ;;  %v5790_v42 = vld [vmem:[%s7423_s8 + $0x90] sm:$0xe] }
  0x91   : > { %v657_v19 = vsel %vm7455_vm2, %v652_v61, %v656_v52  ;;  %v662_v13 = vrot.slane %v661_v6, 4  ;;  %v3012_v28 = vsel %vm7701_vm5, %v5803_v63, %v3011_v1  ;;  %v3013_v8 = vrot.slane %v3011_v1, 4  ;;  %v5791_v50 = vld [vmem:[%s7423_s8 + $0x9c] sm:$0xe]  ;;  %v5728_v14 = vld [vmem:[%s7423_s8 + $0xa0] sm:$0xf] }
  0x92   : > { %v3008_v32 = vsel %vm7701_vm5, %v3006_v10, %v3007_v59  ;;  %v5804_v38 = vrot.slane %v5788_v24, 9  ;;  %v3018_v43 = vrot.slane %v7900_v11, 5  ;;  %v3021_v49 = vrot.slane %v7903_v17, 5  ;;  %v5729_v22 = vld [vmem:[%s7423_s8 + $0xa4] sm:$0x1] }
  0x93   : > { %v667_v34 = vsel %vm7455_vm2, %v662_v13, %v666_v56  ;;  %v5834_v33 = vcombine.low %v3005_v7, %v3008_v32  ;;  %v3015_v46 = vsel %vm7701_vm5, %v3013_v8, %v3014_v60  ;;  %v5805_v52 = vrot.slane %v5789_v30, 9  ;;  %v5731_v59 = vld [vmem:[%s7423_s8 + $0xac] sm:$0xf]  ;;  %v7939_v61 = vld [vmem:[%s7423_s8 + $0x10] sm:$0xf] }
  0x94   : > { %v5530_v0 = vcombine.low %v657_v19, %v667_v34  ;;  %v5835_v20 = vcombine.low %v3012_v28, %v3015_v46  ;;  %v3025_v53 = vrot.slane %v5722_v15, 5  ;;  %v3028_v45 = vrot.slane %v5723_v26, 5  ;;  %v7177_v24 = vld [vmem:[%s7423_s8 + $0xc] sm:$0xf]  ;;  %v7179_v8 = vld [vmem:[%s7423_s8 + $0x18] sm:$0xf] }
  0x95   : > { %6576 = vmatmul.mubr.bf16.gmra.mrb[12].mxu0 %v5834_v33  ;;  %v3019_v51 = vsel %vm7701_vm5, %v5804_v38, %v3018_v43  ;;  %v3020_v55 = vrot.slane %v3018_v43, 4  ;;  %v3032_v58 = vrot.slane %v5725_v39, 5  ;;  %v5540_v6 = vcombine.low %v7177_v24, %v7939_v61  ;;  %v7095_v19 = vld [vmem:[%s9749_s1 + $0x88] sm:$0xff]   ;;  %v7951_v15 = vld [vmem:[%s7423_s8 + $0x1c] sm:$0xf] }
  0x96   : > { %6352 = vmatmul.mubr.bf16.gmra.mrb[28].mxu1 %v5530_v0  ;;  %6579 = vmatprep.mubr.bf16.mxu0 %v5835_v20  ;;  %v3026_v56 = vsel %vm7701_vm5, %v5805_v52, %v3025_v53  ;;  %v3027_v57 = vrot.slane %v3025_v53, 4  ;;  %v5806_v1 = vrot.slane %v5790_v42, 9  ;;  %v3035_v7 = vrot.slane %v5726_v23, 5  ;;  %v5732_v30 = vld [vmem:[%s7423_s8 + $0xb0] sm:$0x1] }
  0x97   : > { %6371 = vmatprep.mubr.bf16.mxu1 %v5539_v18  ;;  %v3022_v63 = vsel %vm7701_vm5, %v3020_v55, %v3021_v49  ;;  %v3034_v13 = vrot.slane %v3032_v58, 4  ;;  %v5807_v28 = vrot.slane %v5791_v50, 9  ;;  %v5541_v32 = vcombine.low %v7179_v8, %v7951_v15  ;;  %v5792_v34 = vld [vmem:[%s7423_s8 + $0xa8] sm:$0xe]  ;;  %v5734_v33 = vld [vmem:[%s7423_s8 + $0xb8] sm:$0xf] }
  0x98   : > { %v5836_v10 = vcombine.low %v3019_v51, %v3022_v63  ;;  %v3029_v60 = vsel %vm7701_vm5, %v3027_v57, %v3028_v45  ;;  %v3039_v18 = vrot.slane %v5728_v14, 5  ;;  %v3042_v26 = vrot.slane %v5729_v22, 5  ;;  %v5735_v20 = vld [vmem:[%s7423_s8 + $0xbc] sm:$0x1]  ;;  %v5793_v23 = vld [vmem:[%s7423_s8 + $0xb4] sm:$0xe] }
  0x99   : > { %v5837_v36 = vcombine.low %v3026_v56, %v3029_v60  ;;  %v3046_v38 = vrot.slane %v5731_v59, 5  ;;  %v3033_v39 = vsel %vm7701_vm5, %v5806_v1, %v3032_v58  ;;  %v3036_v0 = vsel %vm7701_vm5, %v3034_v13, %v3035_v7  ;;  %v7099_v50 = vld [vmem:[%s9749_s1 + $0x90] sm:$0xff]   ;;  %v5737_v53 = vld [vmem:[%s7423_s8 + $0xc4] sm:$0xf]  ;;  %v7974_v51 = vld [vmem:[%s7423_s8 + $0x28] sm:$0xf] }
  0x9a   : > { %v3041_v46 = vrot.slane %v3039_v18, 4  ;;  %v3040_v42 = vsel %vm7701_vm5, %v5807_v28, %v3039_v18  ;;  %v3053_v49 = vrot.slane %v5734_v33, 5  ;;  %v5808_v52 = vrot.slane %v5792_v34, 9  ;;  %v7181_v22 = vld [vmem:[%s7423_s8 + $0x24] sm:$0xf]  ;;  %v7103_v1 = vld [vmem:[%s9749_s1 + $0x98] sm:$0xff]  }
  0x9b   : > { %v5838_v45 = vcombine.low %v3033_v39, %v3036_v0  ;;  %v3048_v14 = vrot.slane %v3046_v38, 4  ;;  %v5542_v55 = vcombine.low %v7181_v22, %v7974_v51  ;;  %v7183_v57 = vld [vmem:[%s7423_s8 + $0x30] sm:$0xf]  ;;  %v7979_v58 = vld [vmem:[%s7423_s8 + $0x34] sm:$0xf]  ;;  %v5809_v24 = vrot.slane %v5793_v23, 9 }
  0x9c   : > { %v3043_v43 = vsel %vm7701_vm5, %v3041_v46, %v3042_v26  ;;  %v5543_v59 = vcombine.low %v7183_v57, %v7979_v58  ;;  %v3056_v63 = vrot.slane %v5735_v20, 5  ;;  %v5794_v7 = vld [vmem:[%s7423_s8 + $0xc0] sm:$0xe]  ;;  %v3047_v60 = vsel %vm7701_vm5, %v5808_v52, %v3046_v38  ;;  %v5738_v8 = vld [vmem:[%s7423_s8 + $0xc8] sm:$0x1]  ;;  %v7106_v22 = vld [vmem:[%s7423_s8 + $0x18] sm:$0xff]  }
  0x9d   : > { %6580 = vmatmul.mubr.bf16.gmra.mrb[16].mxu0 %v5836_v10  ;;  %v5839_v56 = vcombine.low %v3040_v42, %v3043_v43  ;;  %v3060_v10 = vrot.slane %v5737_v53, 5  ;;  %v3054_v13 = vsel %vm7701_vm5, %v5809_v24, %v3053_v49  ;;  %v5810_v18 = vrot.slane %v5794_v7, 9  ;;  %v7185_v26 = vld [vmem:[%s7423_s8 + $0x3c] sm:$0xf]  ;;  %v7187_v39 = vld [vmem:[%s7423_s8 + $0x48] sm:$0xf] }
  0x9e   : > { %6372 = vmatmul.mubr.bf16.vlgmr.msra.gmra.mrb[0].mxu1 %v5540_v6  ;;  %6583 = vmatprep.mubr.bf16.mxu0 %v5837_v36  ;;  %v3055_v6 = vrot.slane %v3053_v49, 4  ;;  %v3063_v38 = vrot.slane %v5738_v8, 5  ;;  %v8005_v0 = vld [vmem:[%s7423_s8 + $0x4c] sm:$0xf]  ;;  %v7120_v49 = vld [vmem:[%s9749_s1 + $0xb0] sm:$0xff]   ;;  %v2413_v52 = vshrl.u32 %v7900_v11, 16 }
  0x9f   : > { %6404 = vmatpush3.bf16.msra.mxu1 %v7625_v4  ;;  %6375 = vmatprep.mubr.bf16.mxu1 %v5541_v32  ;;  %v3049_v4 = vrot.slane %v5732_v30, 5  ;;  %v7108_v32 = vld [vmem:[%s9749_s1 + $0xa0] sm:$0xff]   ;;  %v3062_v46 = vrot.slane %v3060_v10, 4  ;;  %v5545_v20 = vcombine.low %v7187_v39, %v8005_v0  ;;  %v7114_v23 = vld [vmem:[%s9749_s1 + $0xa8] sm:$0xff]   ;;  %v3061_v42 = vsel %vm7701_vm5, %v5810_v18, %v3060_v10  ;;  %v7112_v18 = vld [vmem:[%s7423_s8 + $0x30] sm:$0xff]  }
  0xa0   : > { %6405 = vmatprep.subr.bf16.mxu1 %v7095_v19  ;;  %v3057_v28 = vsel %vm7701_vm5, %v3055_v6, %v3056_v63  ;;  %v8000_v30 = vld [vmem:[%s7423_s8 + $0x40] sm:$0xf]  ;;  %v8033_v57 = vrot.slane %v2413_v52, 4  ;;  %v7109_v6 = vld [vmem:[%s7423_s8 + $0x24] sm:$0xff]   ;;  %v1323_v7 = vrot.slane %v7939_v61, 5  ;;  %v2419_v8 = vshll.u32 %v7903_v17, 16 }
  0xa1   : > { %v5544_v34 = vcombine.low %v7185_v26, %v8000_v30  ;;  %v5841_v33 = vcombine.low %v3054_v13, %v3057_v28  ;;  %v3064_v43 = vsel %vm7701_vm5, %v3062_v46, %v3063_v38  ;;  %v1263_v63 = vld [vmem:[%s7423_s8] sm:$0xe]  ;;  %v1264_v10 = vld [vmem:[%s7423_s8 + $0xc] sm:$0xe]  ;;  %v1330_v13 = vrot.slane %v7951_v15, 5 }
  0xa2   : > { %v5842_v53 = vcombine.low %v3061_v42, %v3064_v43  ;;  %v1266_v61 = vld [vmem:[%s7423_s8 + $0x24] sm:$0xe]  ;;  %v5550_v15 = vcombine.low %v7753_v16, %v7761_v40  ;;  %v5551_v26 = vcombine.low %v7782_v2, %v7785_v3  ;;  %v5563_v17 = vrot.slane %v1263_v63, 9  ;;  %v7193_v38 = vld [vmem:[%s7423_s8 + $0x20] sm:$0x1]  ;;  %v7121_v2 = vld [vmem:[%s7423_s8 + $0x54] sm:$0xff]  }
  0xa3   : > { %6406 = vmatpush3.bf16.msra.mxu1 %v7095_v19  ;;  %v3050_v19 = vsel %vm7701_vm5, %v3048_v14, %v3049_v4  ;;  %v8022_v14 = vld [vmem:[%s7423_s8 + $0x58] sm:$0xf]  ;;  %v1332_v46 = vrot.slane %v1330_v13, 4  ;;  %v1333_v39 = vrot.slane %v7193_v38, 5  ;;  %v7194_v43 = vld [vmem:[%s7423_s8 + $0x2c] sm:$0x1] }
  0xa4   : > { %6407 = vmatprep.subr.bf16.mxu1 %v7099_v50  ;;  %v5840_v36 = vcombine.low %v3047_v60, %v3050_v19  ;;  %v8048_v60 = vld [vmem:[%s9749_s1 + $0xc0] sm:$0xff]   ;;  %v1265_v19 = vld [vmem:[%s7423_s8 + $0x18] sm:$0xe]  ;;  %v7197_v38 = vld [vmem:[%s7423_s8 + $0x50] sm:$0x1]  ;;  %v1365_v16 = vrot.slane %v8022_v14, 5 }
  0xa5   : > { %6584 = vmatmul.mubr.bf16.gmra.mrb[20].mxu0 %v5838_v45  ;;  %v7189_v45 = vld [vmem:[%s7423_s8 + $0x54] sm:$0xf]  ;;  %v8171_v40 = vld [vmem:[%s7423_s8 + $0x64] sm:$0xf] }
  0xa6   : > { %6376 = vmatmul.mubr.bf16.gmra.mrb[4].mxu1 %v5542_v55  ;;  %6587 = vmatprep.mubr.bf16.mxu0 %v5839_v56  ;;  %v5546_v4 = vcombine.low %v7189_v45, %v8022_v14  ;;  %v5547_v55 = vcombine.low %v7679_v25, %v7682_v35  ;;  %v7126_v56 = vld [vmem:[%s9749_s1 + $0xb8] sm:$0xff]   ;;  %v7192_v25 = vld [vmem:[%s7423_s8 + $0x14] sm:$0x1]  ;;  %v7124_v3 = vld [vmem:[%s7423_s8 + $0x60] sm:$0xff]  }
  0xa7   : > { %6379 = vmatprep.mubr.bf16.mxu1 %v5543_v59  ;;  %6408 = vmatpush3.bf16.msra.mxu1 %v7099_v50  ;;  %v2409_v50 = vshll.u32 %v7900_v11, 16  ;;  %v8036_v59 = vld [vmem:[%s7423_s8 + $0x8] sm:$0x1]  ;;  %v1326_v35 = vrot.slane %v7192_v25, 5 }
  0xa8   : > { %6409 = vmatprep.subr.bf16.mxu1 %v7103_v1  ;;  %v1319_v24 = vrot.slane %v8036_v59, 5 }
  0xa9   : > { %v8031_v11 = vrot.slane %v2409_v50, 5 }
  0xab   : > { %6410 = vmatpush3.bf16.msra.mxu1 %v7103_v1  ;;  %v1316_v1 = vrot.slane %v7915_v62, 5  ;;  %v5548_v62 = vcombine.low %v7697_v5, %v7709_v21  ;;  %v5564_v21 = vrot.slane %v1264_v10, 9  ;;  %v5923_v10 = vld [vmem:[%s7423_s8 + $0x18] sm:$0xf] }
  0xac   : > { %6411 = vmatprep.subr.bf16.mxu1 %v7108_v32 }
  0xad   : > { %6588 = vmatmul.mubr.bf16.gmra.mrb[24].mxu0 %v5840_v36  ;;  %v5549_v36 = vcombine.low %v7720_v47, %v7731_v54  ;;  %v1318_v5 = vrot.slane %v1316_v1, 4  ;;  %v7116_v47 = vld [vmem:[%s9749_s1 + $0x1c8] sm:$0xff]   ;;  %v5565_v54 = vrot.slane %v1265_v19, 9  ;;  %v8091_v59 = vsel %vm7701_vm5, %v5563_v17, %v1316_v1  ;;  %v5924_v19 = vld [vmem:[%s7423_s8 + $0x1c] sm:$0xf] }
  0xae   : > { %6380 = vmatmul.mubr.bf16.gmra.mrb[8].mxu1 %v5544_v34  ;;  %6591 = vmatprep.mubr.bf16.mxu0 %v5841_v33  ;;  %v1344_v34 = vrot.slane %v7979_v58, 5  ;;  %v1325_v33 = vrot.slane %v1323_v7, 4  ;;  %v5566_v58 = vrot.slane %v1266_v61, 9  ;;  %v1358_v1 = vrot.slane %v8005_v0, 5  ;;  %v7118_v0 = vld [vmem:[%s7423_s8 + $0x48] sm:$0xff]  }
  0xaf   : > { %6383 = vmatprep.mubr.bf16.mxu1 %v5545_v20  ;;  %6412 = vmatpush3.bf16.msra.mxu1 %v7108_v32  ;;  %v1337_v32 = vrot.slane %v7974_v51, 5  ;;  %v1267_v51 = vld [vmem:[%s7423_s8 + $0x30] sm:$0xe]  ;;  %v5552_v20 = vcombine.low %v7803_v31, %v7812_v48  ;;  %v8099_v25 = vsel %vm7701_vm5, %v1318_v5, %v1319_v24  ;;  %v8107_v63 = vsel %vm7701_vm5, %v5565_v54, %v1330_v13  ;;  %v1269_v13 = vld [vmem:[%s7423_s8 + $0x48] sm:$0xe] }
  0xb0   : > { %6413 = vmatprep.subr.bf16.mxu1 %v7114_v23  ;;  %v5567_v50 = vrot.slane %v1267_v51, 9  ;;  %v1346_v52 = vrot.slane %v1344_v34, 4  ;;  %v3823_v5 = vshrl.u32 %v5923_v10, 16  ;;  %v3836_v51 = vshrl.u32 %v5924_v19, 16  ;;  %v7127_v48 = vld [vmem:[%s7423_s8 + $0x6c] sm:$0xff]  }
  0xb1   : > { %v1339_v42 = vrot.slane %v1337_v32, 4  ;;  %v8119_v24 = vsel %vm7701_vm5, %v5566_v58, %v1337_v32  ;;  %v7196_v32 = vld [vmem:[%s7423_s8 + $0x44] sm:$0x1]  ;;  %v5569_v54 = vrot.slane %v1269_v13, 9  ;;  %v5927_v13 = vld [vmem:[%s7423_s8 + $0x28] sm:$0xf] }
  0xb2   : > { %v8129_v61 = vsel %vm7701_vm5, %v5567_v50, %v1344_v34  ;;  %v1354_v17 = vrot.slane %v7196_v32, 5  ;;  %v5925_v50 = vld [vmem:[%s7423_s8 + $0x20] sm:$0x1]  ;;  %v1271_v32 = vld [vmem:[%s7423_s8 + $0x60] sm:$0xe] }
  0xb3   : > { %6414 = vmatpush3.bf16.msra.mxu1 %v7114_v23  ;;  %v5553_v23 = vcombine.low %v7837_v27, %v7840_v29 }
  0xb4   : > { %6415 = vmatprep.subr.bf16.mxu1 %v7120_v49 }
  0xb5   : > { %6592 = vmatmul.mubr.bf16.gmra.mrb[28].mxu0 %v5842_v53  ;;  %v7195_v53 = vld [vmem:[%s7423_s8 + $0x38] sm:$0x1] }
  0xb6   : > { %6384 = vmatmul.mubr.bf16.gmra.mrb[12].mxu1 %v5546_v4  ;;  %6611 = vmatprep.mubr.bf16.mxu0 %v7106_v22  ;;  %v1347_v45 = vrot.slane %v7195_v53, 5  ;;  %v1268_v4 = vld [vmem:[%s7423_s8 + $0x3c] sm:$0xe]  ;;  %v1351_v22 = vrot.slane %v8000_v30, 5  ;;  %v8095_v30 = vsel %vm7701_vm5, %v5564_v21, %v1323_v7  ;;  %v3826_v21 = vshll.u32 %v5923_v10, 16  ;;  %v7132_v53 = vld [vmem:[%s9749_s1 + $0x1e0] sm:$0xff]  }
  0xb7   : > { %6387 = vmatprep.mubr.bf16.mxu1 %v5547_v55  ;;  %6416 = vmatpush3.bf16.msra.mxu1 %v7120_v49  ;;  %v1340_v49 = vrot.slane %v7194_v43, 5  ;;  %v8082_v55 = vrot.slane %v2419_v8, 5  ;;  %v7115_v7 = vld [vmem:[%s7423_s8 + $0x3c] sm:$0xff]   ;;  %v8115_v8 = vsel %vm7701_vm5, %v1332_v46, %v1333_v39  ;;  %v1360_v46 = vrot.slane %v1358_v1, 4  ;;  %v5929_v43 = vld [vmem:[%s7423_s8 + $0x30] sm:$0xf] }
  0xb8   : > { %6417 = vmatprep.subr.bf16.mxu1 %v7126_v56  ;;  %v1361_v39 = vrot.slane %v7197_v38, 5  ;;  %v3825_v10 = vrot.slane %v3823_v5, 4 }
  0xb9   : > { %9773 = vst [vmem:[#allocation5_spill] sm:$0xff] %v8082_v55 }
  0xbb   : > { %6418 = vmatpush3.bf16.msra.mxu1 %v7126_v56  ;;  %v7122_v56 = vld [vmem:[%s9749_s1 + $0x1d0] sm:$0xff]  }
  0xbc   : > { %6451 = vmatprep.subr.bf16.mxu1 %v8048_v60 }
  0xbd   : > { %6612 = vmatmul.mubr.bf16.vlgmr.msra.gmra.mrb[0].mxu0 %v7109_v6  ;;  %v8103_v6 = vsel %vm7701_vm5, %v1325_v33, %v1326_v35  ;;  %v8123_v35 = vsel %vm7701_vm5, %v1339_v42, %v1340_v49  ;;  %v3832_v33 = vshll.u32 %v5924_v19, 16  ;;  %v3828_v19 = vrot.slane %v3826_v21, 5  ;;  %v1272_v21 = vld [vmem:[%s7423_s8 + $0x6c] sm:$0xe] }
  0xbe   : > { %6388 = vmatmul.mubr.bf16.gmra.mrb[16].mxu1 %v5548_v62  ;;  %6644 = vmatpush3.bf16.msra.mxu0 %v7887_v44  ;;  %v5568_v62 = vrot.slane %v1268_v4, 9  ;;  %v5572_v58 = vrot.slane %v1272_v21, 9 }
  0xbf   : > { %6391 = vmatprep.mubr.bf16.mxu1 %v5549_v36  ;;  %6615 = vmatprep.mubr.bf16.mxu0 %v7112_v18  ;;  %v8133_v36 = vsel %vm7701_vm5, %v1346_v52, %v1347_v45  ;;  %v1353_v18 = vrot.slane %v1351_v22, 4  ;;  %v5926_v52 = vld [vmem:[%s7423_s8 + $0x24] sm:$0xf]  ;;  %v3860_v45 = vshrl.u32 %v5927_v13, 16 }
  0xc0   : > { %6645 = vmatprep.subr.bf16.mxu0 %v7116_v47  ;;  %v8150_v49 = vsel %vm7701_vm5, %v5568_v62, %v1351_v22  ;;  %v8167_v22 = vld [vmem:[%s7423_s8 + $0x54] sm:$0xe]  ;;  %v3838_v62 = vrot.slane %v3836_v51, 4  ;;  %v3847_v38 = vshrl.u32 %v5926_v52, 16  ;;  %v3850_v28 = vshll.u32 %v5926_v52, 16 }
  0xc1   : > { %v8164_v4 = vsel %vm7701_vm5, %v1353_v18, %v1354_v17  ;;  %v3842_v17 = vshll.u32 %v5925_v50, 16  ;;  %v5570_v5 = vrot.slane %v8167_v22, 9  ;;  %v7136_v50 = vld [vmem:[%s9749_s1 + $0x1e8] sm:$0xff]   ;;  %v1367_v52 = vrot.slane %v1365_v16, 4 }
  0xc2   : > { %6646 = vmatpush3.bf16.msra.mxu0 %v7116_v47  ;;  %v7128_v47 = vld [vmem:[%s9749_s1 + $0x1d8] sm:$0xff]   ;;  %v3829_v22 = vor.u32 %v3828_v19, %v3825_v10  ;;  %v3849_v34 = vrot.slane %v3847_v38, 4  ;;  %v3852_v44 = vrot.slane %v3850_v28, 5  ;;  %v7202_v10 = vld [vmem:[%s7423_s8 + $0x74] sm:$0x1]  ;;  %v3862_v28 = vrot.slane %v3860_v45, 4 }
  0xc3   : > { %6647 = vmatprep.subr.bf16.mxu0 %v7122_v56  ;;  %v8205_v42 = vrot.slane %v3842_v17, 5  ;;  %v1382_v19 = vrot.slane %v7202_v10, 5  ;;  %v3871_v38 = vshrl.u32 %v5929_v43, 16  ;;  %v8230_v27 = vsel %vm7701_vm5, %v5570_v5, %v1365_v16 }
  0xc4   : > { %v3830_v21 = vrot.slane %v3829_v22, 4 }
  0xc5   : > { %6616 = vmatmul.mubr.bf16.gmra.mrb[4].mxu0 %v7115_v7  ;;  %v8177_v7 = vrot.slane %v3832_v33, 5  ;;  %v7200_v33 = vld [vmem:[%s7423_s8 + $0x70] sm:$0xf] }
  0xc6   : > { %6392 = vmatmul.mubr.bf16.gmra.mrb[20].mxu1 %v5550_v15  ;;  %6619 = vmatprep.mubr.bf16.mxu0 %v7118_v0  ;;  %v1372_v15 = vrot.slane %v8171_v40, 5  ;;  %v7199_v0 = vld [vmem:[%s7423_s8 + $0x5c] sm:$0x1]  ;;  %v1379_v51 = vrot.slane %v7200_v33, 5 }
  0xc7   : > { %6395 = vmatprep.mubr.bf16.mxu1 %v5551_v26  ;;  %6648 = vmatpush3.bf16.msra.mxu0 %v7122_v56  ;;  %v1368_v18 = vrot.slane %v7199_v0, 5  ;;  %v8186_v26 = vsel %vm7701_vm5, %v5569_v54, %v1358_v1  ;;  %v8190_v56 = vsel %vm7701_vm5, %v1360_v46, %v1361_v39  ;;  %v7201_v1 = vld [vmem:[%s7423_s8 + $0x68] sm:$0x1]  ;;  %v3856_v0 = vshll.u32 %v5927_v13, 16  ;;  %v7144_v40 = vld [vmem:[%s9749_s1 + $0x1f8] sm:$0xff]  }
  0xc8   : > { %6649 = vmatprep.subr.bf16.mxu0 %v7128_v47  ;;  %v1375_v54 = vrot.slane %v7201_v1, 5  ;;  %v5571_v46 = vrot.slane %v1271_v32, 9  ;;  %v1374_v39 = vrot.slane %v1372_v15, 4  ;;  %v3839_v33 = vor.u32 %v3838_v62, %v8177_v7  ;;  %v5930_v1 = vld [vmem:[%s7423_s8 + $0x34] sm:$0xf] }
  0xc9   : > { %v1381_v32 = vrot.slane %v1379_v51, 4  ;;  %v5928_v62 = vld [vmem:[%s7423_s8 + $0x2c] sm:$0x1]  ;;  %v8217_v17 = vrot.slane %v3856_v0, 5  ;;  %v3880_v13 = vshll.u32 %v5930_v1, 16  ;;  %v3884_v31 = vshrl.u32 %v5930_v1, 16 }
  0xca   : > { %v3840_v10 = vrot.slane %v3839_v33, 4  ;;  %v8234_v29 = vsel %vm7701_vm5, %v1367_v52, %v1368_v18  ;;  %v8241_v45 = vsel %vm7701_vm5, %v5571_v46, %v1372_v15  ;;  %v8245_v14 = vsel %vm7701_vm5, %v1374_v39, %v1375_v54  ;;  %v1273_v18 = vld [vmem:[%s7423_s8 + $0x78] sm:$0xe] }
  0xcb   : > { %6650 = vmatpush3.bf16.msra.mxu0 %v7128_v47  ;;  %v8249_v16 = vsel %vm7701_vm5, %v5572_v58, %v1379_v51  ;;  %v8259_v15 = vsel %vm7701_vm5, %v1381_v32, %v1382_v19  ;;  %v3863_v5 = vor.u32 %v3862_v28, %v8217_v17  ;;  %v3873_v52 = vrot.slane %v3871_v38, 4  ;;  %v5932_v58 = vld [vmem:[%s7423_s8 + $0x3c] sm:$0xf]  ;;  %v5933_v51 = vld [vmem:[%s7423_s8 + $0x40] sm:$0xf] }
  0xcc   : > { %6651 = vmatprep.subr.bf16.mxu0 %v7132_v53  ;;  %v3835_v0 = vsel %vm7455_vm2, %v3830_v21, %v8177_v7  ;;  %v3845_v46 = vsel %vm7455_vm2, %v3840_v10, %v8205_v42  ;;  %v8270_v39 = vrot.slane %v3880_v13, 5  ;;  %v3886_v22 = vrot.slane %v3884_v31, 4  ;;  %v7204_v19 = vld [vmem:[%s7423_s8 + $0x80] sm:$0x1]  ;;  %v8429_v47 = vld [vmem:[%s7423_s8 + $0x68] sm:$0x1] }
  0xcd   : > { %6620 = vmatmul.mubr.bf16.gmra.mrb[8].mxu0 %v7121_v2  ;;  %v3874_v2 = vshll.u32 %v5929_v43, 16  ;;  %v3866_v43 = vshll.u32 %v5928_v62, 16  ;;  %v5573_v32 = vrot.slane %v1273_v18, 9  ;;  %v1274_v62 = vld [vmem:[%s7423_s8 + $0x84] sm:$0xe]  ;;  %v3895_v28 = vshrl.u32 %v5932_v58, 16 }
  0xce   : > { %6396 = vmatmul.mubr.bf16.gmra.mrb[24].mxu1 %v5552_v20  ;;  %6623 = vmatprep.mubr.bf16.mxu0 %v7124_v3  ;;  %v7140_v20 = vld [vmem:[%s9749_s1 + $0x1f0] sm:$0xff]   ;;  %v7203_v3 = vld [vmem:[%s7423_s8 + $0x7c] sm:$0xf]  ;;  %v3898_v7 = vshll.u32 %v5932_v58, 16  ;;  %v3904_v38 = vshll.u32 %v5933_v51, 16  ;;  %v9774_v42 = vcombine.low %v7860_v41, %v7865_v12  ;;  %v8281_v13 = vrot.slane %v3863_v5, 4 }
  0xcf   : > { %6399 = vmatprep.mubr.bf16.mxu1 %v5553_v23  ;;  %6652 = vmatpush3.bf16.msra.mxu0 %v7132_v53  ;;  %v3853_v23 = vor.u32 %v3852_v44, %v3849_v34  ;;  %v7129_v53 = vld [vmem:[%s7423_s8 + $0x78] sm:$0xff]   ;;  %v1386_v44 = vrot.slane %v7203_v3, 5  ;;  %v3876_v54 = vrot.slane %v3874_v2, 5  ;;  %v8274_v1 = vrot.slane %v3866_v43, 5  ;;  %v8286_v21 = vld [vmem:[%s9749_s1 + $0x200] sm:$0xff]   ;;  %9782 = vst [vmem:[#allocation8_spill] sm:$0xff] %v8429_v47 }
  0xd0   : > { %6653 = vmatprep.subr.bf16.mxu0 %v7136_v50  ;;  %v5931_v34 = vld [vmem:[%s7423_s8 + $0x38] sm:$0x1]  ;;  %v3908_v2 = vshrl.u32 %v5933_v51, 16  ;;  %v7131_v43 = vld [vmem:[%s7423_s8 + $0x84] sm:$0xff]   ;;  %v3887_v12 = vor.u32 %v3886_v22, %v8270_v39  ;;  %v3900_v58 = vrot.slane %v3898_v7, 5  ;;  %v8308_v51 = vrot.slane %v3904_v38, 5 }
  0xd1   : > { %v8272_v33 = vrot.slane %v3853_v23, 4  ;;  %v1388_v10 = vrot.slane %v1386_v44, 4  ;;  %v3877_v31 = vor.u32 %v3876_v54, %v3873_v52  ;;  %v9775_v23 = vcombine.low %v8091_v59, %v8099_v25  ;;  %v7205_v18 = vld [vmem:[%s7423_s8 + $0x88] sm:$0xf]  ;;  %v5934_v5 = vld [vmem:[%s7423_s8 + $0x44] sm:$0x1] }
  0xd2   : > { %v1393_v3 = vrot.slane %v7205_v18, 5  ;;  %v8299_v59 = vcombine.low %v3835_v0, %v3845_v46  ;;  %v5935_v52 = vld [vmem:[%s7423_s8 + $0x48] sm:$0xf]  ;;  %v3897_v54 = vrot.slane %v3895_v28, 4  ;;  %v3910_v22 = vrot.slane %v3908_v2, 4 }
  0xd3   : > { %6654 = vmatpush3.bf16.msra.mxu0 %v7136_v50  ;;  %v1389_v50 = vrot.slane %v7204_v19, 5  ;;  %v7133_v19 = vld [vmem:[%s7423_s8 + $0x90] sm:$0xff]   ;;  %v3859_v0 = vsel %vm7455_vm2, %v8272_v33, %v8217_v17  ;;  %v3878_v46 = vrot.slane %v3877_v31, 4  ;;  %v3869_v28 = vsel %vm7455_vm2, %v8281_v13, %v8274_v1  ;;  %v8330_v33 = vld [vmem:[%s7423_s8 + $0x58] sm:$0xf]  ;;  %v7134_v31 = vld [vmem:[%s9749_s1 + $0xc8] sm:$0xff]  }
  0xd4   : > { %6655 = vmatprep.subr.bf16.mxu0 %v7140_v20  ;;  %v3888_v38 = vrot.slane %v3887_v12, 4  ;;  %v1395_v2 = vrot.slane %v1393_v3, 4  ;;  %v5938_v17 = vld [vmem:[%s7423_s8 + $0x54] sm:$0xf]  ;;  %v3914_v1 = vshll.u32 %v5934_v5, 16  ;;  %v3919_v13 = vshrl.u32 %v5935_v52, 16 }
  0xd5   : > { %6624 = vmatmul.mubr.bf16.gmra.mrb[12].mxu0 %v7127_v48  ;;  %v3890_v48 = vshll.u32 %v5931_v34, 16  ;;  %v8326_v7 = vsel %vm7701_vm5, %v1388_v10, %v1389_v50  ;;  %v3922_v50 = vshll.u32 %v5935_v52, 16  ;;  %v3901_v10 = vor.u32 %v3900_v58, %v3897_v54  ;;  %v7135_v54 = vld [vmem:[%s7423_s8 + $0x9c] sm:$0xff]   ;;  %v7211_v41 = vld [vmem:[%s7423_s8 + $0xac] sm:$0xf] }
  0xd6   : > { %6400 = vmatmul.mubr.bf16.gmra.mrb[28].mxu1 %v9774_v42  ;;  %6627 = vmatprep.mubr.bf16.mxu0 %v7129_v53  ;;  %v5574_v53 = vrot.slane %v1274_v62, 9  ;;  %v7206_v42 = vld [vmem:[%s7423_s8 + $0x8c] sm:$0x1]  ;;  %v3952_v5 = vshll.u32 %v8330_v33, 16  ;;  %v9777_v52 = vcombine.low %v8107_v63, %v8115_v8  ;;  %v8366_v63 = vld [vmem:[%s7423_s8 + $0x50] sm:$0x1] }
  0xd7   : > { %6419 = vmatprep.mubr.bf16.mxu1 %v9775_v23  ;;  %6656 = vmatpush3.bf16.msra.mxu0 %v7140_v20  ;;  %v8305_v20 = vsel %vm7701_vm5, %v5573_v32, %v1386_v44  ;;  %v3892_v62 = vrot.slane %v3890_v48, 5  ;;  %v1396_v23 = vrot.slane %v7206_v42, 5  ;;  %v1275_v44 = vld [vmem:[%s7423_s8 + $0x90] sm:$0xe]  ;;  %v8318_v32 = vld [vmem:[%s7423_s8 + $0x4c] sm:$0xf]  ;;  %v3911_v48 = vor.u32 %v3910_v22, %v8308_v51 }
  0xd8   : > { %6657 = vmatprep.subr.bf16.mxu0 %v7144_v40  ;;  %v3928_v12 = vshll.u32 %v8318_v32, 16  ;;  %v3932_v18 = vshrl.u32 %v8318_v32, 16  ;;  %v9776_v42 = vcombine.low %v8095_v30, %v8103_v6  ;;  %v7138_v30 = vld [vmem:[%s9749_s1 + $0xd0] sm:$0xff]   ;;  %v3883_v6 = vsel %vm7455_vm2, %v3878_v46, %v8270_v39  ;;  %v7137_v8 = vld [vmem:[%s7423_s8 + $0xa8] sm:$0xff]   ;;  %v8373_v39 = vld [vmem:[%s7423_s8 + $0x5c] sm:$0x1] }
  0xd9   : > { %v3893_v58 = vsel %vm7455_vm2, %v3888_v38, %v3892_v62  ;;  %v5575_v22 = vrot.slane %v1275_v44, 9  ;;  %v3924_v25 = vrot.slane %v3922_v50, 5  ;;  %9778 = vst [vmem:[#allocation6_spill] sm:$0xff] %v8373_v39  ;;  %v3902_v46 = vrot.slane %v3901_v10, 4 }
  0xda   : > { %v3912_v62 = vrot.slane %v3911_v48, 4  ;;  %v8375_v38 = vrot.slane %v3928_v12, 5  ;;  %v8377_v34 = vrot.slane %v3952_v5, 5  ;;  %v8382_v50 = vcombine.low %v3859_v0, %v3869_v28  ;;  %v5941_v28 = vld [vmem:[%s7423_s8 + $0x60] sm:$0xf] }
  0xdb   : > { %6658 = vmatpush3.bf16.msra.mxu0 %v7144_v40  ;;  %v8338_v40 = vsel %vm7701_vm5, %v5574_v53, %v1393_v3  ;;  %v3943_v53 = vshrl.u32 %v5938_v17, 16  ;;  %v3946_v3 = vshll.u32 %v5938_v17, 16  ;;  %v7207_v17 = vld [vmem:[%s7423_s8 + $0x94] sm:$0xf]  ;;  %v8386_v48 = vcombine.low %v3883_v6, %v3893_v58 }
  0xdc   : > { %6691 = vmatprep.subr.bf16.mxu0 %v8286_v21  ;;  %v3938_v0 = vshll.u32 %v8366_v63, 16  ;;  %v3907_v6 = vsel %vm7455_vm2, %v3902_v46, %v8308_v51  ;;  %v9781_v46 = vcombine.low %v8129_v61, %v8133_v36 }
  0xdd   : > { %6628 = vmatmul.mubr.bf16.gmra.mrb[16].mxu0 %v7131_v43  ;;  %v3956_v43 = vshrl.u32 %v8330_v33, 16  ;;  %v3945_v44 = vrot.slane %v3943_v53, 4  ;;  %v7208_v53 = vld [vmem:[%s7423_s8 + $0x98] sm:$0x1] }
  0xde   : > { %6420 = vmatmul.mubr.bf16.vlgmr.msra.gmra.mrb[0].mxu1 %v9776_v42  ;;  %6631 = vmatprep.mubr.bf16.mxu0 %v7133_v19  ;;  %v8369_v19 = vrot.slane %v3914_v1, 5  ;;  %v1400_v42 = vrot.slane %v7207_v17, 5  ;;  %v7209_v17 = vld [vmem:[%s7423_s8 + $0xa0] sm:$0xf]  ;;  %v3940_v36 = vrot.slane %v3938_v0, 5 }
  0xdf   : > { %6452 = vmatpush3.bf16.msra.mxu1 %v8048_v60  ;;  %6423 = vmatprep.mubr.bf16.mxu1 %v9777_v52  ;;  %v8363_v60 = vsel %vm7701_vm5, %v1395_v2, %v1396_v23  ;;  %v3921_v52 = vrot.slane %v3919_v13, 4  ;;  %v3934_v23 = vrot.slane %v3932_v18, 4  ;;  %v3948_v2 = vrot.slane %v3946_v3, 5  ;;  %v7142_v13 = vld [vmem:[%s9749_s1 + $0xd8] sm:$0xff]  }
  0xe0   : > { %6453 = vmatprep.subr.bf16.mxu1 %v7134_v31  ;;  %v3958_v1 = vrot.slane %v3956_v43, 4  ;;  %v1276_v18 = vld [vmem:[%s7423_s8 + $0x9c] sm:$0xe]  ;;  %v1403_v3 = vrot.slane %v7208_v53, 5  ;;  %v8399_v43 = vld [vmem:[%s7423_s8 + $0x64] sm:$0xf] }
  0xe1   : > { %v3925_v5 = vor.u32 %v3924_v25, %v3921_v52  ;;  %9779 = vst [vmem:[#allocation7_spill] sm:$0xff] %v8399_v43  ;;  %v3935_v58 = vor.u32 %v3934_v23, %v8375_v38  ;;  %v1407_v12 = vrot.slane %v7209_v17, 5  ;;  %v9780_v25 = vcombine.low %v8119_v24, %v8123_v35  ;;  %v7139_v23 = vld [vmem:[%s7423_s8 + $0xb4] sm:$0xff]   ;;  %v7145_v24 = vld [vmem:[%s9749_s1 + $0xe0] sm:$0xff]   ;;  %v5944_v17 = vld [vmem:[%s7423_s8 + $0x6c] sm:$0xf] }
  0xe2   : > { %v1402_v52 = vrot.slane %v1400_v42, 4  ;;  %v3949_v53 = vor.u32 %v3948_v2, %v3945_v44  ;;  %v3959_v51 = vor.u32 %v3958_v1, %v8377_v34  ;;  %v3967_v35 = vshrl.u32 %v5941_v28, 16  ;;  %v7210_v2 = vld [vmem:[%s7423_s8 + $0xa4] sm:$0x1] }
  0xe3   : > { %6454 = vmatpush3.bf16.msra.mxu1 %v7134_v31  ;;  %v8393_v31 = vsel %vm7701_vm5, %v5575_v22, %v1400_v42  ;;  %v3962_v22 = vshll.u32 %v8373_v39, 16  ;;  %v3980_v42 = vshrl.u32 %v8399_v43, 16  ;;  %v3926_v61 = vrot.slane %v3925_v5, 4  ;;  %v8568_v39 = vld [vmem:[%s7423_s8 + $0x98] sm:$0x1] }
  0xe4   : > { %6455 = vmatprep.subr.bf16.mxu1 %v7138_v30  ;;  %v5576_v44 = vrot.slane %v1276_v18, 9  ;;  %v1410_v1 = vrot.slane %v7210_v2, 5  ;;  %v3950_v5 = vrot.slane %v3949_v53, 4  ;;  %v3960_v18 = vrot.slane %v3959_v51, 4  ;;  %9795 = vst [vmem:[#allocation17_spill] sm:$0xff] %v8568_v39 }
  0xe5   : > { %6632 = vmatmul.mubr.bf16.gmra.mrb[20].mxu0 %v7135_v54  ;;  %v3917_v54 = vsel %vm7455_vm2, %v3912_v62, %v8369_v19  ;;  %v3976_v19 = vshll.u32 %v8399_v43, 16  ;;  %v7141_v62 = vld [vmem:[%s7423_s8 + $0xc0] sm:$0xff]   ;;  %v3964_v10 = vrot.slane %v3962_v22, 5  ;;  %v8435_v43 = vsel %vm7701_vm5, %v1402_v52, %v1403_v3 }
  0xe6   : > { %6424 = vmatmul.mubr.bf16.gmra.mrb[4].mxu1 %v9780_v25  ;;  %6635 = vmatprep.mubr.bf16.mxu0 %v7137_v8  ;;  %v3970_v8 = vshll.u32 %v5941_v28, 16  ;;  %v3936_v25 = vrot.slane %v3935_v58, 4  ;;  %v1414_v28 = vrot.slane %v7211_v41, 5  ;;  %v8431_v55 = vcombine.low %v3907_v6, %v3917_v54  ;;  %v7147_v41 = vld [vmem:[%s9749_s1 + $0xe8] sm:$0xff]  }
  0xe7   : > { %6427 = vmatprep.mubr.bf16.mxu1 %v9781_v46  ;;  %6456 = vmatpush3.bf16.msra.mxu1 %v7138_v30  ;;  %v1277_v30 = vld [vmem:[%s7423_s8 + $0xa8] sm:$0xe]  ;;  %v1409_v46 = vrot.slane %v1407_v12, 4  ;;  %v3969_v0 = vrot.slane %v3967_v35, 4  ;;  %v8437_v58 = vrot.slane %v3976_v19, 5  ;;  %v3982_v22 = vrot.slane %v3980_v42, 4 }
  0xe8   : > { %6457 = vmatprep.subr.bf16.mxu1 %v7142_v13  ;;  %v3972_v2 = vrot.slane %v3970_v8, 5  ;;  %v3931_v3 = vsel %vm7455_vm2, %v3926_v61, %v8375_v38  ;;  %v8447_v6 = vsel %vm7701_vm5, %v5576_v44, %v1407_v12  ;;  %v3991_v54 = vshrl.u32 %v5944_v17, 16  ;;  %v7212_v38 = vld [vmem:[%s7423_s8 + $0xb0] sm:$0x1]  ;;  %v1278_v19 = vld [vmem:[%s7423_s8 + $0xb4] sm:$0xe] }
  0xe9   : > { %v3994_v52 = vshll.u32 %v5944_v17, 16  ;;  %v3941_v53 = vsel %vm7455_vm2, %v3936_v25, %v3940_v36  ;;  %v8456_v51 = vsel %vm7701_vm5, %v1409_v46, %v1410_v1  ;;  %v5577_v35 = vrot.slane %v1277_v30, 9  ;;  %v8478_v30 = vld [vmem:[%s7423_s8 + $0x74] sm:$0x1]  ;;  %v7213_v25 = vld [vmem:[%s7423_s8 + $0xb8] sm:$0xf] }
  0xea   : > { %v1417_v8 = vrot.slane %v7212_v38, 5  ;;  %v9784_v12 = vcombine.low %v8150_v49, %v8164_v4  ;;  %v3955_v42 = vsel %vm7455_vm2, %v3950_v5, %v8377_v34  ;;  %v3965_v61 = vsel %vm7455_vm2, %v3960_v18, %v3964_v10  ;;  %v7143_v4 = vld [vmem:[%s7423_s8 + $0xcc] sm:$0xff]   ;;  %9786 = vst [vmem:[#allocation10_spill] sm:$0xff] %v8478_v30  ;;  %v5950_v38 = vld [vmem:[%s7423_s8 + $0x84] sm:$0xf] }
  0xeb   : > { %6458 = vmatpush3.bf16.msra.mxu1 %v7142_v13  ;;  %v8450_v13 = vld [vmem:[%s7423_s8 + $0x70] sm:$0xf]  ;;  %v1416_v36 = vrot.slane %v1414_v28, 4  ;;  %v3986_v44 = vshll.u32 %v8429_v47, 16  ;;  %v9785_v49 = vcombine.low %v8186_v26, %v8190_v56  ;;  %v3983_v1 = vor.u32 %v3982_v22, %v8437_v58  ;;  %v8495_v22 = vld [vmem:[%s7423_s8 + $0x7c] sm:$0xf] }
  0xec   : > { %6459 = vmatprep.subr.bf16.mxu1 %v7145_v24  ;;  %9783 = vst [vmem:[#allocation9_spill] sm:$0xff] %v8450_v13  ;;  %v4000_v34 = vshll.u32 %v8450_v13, 16  ;;  %v4004_v10 = vshrl.u32 %v8450_v13, 16  ;;  %v5578_v17 = vrot.slane %v1278_v19, 9  ;;  %v1421_v46 = vrot.slane %v7213_v25, 5  ;;  %9787 = vst [vmem:[#allocation11_spill] sm:$0xff] %v8495_v22 }
  0xed   : > { %6636 = vmatmul.mubr.bf16.gmra.mrb[24].mxu0 %v7139_v23  ;;  %v7149_v23 = vld [vmem:[%s9749_s1 + $0xf0] sm:$0xff]   ;;  %v3993_v26 = vrot.slane %v3991_v54, 4  ;;  %v3996_v56 = vrot.slane %v3994_v52, 5  ;;  %v8486_v18 = vcombine.low %v3931_v3, %v3941_v53  ;;  %v8498_v19 = vcombine.low %v3955_v42, %v3965_v61  ;;  %v7214_v3 = vld [vmem:[%s7423_s8 + $0xbc] sm:$0x1] }
  0xee   : > { %6428 = vmatmul.mubr.bf16.gmra.mrb[8].mxu1 %v9784_v12  ;;  %6639 = vmatprep.mubr.bf16.mxu0 %v7141_v62  ;;  %v3973_v62 = vor.u32 %v3972_v2, %v3969_v0  ;;  %v8492_v2 = vsel %vm7701_vm5, %v5577_v35, %v1414_v28  ;;  %v8502_v54 = vsel %vm7701_vm5, %v1416_v36, %v1417_v8  ;;  %v8504_v52 = vrot.slane %v3986_v44, 5  ;;  %v7151_v12 = vld [vmem:[%s9749_s1 + $0xf8] sm:$0xff]   ;;  %v8511_v28 = vld [vmem:[%s7423_s8 + $0x88] sm:$0xf] }
  0xef   : > { %6431 = vmatprep.mubr.bf16.mxu1 %v9785_v49  ;;  %6460 = vmatpush3.bf16.msra.mxu1 %v7145_v24  ;;  %v5947_v24 = vld [vmem:[%s7423_s8 + $0x78] sm:$0xf]  ;;  %v1424_v53 = vrot.slane %v7214_v3, 5  ;;  %9788 = vst [vmem:[#allocation12_spill] sm:$0xff] %v8511_v28  ;;  %v8515_v42 = vrot.slane %v3983_v1, 4  ;;  %v8517_v61 = vrot.slane %v4000_v34, 5  ;;  %v8521_v36 = vsel %vm7701_vm5, %v5578_v17, %v1421_v46 }
  0xf0   : > { %6461 = vmatprep.subr.bf16.mxu1 %v7147_v41  ;;  %v8513_v35 = vrot.slane %v3973_v62, 4  ;;  %v4006_v8 = vrot.slane %v4004_v10, 4  ;;  %v1423_v44 = vrot.slane %v1421_v46, 4  ;;  %v3997_v49 = vor.u32 %v3996_v56, %v3993_v26  ;;  %v5953_v3 = vld [vmem:[%s7423_s8 + $0x90] sm:$0xf] }
  0xf1   : > { %v4010_v25 = vshll.u32 %v8478_v30, 16  ;;  %v4018_v0 = vshll.u32 %v5947_v24, 16  ;;  %v4024_v62 = vshll.u32 %v8495_v22, 16  ;;  %v4028_v1 = vshrl.u32 %v8495_v22, 16  ;;  %v8528_v34 = vld [vmem:[%s7423_s8 + $0x94] sm:$0xf] }
  0xf2   : > { %9789 = vst [vmem:[#allocation13_spill] sm:$0xff] %v8528_v34  ;;  %v9790_v10 = vcombine.low %v8230_v27, %v8234_v29  ;;  %v4039_v17 = vshrl.u32 %v5950_v38, 16  ;;  %v4042_v46 = vshll.u32 %v5950_v38, 16  ;;  %v4052_v26 = vshrl.u32 %v8511_v28, 16  ;;  %v5956_v38 = vld [vmem:[%s7423_s8 + $0x9c] sm:$0xf] }
  0xf3   : > { %6462 = vmatpush3.bf16.msra.mxu1 %v7147_v41  ;;  %v4015_v41 = vshrl.u32 %v5947_v24, 16  ;;  %v9791_v56 = vcombine.low %v8241_v45, %v8245_v14  ;;  %v4007_v29 = vor.u32 %v4006_v8, %v8517_v61  ;;  %v4066_v24 = vshll.u32 %v5953_v3, 16  ;;  %v8550_v45 = vld [vmem:[%s7423_s8 + $0x80] sm:$0x1] }
  0xf4   : > { %6463 = vmatprep.subr.bf16.mxu1 %v7149_v23  ;;  %v8547_v5 = vrot.slane %v4010_v25, 5  ;;  %9792 = vst [vmem:[#allocation14_spill] sm:$0xff] %v8550_v45  ;;  %v4072_v14 = vshll.u32 %v8528_v34, 16  ;;  %v4020_v27 = vrot.slane %v4018_v0, 5  ;;  %v4030_v8 = vrot.slane %v4028_v1, 4 }
  0xf5   : > { %6640 = vmatmul.mubr.bf16.gmra.mrb[28].mxu0 %v7143_v4  ;;  %v4048_v4 = vshll.u32 %v8511_v28, 16  ;;  %v8554_v28 = vrot.slane %v4024_v62, 5  ;;  %v8560_v22 = vld [vmem:[%s7423_s8 + $0xa0] sm:$0xf]  ;;  %v4041_v25 = vrot.slane %v4039_v17, 4  ;;  %v4044_v30 = vrot.slane %v4042_v46, 5 }
  0xf6   : > { %6432 = vmatmul.mubr.bf16.gmra.mrb[12].mxu1 %v9790_v10  ;;  %6659 = vmatprep.mubr.bf16.mxu0 %v8299_v59  ;;  %v4063_v59 = vshrl.u32 %v5953_v3, 16  ;;  %v8545_v10 = vrot.slane %v3997_v49, 4  ;;  %v8557_v3 = vld [vmem:[%s7423_s8 + $0x8c] sm:$0x1]  ;;  %9794 = vst [vmem:[#allocation16_spill] sm:$0xff] %v8560_v22  ;;  %v4054_v47 = vrot.slane %v4052_v26, 4  ;;  %v8577_v62 = vsel %vm7701_vm5, %v1423_v44, %v1424_v53 }
  0xf7   : > { %6435 = vmatprep.mubr.bf16.mxu1 %v9791_v56  ;;  %6464 = vmatpush3.bf16.msra.mxu1 %v7149_v23  ;;  %v4076_v23 = vshrl.u32 %v8528_v34, 16  ;;  %v4017_v56 = vrot.slane %v4015_v41, 4  ;;  %9793 = vst [vmem:[#allocation15_spill] sm:$0xff] %v8557_v3  ;;  %v7148_v49 = vld [vmem:[%s9749_s1 + $0x208] sm:$0xff]   ;;  %v8565_v13 = vrot.slane %v4048_v4, 5  ;;  %v4068_v34 = vrot.slane %v4066_v24, 5 }
  0xf8   : > { %6465 = vmatprep.subr.bf16.mxu1 %v7151_v12  ;;  %v5959_v41 = vld [vmem:[%s7423_s8 + $0xa8] sm:$0xf]  ;;  %v4065_v1 = vrot.slane %v4063_v59, 4  ;;  %v8582_v17 = vld [vmem:[%s9749_s1 + $0x100] sm:$0xff]   ;;  %v8585_v46 = vrot.slane %v4072_v14, 5  ;;  %v4087_v26 = vshrl.u32 %v5956_v38, 16  ;;  %v9797_v24 = vcombine.low %v8249_v16, %v8259_v15 }
  0xf9   : > { %9796 = vst [vmem:[#allocation18_spill] sm:$0xff] %v8582_v17  ;;  %v4078_v4 = vrot.slane %v4076_v23, 4  ;;  %v4090_v0 = vshll.u32 %v5956_v38, 16  ;;  %v8588_v53 = vrot.slane %v4007_v29, 4  ;;  %v4096_v44 = vshll.u32 %v8560_v22, 16  ;;  %v7150_v16 = vld [vmem:[%s9749_s1 + $0x210] sm:$0xff]  }
  0xfa   : > { %v4100_v59 = vshrl.u32 %v8560_v22, 16  ;;  %v4021_v14 = vor.u32 %v4020_v27, %v4017_v56  ;;  %v4031_v38 = vor.u32 %v4030_v8, %v8554_v28  ;;  %v4045_v23 = vor.u32 %v4044_v30, %v4041_v25  ;;  %v8600_v29 = vld [vmem:[%s7423_s8 + $0xac] sm:$0xf]  ;;  %v8613_v25 = vld [vmem:[%s7423_s8 + $0xa4] sm:$0x1] }
  0xfb   : > { %6466 = vmatpush3.bf16.msra.mxu1 %v7151_v12  ;;  %v4034_v12 = vshll.u32 %v8550_v45, 16  ;;  %9798 = vst [vmem:[#allocation19_spill] sm:$0xff] %v8600_v29  ;;  %v4055_v15 = vor.u32 %v4054_v47, %v8565_v13  ;;  %v4111_v27 = vshrl.u32 %v5959_v41, 16  ;;  %v4114_v30 = vshll.u32 %v5959_v41, 16 }
  0xfc   : > { %6739 = vmatprep.subr.bf16.mxu1 %v8582_v17  ;;  %v9799_v17 = vcombine.low %v8305_v20, %v8326_v7  ;;  %v4069_v56 = vor.u32 %v4068_v34, %v4065_v1  ;;  %v4079_v8 = vor.u32 %v4078_v4, %v8585_v46  ;;  %v4089_v20 = vrot.slane %v4087_v26, 4 }
  0xfd   : > { %6660 = vmatmul.mubr.bf16.vlgmr.msra.gmra.mrb[0].mxu0 %v8382_v50  ;;  %v4058_v50 = vshll.u32 %v8557_v3, 16  ;;  %v4092_v7 = vrot.slane %v4090_v0, 5  ;;  %v4124_v22 = vshrl.u32 %v8600_v29, 16  ;;  %v4022_v47 = vrot.slane %v4021_v14, 4  ;;  %v7152_v0 = vld [vmem:[%s9749_s1 + $0x218] sm:$0xff]  }
  0xfe   : > { %6436 = vmatmul.mubr.bf16.gmra.mrb[16].mxu1 %v9797_v24  ;;  %6692 = vmatpush3.bf16.msra.mxu0 %v8286_v21  ;;  %v4082_v21 = vshll.u32 %v8568_v39, 16  ;;  %v4120_v24 = vshll.u32 %v8600_v29, 16  ;;  %v4032_v39 = vrot.slane %v4031_v38, 4  ;;  %v4036_v3 = vrot.slane %v4034_v12, 5 }
  0xff   : > { %6439 = vmatprep.mubr.bf16.mxu1 %v9799_v17  ;;  %6663 = vmatprep.mubr.bf16.mxu0 %v8386_v48  ;;  %v8615_v17 = vrot.slane %v4096_v44, 5  ;;  %v4102_v48 = vrot.slane %v4100_v59, 4  ;;  %v4060_v41 = vrot.slane %v4058_v50, 5  ;;  %v4046_v34 = vrot.slane %v4045_v23, 4 }
 0x100   : > { %6693 = vmatprep.subr.bf16.mxu0 %v7148_v49  ;;  %v4056_v1 = vrot.slane %v4055_v15, 4  ;;  %v4113_v4 = vrot.slane %v4111_v27, 4  ;;  %v4116_v45 = vrot.slane %v4114_v30, 5  ;;  %v4070_v26 = vrot.slane %v4069_v56, 4  ;;  %v8681_v27 = vld [vmem:[%s7423_s8 + $0xbc] sm:$0x1] }
 0x101   : > { %v4084_v44 = vrot.slane %v4082_v21, 5  ;;  %v4093_v59 = vor.u32 %v4092_v7, %v4089_v20  ;;  %v4106_v29 = vshll.u32 %v8613_v25, 16  ;;  %v4103_v12 = vor.u32 %v4102_v48, %v8615_v17  ;;  %v8648_v21 = vld [vmem:[%s7423_s8 + $0xb0] sm:$0x1] }
 0x102   : > { %6694 = vmatpush3.bf16.msra.mxu0 %v7148_v49  ;;  %v4080_v49 = vrot.slane %v4079_v8, 4  ;;  %v8625_v14 = vrot.slane %v4120_v24, 5  ;;  %v4126_v38 = vrot.slane %v4124_v22, 4  ;;  %v9800_v23 = vor.u32 %v8033_v57, %v8031_v11 }
 0x103   : > { %6695 = vmatprep.subr.bf16.mxu0 %v7150_v16  ;;  %v9801_v15 = vcombine.low %v8338_v40, %v8363_v60  ;;  %v4013_v22 = vsel %vm7455_vm2, %v8588_v53, %v8547_v5  ;;  %v4027_v57 = vsel %vm7455_vm2, %v4022_v47, %v8554_v28  ;;  %v9802_v40 = vcombine.low %v8393_v31, %v8435_v43  ;;  %v7155_v31 = vld [vmem:[%s9749_s1 + $0x220] sm:$0xff]  }
 0x104   : > { %v8630_v50 = vrot.slane %v9800_v23, 4  ;;  %v4037_v60 = vsel %vm7455_vm2, %v4032_v39, %v4036_v3  ;;  %v4117_v5 = vor.u32 %v4116_v45, %v4113_v4  ;;  %v4061_v28 = vsel %vm7455_vm2, %v4056_v1, %v4060_v41  ;;  %v6015_v41 = vld [vmem:[%s7423_s8 + $0x48] sm:$0xe] }
 0x105   : > { %6664 = vmatmul.mubr.bf16.gmra.mrb[4].mxu0 %v8431_v55  ;;  %v4003_v55 = vsel %vm7455_vm2, %v8545_v10, %v8517_v61  ;;  %v5962_v61 = vld [vmem:[%s7423_s8 + $0xb4] sm:$0xf]  ;;  %v8660_v10 = vld [vmem:[%s7423_s8 + $0xb8] sm:$0xf]  ;;  %v4075_v39 = vsel %vm7455_vm2, %v4070_v26, %v8585_v46  ;;  %v8670_v43 = vrot.slane %v4093_v59, 4  ;;  %v8672_v3 = vrot.slane %v4106_v29, 5 }
 0x106   : > { %6440 = vmatmul.mubr.bf16.gmra.mrb[20].mxu1 %v9801_v15  ;;  %6667 = vmatprep.mubr.bf16.mxu0 %v8486_v18  ;;  %v4051_v18 = vsel %vm7455_vm2, %v4046_v34, %v8565_v13  ;;  %v4085_v13 = vsel %vm7455_vm2, %v4080_v49, %v4084_v44  ;;  %v8676_v45 = vrot.slane %v4103_v12, 4  ;;  %v4127_v53 = vor.u32 %v4126_v38, %v8625_v14  ;;  %v6016_v26 = vld [vmem:[%s7423_s8 + $0x54] sm:$0xe] }
 0x107   : > { %6443 = vmatprep.mubr.bf16.mxu1 %v9802_v40  ;;  %6696 = vmatpush3.bf16.msra.mxu0 %v7150_v16  ;;  %v4130_v16 = vshll.u32 %v8648_v21, 16  ;;  %v9803_v46 = vsel %vm7455_vm2, %v8515_v42, %v8504_v52  ;;  %v9804_v29 = vsel %vm7455_vm2, %v8513_v35, %v8437_v58  ;;  %v4135_v56 = vshrl.u32 %v5962_v61, 16 }
 0x108   : > { %6697 = vmatprep.subr.bf16.mxu0 %v7152_v0  ;;  %v5993_v30 = vcombine.low %v9804_v29, %v9803_v46  ;;  %v4138_v8 = vshll.u32 %v5962_v61, 16  ;;  %v4144_v20 = vshll.u32 %v8660_v10, 16  ;;  %v5609_v7 = vcombine.low %v8492_v2, %v8502_v54  ;;  %v7158_v2 = vld [vmem:[%s9749_s1 + $0x228] sm:$0xff]   ;;  %v5965_v54 = vld [vmem:[%s7423_s8 + $0xc0] sm:$0xf]  ;;  %v9808_v29 = vld [vmem:[#allocation8_spill] sm:$0xff] }
 0x109   : > { %v5610_v48 = vcombine.low %v8521_v36, %v8577_v62  ;;  %v5994_v24 = vcombine.low %v4003_v55, %v4013_v22  ;;  %v8698_v52 = vrot.slane %v4117_v5, 4  ;;  %v5995_v42 = vcombine.low %v4027_v57, %v4037_v60 }
 0x10a   : > { %v8700_v58 = vcombine.low %v4051_v18, %v4061_v28  ;;  %v8702_v35 = vcombine.low %v4075_v39, %v4085_v13  ;;  %v4099_v47 = vsel %vm7455_vm2, %v8670_v43, %v8615_v17  ;;  %v4109_v34 = vsel %vm7455_vm2, %v8676_v45, %v8672_v3  ;;  %v6018_v28 = vld [vmem:[%s7423_s8 + $0x6c] sm:$0xe] }
 0x10b   : > { %6698 = vmatpush3.bf16.msra.mxu0 %v7152_v0  ;;  %v8718_v1 = vrot.slane %v4127_v53, 4  ;;  %v8720_v4 = vrot.slane %v4130_v16, 5  ;;  %v4148_v0 = vshrl.u32 %v8660_v10, 16  ;;  %v9805_v44 = vcombine.low %v8447_v6, %v8456_v51  ;;  %v7161_v6 = vld [vmem:[%s9749_s1 + $0x230] sm:$0xff]   ;;  %v8742_v51 = vld [vmem:[%s7423_s8 + $0xc4] sm:$0xf] }
 0x10c   : > { %6699 = vmatprep.subr.bf16.mxu0 %v7155_v31  ;;  %v8727_v59 = vrot.slane %v4135_v56, 4  ;;  %v8731_v49 = vrot.slane %v4144_v20, 5  ;;  %v4154_v12 = vshll.u32 %v8681_v27, 16  ;;  %v4123_v38 = vsel %vm7455_vm2, %v8698_v52, %v8625_v14  ;;  %v6017_v14 = vld [vmem:[%s7423_s8 + $0x60] sm:$0xe]  ;;  %v9806_v39 = vld [vmem:[#allocation6_spill] sm:$0xff] }
 0x10d   : > { %6668 = vmatmul.mubr.bf16.gmra.mrb[8].mxu0 %v8498_v19  ;;  %v8729_v19 = vrot.slane %v4138_v8, 5  ;;  %v4159_v23 = vshrl.u32 %v5965_v54, 16  ;;  %v6031_v15 = vrot.slane %v6015_v41, 9  ;;  %v4622_v55 = vrot.slane %v8318_v32, 5  ;;  %v7153_v13 = vld [vmem:[%s7423_s8 + $0xc] sm:$0xff]   ;;  %v7164_v56 = vld [vmem:[%s9749_s1 + $0x238] sm:$0xff]  }
 0x10e   : > { %6444 = vmatmul.mubr.bf16.gmra.mrb[24].mxu1 %v9805_v44  ;;  %6671 = vmatprep.mubr.bf16.mxu0 %v5993_v30  ;;  %v4162_v22 = vshll.u32 %v5965_v54, 16  ;;  %v4625_v57 = vrot.slane %v8366_v63, 5  ;;  %v6032_v40 = vrot.slane %v6016_v26, 9  ;;  %v4629_v60 = vrot.slane %v8330_v33, 5  ;;  %v9807_v16 = vld [vmem:[#allocation7_spill] sm:$0xff]  ;;  %v9809_v52 = vld [vmem:[#allocation9_spill] sm:$0xff] }
 0x10f   : > { %6447 = vmatprep.mubr.bf16.mxu1 %v5609_v7  ;;  %6700 = vmatpush3.bf16.msra.mxu0 %v7155_v31  ;;  %v4133_v18 = vsel %vm7455_vm2, %v8718_v1, %v8720_v4  ;;  %v8752_v5 = vrot.slane %v4148_v0, 4  ;;  %v8756_v61 = vsel %vm7701_vm5, %v6031_v15, %v4622_v55  ;;  %v4624_v32 = vrot.slane %v4622_v55, 4  ;;  %v9810_v4 = vld [vmem:[#allocation10_spill] sm:$0xff] }
 0x110   : > { %6701 = vmatprep.subr.bf16.mxu0 %v7158_v2  ;;  %v4168_v31 = vshll.u32 %v8742_v51, 16  ;;  %v8762_v63 = vsel %vm7701_vm5, %v6032_v40, %v4629_v60  ;;  %v4631_v33 = vrot.slane %v4629_v60, 4  ;;  %v4632_v3 = vrot.slane %v9806_v39, 5  ;;  %v8793_v26 = vld [vmem:[%s7423_s8 + $0xc8] sm:$0x1]  ;;  %v7154_v40 = vld [vmem:[%s7423_s8 + $0x18] sm:$0xff]  }
 0x111   : > { %v8768_v45 = vsel %vm7701_vm5, %v4624_v32, %v4625_v57  ;;  %v6033_v53 = vrot.slane %v6017_v14, 9  ;;  %v4636_v46 = vrot.slane %v9807_v16, 5  ;;  %v4639_v30 = vrot.slane %v9808_v29, 5  ;;  %v7156_v39 = vld [vmem:[%s7423_s8 + $0x24] sm:$0xff]  }
 0x112   : > { %v6063_v8 = vcombine.low %v8756_v61, %v8768_v45  ;;  %v8779_v20 = vsel %vm7701_vm5, %v4631_v33, %v4632_v3  ;;  %v6034_v7 = vrot.slane %v6018_v28, 9  ;;  %v4646_v0 = vrot.slane %v9810_v4, 5  ;;  %v9812_v28 = vld [vmem:[#allocation14_spill] sm:$0xff]  ;;  %v5724_v61 = vld [vmem:[%s7423_s8 + $0x90] sm:$0xf] }
 0x113   : > { %6702 = vmatpush3.bf16.msra.mxu0 %v7158_v2  ;;  %v4643_v2 = vrot.slane %v9809_v52, 5  ;;  %v6064_v54 = vcombine.low %v8762_v63, %v8779_v20  ;;  %v8786_v41 = vsel %vm7701_vm5, %v6033_v53, %v4636_v46  ;;  %v4638_v1 = vrot.slane %v4636_v46, 4  ;;  %v9813_v53 = vld [vmem:[#allocation5_spill] sm:$0xff]  ;;  %v7170_v45 = vld [vmem:[%s7423_s8 + $0xa8] sm:$0xff]  }
 0x114   : > { %6703 = vmatprep.subr.bf16.mxu0 %v7161_v6  ;;  %v8795_v44 = vrot.slane %v4159_v23, 4  ;;  %v8808_v36 = vcombine.low %v4099_v47, %v4109_v34  ;;  %v4141_v62 = vor.u32 %v8729_v19, %v8727_v59  ;;  %v6019_v23 = vld [vmem:[%s7423_s8 + $0x78] sm:$0xe]  ;;  %v8820_v57 = vrot.slane %v4154_v12, 5  ;;  %v5968_v12 = vld [vmem:[%s7423_s8 + $0xcc] sm:$0xf] }
 0x115   : > { %6672 = vmatmul.mubr.bf16.gmra.mrb[12].mxu0 %v5994_v24  ;;  %v8797_v24 = vrot.slane %v4162_v22, 5  ;;  %v8801_v15 = vsel %vm7701_vm5, %v6034_v7, %v4643_v2  ;;  %v4645_v55 = vrot.slane %v4643_v2, 4  ;;  %v8818_v22 = vcombine.low %v4123_v38, %v4133_v18  ;;  %v5718_v47 = vld [vmem:[%s7423_s8 + $0x78] sm:$0xf]  ;;  %v9811_v18 = vld [vmem:[#allocation11_spill] sm:$0xff] }
 0x116   : > { %6448 = vmatmul.mubr.bf16.gmra.mrb[28].mxu1 %v5610_v48  ;;  %6675 = vmatprep.mubr.bf16.mxu0 %v5995_v42  ;;  %v4172_v48 = vshrl.u32 %v8742_v51, 16  ;;  %v8815_v42 = vsel %vm7701_vm5, %v4638_v1, %v4639_v30  ;;  %v4151_v34 = vor.u32 %v8752_v5, %v8731_v49  ;;  %v8831_v59 = vrot.slane %v4168_v31, 5  ;;  %v8845_v31 = vld [vmem:[%s7423_s8 + $0xd0] sm:$0xf]  ;;  %v9814_v1 = vld [vmem:[#allocation12_spill] sm:$0xff] }
 0x117   : > { %6467 = vmatprep.mubr.bf16.mxu1 %v7153_v13  ;;  %6704 = vmatpush3.bf16.msra.mxu0 %v7161_v6  ;;  %v6065_v17 = vcombine.low %v8786_v41, %v8815_v42  ;;  %v8826_v43 = vsel %vm7701_vm5, %v4645_v55, %v4646_v0  ;;  %v4178_v19 = vshll.u32 %v8793_v26, 16  ;;  %v6020_v6 = vld [vmem:[%s7423_s8 + $0x84] sm:$0xe]  ;;  %v4165_v60 = vor.u32 %v8797_v24, %v8795_v44  ;;  %v9815_v24 = vld [vmem:[#allocation15_spill] sm:$0xff]  ;;  %v7236_v63 = vld [vmem:[%s7423_s8 + $0x8c] sm:$0x1] }
 0x118   : > { %6705 = vmatprep.subr.bf16.mxu0 %v7164_v56  ;;  %v6066_v38 = vcombine.low %v8801_v15, %v8826_v43  ;;  %v6035_v14 = vrot.slane %v6019_v23, 9  ;;  %v4650_v32 = vrot.slane %v9811_v18, 5  ;;  %v4653_v33 = vrot.slane %v9812_v28, 5 }
 0x119   : > { %v4174_v5 = vrot.slane %v4172_v48, 4  ;;  %v2400_v3 = vshrl.u32 %v5718_v47, 16  ;;  %v2403_v13 = vshll.u32 %v5718_v47, 16  ;;  %v2422_v16 = vsel %vm7455_vm2, %v8630_v50, %v9813_v53 }
 0x11a   : > { %v4183_v46 = vshrl.u32 %v5968_v12, 16  ;;  %v8853_v29 = vsel %vm7701_vm5, %v6035_v14, %v4650_v32  ;;  %v4652_v30 = vrot.slane %v4650_v32, 4  ;;  %v6036_v7 = vrot.slane %v6020_v6, 9  ;;  %v7216_v6 = vld [vmem:[%s9749_s1 + $0x108] sm:$0xff]  }
 0x11b   : > { %6706 = vmatpush3.bf16.msra.mxu0 %v7164_v56  ;;  %v4186_v52 = vshll.u32 %v5968_v12, 16  ;;  %v2402_v2 = vrot.slane %v2400_v3, 4  ;;  %v2405_v56 = vrot.slane %v2403_v13, 5  ;;  %v4657_v4 = vrot.slane %v9814_v1, 5  ;;  %v6021_v12 = vld [vmem:[%s7423_s8 + $0x90] sm:$0xe] }
 0x11c   : > { %v4192_v50 = vshll.u32 %v8845_v31, 16  ;;  %v4196_v0 = vshrl.u32 %v8845_v31, 16  ;;  %v8862_v44 = vsel %vm7701_vm5, %v4652_v30, %v4653_v33  ;;  %v4660_v55 = vrot.slane %v9815_v24, 5  ;;  %v7157_v3 = vld [vmem:[%s7423_s8 + $0x30] sm:$0xff]  }
 0x11d   : > { %6676 = vmatmul.mubr.bf16.gmra.mrb[16].mxu0 %v8700_v58  ;;  %v9816_v58 = vld [vmem:[#allocation18_spill] sm:$0xff]  ;;  %v4175_v48 = vor.u32 %v4174_v5, %v8831_v59  ;;  %v2406_v23 = vor.u32 %v2405_v56, %v2402_v2  ;;  %v4659_v47 = vrot.slane %v4657_v4, 4  ;;  %v4152_v14 = vrot.slane %v4151_v34, 4  ;;  %v8883_v13 = vld [vmem:[%s7423_s8 + $0xd4] sm:$0x1]  ;;  %v9817_v2 = vld [vmem:[#allocation13_spill] sm:$0xff] }
 0x11e   : > { %6468 = vmatmul.mubr.bf16.vlgmr.msra.gmra.mrb[0].mxu1 %v7154_v40  ;;  %6679 = vmatprep.mubr.bf16.mxu0 %v8702_v35  ;;  %v6067_v35 = vcombine.low %v8853_v29, %v8862_v44  ;;  %v4142_v40 = vrot.slane %v4141_v62, 4  ;;  %v4180_v18 = vrot.slane %v4178_v19, 5  ;;  %v8875_v32 = vsel %vm7701_vm5, %v6036_v7, %v4657_v4  ;;  %v7159_v19 = vld [vmem:[%s7423_s8 + $0x3c] sm:$0xff]   ;;  %v7217_v1 = vld [vmem:[%s9749_s1 + $0x110] sm:$0xff]  }
 0x11f   : > { %6747 = vmatpush3.bf16.msra.mxu1 %v9816_v58  ;;  %6471 = vmatprep.mubr.bf16.mxu1 %v7156_v39  ;;  %v4185_v28 = vrot.slane %v4183_v46, 4  ;;  %v4188_v33 = vrot.slane %v4186_v52, 5  ;;  %v2407_v39 = vrot.slane %v2406_v23, 4  ;;  %v8879_v5 = vsel %vm7701_vm5, %v4659_v47, %v4660_v55  ;;  %v7218_v47 = vld [vmem:[%s7423_s8 + $0x1c] sm:$0xf] }
 0x120   : > { %6740 = vmatprep.subr.bf16.mxu1 %v7216_v6  ;;  %v8885_v53 = vrot.slane %v4192_v50, 5  ;;  %v4198_v30 = vrot.slane %v4196_v0, 4  ;;  %v6068_v62 = vcombine.low %v8875_v32, %v8879_v5  ;;  %v6037_v34 = vrot.slane %v6021_v12, 9 }
 0x121   : > { %v4166_v7 = vrot.slane %v4165_v60, 4  ;;  %v4176_v46 = vrot.slane %v4175_v48, 4  ;;  %v2412_v52 = vsel %vm7455_vm2, %v2407_v39, %v8031_v11  ;;  %v4664_v56 = vrot.slane %v9817_v2, 5  ;;  %v9818_v11 = vld [vmem:[#allocation17_spill] sm:$0xff]  ;;  %v7160_v39 = vld [vmem:[%s7423_s8 + $0x48] sm:$0xff]  }
 0x122   : > { %v4147_v4 = vsel %vm7455_vm2, %v4142_v40, %v8731_v49  ;;  %v4157_v60 = vsel %vm7455_vm2, %v4152_v14, %v8820_v57  ;;  %v8903_v50 = vcombine.low %v2412_v52, %v2422_v16  ;;  %v4667_v0 = vrot.slane %v9818_v11, 5  ;;  %v6011_v57 = vld [vmem:[%s7423_s8 + $0x18] sm:$0xe]  ;;  %v6022_v16 = vld [vmem:[%s7423_s8 + $0x9c] sm:$0xe] }
 0x123   : > { %6748 = vmatpush3.bf16.msra.mxu1 %v7216_v6  ;;  %v4189_v24 = vor.u32 %v4188_v33, %v4185_v28  ;;  %v4202_v55 = vshll.u32 %v8883_v13, 16  ;;  %v8910_v58 = vsel %vm7701_vm5, %v6037_v34, %v4664_v56  ;;  %v4666_v48 = vrot.slane %v4664_v56, 4  ;;  %v7219_v40 = vld [vmem:[%s9749_s1 + $0x118] sm:$0xff]   ;;  %v7220_v2 = vld [vmem:[%s7423_s8 + $0x20] sm:$0x1] }
 0x124   : > { %6741 = vmatprep.subr.bf16.mxu1 %v7217_v1  ;;  %v4199_v49 = vor.u32 %v4198_v30, %v8885_v53  ;;  %v4181_v23 = vsel %vm7455_vm2, %v4176_v46, %v4180_v18  ;;  %v4594_v12 = vrot.slane %v7218_v47, 5  ;;  %v6000_v6 = vcombine.low %v4147_v4, %v4157_v60  ;;  %v9819_v34 = vld [vmem:[#allocation16_spill] sm:$0xff]  ;;  %v6023_v11 = vld [vmem:[%s7423_s8 + $0xa8] sm:$0xe] }
 0x125   : > { %6680 = vmatmul.mubr.bf16.gmra.mrb[20].mxu0 %v8808_v36  ;;  %v4171_v36 = vsel %vm7455_vm2, %v4166_v7, %v8831_v59  ;;  %v4190_v14 = vrot.slane %v4189_v24, 4  ;;  %v4204_v28 = vrot.slane %v4202_v55, 5  ;;  %v6027_v18 = vrot.slane %v6011_v57, 9  ;;  %v7162_v46 = vld [vmem:[%s7423_s8 + $0x54] sm:$0xff]   ;;  %v6012_v55 = vld [vmem:[%s7423_s8 + $0x24] sm:$0xe] }
 0x126   : > { %6472 = vmatmul.mubr.bf16.gmra.mrb[4].mxu1 %v7157_v3  ;;  %6683 = vmatprep.mubr.bf16.mxu0 %v8818_v22  ;;  %v8924_v22 = vsel %vm7701_vm5, %v4666_v48, %v4667_v0  ;;  %v6038_v33 = vrot.slane %v6022_v16, 9  ;;  %v6001_v3 = vcombine.low %v4171_v36, %v4181_v23  ;;  %v4200_v30 = vrot.slane %v4199_v49, 4  ;;  %v7222_v48 = vld [vmem:[%s7423_s8 + $0x28] sm:$0xf]  ;;  %v7223_v36 = vld [vmem:[%s7423_s8 + $0x34] sm:$0xf] }
 0x127   : > { %6475 = vmatprep.mubr.bf16.mxu1 %v7159_v19  ;;  %6749 = vmatpush3.bf16.msra.mxu1 %v7217_v1  ;;  %v6069_v59 = vcombine.low %v8910_v58, %v8924_v22  ;;  %v4671_v19 = vrot.slane %v9819_v34, 5  ;;  %v4674_v7 = vrot.slane %v8613_v25, 5  ;;  %v4596_v52 = vrot.slane %v4594_v12, 4  ;;  %v7221_v1 = vld [vmem:[%s9749_s1 + $0x120] sm:$0xff]  }
 0x128   : > { %6742 = vmatprep.subr.bf16.mxu1 %v7219_v40  ;;  %v4597_v56 = vrot.slane %v7220_v2, 5  ;;  %v4595_v25 = vsel %vm7701_vm5, %v6027_v18, %v4594_v12  ;;  %v4195_v0 = vsel %vm7455_vm2, %v4190_v14, %v8885_v53  ;;  %v4205_v24 = vsel %vm7455_vm2, %v4200_v30, %v4204_v28  ;;  %v6013_v12 = vld [vmem:[%s7423_s8 + $0x30] sm:$0xe]  ;;  %v7163_v30 = vld [vmem:[%s7423_s8 + $0x60] sm:$0xff]  }
 0x129   : > { %v8941_v4 = vsel %vm7701_vm5, %v6038_v33, %v4671_v19  ;;  %v4673_v60 = vrot.slane %v4671_v19, 4  ;;  %v4601_v49 = vrot.slane %v7222_v48, 5  ;;  %v4608_v23 = vrot.slane %v7223_v36, 5  ;;  %v7225_v33 = vld [vmem:[%s7423_s8 + $0x2c] sm:$0x1] }
 0x12a   : > { %v4598_v16 = vsel %vm7701_vm5, %v4596_v52, %v4597_v56  ;;  %v6039_v47 = vrot.slane %v6023_v11, 9  ;;  %v6002_v28 = vcombine.low %v4195_v0, %v4205_v24  ;;  %v6028_v18 = vrot.slane %v6012_v55, 9  ;;  %v7165_v52 = vld [vmem:[%s7423_s8 + $0x6c] sm:$0xff]   ;;  %v6024_v11 = vld [vmem:[%s7423_s8 + $0xb4] sm:$0xe] }
 0x12b   : > { %6750 = vmatpush3.bf16.msra.mxu1 %v7219_v40  ;;  %v8955_v57 = vsel %vm7701_vm5, %v4673_v60, %v4674_v7  ;;  %v9820_v40 = vld [vmem:[#allocation19_spill] sm:$0xff]  ;;  %v6059_v34 = vcombine.low %v4595_v25, %v4598_v16  ;;  %v4603_v19 = vrot.slane %v4601_v49, 4  ;;  %v6029_v2 = vrot.slane %v6013_v12, 9  ;;  %v6014_v0 = vld [vmem:[%s7423_s8 + $0x3c] sm:$0xe] }
 0x12c   : > { %6743 = vmatprep.subr.bf16.mxu1 %v7221_v1  ;;  %v6070_v53 = vcombine.low %v8941_v4, %v8955_v57  ;;  %v4678_v14 = vrot.slane %v9820_v40, 5  ;;  %v4610_v56 = vrot.slane %v4608_v23, 4  ;;  %v7227_v24 = vld [vmem:[%s7423_s8 + $0x40] sm:$0xf]  ;;  %v4602_v48 = vsel %vm7701_vm5, %v6028_v18, %v4601_v49  ;;  %v7229_v18 = vld [vmem:[%s7423_s8 + $0x44] sm:$0x1] }
 0x12d   : > { %6684 = vmatmul.mubr.bf16.gmra.mrb[24].mxu0 %v6000_v6  ;;  %v7224_v6 = vld [vmem:[%s9749_s1 + $0x128] sm:$0xff]   ;;  %v4615_v55 = vrot.slane %v7227_v24, 5  ;;  %v4685_v12 = vrot.slane %v8660_v10, 5  ;;  %v4609_v49 = vsel %vm7701_vm5, %v6029_v2, %v4608_v23  ;;  %v7230_v10 = vld [vmem:[%s9749_s1 + $0x138] sm:$0xff]   ;;  %v6025_v23 = vld [vmem:[%s7423_s8 + $0xc0] sm:$0xe] }
 0x12e   : > { %6476 = vmatmul.mubr.bf16.gmra.mrb[8].mxu1 %v7160_v39  ;;  %6687 = vmatprep.mubr.bf16.mxu0 %v6001_v3  ;;  %v4604_v39 = vrot.slane %v7225_v33, 5  ;;  %v4681_v3 = vrot.slane %v8648_v21, 5  ;;  %v8972_v7 = vsel %vm7701_vm5, %v6039_v47, %v4678_v14  ;;  %v7228_v21 = vld [vmem:[%s9749_s1 + $0x130] sm:$0xff]   ;;  %v6040_v47 = vrot.slane %v6024_v11, 9 }
 0x12f   : > { %6479 = vmatprep.mubr.bf16.mxu1 %v7162_v46  ;;  %6751 = vmatpush3.bf16.msra.mxu1 %v7221_v1  ;;  %v4680_v46 = vrot.slane %v4678_v14, 4  ;;  %v7226_v1 = vld [vmem:[%s7423_s8 + $0x38] sm:$0x1]  ;;  %v6030_v14 = vrot.slane %v6014_v0, 9  ;;  %v4618_v33 = vrot.slane %v7229_v18, 5  ;;  %v4692_v11 = vrot.slane %v8742_v51, 5 }
 0x130   : > { %6744 = vmatprep.subr.bf16.mxu1 %v7224_v6  ;;  %v4611_v60 = vrot.slane %v7226_v1, 5  ;;  %v4605_v36 = vsel %vm7701_vm5, %v4603_v19, %v4604_v39  ;;  %v4687_v39 = vrot.slane %v4685_v12, 4  ;;  %v5715_v19 = vld [vmem:[%s7423_s8 + $0x6c] sm:$0xf]  ;;  %v7168_v18 = vld [vmem:[%s7423_s8 + $0x90] sm:$0xff]   ;;  %v2443_v20 = vshll.u32 %v7236_v63, 16 }
 0x131   : > { %v8984_v25 = vsel %vm7701_vm5, %v4680_v46, %v4681_v3  ;;  %v6060_v3 = vcombine.low %v4602_v48, %v4605_v36  ;;  %v4616_v1 = vsel %vm7701_vm5, %v6030_v14, %v4615_v55  ;;  %v2376_v0 = vshrl.u32 %v5715_v19, 16  ;;  %v6026_v51 = vld [vmem:[%s7423_s8 + $0xcc] sm:$0xe] }
 0x132   : > { %v6071_v16 = vcombine.low %v8972_v7, %v8984_v25  ;;  %v4612_v40 = vsel %vm7701_vm5, %v4610_v56, %v4611_v60  ;;  %v6041_v56 = vrot.slane %v6025_v23, 9  ;;  %v2379_v24 = vshll.u32 %v5715_v19, 16 }
 0x133   : > { %6752 = vmatpush3.bf16.msra.mxu1 %v7224_v6  ;;  %v4688_v6 = vrot.slane %v8681_v27, 5  ;;  %v9004_v27 = vsel %vm7701_vm5, %v6040_v47, %v4685_v12  ;;  %v4695_v36 = vrot.slane %v8793_v26, 5  ;;  %v4694_v12 = vrot.slane %v4692_v11, 4 }
 0x134   : > { %6745 = vmatprep.subr.bf16.mxu1 %v7228_v21  ;;  %v2381_v26 = vrot.slane %v2379_v24, 5  ;;  %v4702_v23 = vrot.slane %v8883_v13, 5 }
 0x135   : > { %6688 = vmatmul.mubr.bf16.gmra.mrb[28].mxu0 %v6002_v28  ;;  %v4617_v28 = vrot.slane %v4615_v55, 4  ;;  %v9011_v46 = vsel %vm7701_vm5, %v4687_v39, %v4688_v6  ;;  %v9025_v55 = vsel %vm7701_vm5, %v6041_v56, %v4692_v11  ;;  %v4699_v39 = vrot.slane %v8845_v31, 5  ;;  %v7232_v56 = vld [vmem:[%s7423_s8 + $0x74] sm:$0x1] }
 0x136   : > { %6480 = vmatmul.mubr.bf16.gmra.mrb[12].mxu1 %v7163_v30  ;;  %6707 = vmatprep.mubr.bf16.mxu0 %v6059_v34  ;;  %v7166_v30 = vld [vmem:[%s7423_s8 + $0x78] sm:$0xff]   ;;  %v6061_v34 = vcombine.low %v4609_v49, %v4612_v40  ;;  %v6072_v2 = vcombine.low %v9004_v27, %v9011_v46  ;;  %v9030_v49 = vsel %vm7701_vm5, %v4694_v12, %v4695_v36  ;;  %v2378_v40 = vrot.slane %v2376_v0, 4  ;;  %v7233_v0 = vld [vmem:[%s7423_s8 + $0x88] sm:$0xf] }
 0x137   : > { %6483 = vmatprep.mubr.bf16.mxu1 %v7165_v52  ;;  %6753 = vmatpush3.bf16.msra.mxu1 %v7228_v21  ;;  %v7167_v52 = vld [vmem:[%s7423_s8 + $0x84] sm:$0xff]   ;;  %v4619_v60 = vsel %vm7701_vm5, %v4617_v28, %v4618_v33  ;;  %v7231_v21 = vld [vmem:[%s7423_s8 + $0x70] sm:$0xf]  ;;  %v6073_v28 = vcombine.low %v9025_v55, %v9030_v49  ;;  %v4701_v19 = vrot.slane %v4699_v39, 4  ;;  %v2433_v24 = vshll.u32 %v7233_v0, 16 }
 0x138   : > { %6746 = vmatprep.subr.bf16.mxu1 %v7230_v10  ;;  %v2385_v48 = vshll.u32 %v7231_v21, 16  ;;  %v2389_v47 = vshrl.u32 %v7231_v21, 16  ;;  %v6062_v6 = vcombine.low %v4616_v1, %v4619_v60  ;;  %v2395_v1 = vshll.u32 %v7232_v56, 16 }
 0x139   : > { %v9052_v11 = vsel %vm7701_vm5, %v4701_v19, %v4702_v23  ;;  %v2437_v21 = vshrl.u32 %v7233_v0, 16  ;;  %v7235_v19 = vld [vmem:[%s7423_s8 + $0xa0] sm:$0xf] }
 0x13a   : > { %v9032_v14 = vrot.slane %v2385_v48, 5  ;;  %v2391_v33 = vrot.slane %v2389_v47, 4  ;;  %v2485_v56 = vshrl.u32 %v7235_v19, 16 }
 0x13b   : > { %6754 = vmatpush3.bf16.msra.mxu1 %v7230_v10  ;;  %v6042_v10 = vrot.slane %v6026_v51, 9 }
 0x13c   : > { %v2392_v31 = vor.u32 %v2391_v33, %v9032_v14  ;;  %v2451_v33 = vshll.u32 %v5724_v61, 16 }
 0x13d   : > { %6708 = vmatmul.mubr.bf16.vlgmr.msra.gmra.mrb[0].mxu0 %v6060_v3  ;;  %v7169_v3 = vld [vmem:[%s7423_s8 + $0x9c] sm:$0xff]  }
 0x13e   : > { %6484 = vmatmul.mubr.bf16.gmra.mrb[16].mxu1 %v7166_v30  ;;  %6711 = vmatprep.mubr.bf16.mxu0 %v6061_v34  ;;  %v5721_v30 = vld [vmem:[%s7423_s8 + $0x84] sm:$0xf]  ;;  %v9043_v34 = vsel %vm7701_vm5, %v6042_v10, %v4699_v39  ;;  %v2393_v47 = vrot.slane %v2392_v31, 4  ;;  %v7234_v10 = vld [vmem:[%s7423_s8 + $0x94] sm:$0xf]  ;;  %v2453_v0 = vrot.slane %v2451_v33, 5 }
 0x13f   : > { %6487 = vmatprep.mubr.bf16.mxu1 %v7167_v52  ;;  %v2382_v52 = vor.u32 %v2381_v26, %v2378_v40  ;;  %v2424_v13 = vshrl.u32 %v5721_v30, 16  ;;  %v2427_v60 = vshll.u32 %v5721_v30, 16  ;;  %v6074_v48 = vcombine.low %v9043_v34, %v9052_v11 }
 0x140   : > { %v9061_v40 = vrot.slane %v2433_v24, 5  ;;  %v2439_v26 = vrot.slane %v2437_v21, 4  ;;  %v2457_v39 = vshll.u32 %v7234_v10, 16  ;;  %v2461_v23 = vshrl.u32 %v7234_v10, 16  ;;  %v7238_v10 = vld [vmem:[%s7423_s8 + $0xa4] sm:$0x1] }
 0x141   : > { %v2383_v36 = vrot.slane %v2382_v52, 4  ;;  %v2426_v12 = vrot.slane %v2424_v13, 4  ;;  %v2429_v51 = vrot.slane %v2427_v60, 5  ;;  %v2481_v52 = vshll.u32 %v7235_v19, 16  ;;  %v7239_v19 = vld [vmem:[%s7423_s8 + $0xac] sm:$0xf] }
 0x142   : > { %v2440_v13 = vor.u32 %v2439_v26, %v9061_v40  ;;  %v9078_v41 = vrot.slane %v2457_v39, 5  ;;  %v2463_v42 = vrot.slane %v2461_v23, 4  ;;  %v2487_v21 = vrot.slane %v2485_v56, 4  ;;  %v5733_v23 = vld [vmem:[%s7423_s8 + $0xb4] sm:$0xf] }
 0x143   : > { %v2491_v39 = vshll.u32 %v7238_v10, 16  ;;  %v2509_v15 = vshrl.u32 %v7239_v19, 16  ;;  %v2523_v63 = vshll.u32 %v5733_v23, 16 }
 0x144   : > { %v2464_v26 = vor.u32 %v2463_v42, %v9078_v41 }
 0x145   : > { %6712 = vmatmul.mubr.bf16.gmra.mrb[4].mxu0 %v6062_v6  ;;  %v5727_v6 = vld [vmem:[%s7423_s8 + $0x9c] sm:$0xf] }
 0x146   : > { %6488 = vmatmul.mubr.bf16.gmra.mrb[20].mxu1 %v7168_v18  ;;  %6715 = vmatprep.mubr.bf16.mxu0 %v6063_v8  ;;  %v2397_v8 = vrot.slane %v2395_v1, 5  ;;  %v2448_v18 = vshrl.u32 %v5724_v61, 16  ;;  %v2475_v30 = vshll.u32 %v5727_v6, 16  ;;  %v2388_v1 = vsel %vm7455_vm2, %v2383_v36, %v9032_v14  ;;  %v7172_v61 = vld [vmem:[%s7423_s8 + $0xc0] sm:$0xff]  }
 0x147   : > { %6491 = vmatprep.mubr.bf16.mxu1 %v7169_v3  ;;  %v2472_v3 = vshrl.u32 %v5727_v6, 16  ;;  %v9080_v14 = vrot.slane %v2481_v52, 5  ;;  %v2505_v52 = vshll.u32 %v7239_v19, 16 }
 0x148   : > { %v2398_v31 = vsel %vm7455_vm2, %v2393_v47, %v2397_v8  ;;  %v2450_v60 = vrot.slane %v2448_v18, 4  ;;  %v2477_v24 = vrot.slane %v2475_v30, 5  ;;  %v2445_v8 = vrot.slane %v2443_v20, 5  ;;  %v7240_v20 = vld [vmem:[%s7423_s8 + $0xb8] sm:$0xf] }
 0x149   : > { %v2441_v47 = vrot.slane %v2440_v13, 4  ;;  %v2488_v33 = vor.u32 %v2487_v21, %v9080_v14  ;;  %v2529_v29 = vshll.u32 %v7240_v20, 16  ;;  %v2533_v44 = vshrl.u32 %v7240_v20, 16 }
 0x14b   : > { %v2489_v13 = vrot.slane %v2488_v33, 4 }
 0x14d   : > { %6716 = vmatmul.mubr.bf16.gmra.mrb[8].mxu0 %v6064_v54  ;;  %v2430_v54 = vor.u32 %v2429_v51, %v2426_v12  ;;  %v2454_v12 = vor.u32 %v2453_v0, %v2450_v60  ;;  %v7237_v51 = vld [vmem:[%s7423_s8 + $0x98] sm:$0x1]  ;;  %v2493_v60 = vrot.slane %v2491_v39, 5 }
 0x14e   : > { %6492 = vmatmul.mubr.bf16.gmra.mrb[24].mxu1 %v7170_v45  ;;  %6719 = vmatprep.mubr.bf16.mxu0 %v6065_v17  ;;  %v2474_v17 = vrot.slane %v2472_v3, 4  ;;  %v5763_v45 = vcombine.low %v2388_v1, %v2398_v31  ;;  %v2467_v6 = vshll.u32 %v7237_v51, 16  ;;  %v2520_v31 = vshrl.u32 %v5733_v23, 16 }
 0x14f   : > { %6495 = vmatprep.mubr.bf16.mxu1 %v7171_v9  ;;  %v2431_v36 = vrot.slane %v2430_v54, 4  ;;  %v5730_v9 = vld [vmem:[%s7423_s8 + $0xa8] sm:$0xf]  ;;  %v2455_v56 = vrot.slane %v2454_v12, 4  ;;  %v2494_v32 = vsel %vm7455_vm2, %v2489_v13, %v2493_v60 }
 0x150   : > { %v2478_v18 = vor.u32 %v2477_v24, %v2474_v17  ;;  %v2496_v3 = vshrl.u32 %v5730_v9, 16  ;;  %v2499_v30 = vshll.u32 %v5730_v9, 16  ;;  %v2469_v1 = vrot.slane %v2467_v6, 5 }
 0x151   : > { %v2436_v43 = vsel %vm7455_vm2, %v2431_v36, %v9061_v40  ;;  %v2507_v17 = vrot.slane %v2505_v52, 5  ;;  %v2511_v24 = vrot.slane %v2509_v15, 4  ;;  %v2522_v21 = vrot.slane %v2520_v31, 4  ;;  %v5736_v36 = vld [vmem:[%s7423_s8 + $0xc0] sm:$0xf] }
 0x152   : > { %v2479_v54 = vrot.slane %v2478_v18, 4  ;;  %v2498_v0 = vrot.slane %v2496_v3, 4  ;;  %v2501_v42 = vrot.slane %v2499_v30, 5  ;;  %v2544_v9 = vshrl.u32 %v5736_v36, 16  ;;  %v7242_v18 = vld [vmem:[%s7423_s8 + $0xc4] sm:$0xf] }
 0x153   : > { %v2553_v33 = vshll.u32 %v7242_v18, 16 }
 0x154   : > { %v2484_v51 = vsel %vm7455_vm2, %v2479_v54, %v9080_v14  ;;  %v2502_v5 = vor.u32 %v2501_v42, %v2498_v0  ;;  %v2557_v14 = vshrl.u32 %v7242_v18, 16  ;;  %v2546_v19 = vrot.slane %v2544_v9, 4 }
 0x155   : > { %6720 = vmatmul.mubr.bf16.gmra.mrb[12].mxu0 %v6066_v38  ;;  %v2446_v38 = vsel %vm7455_vm2, %v2441_v47, %v2445_v8  ;;  %v2535_v8 = vrot.slane %v2533_v44, 4  ;;  %v2460_v47 = vsel %vm7455_vm2, %v2455_v56, %v9078_v41  ;;  %v7241_v41 = vld [vmem:[%s7423_s8 + $0xb0] sm:$0x1]  ;;  %v5767_v58 = vcombine.low %v2484_v51, %v2494_v32  ;;  %v7244_v44 = vld [vmem:[%s7423_s8 + $0xc8] sm:$0x1] }
 0x156   : > { %6496 = vmatmul.mubr.bf16.gmra.mrb[28].mxu1 %v7172_v61  ;;  %6723 = vmatprep.mubr.bf16.mxu0 %v6067_v35  ;;  %v2465_v35 = vrot.slane %v2464_v26, 4  ;;  %v5765_v40 = vcombine.low %v2436_v43, %v2446_v38  ;;  %v2525_v61 = vrot.slane %v2523_v63, 5  ;;  %v2515_v6 = vshll.u32 %v7241_v41, 16 }
 0x157   : > { %6531 = vmatprep.mubr.bf16.mxu1 %v5763_v45  ;;  %v2531_v45 = vrot.slane %v2529_v29, 5  ;;  %v2547_v26 = vshll.u32 %v5736_v36, 16  ;;  %v2503_v22 = vrot.slane %v2502_v5, 4  ;;  %v2555_v15 = vrot.slane %v2553_v33, 5 }
 0x158   : > { %v2470_v12 = vsel %vm7455_vm2, %v2465_v35, %v2469_v1  ;;  %v2526_v10 = vor.u32 %v2525_v61, %v2522_v21  ;;  %v2517_v30 = vrot.slane %v2515_v6, 5  ;;  %v2559_v43 = vrot.slane %v2557_v14, 4 }
 0x159   : > { %v2536_v39 = vor.u32 %v2535_v8, %v2531_v45  ;;  %v5766_v3 = vcombine.low %v2460_v47, %v2470_v12  ;;  %v2549_v52 = vrot.slane %v2547_v26, 5  ;;  %v2508_v31 = vsel %vm7455_vm2, %v2503_v22, %v2507_v17  ;;  %v9168_v8 = vld [vmem:[%s9750_s2] ss:$0 sm:$0xff] }
 0x15a   : > { %v2527_v38 = vrot.slane %v2526_v10, 4  ;;  %v2560_v29 = vor.u32 %v2559_v43, %v2555_v15  ;;  %v2563_v35 = vshll.u32 %v7244_v44, 16 }
 0x15b   : > { %v2537_v56 = vrot.slane %v2536_v39, 4  ;;  %v2550_v20 = vor.u32 %v2549_v52, %v2546_v19 }
 0x15c   : > { %v2532_v4 = vsel %vm7455_vm2, %v2527_v38, %v2531_v45  ;;  %v2565_v54 = vrot.slane %v2563_v35, 5 }
 0x15d   : > { %6724 = vmatmul.mubr.bf16.gmra.mrb[16].mxu0 %v6068_v62  ;;  %v2512_v62 = vor.u32 %v2511_v24, %v2507_v17  ;;  %v2551_v25 = vrot.slane %v2550_v20, 4 }
 0x15e   : > { %6532 = vmatmul.mubr.bf16.vlgmr.msra.gmra.mrb[16].mxu1 %v8903_v50  ;;  %6727 = vmatprep.mubr.bf16.mxu0 %v6069_v59  ;;  %v7243_v50 = vld [vmem:[%s7423_s8 + $0xbc] sm:$0x1]  ;;  %s7251_s8 = scalar_lea.vmem %s7250_s14, 8192 }
 0x15f   : > { %6535 = vmatprep.mubr.bf16.mxu1 %v5765_v40  ;;  %v2539_v23 = vshll.u32 %v7243_v50, 16  ;;  %v2513_v59 = vrot.slane %v2512_v62, 4  ;;  %v2556_v13 = vsel %vm7455_vm2, %v2551_v25, %v2555_v15  ;;  %p7253_p1 = scmp.lt.s32.totalorder %s7251_s8, %s7245_s11 }
 0x161   : > { %v2541_v1 = vrot.slane %v2539_v23, 5  ;;  %v2518_v63 = vsel %vm7455_vm2, %v2513_v59, %v2517_v30  ;;  %p7254_p2 = por %p7253_p1, %p7252_p0 }
 0x163   : > { %v2542_v57 = vsel %vm7455_vm2, %v2537_v56, %v2541_v1  ;;  %p7255_p3 = pnand %p7254_p2, %p7248_p13 }
 0x164   : > { %v5769_v7 = vcombine.low %v2532_v4, %v2542_v57 }
 0x165   : > { %6728 = vmatmul.mubr.bf16.gmra.mrb[20].mxu0 %v6070_v53  ;;  %v5768_v53 = vcombine.low %v2508_v31, %v2518_v63 }
 0x166   : > { %6536 = vmatmul.mubr.bf16.gmra.mrb[20].mxu1 %v5766_v3  ;;  %6731 = vmatprep.mubr.bf16.mxu0 %v6071_v16  ;;  %v2561_v16 = vrot.slane %v2560_v29, 4 }
 0x167   : > { %6539 = vmatprep.mubr.bf16.mxu1 %v5767_v58 }
 0x168   : > { %v2566_v60 = vsel %vm7455_vm2, %v2561_v16, %v2565_v54 }
 0x169   : > { %v5770_v0 = vcombine.low %v2556_v13, %v2566_v60 }
 0x16d   : > { %6732 = vmatmul.mubr.bf16.gmra.mrb[24].mxu0 %v6072_v2 }
 0x16e   : > { %6540 = vmatmul.mubr.bf16.gmra.mrb[24].mxu1 %v5768_v53  ;;  %6735 = vmatprep.mubr.bf16.mxu0 %v6073_v28 }
 0x16f   : > { %6543 = vmatprep.mubr.bf16.mxu1 %v5769_v7 }
 0x175   : > { %6736 = vmatmul.mubr.bf16.gmra.mrb[28].mxu0 %v6074_v48 }
 0x176   : > { %6544 = vmatmul.mubr.bf16.gmra.mrb[28].mxu1 %v5770_v0 }
 0x1f1   : > { %v6469_v27 = vpop.f32.mrb[0].mxu1 }
 0x1f2   : > { %v1976_v46 = vpop.f32.mrb[1].mxu1 }
 0x1f3   : > { %v6470_v2 = vpop.f32.mrb[2].mxu1 }
 0x1f4   : > { %v1979_v42 = vpop.f32.mrb[3].mxu1 }
 0x1f9   : > { %v6473_v17 = vpop.f32.mrb[4].mxu1 }
 0x1fa   : > { %v1992_v55 = vpop.f32.mrb[5].mxu1 }
 0x1fb   : > { %v6474_v49 = vpop.f32.mrb[6].mxu1 }
 0x1fc   : > { %v1995_v28 = vpop.f32.mrb[7].mxu1 }
 0x201   : > { %v6477_v24 = vpop.f32.mrb[8].mxu1 }
 0x202   : > { %v9151_v40 = vpop.f32.mrb[9].mxu1 }
 0x203   : > { %v9153_v21 = vpop.f32.mrb[10].mxu1 }
 0x204   : > { %v9155_v37 = vpop.f32.mrb[11].mxu1 }
 0x209   : > { %v9157_v61 = vpop.f32.mrb[12].mxu1 }
 0x20a   : > { %v9159_v34 = vpop.f32.mrb[13].mxu1 }
 0x20b   : > { %v9161_v11 = vpop.f32.mrb[14].mxu1 }
 0x20c   : > { %v9163_v48 = vpop.f32.mrb[15].mxu1 }
 0x210   : > { %v6709_v45 = vpop.f32.mrb[0].mxu0 }
 0x211   : > { %v6755_v36 = vadd.f32 %v6709_v45, %v6469_v27  ;;  %v4867_v47 = vpop.f32.mrb[1].mxu0 }
 0x212   : > { %v6756_v12 = vadd.f32 %v4867_v47, %v1976_v46  ;;  %v6710_v51 = vpop.f32.mrb[2].mxu0 }
 0x213   : > { %v9171_v32 = vadd.f32 %v6755_v36, %v9168_v8  ;;  %v6757_v5 = vadd.f32 %v6710_v51, %v6470_v2  ;;  %v4870_v62 = vpop.f32.mrb[3].mxu0 }
 0x214   : > { %v9174_v41 = vadd.f32 %v6756_v12, %v9168_v8  ;;  %v6758_v6 = vadd.f32 %v4870_v62, %v1979_v42 }
 0x215   : > { %v9179_v26 = vadd.f32 %v6757_v5, %v9168_v8  ;;  %v5139_v33 = vmul.f32 %v9171_v32, %v9171_v32  ;;  %v5069_v23 = vsel %vm5065_vm6, %v9171_v32, 0.0 }
 0x216   : > { %v5137_v9 = vmul.f32 %v9174_v41, %v9174_v41  ;;  %v9182_v18 = vadd.f32 %v6758_v6, %v9168_v8  ;;  %v5066_v14 = vsel %vm5065_vm6, %v9174_v41, 0.0 }
 0x217   : > { %v5140_v30 = vmul.f32 %v9179_v26, %v9179_v26  ;;  %v5172_v43 = vsel %vm5065_vm6, %v5139_v33, 0.0  ;;  %v5071_v63 = vsel %vm5065_vm6, %v9179_v26, 0.0 }
 0x218   : > { %v5067_v10 = vsel %vm5065_vm6, %v9182_v18, 0.0  ;;  %v5138_v39 = vmul.f32 %v9182_v18, %v9182_v18  ;;  %v6713_v50 = vpop.f32.mrb[4].mxu0  ;;  %v5169_v59 = vsel %vm5065_vm6, %v5137_v9, 0.0 }
 0x219   : > { %v5068_v3 = vadd.f32 %v5067_v10, %v5066_v14  ;;  %v6759_v58 = vadd.f32 %v6713_v50, %v6473_v17  ;;  %v4883_v22 = vpop.f32.mrb[5].mxu0  ;;  %v5174_v57 = vsel %vm5065_vm6, %v5140_v30, 0.0 }
 0x21a   : > { %v5170_v19 = vsel %vm5065_vm6, %v5138_v39, 0.0  ;;  %v6760_v52 = vadd.f32 %v4883_v22, %v1992_v55  ;;  %v6714_v15 = vpop.f32.mrb[6].mxu0 }
 0x21b   : > { %v5070_v38 = vadd.f32 %v5069_v23, %v5068_v3  ;;  %v5171_v56 = vadd.f32 %v5170_v19, %v5169_v59  ;;  %v6761_v1 = vadd.f32 %v6714_v15, %v6474_v49  ;;  %v4886_v31 = vpop.f32.mrb[7].mxu0  ;;  %v9202_v20 = vadd.f32 %v6759_v58, %v9168_v8 }
 0x21c   : > { %v9205_v29 = vadd.f32 %v6760_v52, %v9168_v8  ;;  %v6762_v44 = vadd.f32 %v4886_v31, %v1995_v28 }
 0x21d   : > { %v5173_v35 = vadd.f32 %v5172_v43, %v5171_v56  ;;  %v5072_v4 = vadd.f32 %v5071_v63, %v5070_v38  ;;  %v9216_v13 = vadd.f32 %v6761_v1, %v9168_v8  ;;  %v5143_v60 = vmul.f32 %v9202_v20, %v9202_v20 }
 0x21e   : > { %v5073_v53 = vsel %vm5065_vm6, %v9205_v29, 0.0  ;;  %v5141_v7 = vmul.f32 %v9205_v29, %v9205_v29  ;;  %v9213_v25 = vadd.f32 %v6762_v44, %v9168_v8  ;;  %v5077_v28 = vsel %vm5065_vm6, %v9202_v20, 0.0 }
 0x21f   : > { %v5074_v16 = vadd.f32 %v5073_v53, %v5072_v4  ;;  %v5175_v54 = vadd.f32 %v5174_v57, %v5173_v35  ;;  %v5144_v47 = vmul.f32 %v9216_v13, %v9216_v13  ;;  %v5079_v6 = vsel %vm5065_vm6, %v9216_v13, 0.0 }
 0x220   : > { %v5176_v0 = vsel %vm5065_vm6, %v5141_v7, 0.0  ;;  %v5075_v27 = vsel %vm5065_vm6, %v9213_v25, 0.0  ;;  %v6717_v46 = vpop.f32.mrb[8].mxu0  ;;  %v5142_v17 = vmul.f32 %v9213_v25, %v9213_v25 }
 0x221   : > { %v5177_v2 = vadd.f32 %v5176_v0, %v5175_v54  ;;  %v5076_v42 = vadd.f32 %v5075_v27, %v5074_v16  ;;  %v6763_v55 = vadd.f32 %v6717_v46, %v6477_v24  ;;  %v4899_v49 = vpop.f32.mrb[9].mxu0  ;;  %v5182_v3 = vsel %vm5065_vm6, %v5144_v47, 0.0 }
 0x222   : > { %v6764_v45 = vadd.f32 %v4899_v49, %v9151_v40  ;;  %v6718_v36 = vpop.f32.mrb[10].mxu0  ;;  %v5178_v51 = vsel %vm5065_vm6, %v5142_v17, 0.0  ;;  %v5180_v40 = vsel %vm5065_vm6, %v5143_v60, 0.0 }
 0x223   : > { %v5078_v12 = vadd.f32 %v5077_v28, %v5076_v42  ;;  %v6765_v5 = vadd.f32 %v6718_v36, %v9153_v21  ;;  %v4902_v62 = vpop.f32.mrb[11].mxu0  ;;  %v5179_v24 = vadd.f32 %v5178_v51, %v5177_v2  ;;  %v9240_v14 = vadd.f32 %v6763_v55, %v9168_v8 }
 0x224   : > { %v9235_v9 = vadd.f32 %v6764_v45, %v9168_v8  ;;  %v6766_v33 = vadd.f32 %v4902_v62, %v9155_v37 }
 0x225   : > { %v5080_v10 = vadd.f32 %v5079_v6, %v5078_v12  ;;  %v5181_v39 = vadd.f32 %v5180_v40, %v5179_v24  ;;  %v9251_v37 = vadd.f32 %v6765_v5, %v9168_v8  ;;  %v5147_v15 = vmul.f32 %v9240_v14, %v9240_v14 }
 0x226   : > { %v5081_v21 = vsel %vm5065_vm6, %v9235_v9, 0.0  ;;  %v5145_v50 = vmul.f32 %v9235_v9, %v9235_v9  ;;  %v9247_v23 = vadd.f32 %v6766_v33, %v9168_v8  ;;  %v5085_v1 = vsel %vm5065_vm6, %v9240_v14, 0.0 }
 0x227   : > { %v5082_v58 = vadd.f32 %v5081_v21, %v5080_v10  ;;  %v5183_v22 = vadd.f32 %v5182_v3, %v5181_v39  ;;  %v5148_v4 = vmul.f32 %v9251_v37, %v9251_v37  ;;  %v5188_v0 = vsel %vm5065_vm6, %v5147_v15, 0.0 }
 0x228   : > { %v5184_v59 = vsel %vm5065_vm6, %v5145_v50, 0.0  ;;  %v5083_v30 = vsel %vm5065_vm6, %v9247_v23, 0.0  ;;  %v5146_v19 = vmul.f32 %v9247_v23, %v9247_v23  ;;  %v6721_v52 = vpop.f32.mrb[12].mxu0 }
 0x229   : > { %v5084_v43 = vadd.f32 %v5083_v30, %v5082_v58  ;;  %v6767_v38 = vadd.f32 %v6721_v52, %v9157_v61  ;;  %v4915_v56 = vpop.f32.mrb[13].mxu0  ;;  %v5185_v31 = vadd.f32 %v5184_v59, %v5183_v22  ;;  %v5087_v61 = vsel %vm5065_vm6, %v9251_v37, 0.0 }
 0x22a   : > { %v5186_v63 = vsel %vm5065_vm6, %v5146_v19, 0.0  ;;  %v6768_v44 = vadd.f32 %v4915_v56, %v9159_v34  ;;  %v6722_v35 = vpop.f32.mrb[14].mxu0 }
 0x22b   : > { %v5086_v57 = vadd.f32 %v5085_v1, %v5084_v43  ;;  %v6769_v53 = vadd.f32 %v6722_v35, %v9161_v11  ;;  %v4918_v7 = vpop.f32.mrb[15].mxu0  ;;  %v5187_v16 = vadd.f32 %v5186_v63, %v5185_v31  ;;  %v9276_v34 = vadd.f32 %v6767_v38, %v9168_v8 }
 0x22c   : > { %v9271_v54 = vadd.f32 %v6768_v44, %v9168_v8  ;;  %v6770_v60 = vadd.f32 %v4918_v7, %v9163_v48  ;;  %v5190_v48 = vsel %vm5065_vm6, %v5148_v4, 0.0 }
 0x22d   : > { %v5088_v27 = vadd.f32 %v5087_v61, %v5086_v57  ;;  %v9279_v46 = vadd.f32 %v6769_v53, %v9168_v8  ;;  %v5189_v11 = vadd.f32 %v5188_v0, %v5187_v16  ;;  %v5093_v12 = vsel %vm5065_vm6, %v9276_v34, 0.0 }
 0x22e   : > { %v5089_v2 = vsel %vm5065_vm6, %v9271_v54, 0.0  ;;  %v5149_v42 = vmul.f32 %v9271_v54, %v9271_v54  ;;  %v9286_v17 = vadd.f32 %v6770_v60, %v9168_v8  ;;  %v5151_v51 = vmul.f32 %v9276_v34, %v9276_v34 }
 0x22f   : > { %v5090_v55 = vadd.f32 %v5089_v2, %v5088_v27  ;;  %v5191_v49 = vadd.f32 %v5190_v48, %v5189_v11  ;;  %v5152_v33 = vmul.f32 %v9279_v46, %v9279_v46  ;;  %v5095_v59 = vsel %vm5065_vm6, %v9279_v46, 0.0 }
 0x230   : > { %v5192_v28 = vsel %vm5065_vm6, %v5149_v42, 0.0  ;;  %v5091_v45 = vsel %vm5065_vm6, %v9286_v17, 0.0  ;;  %v5150_v36 = vmul.f32 %v9286_v17, %v9286_v17  ;;  %v6725_v47 = vpop.f32.mrb[16].mxu0  ;;  %v5196_v43 = vsel %vm5065_vm6, %v5151_v51, 0.0 }
 0x231   : > { %v5092_v5 = vadd.f32 %v5091_v45, %v5090_v55  ;;  %v6533_v62 = vpop.f32.mrb[16].mxu1  ;;  %v4931_v6 = vpop.f32.mrb[17].mxu0  ;;  %v5193_v24 = vadd.f32 %v5192_v28, %v5191_v49  ;;  %v5198_v31 = vsel %vm5065_vm6, %v5152_v33, 0.0 }
 0x232   : > { %v5194_v40 = vsel %vm5065_vm6, %v5150_v36, 0.0  ;;  %v6771_v10 = vadd.f32 %v6725_v47, %v6533_v62  ;;  %v2794_v39 = vpop.f32.mrb[17].mxu1  ;;  %v6726_v21 = vpop.f32.mrb[18].mxu0 }
 0x233   : > { %v5094_v50 = vadd.f32 %v5093_v12, %v5092_v5  ;;  %v6772_v3 = vadd.f32 %v4931_v6, %v2794_v39  ;;  %v6534_v58 = vpop.f32.mrb[18].mxu1  ;;  %v4934_v22 = vpop.f32.mrb[19].mxu0  ;;  %v5195_v30 = vadd.f32 %v5194_v40, %v5193_v24 }
 0x234   : > { %v9304_v19 = vadd.f32 %v6771_v10, %v9168_v8  ;;  %v6773_v52 = vadd.f32 %v6726_v21, %v6534_v58  ;;  %v2797_v15 = vpop.f32.mrb[19].mxu1 }
 0x235   : > { %v9308_v38 = vadd.f32 %v6772_v3, %v9168_v8  ;;  %v5096_v56 = vadd.f32 %v5095_v59, %v5094_v50  ;;  %v6774_v1 = vadd.f32 %v4934_v22, %v2797_v15  ;;  %v5197_v63 = vadd.f32 %v5196_v43, %v5195_v30 }
 0x236   : > { %v9316_v4 = vadd.f32 %v6773_v52, %v9168_v8  ;;  %v5155_v53 = vmul.f32 %v9304_v19, %v9304_v19  ;;  %v5101_v45 = vsel %vm5065_vm6, %v9304_v19, 0.0 }
 0x237   : > { %v5097_v44 = vsel %vm5065_vm6, %v9308_v38, 0.0  ;;  %v5153_v35 = vmul.f32 %v9308_v38, %v9308_v38  ;;  %v9319_v57 = vadd.f32 %v6774_v1, %v9168_v8  ;;  %v5199_v61 = vadd.f32 %v5198_v31, %v5197_v63 }
 0x238   : > { %v5098_v7 = vadd.f32 %v5097_v44, %v5096_v56  ;;  %v6729_v16 = vpop.f32.mrb[20].mxu0  ;;  %v5156_v36 = vmul.f32 %v9316_v4, %v9316_v4  ;;  %v5204_v62 = vsel %vm5065_vm6, %v5155_v53, 0.0  ;;  %v5103_v10 = vsel %vm5065_vm6, %v9316_v4, 0.0 }
 0x239   : > { %v5200_v60 = vsel %vm5065_vm6, %v5153_v35, 0.0  ;;  %v5099_v0 = vsel %vm5065_vm6, %v9319_v57, 0.0  ;;  %v5154_v27 = vmul.f32 %v9319_v57, %v9319_v57  ;;  %v6537_v11 = vpop.f32.mrb[20].mxu1  ;;  %v4947_v2 = vpop.f32.mrb[21].mxu0 }
 0x23a   : > { %v5201_v42 = vadd.f32 %v5200_v60, %v5199_v61  ;;  %v5100_v48 = vadd.f32 %v5099_v0, %v5098_v7  ;;  %v6775_v55 = vadd.f32 %v6729_v16, %v6537_v11  ;;  %v2810_v49 = vpop.f32.mrb[21].mxu1  ;;  %v6730_v28 = vpop.f32.mrb[22].mxu0  ;;  %v5206_v22 = vsel %vm5065_vm6, %v5156_v36, 0.0 }
 0x23b   : > { %v5202_v47 = vsel %vm5065_vm6, %v5154_v27, 0.0  ;;  %v6776_v12 = vadd.f32 %v4947_v2, %v2810_v49  ;;  %v6538_v51 = vpop.f32.mrb[22].mxu1  ;;  %v4950_v5 = vpop.f32.mrb[23].mxu0 }
 0x23c   : > { %v5102_v6 = vadd.f32 %v5101_v45, %v5100_v48  ;;  %v5203_v24 = vadd.f32 %v5202_v47, %v5201_v42  ;;  %v6777_v33 = vadd.f32 %v6730_v28, %v6538_v51  ;;  %v2813_v40 = vpop.f32.mrb[23].mxu1  ;;  %v9337_v39 = vadd.f32 %v6775_v55, %v9168_v8 }
 0x23d   : > { %v9340_v21 = vadd.f32 %v6776_v12, %v9168_v8  ;;  %v6778_v50 = vadd.f32 %v4950_v5, %v2813_v40 }
 0x23e   : > { %v5205_v3 = vadd.f32 %v5204_v62, %v5203_v24  ;;  %v5104_v58 = vadd.f32 %v5103_v10, %v5102_v6  ;;  %v9351_v56 = vadd.f32 %v6777_v33, %v9168_v8  ;;  %v5159_v31 = vmul.f32 %v9337_v39, %v9337_v39 }
 0x23f   : > { %v5105_v59 = vsel %vm5065_vm6, %v9340_v21, 0.0  ;;  %v5157_v30 = vmul.f32 %v9340_v21, %v9340_v21  ;;  %v9348_v52 = vadd.f32 %v6778_v50, %v9168_v8  ;;  %v5109_v11 = vsel %vm5065_vm6, %v9337_v39, 0.0 }
 0x240   : > { %v5106_v15 = vadd.f32 %v5105_v59, %v5104_v58  ;;  %v5207_v43 = vadd.f32 %v5206_v22, %v5205_v3  ;;  %v6733_v1 = vpop.f32.mrb[24].mxu0  ;;  %v5160_v55 = vmul.f32 %v9351_v56, %v9351_v56  ;;  %v5111_v47 = vsel %vm5065_vm6, %v9351_v56, 0.0 }
 0x241   : > { %v5208_v63 = vsel %vm5065_vm6, %v5157_v30, 0.0  ;;  %v5107_v44 = vsel %vm5065_vm6, %v9348_v52, 0.0  ;;  %v6541_v35 = vpop.f32.mrb[24].mxu1  ;;  %v4963_v53 = vpop.f32.mrb[25].mxu0  ;;  %v5158_v16 = vmul.f32 %v9348_v52, %v9348_v52  ;;  %v5212_v62 = vsel %vm5065_vm6, %v5159_v31, 0.0 }
 0x242   : > { %v5209_v7 = vadd.f32 %v5208_v63, %v5207_v43  ;;  %v5108_v61 = vadd.f32 %v5107_v44, %v5106_v15  ;;  %v6779_v60 = vadd.f32 %v6733_v1, %v6541_v35  ;;  %v2826_v0 = vpop.f32.mrb[25].mxu1  ;;  %v6734_v27 = vpop.f32.mrb[26].mxu0  ;;  %v5214_v3 = vsel %vm5065_vm6, %v5160_v55, 0.0 }
 0x243   : > { %v6780_v2 = vadd.f32 %v4963_v53, %v2826_v0  ;;  %v6542_v42 = vpop.f32.mrb[26].mxu1  ;;  %v4966_v48 = vpop.f32.mrb[27].mxu0  ;;  %v5210_v28 = vsel %vm5065_vm6, %v5158_v16, 0.0 }
 0x244   : > { %v5110_v49 = vadd.f32 %v5109_v11, %v5108_v61  ;;  %v6781_v45 = vadd.f32 %v6734_v27, %v6542_v42  ;;  %v2829_v36 = vpop.f32.mrb[27].mxu1  ;;  %v5211_v12 = vadd.f32 %v5210_v28, %v5209_v7  ;;  %v9372_v6 = vadd.f32 %v6779_v60, %v9168_v8 }
 0x245   : > { %v9368_v51 = vadd.f32 %v6780_v2, %v9168_v8  ;;  %v6782_v5 = vadd.f32 %v4966_v48, %v2829_v36 }
 0x246   : > { %v5112_v24 = vadd.f32 %v5111_v47, %v5110_v49  ;;  %v5213_v33 = vadd.f32 %v5212_v62, %v5211_v12  ;;  %v9383_v22 = vadd.f32 %v6781_v45, %v9168_v8  ;;  %v5163_v44 = vmul.f32 %v9372_v6, %v9372_v6 }
 0x247   : > { %v5113_v40 = vsel %vm5065_vm6, %v9368_v51, 0.0  ;;  %v5161_v10 = vmul.f32 %v9368_v51, %v9368_v51  ;;  %v9379_v50 = vadd.f32 %v6782_v5, %v9168_v8  ;;  %v5117_v16 = vsel %vm5065_vm6, %v9372_v6, 0.0 }
 0x248   : > { %v5114_v58 = vadd.f32 %v5113_v40, %v5112_v24  ;;  %v6737_v59 = vpop.f32.mrb[28].mxu0  ;;  %v5215_v30 = vadd.f32 %v5214_v3, %v5213_v33  ;;  %v5164_v42 = vmul.f32 %v9383_v22, %v9383_v22  ;;  %v5119_v28 = vsel %vm5065_vm6, %v9383_v22, 0.0 }
 0x249   : > { %v5216_v15 = vsel %vm5065_vm6, %v5161_v10, 0.0  ;;  %v5115_v43 = vsel %vm5065_vm6, %v9379_v50, 0.0  ;;  %v5162_v1 = vmul.f32 %v9379_v50, %v9379_v50  ;;  %v6545_v31 = vpop.f32.mrb[28].mxu1  ;;  %v4979_v63 = vpop.f32.mrb[29].mxu0  ;;  %v5220_v12 = vsel %vm5065_vm6, %v5163_v44, 0.0 }
 0x24a   : > { %v5116_v35 = vadd.f32 %v5115_v43, %v5114_v58  ;;  %v6783_v53 = vadd.f32 %v6737_v59, %v6545_v31  ;;  %v2842_v7 = vpop.f32.mrb[29].mxu1  ;;  %v6738_v61 = vpop.f32.mrb[30].mxu0  ;;  %v5217_v60 = vadd.f32 %v5216_v15, %v5215_v30  ;;  %v5222_v3 = vsel %vm5065_vm6, %v5164_v42, 0.0 }
 0x24b   : > { %v5218_v0 = vsel %vm5065_vm6, %v5162_v1, 0.0  ;;  %v6784_v27 = vadd.f32 %v4979_v63, %v2842_v7  ;;  %v6546_v11 = vpop.f32.mrb[30].mxu1  ;;  %v4982_v2 = vpop.f32.mrb[31].mxu0 }
 0x24c   : > { %v5118_v48 = vadd.f32 %v5117_v16, %v5116_v35  ;;  %v6785_v55 = vadd.f32 %v6738_v61, %v6546_v11  ;;  %v2845_v49 = vpop.f32.mrb[31].mxu1  ;;  %v5219_v45 = vadd.f32 %v5218_v0, %v5217_v60  ;;  %v9404_v5 = vadd.f32 %v6783_v53, %v9168_v8 }
 0x24d   : > { %v9400_v36 = vadd.f32 %v6784_v27, %v9168_v8  ;;  %v6786_v47 = vadd.f32 %v4982_v2, %v2845_v49 }
 0x24e   : > { %v5120_v62 = vadd.f32 %v5119_v28, %v5118_v48  ;;  %v5221_v24 = vadd.f32 %v5220_v12, %v5219_v45  ;;  %v9415_v59 = vadd.f32 %v6785_v55, %v9168_v8  ;;  %v5167_v31 = vmul.f32 %v9404_v5, %v9404_v5 }
 0x24f   : > { %v5121_v33 = vsel %vm5065_vm6, %v9400_v36, 0.0  ;;  %v5165_v40 = vmul.f32 %v9400_v36, %v9400_v36  ;;  %v9411_v10 = vadd.f32 %v6786_v47, %v9168_v8  ;;  %v5125_v44 = vsel %vm5065_vm6, %v9404_v5, 0.0 }
 0x250   : > { %v5122_v58 = vadd.f32 %v5121_v33, %v5120_v62  ;;  %v5223_v30 = vadd.f32 %v5222_v3, %v5221_v24  ;;  %v5168_v53 = vmul.f32 %v9415_v59, %v9415_v59  ;;  %v5127_v61 = vsel %vm5065_vm6, %v9415_v59, 0.0 }
 0x251   : > { %v5224_v15 = vsel %vm5065_vm6, %v5165_v40, 0.0  ;;  %v5123_v43 = vsel %vm5065_vm6, %v9411_v10, 0.0  ;;  %v5166_v1 = vmul.f32 %v9411_v10, %v9411_v10  ;;  %v5228_v60 = vsel %vm5065_vm6, %v5167_v31, 0.0 }
 0x252   : > { %v5124_v63 = vadd.f32 %v5123_v43, %v5122_v58  ;;  %v5225_v35 = vadd.f32 %v5224_v15, %v5223_v30  ;;  %v5230_v11 = vsel %vm5065_vm6, %v5168_v53, 0.0 }
 0x253   : > { %v5226_v8 = vsel %vm5065_vm6, %v5166_v1, 0.0 }
 0x254   : > { %v5126_v7 = vadd.f32 %v5125_v44, %v5124_v63  ;;  %v5227_v16 = vadd.f32 %v5226_v8, %v5225_v35 }
 0x256   : > { %v5128_v0 = vadd.f32 %v5127_v61, %v5126_v7  ;;  %v5229_v27 = vadd.f32 %v5228_v60, %v5227_v16 }
 0x258   : > { %v5129_v2 = vrot.slane %v5128_v0, 4  ;;  %v5231_v42 = vadd.f32 %v5230_v11, %v5229_v27 }
 0x25a   : > { %v5130_v48 = vadd.f32 %v5129_v2, %v5128_v0  ;;  %v5232_v55 = vrot.slane %v5231_v42, 4 }
 0x25c   : > { %v5131_v49 = vrot.slane %v5130_v48, 2  ;;  %v5233_v28 = vadd.f32 %v5232_v55, %v5231_v42 }
 0x25e   : > { %v5132_v45 = vadd.f32 %v5131_v49, %v5130_v48  ;;  %v5234_v47 = vrot.slane %v5233_v28, 2 }
 0x260   : > { %v5133_v12 = vrot.slane %v5132_v45, 1  ;;  %v5235_v62 = vadd.f32 %v5234_v47, %v5233_v28 }
 0x262   : > { %v5134_v24 = vadd.f32 %v5133_v12, %v5132_v45  ;;  %v5236_v33 = vrot.slane %v5235_v62, 1 }
 0x264   : > { %v9433_v40 = vmul.f32 0.00390625, %v5134_v24  ;;  %v5237_v3 = vadd.f32 %v5236_v33, %v5235_v62 }
 0x266   : > { %v5239_v58 = vmul.f32 %v9433_v40, %v9433_v40  ;;  %v5270_v30 = vsub.f32 %v9411_v10, %v9433_v40  ;;  %v5238_v15 = vmul.f32 0.00390625, %v5237_v3  ;;  %v5253_v1 = vsub.f32 %v9271_v54, %v9433_v40 }
 0x267   : > { %v5254_v31 = vsub.f32 %v9286_v17, %v9433_v40  ;;  %v5255_v63 = vsub.f32 %v9276_v34, %v9433_v40  ;;  %v5256_v44 = vsub.f32 %v9279_v46, %v9433_v40  ;;  %v5257_v8 = vsub.f32 %v9308_v38, %v9433_v40 }
 0x268   : > { %v5240_v43 = vsub.f32 %v5238_v15, %v5239_v58  ;;  %v5258_v10 = vsub.f32 %v9319_v57, %v9433_v40  ;;  %v5259_v54 = vsub.f32 %v9304_v19, %v9433_v40  ;;  %v5260_v17 = vsub.f32 %v9316_v4, %v9433_v40  ;;  %v5309_v15 = vld [vmem:[%s9482_s29 + $0x10] sm:$0xff]  ;;  %v5316_v19 = vld [vmem:[%s9482_s29 + $0x48] sm:$0xff] }
 0x269   : > { %v5261_v34 = vsub.f32 %v9340_v21, %v9433_v40  ;;  %v5262_v46 = vsub.f32 %v9348_v52, %v9433_v40  ;;  %v5263_v38 = vsub.f32 %v9337_v39, %v9433_v40  ;;  %v5264_v57 = vsub.f32 %v9351_v56, %v9433_v40  ;;  %v5322_v39 = vld [vmem:[%s9482_s29 + $0x78] sm:$0xff] }
 0x26a   : > { %v5273_v35 = vadd.f32 1e-05, %v5240_v43  ;;  %v5265_v53 = vsub.f32 %v9368_v51, %v9433_v40  ;;  %v5266_v7 = vsub.f32 %v9379_v50, %v9433_v40  ;;  %v5267_v61 = vsub.f32 %v9372_v6, %v9433_v40  ;;  %v5325_v6 = vld [vmem:[%s9482_s29 + $0x90] sm:$0xff] }
 0x26b   : > { %v5268_v16 = vsub.f32 %v9383_v22, %v9433_v40  ;;  %v5269_v60 = vsub.f32 %v9400_v36, %v9433_v40  ;;  %v5271_v0 = vsub.f32 %v9404_v5, %v9433_v40  ;;  %v5272_v27 = vsub.f32 %v9415_v59, %v9433_v40  ;;  %v5329_v5 = vld [vmem:[%s9482_s29 + $0xb0] sm:$0xff]  ;;  %v5328_v59 = vld [vmem:[%s9482_s29 + $0xa8] sm:$0xff] }
 0x26c   : > { %7173 = vrsqrt.f32 %v5273_v35  ;;  %v5241_v11 = vsub.f32 %v9174_v41, %v9433_v40  ;;  %v5242_v2 = vsub.f32 %v9182_v18, %v9433_v40  ;;  %v5243_v42 = vsub.f32 %v9171_v32, %v9433_v40  ;;  %v5336_v32 = vld [vmem:[%s9482_s29 + $0xe8] sm:$0xff] }
 0x26d   : > { %v5244_v48 = vsub.f32 %v9179_v26, %v9433_v40  ;;  %v5245_v55 = vsub.f32 %v9205_v29, %v9433_v40  ;;  %v5246_v49 = vsub.f32 %v9213_v25, %v9433_v40  ;;  %v5247_v41 = vsub.f32 %v9202_v20, %v9433_v40 }
 0x26e   : > { %v5248_v18 = vsub.f32 %v9216_v13, %v9433_v40  ;;  %v5249_v26 = vsub.f32 %v9235_v9, %v9433_v40  ;;  %v5250_v45 = vsub.f32 %v9247_v23, %v9433_v40  ;;  %v5251_v29 = vsub.f32 %v9240_v14, %v9433_v40 }
 0x26f   : > { %v5252_v25 = vsub.f32 %v9251_v37, %v9433_v40  ;;  %v5307_v37 = vld [vmem:[%s9482_s29] sm:$0xff]  ;;  %v5333_v40 = vld [vmem:[%s9482_s29 + $0xd0] sm:$0xff] }
 0x276   : > { %v7174_v28 = vpop.eup %7173 }
 0x277   : > { %v5304_v20 = vmul.f32 %v7174_v28, %v5270_v30  ;;  %v5275_v47 = vmul.f32 %v7174_v28, %v5241_v11  ;;  %v5276_v12 = vmul.f32 %v7174_v28, %v5242_v2  ;;  %v5277_v13 = vmul.f32 %v7174_v28, %v5243_v42  ;;  %v5310_v2 = vld [vmem:[%s9482_s29 + $0x18] sm:$0xff]  ;;  %v5308_v42 = vld [vmem:[%s9482_s29 + $0x8] sm:$0xff] }
 0x278   : > { %v5278_v62 = vmul.f32 %v7174_v28, %v5244_v48  ;;  %v5279_v9 = vmul.f32 %v7174_v28, %v5245_v55  ;;  %v5280_v24 = vmul.f32 %v7174_v28, %v5246_v49  ;;  %v5281_v23 = vmul.f32 %v7174_v28, %v5247_v41  ;;  %v5313_v48 = vld [vmem:[%s9482_s29 + $0x30] sm:$0xff]  ;;  %v5311_v55 = vld [vmem:[%s9482_s29 + $0x20] sm:$0xff] }
 0x279   : > { %v5368_v33 = vadd.f32 %v5336_v32, %v5304_v20  ;;  %v5282_v3 = vmul.f32 %v7174_v28, %v5248_v18  ;;  %v5283_v58 = vmul.f32 %v7174_v28, %v5249_v26  ;;  %v5284_v14 = vmul.f32 %v7174_v28, %v5250_v45  ;;  %v5317_v26 = vld [vmem:[%s9482_s29 + $0x50] sm:$0xff]  ;;  %v5315_v45 = vld [vmem:[%s9482_s29 + $0x40] sm:$0xff] }
 0x27a   : > { %v5285_v30 = vmul.f32 %v7174_v28, %v5251_v29  ;;  %v5286_v43 = vmul.f32 %v7174_v28, %v5252_v25  ;;  %v5287_v35 = vmul.f32 %v7174_v28, %v5253_v1  ;;  %v5288_v11 = vmul.f32 %v7174_v28, %v5254_v31  ;;  %v5314_v1 = vld [vmem:[%s9482_s29 + $0x38] sm:$0xff]  ;;  %v5312_v31 = vld [vmem:[%s9482_s29 + $0x28] sm:$0xff] }
 0x27b   : > { %5400 = vst.msk [vmem:[%s9520_s30 + $0xe8] sm:$0xff] %vm5065_vm6, %v5368_v33  ;;  %v5289_v49 = vmul.f32 %v7174_v28, %v5255_v63  ;;  %v9524_v41 = vmul.f32 %v7174_v28, %v5256_v44  ;;  %v9526_v18 = vmul.f32 %v7174_v28, %v5257_v8  ;;  %v9528_v32 = vmul.f32 %v7174_v28, %v5258_v10  ;;  %v5318_v10 = vld [vmem:[%s9482_s29 + $0x58] sm:$0xff] }
 0x27c   : > { %v5293_v29 = vmul.f32 %v7174_v28, %v5259_v54  ;;  %v9540_v63 = vmul.f32 %v7174_v28, %v5260_v17  ;;  %v9545_v44 = vmul.f32 %v7174_v28, %v5261_v34  ;;  %v9550_v8 = vmul.f32 %v7174_v28, %v5262_v46  ;;  %v5321_v54 = vld [vmem:[%s9482_s29 + $0x70] sm:$0xff]  ;;  %v5319_v34 = vld [vmem:[%s9482_s29 + $0x60] sm:$0xff]  ;;  %v5320_v46 = vld [vmem:[%s9482_s29 + $0x68] sm:$0xff] }
 0x27d   : > { %v5297_v4 = vmul.f32 %v7174_v28, %v5263_v38  ;;  %v9561_v21 = vmul.f32 %v7174_v28, %v5264_v57  ;;  %v9566_v52 = vmul.f32 %v7174_v28, %v5265_v53  ;;  %v9571_v17 = vmul.f32 %v7174_v28, %v5266_v7  ;;  %v5323_v57 = vld [vmem:[%s9482_s29 + $0x80] sm:$0xff]  ;;  %v5326_v53 = vld [vmem:[%s9482_s29 + $0x98] sm:$0xff] }
 0x27e   : > { %v9579_v56 = vmul.f32 %v7174_v28, %v5267_v61  ;;  %v9584_v51 = vmul.f32 %v7174_v28, %v5268_v16  ;;  %v9589_v50 = vmul.f32 %v7174_v28, %v5269_v60  ;;  %v9594_v38 = vmul.f32 %v7174_v28, %v5271_v0  ;;  %v5324_v16 = vld [vmem:[%s9482_s29 + $0x88] sm:$0xff]  ;;  %v5327_v60 = vld [vmem:[%s9482_s29 + $0xa0] sm:$0xff] }
 0x27f   : > { %v9602_v22 = vmul.f32 %v7174_v28, %v5272_v27  ;;  %v5339_v7 = vadd.f32 %v5307_v37, %v5275_v47  ;;  %v5340_v36 = vadd.f32 %v5308_v42, %v5276_v12  ;;  %v5341_v61 = vadd.f32 %v5309_v15, %v5277_v13  ;;  %v5331_v13 = vld [vmem:[%s9482_s29 + $0xc0] sm:$0xff]  ;;  %v5338_v37 = vld [vmem:[%s9482_s29 + $0xf8] sm:$0xff] }
 0x280   : > { %9821 = vst [vmem:[#allocation6_spill] sm:$0xff] %v9594_v38  ;;  %v5342_v0 = vadd.f32 %v5310_v2, %v5278_v62  ;;  %v5343_v25 = vadd.f32 %v5311_v55, %v5279_v9  ;;  %v5344_v20 = vadd.f32 %v5312_v31, %v5280_v24  ;;  %v5345_v33 = vadd.f32 %v5313_v48, %v5281_v23  ;;  %v5330_v38 = vld [vmem:[%s9482_s29 + $0xb8] sm:$0xff]  ;;  %v5332_v9 = vld [vmem:[%s9482_s29 + $0xc8] sm:$0xff]  ;;  %v5335_v15 = vld [vmem:[%s9482_s29 + $0xe0] sm:$0xff] }
 0x281   : > { %v5346_v27 = vadd.f32 %v5314_v1, %v5282_v3  ;;  %v5347_v28 = vadd.f32 %v5315_v45, %v5283_v58  ;;  %v5348_v47 = vadd.f32 %v5316_v19, %v5284_v14  ;;  %v5349_v12 = vadd.f32 %v5317_v26, %v5285_v30  ;;  %5371 = vst.msk [vmem:[%s9520_s30] sm:$0xff] %vm5065_vm6, %v5339_v7  ;;  %v5334_v62 = vld [vmem:[%s9482_s29 + $0xd8] sm:$0xff]  ;;  %v5337_v14 = vld [vmem:[%s9482_s29 + $0xf0] sm:$0xff] }
 0x282   : > { %5372 = vst.msk [vmem:[%s9520_s30 + $0x8] sm:$0xff] %vm5065_vm6, %v5340_v36  ;;  %5373 = vst.msk [vmem:[%s9520_s30 + $0x10] sm:$0xff] %vm5065_vm6, %v5341_v61  ;;  %v5350_v24 = vadd.f32 %v5318_v10, %v5286_v43  ;;  %v5351_v23 = vadd.f32 %v5319_v34, %v5287_v35  ;;  %v5352_v3 = vadd.f32 %v5320_v46, %v5288_v11 }
 0x283   : > { %v5353_v58 = vadd.f32 %v5321_v54, %v5289_v49  ;;  %5374 = vst.msk [vmem:[%s9520_s30 + $0x18] sm:$0xff] %vm5065_vm6, %v5342_v0  ;;  %5375 = vst.msk [vmem:[%s9520_s30 + $0x20] sm:$0xff] %vm5065_vm6, %v5343_v25  ;;  %v5354_v30 = vadd.f32 %v5322_v39, %v9524_v41  ;;  %v5355_v43 = vadd.f32 %v5323_v57, %v9526_v18 }
 0x284   : > { %5376 = vst.msk [vmem:[%s9520_s30 + $0x28] sm:$0xff] %vm5065_vm6, %v5344_v20  ;;  %5377 = vst.msk [vmem:[%s9520_s30 + $0x30] sm:$0xff] %vm5065_vm6, %v5345_v33  ;;  %v5356_v35 = vadd.f32 %v5324_v16, %v9528_v32  ;;  %v5357_v11 = vadd.f32 %v5325_v6, %v5293_v29  ;;  %v5358_v2 = vadd.f32 %v5326_v53, %v9540_v63 }
 0x285   : > { %5378 = vst.msk [vmem:[%s9520_s30 + $0x38] sm:$0xff] %vm5065_vm6, %v5346_v27  ;;  %5379 = vst.msk [vmem:[%s9520_s30 + $0x40] sm:$0xff] %vm5065_vm6, %v5347_v28  ;;  %v5359_v42 = vadd.f32 %v5327_v60, %v9545_v44  ;;  %v5360_v48 = vadd.f32 %v5328_v59, %v9550_v8  ;;  %v5361_v55 = vadd.f32 %v5329_v5, %v5297_v4 }
 0x286   : > { %5380 = vst.msk [vmem:[%s9520_s30 + $0x48] sm:$0xff] %vm5065_vm6, %v5348_v47  ;;  %5381 = vst.msk [vmem:[%s9520_s30 + $0x50] sm:$0xff] %vm5065_vm6, %v5349_v12  ;;  %v5362_v49 = vadd.f32 %v5330_v38, %v9561_v21  ;;  %v5363_v41 = vadd.f32 %v5331_v13, %v9566_v52  ;;  %v5364_v18 = vadd.f32 %v5332_v9, %v9571_v17 }
 0x287   : > { %5382 = vst.msk [vmem:[%s9520_s30 + $0x58] sm:$0xff] %vm5065_vm6, %v5350_v24  ;;  %5383 = vst.msk [vmem:[%s9520_s30 + $0x60] sm:$0xff] %vm5065_vm6, %v5351_v23  ;;  %v5365_v32 = vadd.f32 %v5333_v40, %v9579_v56  ;;  %v5366_v1 = vadd.f32 %v5334_v62, %v9584_v51  ;;  %v5367_v31 = vadd.f32 %v5335_v15, %v9589_v50  ;;  %v9822_v26 = vld [vmem:[#allocation6_spill] sm:$0xff] }
 0x288   : > { %5384 = vst.msk [vmem:[%s9520_s30 + $0x68] sm:$0xff] %vm5065_vm6, %v5352_v3  ;;  %5385 = vst.msk [vmem:[%s9520_s30 + $0x70] sm:$0xff] %vm5065_vm6, %v5353_v58  ;;  %v5369_v45 = vadd.f32 %v5337_v14, %v9822_v26  ;;  %v5370_v29 = vadd.f32 %v5338_v37, %v9602_v22 }
 0x289   : > { %5386 = vst.msk [vmem:[%s9520_s30 + $0x78] sm:$0xff] %vm5065_vm6, %v5354_v30  ;;  %5387 = vst.msk [vmem:[%s9520_s30 + $0x80] sm:$0xff] %vm5065_vm6, %v5355_v43 }
 0x28a   : > { %5388 = vst.msk [vmem:[%s9520_s30 + $0x88] sm:$0xff] %vm5065_vm6, %v5356_v35  ;;  %5389 = vst.msk [vmem:[%s9520_s30 + $0x90] sm:$0xff] %vm5065_vm6, %v5357_v11 }
 0x28b   : > { %5390 = vst.msk [vmem:[%s9520_s30 + $0x98] sm:$0xff] %vm5065_vm6, %v5358_v2  ;;  %5391 = vst.msk [vmem:[%s9520_s30 + $0xa0] sm:$0xff] %vm5065_vm6, %v5359_v42 }
 0x28c   : > { %5392 = vst.msk [vmem:[%s9520_s30 + $0xa8] sm:$0xff] %vm5065_vm6, %v5360_v48  ;;  %5393 = vst.msk [vmem:[%s9520_s30 + $0xb0] sm:$0xff] %vm5065_vm6, %v5361_v55 }
 0x28d   : > { %5394 = vst.msk [vmem:[%s9520_s30 + $0xb8] sm:$0xff] %vm5065_vm6, %v5362_v49  ;;  %5395 = vst.msk [vmem:[%s9520_s30 + $0xc0] sm:$0xff] %vm5065_vm6, %v5363_v41 }
 0x28e   : > { %5396 = vst.msk [vmem:[%s9520_s30 + $0xc8] sm:$0xff] %vm5065_vm6, %v5364_v18  ;;  %5397 = vst.msk [vmem:[%s9520_s30 + $0xd0] sm:$0xff] %vm5065_vm6, %v5365_v32 }
 0x28f   : > { %5398 = vst.msk [vmem:[%s9520_s30 + $0xd8] sm:$0xff] %vm5065_vm6, %v5366_v1  ;;  %5399 = vst.msk [vmem:[%s9520_s30 + $0xe0] sm:$0xff] %vm5065_vm6, %v5367_v31 }
 0x290   : > { %5401 = vst.msk [vmem:[%s9520_s30 + $0xf0] sm:$0xff] %vm5065_vm6, %v5369_v45  ;;  %5402 = vst.msk [vmem:[%s9520_s30 + $0xf8] sm:$0xff] %vm5065_vm6, %v5370_v29 }
 0x291   : > { %7258 = shalt.err (!%p7255_p3)
}
 0x292   : > { %s7259_s20 = scalar_lea.hbm %s9671_s10, 4096  ;;  %s7263_s27 = scalar_lea.hbm %s9752_s4, 8192 }
 0x293   : > { %p7260_p4 = scmp.ne.s32.totalorder %s9671_s10, %s7259_s20  ;;  %p7264_p9 = scmp.lt.u32.totalorder %s9671_s10, %s9752_s4 }
 0x294   : > { %p7265_p10 = scmp.lt.u32.totalorder %s7263_s27, %s7259_s20  ;;  %p7267_p12 = scmp.lt.u32.totalorder %s7259_s20, %s9671_s10 }
 0x295   : > { %p7261_p7 = pnand %p7260_p4, %p7375_p5 }
 0x296   : > { %p7266_p11 = por %p7265_p10, %p7264_p9 }
 0x297   : > { %p7262_p8 = pneg %p7261_p7 }
 0x298   : > { %p7268_p13 = por %p7267_p12, %p7266_p11 }
 0x29a   : > { %p7269_p0 = pnand %p7268_p13, %p7262_p8 }
 0x29c   : > { %7272 = shalt.err (!%p7269_p0)
}
 0x29d   : > { %s7310_s13 = smov 128   ;;  %s7311_s30 = smov 8  }
 0x29e   : > { %7012 = dma.vmem_to_hbm [thread:$0]  (%p7375_p5), %s9675_s6, 4096, %s9671_s10, %s9707_s19, %s7310_s13, %s7310_s13, %s7311_s30  }
 0x29f PF: > { %p7018_p1 = scmp.ge.s32.totalorder %s7307_s18, 2  ;;  %s5432_s5 = sand.u32 1, %s7295_s15  }
 0x2a0   : > { %s5433_s7 = scalar_lea.sflag [#allocation3], %s5432_s5 }
 0x2a1   : > { %p7015_p2 = pnand %p7018_p1, %p7379_p6 }
 0x2a3   : > { %7290 = dma.done.wait (!%p7015_p2), %s5433_s7, 4096  }
 0x2a4   : > { %7292 = vsyncadd (!%p7015_p2), %s5433_s7, 4294963200  ;;  %p14_p3 = scmp.ge.s32.totalorder %s7362_s21, 4   ;;  %s9823_s15 = smov %s7299_s16 }
 0x2a5   : > { %s9824_s16 = smov %s7303_s17  ;;  %s9825_s17 = smov %s7373_s24 }
 0x2a6   : > { %s9826_s18 = smov %s7362_s21  ;;  %16 = sbr.rel (!%p14_p3) target bundleno = 3 (0x3), region = 84 }
 0x2ad   :  { %5438 = vsyncpa [#allocation3], 1 }
 0x2ae   :  { %5440 = vsyncpa [#allocation3 + $0x1], 1 }

</bundles_post_ra>
